<compile_context>
chip_gen: v7x
topology: tpu7x:2x2x1
jax: 0.10.0
libtpu: 0.0.40
codegen_flags: <defaults>
</compile_context>

<pallas_src>
import jax
import jax.numpy as jnp
from jax.experimental import pallas as pl
from jax.experimental.pallas import tpu as pltpu

EPS = 1e-5
LANE = 128
SUBLANE = 8


def _round_up(v, m):
    return (v + m - 1) // m * m


def double_conv_kernel(x_ref, w1_ref, g1_ref, bt1_ref,
                       w2_ref, g2_ref, bt2_ref,
                       o_ref, pad_ref):
    N, Hp, Wpp, C = x_ref.shape            # bf16 input, lane-padded channels
    H, W = o_ref.shape[1], o_ref.shape[2]
    M = N * H * W
    inv_m = 1.0 / M

    def conv3x3(xp, w_ref):
        # 9 accumulating (M, C) x (C, C) bf16 matmuls -> f32 accumulator
        # (no (M, 9C) im2col buffer is ever materialized).
        acc = None
        for k in range(9):
            dh, dw = divmod(k, 3)
            patch = xp[:, dh:dh + H, dw:dw + W, :].reshape(M, C)
            term = jnp.dot(patch, w_ref[k],
                           preferred_element_type=jnp.float32)
            acc = term if acc is None else acc + term
        return acc

    def bn_relu(acc, g_ref, bt_ref):
        # Train-mode BatchNorm (biased variance, eps=1e-5) + ReLU, all f32.
        # Mean-centered two-pass variance avoids E[x^2]-(E[x])^2 cancellation.
        mean = jnp.sum(acc, axis=0, keepdims=True) * inv_m
        centered = acc - mean
        var = jnp.sum(centered * centered, axis=0, keepdims=True) * inv_m
        scale = g_ref[...] * jax.lax.rsqrt(var + EPS)
        return jnp.maximum(centered * scale + bt_ref[...], 0.0)

    # ---- conv1 + BN1 + ReLU (conv bias cancelled by BN mean subtraction) ---
    y = bn_relu(conv3x3(x_ref[...], w1_ref), g1_ref, bt1_ref)

    # ---- padded bf16 intermediate: aligned, full-width stores only ---------
    y4 = y.astype(jnp.bfloat16).reshape(N, H, W, C)
    # fold the left/right 1-px halo into the interior store by padding along
    # W in-register (Wpp is a multiple of 8 -> unmasked full-sublane stores).
    pad_ref[:, 1:H + 1, :, :] = jnp.pad(
        y4, ((0, 0), (0, 0), (1, Wpp - W - 1), (0, 0)))
    zero_row = jnp.zeros((N, 1, Wpp, C), jnp.bfloat16)
    pad_ref[:, 0:1, :, :] = zero_row
    pad_ref[:, H + 1:H + 2, :, :] = zero_row

    # ---- conv2 + BN2 + ReLU -------------------------------------------------
    out = bn_relu(conv3x3(pad_ref[...], w2_ref), g2_ref, bt2_ref)
    o_ref[...] = out.reshape(N, H, W, C)


@jax.jit
def double_conv(x_nchw, w1, b1, g1, bt1, w2, b2, g2, bt2):
    # b1 / b2 accepted for interface parity; they are cancelled exactly by the
    # train-mode BatchNorm mean subtraction.
    del b1, b2
    N, Cin, H, W = x_nchw.shape
    Cout = w1.shape[-1]
    C = _round_up(max(Cin, Cout, LANE), LANE)     # lane-dense channel width
    Wpp = _round_up(W + 2, SUBLANE)               # sublane-aligned padded W

    # NCHW -> NHWC, spatial halo pad + channel pad to C lanes, bf16 for MXU.
    x = jnp.transpose(x_nchw, (0, 2, 3, 1))
    x_pad = jnp.pad(
        x, ((0, 0), (1, 1), (1, Wpp - W - 1), (0, C - Cin))
    ).astype(jnp.bfloat16)

    # HWIO weights, channel-padded, one (C, C) tap per matmul: (9, C, C) bf16.
    w1p = jnp.pad(w1, ((0, 0), (0, 0), (0, C - Cin), (0, C - Cout))
                  ).reshape(9, C, C).astype(jnp.bfloat16)
    w2p = jnp.pad(w2, ((0, 0), (0, 0), (0, C - Cout), (0, C - Cout))
                  ).reshape(9, C, C).astype(jnp.bfloat16)
    g1p = jnp.pad(g1, (0, C - Cout)).reshape(1, C).astype(jnp.float32)
    bt1p = jnp.pad(bt1, (0, C - Cout)).reshape(1, C).astype(jnp.float32)
    g2p = jnp.pad(g2, (0, C - Cout)).reshape(1, C).astype(jnp.float32)
    bt2p = jnp.pad(bt2, (0, C - Cout)).reshape(1, C).astype(jnp.float32)

    # VMEM budget derived from the actual buffers (+ generous temp margin),
    # instead of a hardcoded 48 MiB.
    io_bytes = (x_pad.size * 2 + w1p.size * 2 + w2p.size * 2
                + 4 * C * 4                      # BN scale/shift vectors
                + N * (H + 2) * Wpp * C * 2      # bf16 padded-intermediate
                + N * H * W * C * 4)             # f32 output
    vmem_limit = int(min(100 * 1024 * 1024,
                         max(16 * 1024 * 1024, 6 * io_bytes)))

    vmem = pl.BlockSpec(memory_space=pltpu.MemorySpace.VMEM)
    out = pl.pallas_call(
        double_conv_kernel,
        out_shape=jax.ShapeDtypeStruct((N, H, W, C), jnp.float32),
        in_specs=[vmem] * 7,
        out_specs=vmem,
        scratch_shapes=[pltpu.VMEM((N, H + 2, Wpp, C), jnp.bfloat16)],
        compiler_params=pltpu.CompilerParams(vmem_limit_bytes=vmem_limit),
    )(x_pad, w1p, g1p, bt1p, w2p, g2p, bt2p)

    # drop the padded channels, NHWC -> NCHW
    return jnp.transpose(out[..., :Cout], (0, 3, 1, 2))


def ref_double_conv(x_nchw, w1, b1, g1, bt1, w2, b2, g2, bt2):
    """Pure-JAX f32 reference (== the PyTorch module in train mode)."""
    def conv(x, w, b):
        y = jax.lax.conv_general_dilated(
            x, w, window_strides=(1, 1), padding=((1, 1), (1, 1)),
            dimension_numbers=('NCHW', 'HWIO', 'NCHW'))
        return y + b[None, :, None, None]

    def bn_relu(y, g, bt):
        mean = jnp.mean(y, axis=(0, 2, 3), keepdims=True)
        var = jnp.mean((y - mean) ** 2, axis=(0, 2, 3), keepdims=True)
        z = ((y - mean) * jax.lax.rsqrt(var + EPS)
             * g[None, :, None, None] + bt[None, :, None, None])
        return jnp.maximum(z, 0.0)

    y = bn_relu(conv(x_nchw, w1, b1), g1, bt1)
    return bn_relu(conv(y, w2, b2), g2, bt2)


if __name__ == "__main__":
    N, Cin, Cout, H, W = 2, 4, 8, 16, 16

    key = jax.random.PRNGKey(0)
    ks = jax.random.split(key, 9)
    x = jax.random.normal(ks[0], (N, Cin, H, W), jnp.float32)

    # Deterministic synthetic parameters (HWIO conv weights).
    w1 = jax.random.normal(ks[1], (3, 3, Cin, Cout), jnp.float32) * 0.1
    b1 = jax.random.normal(ks[2], (Cout,), jnp.float32) * 0.1
    g1 = 1.0 + 0.1 * jax.random.normal(ks[3], (Cout,), jnp.float32)
    bt1 = 0.1 * jax.random.normal(ks[4], (Cout,), jnp.float32)
    w2 = jax.random.normal(ks[5], (3, 3, Cout, Cout), jnp.float32) * 0.1
    b2 = jax.random.normal(ks[6], (Cout,), jnp.float32) * 0.1
    g2 = 1.0 + 0.1 * jax.random.normal(ks[7], (Cout,), jnp.float32)
    bt2 = 0.1 * jax.random.normal(ks[8], (Cout,), jnp.float32)

    out = double_conv(x, w1, b1, g1, bt1, w2, b2, g2, bt2)
    out = jax.block_until_ready(out)

    ref = ref_double_conv(x, w1, b1, g1, bt1, w2, b2, g2, bt2)
    ref = jax.block_until_ready(ref)

    assert out.shape == (N, Cout, H, W), out.shape
    # bf16 MXU operands with f32 accumulation -> slightly looser tolerance
    # than the pure-f32 variant.
    max_err = float(jnp.max(jnp.abs(out - ref)))
    assert jnp.allclose(out, ref, atol=5e-2, rtol=5e-2), max_err

    print("KERNEL_OK")
</pallas_src>

<mosaic_0001>
module attributes {stable_mosaic.version = 11 : i64} {
  func.func @double_conv_kernel(%arg0: memref<2x18x24x128xbf16, #tpu.memory_space<vmem>>, %arg1: memref<9x128x128xbf16, #tpu.memory_space<vmem>>, %arg2: memref<1x128xf32, #tpu.memory_space<vmem>>, %arg3: memref<1x128xf32, #tpu.memory_space<vmem>>, %arg4: memref<9x128x128xbf16, #tpu.memory_space<vmem>>, %arg5: memref<1x128xf32, #tpu.memory_space<vmem>>, %arg6: memref<1x128xf32, #tpu.memory_space<vmem>>, %arg7: memref<2x16x16x128xf32, #tpu.memory_space<vmem>>, %arg8: memref<2x18x24x128xbf16, #tpu.memory_space<vmem>>) attributes {dimension_semantics = [], scalar_prefetch = 0 : i64, scratch_operands = 1 : i64, tpu.core_type = #tpu.core_type<tc>} {
    %c0 = arith.constant 0 : index
    %c0_0 = arith.constant 0 : index
    %c0_1 = arith.constant 0 : index
    %c0_2 = arith.constant 0 : index
    %0 = vector.load %arg0[%c0, %c0_0, %c0_1, %c0_2] : memref<2x18x24x128xbf16, #tpu.memory_space<vmem>>, vector<2x18x24x128xbf16>
    %1 = vector.extract_strided_slice %0 {offsets = [0, 0, 0, 0], sizes = [2, 16, 16, 128], strides = [1, 1, 1, 1]} : vector<2x18x24x128xbf16> to vector<2x16x16x128xbf16>
    %2 = vector.shape_cast %1 : vector<2x16x16x128xbf16> to vector<512x128xbf16>
    %c0_3 = arith.constant 0 : index
    %c0_4 = arith.constant 0 : index
    %c0_5 = arith.constant 0 : index
    %3 = vector.load %arg1[%c0_3, %c0_4, %c0_5] : memref<9x128x128xbf16, #tpu.memory_space<vmem>>, vector<1x128x128xbf16>
    %4 = vector.shape_cast %3 : vector<1x128x128xbf16> to vector<128x128xbf16>
    %cst = arith.constant dense<0.000000e+00> : vector<512x128xf32>
    %5 = tpu.matmul %2, %4, %cst {dimension_numbers = #tpu.dot_dimension_numbers<[1], [0], [0], [1], [0, 0, 1, 1], [], []>} : vector<512x128xbf16>, vector<128x128xbf16>, vector<512x128xf32> -> vector<512x128xf32>
    %6 = vector.extract_strided_slice %0 {offsets = [0, 0, 1, 0], sizes = [2, 16, 16, 128], strides = [1, 1, 1, 1]} : vector<2x18x24x128xbf16> to vector<2x16x16x128xbf16>
    %7 = vector.shape_cast %6 : vector<2x16x16x128xbf16> to vector<512x128xbf16>
    %c1 = arith.constant 1 : index
    %c0_6 = arith.constant 0 : index
    %c0_7 = arith.constant 0 : index
    %8 = vector.load %arg1[%c1, %c0_6, %c0_7] : memref<9x128x128xbf16, #tpu.memory_space<vmem>>, vector<1x128x128xbf16>
    %9 = vector.shape_cast %8 : vector<1x128x128xbf16> to vector<128x128xbf16>
    %cst_8 = arith.constant dense<0.000000e+00> : vector<512x128xf32>
    %10 = tpu.matmul %7, %9, %cst_8 {dimension_numbers = #tpu.dot_dimension_numbers<[1], [0], [0], [1], [0, 0, 1, 1], [], []>} : vector<512x128xbf16>, vector<128x128xbf16>, vector<512x128xf32> -> vector<512x128xf32>
    %11 = arith.addf %5, %10 : vector<512x128xf32>
    %12 = vector.extract_strided_slice %0 {offsets = [0, 0, 2, 0], sizes = [2, 16, 16, 128], strides = [1, 1, 1, 1]} : vector<2x18x24x128xbf16> to vector<2x16x16x128xbf16>
    %13 = vector.shape_cast %12 : vector<2x16x16x128xbf16> to vector<512x128xbf16>
    %c2 = arith.constant 2 : index
    %c0_9 = arith.constant 0 : index
    %c0_10 = arith.constant 0 : index
    %14 = vector.load %arg1[%c2, %c0_9, %c0_10] : memref<9x128x128xbf16, #tpu.memory_space<vmem>>, vector<1x128x128xbf16>
    %15 = vector.shape_cast %14 : vector<1x128x128xbf16> to vector<128x128xbf16>
    %cst_11 = arith.constant dense<0.000000e+00> : vector<512x128xf32>
    %16 = tpu.matmul %13, %15, %cst_11 {dimension_numbers = #tpu.dot_dimension_numbers<[1], [0], [0], [1], [0, 0, 1, 1], [], []>} : vector<512x128xbf16>, vector<128x128xbf16>, vector<512x128xf32> -> vector<512x128xf32>
    %17 = arith.addf %11, %16 : vector<512x128xf32>
    %18 = vector.extract_strided_slice %0 {offsets = [0, 1, 0, 0], sizes = [2, 16, 16, 128], strides = [1, 1, 1, 1]} : vector<2x18x24x128xbf16> to vector<2x16x16x128xbf16>
    %19 = vector.shape_cast %18 : vector<2x16x16x128xbf16> to vector<512x128xbf16>
    %c3 = arith.constant 3 : index
    %c0_12 = arith.constant 0 : index
    %c0_13 = arith.constant 0 : index
    %20 = vector.load %arg1[%c3, %c0_12, %c0_13] : memref<9x128x128xbf16, #tpu.memory_space<vmem>>, vector<1x128x128xbf16>
    %21 = vector.shape_cast %20 : vector<1x128x128xbf16> to vector<128x128xbf16>
    %cst_14 = arith.constant dense<0.000000e+00> : vector<512x128xf32>
    %22 = tpu.matmul %19, %21, %cst_14 {dimension_numbers = #tpu.dot_dimension_numbers<[1], [0], [0], [1], [0, 0, 1, 1], [], []>} : vector<512x128xbf16>, vector<128x128xbf16>, vector<512x128xf32> -> vector<512x128xf32>
    %23 = arith.addf %17, %22 : vector<512x128xf32>
    %24 = vector.extract_strided_slice %0 {offsets = [0, 1, 1, 0], sizes = [2, 16, 16, 128], strides = [1, 1, 1, 1]} : vector<2x18x24x128xbf16> to vector<2x16x16x128xbf16>
    %25 = vector.shape_cast %24 : vector<2x16x16x128xbf16> to vector<512x128xbf16>
    %c4 = arith.constant 4 : index
    %c0_15 = arith.constant 0 : index
    %c0_16 = arith.constant 0 : index
    %26 = vector.load %arg1[%c4, %c0_15, %c0_16] : memref<9x128x128xbf16, #tpu.memory_space<vmem>>, vector<1x128x128xbf16>
    %27 = vector.shape_cast %26 : vector<1x128x128xbf16> to vector<128x128xbf16>
    %cst_17 = arith.constant dense<0.000000e+00> : vector<512x128xf32>
    %28 = tpu.matmul %25, %27, %cst_17 {dimension_numbers = #tpu.dot_dimension_numbers<[1], [0], [0], [1], [0, 0, 1, 1], [], []>} : vector<512x128xbf16>, vector<128x128xbf16>, vector<512x128xf32> -> vector<512x128xf32>
    %29 = arith.addf %23, %28 : vector<512x128xf32>
    %30 = vector.extract_strided_slice %0 {offsets = [0, 1, 2, 0], sizes = [2, 16, 16, 128], strides = [1, 1, 1, 1]} : vector<2x18x24x128xbf16> to vector<2x16x16x128xbf16>
    %31 = vector.shape_cast %30 : vector<2x16x16x128xbf16> to vector<512x128xbf16>
    %c5 = arith.constant 5 : index
    %c0_18 = arith.constant 0 : index
    %c0_19 = arith.constant 0 : index
    %32 = vector.load %arg1[%c5, %c0_18, %c0_19] : memref<9x128x128xbf16, #tpu.memory_space<vmem>>, vector<1x128x128xbf16>
    %33 = vector.shape_cast %32 : vector<1x128x128xbf16> to vector<128x128xbf16>
    %cst_20 = arith.constant dense<0.000000e+00> : vector<512x128xf32>
    %34 = tpu.matmul %31, %33, %cst_20 {dimension_numbers = #tpu.dot_dimension_numbers<[1], [0], [0], [1], [0, 0, 1, 1], [], []>} : vector<512x128xbf16>, vector<128x128xbf16>, vector<512x128xf32> -> vector<512x128xf32>
    %35 = arith.addf %29, %34 : vector<512x128xf32>
    %36 = vector.extract_strided_slice %0 {offsets = [0, 2, 0, 0], sizes = [2, 16, 16, 128], strides = [1, 1, 1, 1]} : vector<2x18x24x128xbf16> to vector<2x16x16x128xbf16>
    %37 = vector.shape_cast %36 : vector<2x16x16x128xbf16> to vector<512x128xbf16>
    %c6 = arith.constant 6 : index
    %c0_21 = arith.constant 0 : index
    %c0_22 = arith.constant 0 : index
    %38 = vector.load %arg1[%c6, %c0_21, %c0_22] : memref<9x128x128xbf16, #tpu.memory_space<vmem>>, vector<1x128x128xbf16>
    %39 = vector.shape_cast %38 : vector<1x128x128xbf16> to vector<128x128xbf16>
    %cst_23 = arith.constant dense<0.000000e+00> : vector<512x128xf32>
    %40 = tpu.matmul %37, %39, %cst_23 {dimension_numbers = #tpu.dot_dimension_numbers<[1], [0], [0], [1], [0, 0, 1, 1], [], []>} : vector<512x128xbf16>, vector<128x128xbf16>, vector<512x128xf32> -> vector<512x128xf32>
    %41 = arith.addf %35, %40 : vector<512x128xf32>
    %42 = vector.extract_strided_slice %0 {offsets = [0, 2, 1, 0], sizes = [2, 16, 16, 128], strides = [1, 1, 1, 1]} : vector<2x18x24x128xbf16> to vector<2x16x16x128xbf16>
    %43 = vector.shape_cast %42 : vector<2x16x16x128xbf16> to vector<512x128xbf16>
    %c7 = arith.constant 7 : index
    %c0_24 = arith.constant 0 : index
    %c0_25 = arith.constant 0 : index
    %44 = vector.load %arg1[%c7, %c0_24, %c0_25] : memref<9x128x128xbf16, #tpu.memory_space<vmem>>, vector<1x128x128xbf16>
    %45 = vector.shape_cast %44 : vector<1x128x128xbf16> to vector<128x128xbf16>
    %cst_26 = arith.constant dense<0.000000e+00> : vector<512x128xf32>
    %46 = tpu.matmul %43, %45, %cst_26 {dimension_numbers = #tpu.dot_dimension_numbers<[1], [0], [0], [1], [0, 0, 1, 1], [], []>} : vector<512x128xbf16>, vector<128x128xbf16>, vector<512x128xf32> -> vector<512x128xf32>
    %47 = arith.addf %41, %46 : vector<512x128xf32>
    %48 = vector.extract_strided_slice %0 {offsets = [0, 2, 2, 0], sizes = [2, 16, 16, 128], strides = [1, 1, 1, 1]} : vector<2x18x24x128xbf16> to vector<2x16x16x128xbf16>
    %49 = vector.shape_cast %48 : vector<2x16x16x128xbf16> to vector<512x128xbf16>
    %c8 = arith.constant 8 : index
    %c0_27 = arith.constant 0 : index
    %c0_28 = arith.constant 0 : index
    %50 = vector.load %arg1[%c8, %c0_27, %c0_28] : memref<9x128x128xbf16, #tpu.memory_space<vmem>>, vector<1x128x128xbf16>
    %51 = vector.shape_cast %50 : vector<1x128x128xbf16> to vector<128x128xbf16>
    %cst_29 = arith.constant dense<0.000000e+00> : vector<512x128xf32>
    %52 = tpu.matmul %49, %51, %cst_29 {dimension_numbers = #tpu.dot_dimension_numbers<[1], [0], [0], [1], [0, 0, 1, 1], [], []>} : vector<512x128xbf16>, vector<128x128xbf16>, vector<512x128xf32> -> vector<512x128xf32>
    %53 = arith.addf %47, %52 : vector<512x128xf32>
    %cst_30 = arith.constant dense<0.000000e+00> : vector<128xf32>
    %54 = vector.multi_reduction <add>, %53, %cst_30 [0] : vector<512x128xf32> to vector<128xf32>
    %55 = vector.shape_cast %54 : vector<128xf32> to vector<1x128xf32>
    %cst_31 = arith.constant 0.001953125 : f32
    %56 = vector.broadcast %cst_31 : f32 to vector<1x128xf32>
    %57 = arith.mulf %55, %56 : vector<1x128xf32>
    %58 = vector.broadcast %57 : vector<1x128xf32> to vector<512x128xf32>
    %59 = arith.subf %53, %58 : vector<512x128xf32>
    %60 = arith.mulf %59, %59 : vector<512x128xf32>
    %cst_32 = arith.constant dense<0.000000e+00> : vector<128xf32>
    %61 = vector.multi_reduction <add>, %60, %cst_32 [0] : vector<512x128xf32> to vector<128xf32>
    %62 = vector.shape_cast %61 : vector<128xf32> to vector<1x128xf32>
    %cst_33 = arith.constant 0.001953125 : f32
    %63 = vector.broadcast %cst_33 : f32 to vector<1x128xf32>
    %64 = arith.mulf %62, %63 : vector<1x128xf32>
    %c0_34 = arith.constant 0 : index
    %c0_35 = arith.constant 0 : index
    %65 = vector.load %arg2[%c0_34, %c0_35] : memref<1x128xf32, #tpu.memory_space<vmem>>, vector<1x128xf32>
    %cst_36 = arith.constant 9.99999974E-6 : f32
    %66 = vector.broadcast %cst_36 : f32 to vector<1x128xf32>
    %67 = arith.addf %64, %66 : vector<1x128xf32>
    %68 = math.rsqrt %67 : vector<1x128xf32>
    %69 = arith.mulf %65, %68 : vector<1x128xf32>
    %70 = vector.broadcast %69 : vector<1x128xf32> to vector<512x128xf32>
    %71 = arith.mulf %59, %70 : vector<512x128xf32>
    %c0_37 = arith.constant 0 : index
    %c0_38 = arith.constant 0 : index
    %72 = vector.load %arg3[%c0_37, %c0_38] : memref<1x128xf32, #tpu.memory_space<vmem>>, vector<1x128xf32>
    %73 = vector.broadcast %72 : vector<1x128xf32> to vector<512x128xf32>
    %74 = arith.addf %71, %73 : vector<512x128xf32>
    %cst_39 = arith.constant 0.000000e+00 : f32
    %75 = vector.broadcast %cst_39 : f32 to vector<512x128xf32>
    %76 = arith.maximumf %74, %75 : vector<512x128xf32>
    %77 = arith.truncf %76 : vector<512x128xf32> to vector<512x128xbf16>
    %78 = vector.shape_cast %77 : vector<512x128xbf16> to vector<2x16x16x128xbf16>
    %c0_i32 = arith.constant 0 : i32
    %79 = arith.sitofp %c0_i32 : i32 to bf16
    %80 = vector.broadcast %79 : bf16 to vector<2x16x1x128xbf16>
    %81 = tpu.concatenate %80, %78 in 2 : vector<2x16x1x128xbf16>, vector<2x16x16x128xbf16> -> vector<2x16x17x128xbf16>
    %82 = vector.broadcast %79 : bf16 to vector<2x16x7x128xbf16>
    %83 = tpu.concatenate %81, %82 in 2 : vector<2x16x17x128xbf16>, vector<2x16x7x128xbf16> -> vector<2x16x24x128xbf16>
    %c0_40 = arith.constant 0 : index
    %c1_41 = arith.constant 1 : index
    %c0_42 = arith.constant 0 : index
    %c0_43 = arith.constant 0 : index
    %84 = vector.load %arg8[%c0_40, %c1_41, %c0_42, %c0_43] : memref<2x18x24x128xbf16, #tpu.memory_space<vmem>>, vector<2x16x24x128xbf16>
    tpu.vector_store %arg8[%c0_40, %c1_41, %c0_42, %c0_43], %83 {strides = array<i32>} : memref<2x18x24x128xbf16, #tpu.memory_space<vmem>>, vector<2x16x24x128xbf16>,
    %cst_44 = arith.constant 0.000000e+00 : bf16
    %85 = vector.broadcast %cst_44 : bf16 to vector<2x1x24x128xbf16>
    %c0_45 = arith.constant 0 : index
    %c0_46 = arith.constant 0 : index
    %c0_47 = arith.constant 0 : index
    %c0_48 = arith.constant 0 : index
    %86 = vector.load %arg8[%c0_45, %c0_46, %c0_47, %c0_48] : memref<2x18x24x128xbf16, #tpu.memory_space<vmem>>, vector<2x1x24x128xbf16>
    tpu.vector_store %arg8[%c0_45, %c0_46, %c0_47, %c0_48], %85 {strides = array<i32>} : memref<2x18x24x128xbf16, #tpu.memory_space<vmem>>, vector<2x1x24x128xbf16>,
    %c0_49 = arith.constant 0 : index
    %c17 = arith.constant 17 : index
    %c0_50 = arith.constant 0 : index
    %c0_51 = arith.constant 0 : index
    %87 = vector.load %arg8[%c0_49, %c17, %c0_50, %c0_51] : memref<2x18x24x128xbf16, #tpu.memory_space<vmem>>, vector<2x1x24x128xbf16>
    tpu.vector_store %arg8[%c0_49, %c17, %c0_50, %c0_51], %85 {strides = array<i32>} : memref<2x18x24x128xbf16, #tpu.memory_space<vmem>>, vector<2x1x24x128xbf16>,
    %c0_52 = arith.constant 0 : index
    %c0_53 = arith.constant 0 : index
    %c0_54 = arith.constant 0 : index
    %c0_55 = arith.constant 0 : index
    %88 = vector.load %arg8[%c0_52, %c0_53, %c0_54, %c0_55] : memref<2x18x24x128xbf16, #tpu.memory_space<vmem>>, vector<2x18x24x128xbf16>
    %89 = vector.extract_strided_slice %88 {offsets = [0, 0, 0, 0], sizes = [2, 16, 16, 128], strides = [1, 1, 1, 1]} : vector<2x18x24x128xbf16> to vector<2x16x16x128xbf16>
    %90 = vector.shape_cast %89 : vector<2x16x16x128xbf16> to vector<512x128xbf16>
    %c0_56 = arith.constant 0 : index
    %c0_57 = arith.constant 0 : index
    %c0_58 = arith.constant 0 : index
    %91 = vector.load %arg4[%c0_56, %c0_57, %c0_58] : memref<9x128x128xbf16, #tpu.memory_space<vmem>>, vector<1x128x128xbf16>
    %92 = vector.shape_cast %91 : vector<1x128x128xbf16> to vector<128x128xbf16>
    %cst_59 = arith.constant dense<0.000000e+00> : vector<512x128xf32>
    %93 = tpu.matmul %90, %92, %cst_59 {dimension_numbers = #tpu.dot_dimension_numbers<[1], [0], [0], [1], [0, 0, 1, 1], [], []>} : vector<512x128xbf16>, vector<128x128xbf16>, vector<512x128xf32> -> vector<512x128xf32>
    %94 = vector.extract_strided_slice %88 {offsets = [0, 0, 1, 0], sizes = [2, 16, 16, 128], strides = [1, 1, 1, 1]} : vector<2x18x24x128xbf16> to vector<2x16x16x128xbf16>
    %95 = vector.shape_cast %94 : vector<2x16x16x128xbf16> to vector<512x128xbf16>
    %c1_60 = arith.constant 1 : index
    %c0_61 = arith.constant 0 : index
    %c0_62 = arith.constant 0 : index
    %96 = vector.load %arg4[%c1_60, %c0_61, %c0_62] : memref<9x128x128xbf16, #tpu.memory_space<vmem>>, vector<1x128x128xbf16>
    %97 = vector.shape_cast %96 : vector<1x128x128xbf16> to vector<128x128xbf16>
    %cst_63 = arith.constant dense<0.000000e+00> : vector<512x128xf32>
    %98 = tpu.matmul %95, %97, %cst_63 {dimension_numbers = #tpu.dot_dimension_numbers<[1], [0], [0], [1], [0, 0, 1, 1], [], []>} : vector<512x128xbf16>, vector<128x128xbf16>, vector<512x128xf32> -> vector<512x128xf32>
    %99 = arith.addf %93, %98 : vector<512x128xf32>
    %100 = vector.extract_strided_slice %88 {offsets = [0, 0, 2, 0], sizes = [2, 16, 16, 128], strides = [1, 1, 1, 1]} : vector<2x18x24x128xbf16> to vector<2x16x16x128xbf16>
    %101 = vector.shape_cast %100 : vector<2x16x16x128xbf16> to vector<512x128xbf16>
    %c2_64 = arith.constant 2 : index
    %c0_65 = arith.constant 0 : index
    %c0_66 = arith.constant 0 : index
    %102 = vector.load %arg4[%c2_64, %c0_65, %c0_66] : memref<9x128x128xbf16, #tpu.memory_space<vmem>>, vector<1x128x128xbf16>
    %103 = vector.shape_cast %102 : vector<1x128x128xbf16> to vector<128x128xbf16>
    %cst_67 = arith.constant dense<0.000000e+00> : vector<512x128xf32>
    %104 = tpu.matmul %101, %103, %cst_67 {dimension_numbers = #tpu.dot_dimension_numbers<[1], [0], [0], [1], [0, 0, 1, 1], [], []>} : vector<512x128xbf16>, vector<128x128xbf16>, vector<512x128xf32> -> vector<512x128xf32>
    %105 = arith.addf %99, %104 : vector<512x128xf32>
    %106 = vector.extract_strided_slice %88 {offsets = [0, 1, 0, 0], sizes = [2, 16, 16, 128], strides = [1, 1, 1, 1]} : vector<2x18x24x128xbf16> to vector<2x16x16x128xbf16>
    %107 = vector.shape_cast %106 : vector<2x16x16x128xbf16> to vector<512x128xbf16>
    %c3_68 = arith.constant 3 : index
    %c0_69 = arith.constant 0 : index
    %c0_70 = arith.constant 0 : index
    %108 = vector.load %arg4[%c3_68, %c0_69, %c0_70] : memref<9x128x128xbf16, #tpu.memory_space<vmem>>, vector<1x128x128xbf16>
    %109 = vector.shape_cast %108 : vector<1x128x128xbf16> to vector<128x128xbf16>
    %cst_71 = arith.constant dense<0.000000e+00> : vector<512x128xf32>
    %110 = tpu.matmul %107, %109, %cst_71 {dimension_numbers = #tpu.dot_dimension_numbers<[1], [0], [0], [1], [0, 0, 1, 1], [], []>} : vector<512x128xbf16>, vector<128x128xbf16>, vector<512x128xf32> -> vector<512x128xf32>
    %111 = arith.addf %105, %110 : vector<512x128xf32>
    %112 = vector.extract_strided_slice %88 {offsets = [0, 1, 1, 0], sizes = [2, 16, 16, 128], strides = [1, 1, 1, 1]} : vector<2x18x24x128xbf16> to vector<2x16x16x128xbf16>
    %113 = vector.shape_cast %112 : vector<2x16x16x128xbf16> to vector<512x128xbf16>
    %c4_72 = arith.constant 4 : index
    %c0_73 = arith.constant 0 : index
    %c0_74 = arith.constant 0 : index
    %114 = vector.load %arg4[%c4_72, %c0_73, %c0_74] : memref<9x128x128xbf16, #tpu.memory_space<vmem>>, vector<1x128x128xbf16>
    %115 = vector.shape_cast %114 : vector<1x128x128xbf16> to vector<128x128xbf16>
    %cst_75 = arith.constant dense<0.000000e+00> : vector<512x128xf32>
    %116 = tpu.matmul %113, %115, %cst_75 {dimension_numbers = #tpu.dot_dimension_numbers<[1], [0], [0], [1], [0, 0, 1, 1], [], []>} : vector<512x128xbf16>, vector<128x128xbf16>, vector<512x128xf32> -> vector<512x128xf32>
    %117 = arith.addf %111, %116 : vector<512x128xf32>
    %118 = vector.extract_strided_slice %88 {offsets = [0, 1, 2, 0], sizes = [2, 16, 16, 128], strides = [1, 1, 1, 1]} : vector<2x18x24x128xbf16> to vector<2x16x16x128xbf16>
    %119 = vector.shape_cast %118 : vector<2x16x16x128xbf16> to vector<512x128xbf16>
    %c5_76 = arith.constant 5 : index
    %c0_77 = arith.constant 0 : index
    %c0_78 = arith.constant 0 : index
    %120 = vector.load %arg4[%c5_76, %c0_77, %c0_78] : memref<9x128x128xbf16, #tpu.memory_space<vmem>>, vector<1x128x128xbf16>
    %121 = vector.shape_cast %120 : vector<1x128x128xbf16> to vector<128x128xbf16>
    %cst_79 = arith.constant dense<0.000000e+00> : vector<512x128xf32>
    %122 = tpu.matmul %119, %121, %cst_79 {dimension_numbers = #tpu.dot_dimension_numbers<[1], [0], [0], [1], [0, 0, 1, 1], [], []>} : vector<512x128xbf16>, vector<128x128xbf16>, vector<512x128xf32> -> vector<512x128xf32>
    %123 = arith.addf %117, %122 : vector<512x128xf32>
    %124 = vector.extract_strided_slice %88 {offsets = [0, 2, 0, 0], sizes = [2, 16, 16, 128], strides = [1, 1, 1, 1]} : vector<2x18x24x128xbf16> to vector<2x16x16x128xbf16>
    %125 = vector.shape_cast %124 : vector<2x16x16x128xbf16> to vector<512x128xbf16>
    %c6_80 = arith.constant 6 : index
    %c0_81 = arith.constant 0 : index
    %c0_82 = arith.constant 0 : index
    %126 = vector.load %arg4[%c6_80, %c0_81, %c0_82] : memref<9x128x128xbf16, #tpu.memory_space<vmem>>, vector<1x128x128xbf16>
    %127 = vector.shape_cast %126 : vector<1x128x128xbf16> to vector<128x128xbf16>
    %cst_83 = arith.constant dense<0.000000e+00> : vector<512x128xf32>
    %128 = tpu.matmul %125, %127, %cst_83 {dimension_numbers = #tpu.dot_dimension_numbers<[1], [0], [0], [1], [0, 0, 1, 1], [], []>} : vector<512x128xbf16>, vector<128x128xbf16>, vector<512x128xf32> -> vector<512x128xf32>
    %129 = arith.addf %123, %128 : vector<512x128xf32>
    %130 = vector.extract_strided_slice %88 {offsets = [0, 2, 1, 0], sizes = [2, 16, 16, 128], strides = [1, 1, 1, 1]} : vector<2x18x24x128xbf16> to vector<2x16x16x128xbf16>
    %131 = vector.shape_cast %130 : vector<2x16x16x128xbf16> to vector<512x128xbf16>
    %c7_84 = arith.constant 7 : index
    %c0_85 = arith.constant 0 : index
    %c0_86 = arith.constant 0 : index
    %132 = vector.load %arg4[%c7_84, %c0_85, %c0_86] : memref<9x128x128xbf16, #tpu.memory_space<vmem>>, vector<1x128x128xbf16>
    %133 = vector.shape_cast %132 : vector<1x128x128xbf16> to vector<128x128xbf16>
    %cst_87 = arith.constant dense<0.000000e+00> : vector<512x128xf32>
    %134 = tpu.matmul %131, %133, %cst_87 {dimension_numbers = #tpu.dot_dimension_numbers<[1], [0], [0], [1], [0, 0, 1, 1], [], []>} : vector<512x128xbf16>, vector<128x128xbf16>, vector<512x128xf32> -> vector<512x128xf32>
    %135 = arith.addf %129, %134 : vector<512x128xf32>
    %136 = vector.extract_strided_slice %88 {offsets = [0, 2, 2, 0], sizes = [2, 16, 16, 128], strides = [1, 1, 1, 1]} : vector<2x18x24x128xbf16> to vector<2x16x16x128xbf16>
    %137 = vector.shape_cast %136 : vector<2x16x16x128xbf16> to vector<512x128xbf16>
    %c8_88 = arith.constant 8 : index
    %c0_89 = arith.constant 0 : index
    %c0_90 = arith.constant 0 : index
    %138 = vector.load %arg4[%c8_88, %c0_89, %c0_90] : memref<9x128x128xbf16, #tpu.memory_space<vmem>>, vector<1x128x128xbf16>
    %139 = vector.shape_cast %138 : vector<1x128x128xbf16> to vector<128x128xbf16>
    %cst_91 = arith.constant dense<0.000000e+00> : vector<512x128xf32>
    %140 = tpu.matmul %137, %139, %cst_91 {dimension_numbers = #tpu.dot_dimension_numbers<[1], [0], [0], [1], [0, 0, 1, 1], [], []>} : vector<512x128xbf16>, vector<128x128xbf16>, vector<512x128xf32> -> vector<512x128xf32>
    %141 = arith.addf %135, %140 : vector<512x128xf32>
    %cst_92 = arith.constant dense<0.000000e+00> : vector<128xf32>
    %142 = vector.multi_reduction <add>, %141, %cst_92 [0] : vector<512x128xf32> to vector<128xf32>
    %143 = vector.shape_cast %142 : vector<128xf32> to vector<1x128xf32>
    %cst_93 = arith.constant 0.001953125 : f32
    %144 = vector.broadcast %cst_93 : f32 to vector<1x128xf32>
    %145 = arith.mulf %143, %144 : vector<1x128xf32>
    %146 = vector.broadcast %145 : vector<1x128xf32> to vector<512x128xf32>
    %147 = arith.subf %141, %146 : vector<512x128xf32>
    %148 = arith.mulf %147, %147 : vector<512x128xf32>
    %cst_94 = arith.constant dense<0.000000e+00> : vector<128xf32>
    %149 = vector.multi_reduction <add>, %148, %cst_94 [0] : vector<512x128xf32> to vector<128xf32>
    %150 = vector.shape_cast %149 : vector<128xf32> to vector<1x128xf32>
    %cst_95 = arith.constant 0.001953125 : f32
    %151 = vector.broadcast %cst_95 : f32 to vector<1x128xf32>
    %152 = arith.mulf %150, %151 : vector<1x128xf32>
    %c0_96 = arith.constant 0 : index
    %c0_97 = arith.constant 0 : index
    %153 = vector.load %arg5[%c0_96, %c0_97] : memref<1x128xf32, #tpu.memory_space<vmem>>, vector<1x128xf32>
    %cst_98 = arith.constant 9.99999974E-6 : f32
    %154 = vector.broadcast %cst_98 : f32 to vector<1x128xf32>
    %155 = arith.addf %152, %154 : vector<1x128xf32>
    %156 = math.rsqrt %155 : vector<1x128xf32>
    %157 = arith.mulf %153, %156 : vector<1x128xf32>
    %158 = vector.broadcast %157 : vector<1x128xf32> to vector<512x128xf32>
    %159 = arith.mulf %147, %158 : vector<512x128xf32>
    %c0_99 = arith.constant 0 : index
    %c0_100 = arith.constant 0 : index
    %160 = vector.load %arg6[%c0_99, %c0_100] : memref<1x128xf32, #tpu.memory_space<vmem>>, vector<1x128xf32>
    %161 = vector.broadcast %160 : vector<1x128xf32> to vector<512x128xf32>
    %162 = arith.addf %159, %161 : vector<512x128xf32>
    %cst_101 = arith.constant 0.000000e+00 : f32
    %163 = vector.broadcast %cst_101 : f32 to vector<512x128xf32>
    %164 = arith.maximumf %162, %163 : vector<512x128xf32>
    %165 = vector.shape_cast %164 : vector<512x128xf32> to vector<2x16x16x128xf32>
    %c0_102 = arith.constant 0 : index
    %c0_103 = arith.constant 0 : index
    %c0_104 = arith.constant 0 : index
    %c0_105 = arith.constant 0 : index
    %166 = vector.load %arg7[%c0_102, %c0_103, %c0_104, %c0_105] : memref<2x16x16x128xf32, #tpu.memory_space<vmem>>, vector<2x16x16x128xf32>
    tpu.vector_store %arg7[%c0_102, %c0_103, %c0_104, %c0_105], %165 {strides = array<i32>} : memref<2x16x16x128xf32, #tpu.memory_space<vmem>>, vector<2x16x16x128xf32>,
    return
  }
}

</mosaic_0001>

<bundles_post_ra>
// kernel: double_conv.1
= control target key start
LH: loop header
LB: loop body
LE: loop exit
PB: predicated region body
PF: predicated region fallthrough
CT: control target
= control target key end

     0   :  { %vm151_vm0 = vsmask.f32 3328  ;;  %vm152_vm1 = vsmask.f32 7440  ;;  %v23984_v29 = vmov 0  ;;  %vm1965_vm3 = vcmask 1042432   ;;  %s23627_s1 = inlined_call_operand.vmem [shape: bf16[9,128,128], index: 1, kind: input, shape index: {}]   ;;  %s23628_s0 = inlined_call_operand.vmem [shape: bf16[2,18,24,128], index: 0, kind: input, shape index: {}]   ;;  %s23629_s4 = inlined_call_operand.vmem [shape: bf16[9,128,128], index: 4, kind: input, shape index: {}]   ;;  %s23630_s2 = inlined_call_operand.vmem [shape: f32[1,128], index: 2, kind: input, shape index: {}]   ;;  %s23631_s3 = inlined_call_operand.vmem [shape: f32[1,128], index: 3, kind: input, shape index: {}]   ;;  %s23632_s5 = inlined_call_operand.vmem [shape: f32[1,128], index: 5, kind: input, shape index: {}]   ;;  %s23633_s6 = inlined_call_operand.vmem [shape: f32[1,128], index: 6, kind: input, shape index: {}]   ;;  %s23634_s7 = inlined_call_operand.vmem [shape: f32[2,16,16,128], index: 7, kind: output, shape index: {}]  }
   0x1   :  { %v16669_v0 = vld [vmem:[%s23627_s1 + $0x40] sm:$0xff]   ;;  %v16670_v1 = vld [vmem:[%s23627_s1 + $0x48] sm:$0xff]   ;;  %v16671_v2 = vld [vmem:[%s23627_s1 + $0x50] sm:$0xff]   ;;  %vm1966_vm4 = vcmask 1046532   ;;  %vm6227_vm6 = vcmask 1040384  }
   0x2   :  { %14204 = vmatprep.subr.bf16.mxu0 %v16669_v0  ;;  %v16672_v3 = vld [vmem:[%s23627_s1 + $0x58] sm:$0xff]   ;;  %v27_v4 = vld [vmem:[%s23628_s0] sm:$0xf]  ;;  %v28_v5 = vld [vmem:[%s23628_s0 + $0x4] sm:$0xf] }
   0x3   :  { %14205 = vmatpush3.bf16.msra.mxu0 %v16669_v0  ;;  %v29_v6 = vld [vmem:[%s23628_s0 + $0x8] sm:$0xf]  ;;  %v155_v7 = vshrl.u32 %v27_v4, 16  ;;  %v158_v8 = vshll.u32 %v27_v4, 16  ;;  %v164_v9 = vshll.u32 %v28_v5, 16  ;;  %v168_v10 = vshrl.u32 %v28_v5, 16  ;;  %vm17138_vm2 = vmor %vm151_vm0, %vm152_vm1 }
   0x4   :  { %14206 = vmatprep.subr.bf16.mxu0 %v16670_v1  ;;  %v30_v11 = vld [vmem:[%s23628_s0 + $0xc] sm:$0xf]  ;;  %v16673_v12 = vld [vmem:[%s23627_s1 + $0x60] sm:$0xff]   ;;  %v174_v13 = vshll.u32 %v29_v6, 16  ;;  %v31_v14 = vld [vmem:[%s23628_s0 + $0x10] sm:$0xf] }
   0x5   :  { %v32_v15 = vld [vmem:[%s23628_s0 + $0x14] sm:$0xf]  ;;  %v157_v16 = vrot.slane %v155_v7, 4  ;;  %v160_v17 = vrot.slane %v158_v8, 5  ;;  %v166_v18 = vrot.slane %v164_v9, 5  ;;  %v170_v19 = vrot.slane %v168_v10, 4  ;;  %vm18148_vm5 = vmor %vm1965_vm3, %vm1966_vm4 }
   0x6   :  { %v176_v20 = vrot.slane %v174_v13, 5  ;;  %v179_v21 = vshrl.u32 %v30_v11, 16  ;;  %v182_v22 = vshll.u32 %v30_v11, 16  ;;  %v188_v23 = vshll.u32 %v31_v14, 16  ;;  %v33_v28 = vld [vmem:[%s23628_s0 + $0x18] sm:$0xf] }
   0x7   :  { %14207 = vmatpush3.bf16.msra.mxu0 %v16670_v1  ;;  %v161_v24 = vor.u32 %v160_v17, %v157_v16  ;;  %v171_v25 = vor.u32 %v170_v19, %v166_v18  ;;  %v192_v26 = vshrl.u32 %v31_v14, 16  ;;  %v198_v27 = vshll.u32 %v32_v15, 16  ;;  %v34_v33 = vld [vmem:[%s23628_s0 + $0x1c] sm:$0xf]  ;;  %v16674_v38 = vld [vmem:[%s23627_s1 + $0x68] sm:$0xff]   ;;  %v16675_v58 = vld [vmem:[%s23627_s1 + $0x70] sm:$0xff]  }
   0x8   :  { %14208 = vmatprep.subr.bf16.mxu0 %v16671_v2  ;;  %v23985_v29 = vsel %vm17138_vm2, 4294967295, %v23984_v29  ;;  %v181_v30 = vrot.slane %v179_v21, 4  ;;  %v184_v31 = vrot.slane %v182_v22, 5  ;;  %v190_v32 = vrot.slane %v188_v23, 5  ;;  %v35_v40 = vld [vmem:[%s23628_s0 + $0x20] sm:$0xf] }
   0x9   :  { %23986 = vst [vmem:[#allocation3_spill] sm:$0xff] %v23985_v29  ;;  %v162_v34 = vrot.slane %v161_v24, 4  ;;  %v172_v35 = vrot.slane %v171_v25, 4  ;;  %v194_v36 = vrot.slane %v192_v26, 4  ;;  %v200_v37 = vrot.slane %v198_v27, 5  ;;  %v16676_v14 = vld [vmem:[%s23627_s1 + $0x78] sm:$0xff]  }
   0xa   :  { %v185_v39 = vor.u32 %v184_v31, %v181_v30  ;;  %v203_v41 = vshrl.u32 %v33_v28, 16  ;;  %v206_v42 = vshll.u32 %v33_v28, 16  ;;  %v212_v43 = vshll.u32 %v34_v33, 16  ;;  %v36_v48 = vld [vmem:[%s23628_s0 + $0x24] sm:$0xf] }
   0xb   :  { %14209 = vmatpush3.bf16.msra.mxu0 %v16671_v2  ;;  %v167_v44 = vsel %vm17138_vm2, %v162_v34, %v166_v18  ;;  %v177_v45 = vsel %vm17138_vm2, %v172_v35, %v176_v20  ;;  %v195_v46 = vor.u32 %v194_v36, %v190_v32  ;;  %v216_v47 = vshrl.u32 %v34_v33, 16  ;;  %v37_v53 = vld [vmem:[%s23628_s0 + $0x28] sm:$0xf]  ;;  %v38_v61 = vld [vmem:[%s23628_s0 + $0x2c] sm:$0xf]  ;;  %v16677_v35 = vld [vmem:[%s23627_s1] sm:$0xff]  }
   0xc   :  { %14210 = vmatprep.subr.bf16.mxu0 %v16672_v3  ;;  %v12714_v49 = vcombine.low %v167_v44, %v177_v45  ;;  %v186_v50 = vrot.slane %v185_v39, 4  ;;  %v205_v51 = vrot.slane %v203_v41, 4  ;;  %v208_v52 = vrot.slane %v206_v42, 5  ;;  %v39_v4 = vld [vmem:[%s23628_s0 + $0x30] sm:$0xf] }
   0xd   :  { %v196_v54 = vrot.slane %v195_v46, 4  ;;  %v214_v55 = vrot.slane %v212_v43, 5  ;;  %v218_v56 = vrot.slane %v216_v47, 4  ;;  %v222_v57 = vshll.u32 %v35_v40, 16  ;;  %v40_v5 = vld [vmem:[%s23628_s0 + $0x34] sm:$0xf] }
   0xe   :  { %14220 = vmatprep.mubr.bf16.mxu0 %v12714_v49  ;;  %v191_v59 = vsel %vm17138_vm2, %v186_v50, %v190_v32  ;;  %v209_v60 = vor.u32 %v208_v52, %v205_v51  ;;  %v227_v62 = vshrl.u32 %v36_v48, 16  ;;  %v230_v63 = vshll.u32 %v36_v48, 16  ;;  %v41_v17 = vld [vmem:[%s23628_s0 + $0x38] sm:$0xf]  ;;  %v42_v24 = vld [vmem:[%s23628_s0 + $0x3c] sm:$0xf] }
   0xf   :  { %14211 = vmatpush3.bf16.msra.mxu0 %v16672_v3  ;;  %v201_v0 = vsel %vm17138_vm2, %v196_v54, %v200_v37  ;;  %v219_v1 = vor.u32 %v218_v56, %v214_v55  ;;  %v224_v2 = vrot.slane %v222_v57, 5  ;;  %v236_v3 = vshll.u32 %v37_v53, 16  ;;  %v43_v30 = vld [vmem:[%s23628_s0 + $0x40] sm:$0xf]  ;;  %v45_v49 = vld [vmem:[%s23628_s0 + $0x48] sm:$0xf] }
  0x10   :  { %14212 = vmatprep.subr.bf16.mxu0 %v16673_v12  ;;  %v17177_v6 = vcombine.low %v191_v59, %v201_v0  ;;  %v210_v7 = vrot.slane %v209_v60, 4  ;;  %v229_v8 = vrot.slane %v227_v62, 4  ;;  %v232_v9 = vrot.slane %v230_v63, 5  ;;  %v46_v54 = vld [vmem:[%s23628_s0 + $0x4c] sm:$0xf] }
  0x11   :  { %v220_v10 = vrot.slane %v219_v1, 4  ;;  %v238_v11 = vrot.slane %v236_v3, 5  ;;  %v246_v13 = vshll.u32 %v38_v61, 16  ;;  %v251_v18 = vshrl.u32 %v39_v4, 16  ;;  %v16678_v59 = vld [vmem:[%s23627_s1 + $0x8] sm:$0xff]  }
  0x12   :  { %23987 = vst [vmem:[#allocation4_spill] sm:$0xff] %v17177_v6  ;;  %v215_v15 = vsel %vm17138_vm2, %v210_v7, %v214_v55  ;;  %v233_v16 = vor.u32 %v232_v9, %v229_v8  ;;  %v254_v19 = vshll.u32 %v39_v4, 16  ;;  %v260_v23 = vshll.u32 %v40_v5, 16  ;;  %v47_v60 = vld [vmem:[%s23628_s0 + $0x50] sm:$0xf] }
  0x13   :  { %14213 = vmatpush3.bf16.msra.mxu0 %v16673_v12  ;;  %v240_v12 = vshrl.u32 %v37_v53, 16  ;;  %v225_v20 = vsel %vm17138_vm2, %v220_v10, %v224_v2  ;;  %v248_v22 = vrot.slane %v246_v13, 5  ;;  %v253_v27 = vrot.slane %v251_v18, 4  ;;  %v17917_v29 = vld [vmem:[%s23628_s0 + $0x54] sm:$0xf] }
  0x14   :  { %14214 = vmatprep.subr.bf16.mxu0 %v16674_v38  ;;  %v17192_v25 = vcombine.low %v215_v15, %v225_v20  ;;  %v234_v26 = vrot.slane %v233_v16, 4  ;;  %v256_v28 = vrot.slane %v254_v19, 5  ;;  %v262_v32 = vrot.slane %v260_v23, 5  ;;  %v16679_v16 = vld [vmem:[%s23627_s1 + $0x10] sm:$0xff]   ;;  %v50_v20 = vld [vmem:[%s23628_s0 + $0x5c] sm:$0xf] }
  0x15   :  { %v242_v21 = vrot.slane %v240_v12, 4  ;;  %v264_v33 = vshrl.u32 %v40_v5, 16  ;;  %v270_v34 = vshll.u32 %v41_v17, 16  ;;  %v275_v39 = vshrl.u32 %v42_v24, 16  ;;  %v48_v5 = vld [vmem:[%s23628_s0 + $0x54] sm:$0xf] }
  0x16   :  { %23988 = vst [vmem:[#allocation5_spill] sm:$0xff] %v17192_v25  ;;  %v239_v36 = vsel %vm17138_vm2, %v234_v26, %v238_v11  ;;  %v257_v37 = vor.u32 %v256_v28, %v253_v27  ;;  %v278_v40 = vshll.u32 %v42_v24, 16  ;;  %v284_v44 = vshll.u32 %v43_v30, 16  ;;  %v51_v27 = vld [vmem:[%s23628_s0 + $0x60] sm:$0xf] }
  0x17   :  { %14215 = vmatpush3.bf16.msra.mxu0 %v16674_v38  ;;  %v243_v31 = vor.u32 %v242_v21, %v238_v11  ;;  %v44_v38 = vld [vmem:[%s23628_s0 + $0x44] sm:$0xf]  ;;  %v266_v42 = vrot.slane %v264_v33, 4  ;;  %v272_v43 = vrot.slane %v270_v34, 5  ;;  %v277_v46 = vrot.slane %v275_v39, 4 }
  0x18   :  { %14216 = vmatprep.subr.bf16.mxu0 %v16675_v58  ;;  %v258_v45 = vrot.slane %v257_v37, 4  ;;  %v280_v47 = vrot.slane %v278_v40, 5  ;;  %v288_v48 = vshrl.u32 %v43_v30, 16  ;;  %v286_v52 = vrot.slane %v284_v44, 5  ;;  %v49_v11 = vld [vmem:[%s23628_s0 + $0x58] sm:$0xf] }
  0x19   :  { %v244_v41 = vrot.slane %v243_v31, 4  ;;  %v267_v51 = vor.u32 %v266_v42, %v262_v32  ;;  %v294_v53 = vshll.u32 %v44_v38, 16  ;;  %v299_v63 = vshrl.u32 %v45_v49, 16  ;;  %v52_v33 = vld [vmem:[%s23628_s0 + $0x64] sm:$0xf]  ;;  %v16680_v38 = vld [vmem:[%s23627_s1 + $0x18] sm:$0xff]  }
  0x1a   :  { %v263_v56 = vsel %vm17138_vm2, %v258_v45, %v262_v32  ;;  %v281_v57 = vor.u32 %v280_v47, %v277_v46  ;;  %v302_v0 = vshll.u32 %v45_v49, 16  ;;  %v308_v3 = vshll.u32 %v46_v54, 16  ;;  %v55_v49 = vld [vmem:[%s23628_s0 + $0x70] sm:$0xf] }
  0x1b   :  { %14217 = vmatpush3.bf16.msra.mxu0 %v16675_v58  ;;  %v249_v50 = vsel %vm17138_vm2, %v244_v41, %v248_v22  ;;  %v290_v58 = vrot.slane %v288_v48, 4  ;;  %v268_v61 = vrot.slane %v267_v51, 4  ;;  %v296_v62 = vrot.slane %v294_v53, 5  ;;  %v53_v41 = vld [vmem:[%s23628_s0 + $0x68] sm:$0xf] }
  0x1c   :  { %14218 = vmatprep.subr.bf16.mxu0 %v16676_v14  ;;  %v17213_v55 = vcombine.low %v239_v36, %v249_v50  ;;  %v282_v1 = vrot.slane %v281_v57, 4  ;;  %v312_v4 = vshrl.u32 %v46_v54, 16  ;;  %v301_v8 = vrot.slane %v299_v63, 4  ;;  %v54_v48 = vld [vmem:[%s23628_s0 + $0x6c] sm:$0xf] }
  0x1d   :  { %v291_v2 = vor.u32 %v290_v58, %v286_v52  ;;  %v273_v7 = vsel %vm17138_vm2, %v268_v61, %v272_v43  ;;  %v304_v9 = vrot.slane %v302_v0, 5  ;;  %v318_v10 = vshll.u32 %v47_v60, 16 }
  0x1e   :  { %23989 = vst [vmem:[#allocation6_spill] sm:$0xff] %v17213_v55  ;;  %v17233_v12 = vcombine.low %v263_v56, %v273_v7  ;;  %v287_v13 = vsel %vm17138_vm2, %v282_v1, %v286_v52  ;;  %v310_v15 = vrot.slane %v308_v3, 5  ;;  %v314_v18 = vrot.slane %v312_v4, 4 }
  0x1f   :  { %14219 = vmatpush3.bf16.msra.mxu0 %v16676_v14  ;;  %v292_v14 = vrot.slane %v291_v2, 4  ;;  %v305_v17 = vor.u32 %v304_v9, %v301_v8  ;;  %v320_v19 = vrot.slane %v318_v10, 5  ;;  %v323_v21 = vshrl.u32 %v48_v5, 16  ;;  %v56_v2 = vld [vmem:[%s23628_s0 + $0x74] sm:$0xf] }
  0x20   :  { %14284 = vmatprep.subr.bf16.mxu0 %v16677_v35  ;;  %23990 = vst [vmem:[#allocation7_spill] sm:$0xff] %v17233_v12  ;;  %v326_v23 = vshll.u32 %v48_v5, 16  ;;  %v332_v24 = vshll.u32 %v49_v11, 16  ;;  %v336_v26 = vshrl.u32 %v49_v11, 16  ;;  %v315_v31 = vor.u32 %v314_v18, %v310_v15  ;;  %v57_v5 = vld [vmem:[%s23628_s0 + $0x78] sm:$0xf] }
  0x21   :  { %v297_v22 = vsel %vm17138_vm2, %v292_v14, %v296_v62  ;;  %v306_v30 = vrot.slane %v305_v17, 4  ;;  %v325_v32 = vrot.slane %v323_v21, 4  ;;  %v342_v37 = vshll.u32 %v50_v20, 16  ;;  %v58_v11 = vld [vmem:[%s23628_s0 + $0x7c] sm:$0xf]  ;;  %v16682_v17 = vld [vmem:[%s23627_s1 + $0x28] sm:$0xff]  }
  0x22   :  { %14221 = vmatmul.mubr.bf16.vlgmr.msra.gmra.mrb[0].mxu0 %v17177_v6  ;;  %v17248_v28 = vcombine.low %v287_v13, %v297_v22  ;;  %v328_v34 = vrot.slane %v326_v23, 5  ;;  %v338_v36 = vrot.slane %v336_v26, 4  ;;  %v316_v40 = vrot.slane %v315_v31, 4  ;;  %v59_v21 = vld [vmem:[%s23628_s0 + $0x80] sm:$0xf] }
  0x23   :  { %14285 = vmatpush3.bf16.msra.mxu0 %v16677_v35  ;;  %14224 = vmatprep.mubr.bf16.mxu0 %v17192_v25  ;;  %v334_v35 = vrot.slane %v332_v24, 5  ;;  %v311_v39 = vsel %vm17138_vm2, %v306_v30, %v310_v15  ;;  %v347_v42 = vshrl.u32 %v51_v27, 16  ;;  %v350_v43 = vshll.u32 %v51_v27, 16  ;;  %v60_v30 = vld [vmem:[%s23628_s0 + $0x84] sm:$0xf] }
  0x24   :  { %14286 = vmatprep.subr.bf16.mxu0 %v16678_v59  ;;  %23991 = vst [vmem:[#allocation8_spill] sm:$0xff] %v17248_v28  ;;  %v329_v44 = vor.u32 %v328_v34, %v325_v32  ;;  %v344_v46 = vrot.slane %v342_v37, 5  ;;  %v356_v47 = vshll.u32 %v52_v33, 16  ;;  %v321_v50 = vsel %vm17138_vm2, %v316_v40, %v320_v19  ;;  %v16683_v40 = vld [vmem:[%s23627_s1 + $0x30] sm:$0xff]   ;;  %v17950_v25 = vld [vmem:[%s23627_s1 + $0xc0] sm:$0xff]  }
  0x25   :  { %v339_v45 = vor.u32 %v338_v36, %v334_v35  ;;  %v349_v51 = vrot.slane %v347_v42, 4  ;;  %v352_v52 = vrot.slane %v350_v43, 5  ;;  %v360_v53 = vshrl.u32 %v52_v33, 16  ;;  %v17960_v6 = vld [vmem:[%s23628_s0 + $0x70] sm:$0xf] }
  0x26   :  { %v17271_v54 = vcombine.low %v311_v39, %v321_v50  ;;  %v330_v56 = vrot.slane %v329_v44, 4  ;;  %v358_v58 = vrot.slane %v356_v47, 5  ;;  %v366_v62 = vshll.u32 %v53_v41, 16  ;;  %v61_v39 = vld [vmem:[%s23628_s0 + $0x88] sm:$0xf] }
  0x27   :  { %14287 = vmatpush3.bf16.msra.mxu0 %v16678_v59  ;;  %v340_v57 = vrot.slane %v339_v45, 4  ;;  %v16681_v59 = vld [vmem:[%s23627_s1 + $0x20] sm:$0xff]   ;;  %v353_v60 = vor.u32 %v352_v52, %v349_v51  ;;  %v362_v61 = vrot.slane %v360_v53, 4  ;;  %v371_v63 = vshrl.u32 %v54_v48, 16  ;;  %v62_v44 = vld [vmem:[%s23628_s0 + $0x8c] sm:$0xf] }
  0x28   :  { %14288 = vmatprep.subr.bf16.mxu0 %v16679_v16  ;;  %23992 = vst [vmem:[#allocation9_spill] sm:$0xff] %v17271_v54  ;;  %v335_v0 = vsel %vm17138_vm2, %v330_v56, %v334_v35  ;;  %v374_v3 = vshll.u32 %v54_v48, 16  ;;  %v380_v4 = vshll.u32 %v55_v49, 16  ;;  %v368_v10 = vrot.slane %v366_v62, 5  ;;  %v63_v56 = vld [vmem:[%s23628_s0 + $0x90] sm:$0xf] }
  0x29   :  { %v345_v1 = vsel %vm17138_vm2, %v340_v57, %v344_v46  ;;  %v354_v8 = vrot.slane %v353_v60, 4  ;;  %v363_v9 = vor.u32 %v362_v61, %v358_v58  ;;  %v373_v13 = vrot.slane %v371_v63, 4  ;;  %v64_v61 = vld [vmem:[%s23628_s0 + $0x94] sm:$0xf]  ;;  %v16684_v62 = vld [vmem:[%s23627_s1 + $0x38] sm:$0xff]  }
  0x2a   :  { %14225 = vmatmul.mubr.bf16.gmra.mrb[4].mxu0 %v17213_v55  ;;  %v17286_v7 = vcombine.low %v335_v0, %v345_v1  ;;  %v376_v14 = vrot.slane %v374_v3, 5  ;;  %v382_v15 = vrot.slane %v380_v4, 5  ;;  %v390_v20 = vshll.u32 %v56_v2, 16  ;;  %v16722_v55 = vld [vmem:[%s23627_s1 + $0xb8] sm:$0xff]  }
  0x2b   :  { %14228 = vmatprep.mubr.bf16.mxu0 %v17233_v12  ;;  %14289 = vmatpush3.bf16.msra.mxu0 %v16679_v16  ;;  %v384_v16 = vshrl.u32 %v55_v49, 16  ;;  %v359_v18 = vsel %vm17138_vm2, %v354_v8, %v358_v58  ;;  %v364_v19 = vrot.slane %v363_v9, 4  ;;  %v395_v22 = vshrl.u32 %v57_v5, 16  ;;  %v65_v8 = vld [vmem:[%s23628_s0 + $0x98] sm:$0xf] }
  0x2c   :  { %14290 = vmatprep.subr.bf16.mxu0 %v16680_v38  ;;  %23993 = vst [vmem:[#allocation10_spill] sm:$0xff] %v17286_v7  ;;  %v377_v23 = vor.u32 %v376_v14, %v373_v13  ;;  %v398_v26 = vshll.u32 %v57_v5, 16  ;;  %v404_v27 = vshll.u32 %v58_v11, 16  ;;  %v392_v32 = vrot.slane %v390_v20, 5  ;;  %v67_v20 = vld [vmem:[%s23628_s0 + $0xa0] sm:$0xf] }
  0x2d   :  { %v386_v24 = vrot.slane %v384_v16, 4  ;;  %v369_v31 = vsel %vm17138_vm2, %v364_v19, %v368_v10  ;;  %v397_v33 = vrot.slane %v395_v22, 4  ;;  %v408_v34 = vshrl.u32 %v58_v11, 16 }
  0x2e   :  { %v17306_v35 = vcombine.low %v359_v18, %v369_v31  ;;  %v378_v36 = vrot.slane %v377_v23, 4  ;;  %v406_v41 = vrot.slane %v404_v27, 5  ;;  %v414_v43 = vshll.u32 %v59_v21, 16  ;;  %v16687_v21 = vld [vmem:[%s23627_s1 + $0x80] sm:$0xff]  }
  0x2f   :  { %14291 = vmatpush3.bf16.msra.mxu0 %v16680_v38  ;;  %v387_v37 = vor.u32 %v386_v24, %v382_v15  ;;  %v400_v38 = vrot.slane %v398_v26, 5  ;;  %v410_v42 = vrot.slane %v408_v34, 4  ;;  %v419_v45 = vshrl.u32 %v60_v30, 16  ;;  %v68_v31 = vld [vmem:[%s23628_s0 + $0xa4] sm:$0xf] }
  0x30   :  { %14292 = vmatprep.subr.bf16.mxu0 %v16681_v59  ;;  %23994 = vst [vmem:[#allocation11_spill] sm:$0xff] %v17306_v35  ;;  %v383_v46 = vsel %vm17138_vm2, %v378_v36, %v382_v15  ;;  %v422_v49 = vshll.u32 %v60_v30, 16  ;;  %v416_v51 = vrot.slane %v414_v43, 5  ;;  %v428_v53 = vshll.u32 %v61_v39, 16  ;;  %v66_v15 = vld [vmem:[%s23628_s0 + $0x9c] sm:$0xf] }
  0x31   :  { %v388_v47 = vrot.slane %v387_v37, 4  ;;  %v401_v48 = vor.u32 %v400_v38, %v397_v33  ;;  %v411_v50 = vor.u32 %v410_v42, %v406_v41  ;;  %v421_v52 = vrot.slane %v419_v45, 4 }
  0x32   :  { %14229 = vmatmul.mubr.bf16.gmra.mrb[8].mxu0 %v17248_v28  ;;  %v432_v60 = vshrl.u32 %v61_v39, 16  ;;  %v430_v1 = vrot.slane %v428_v53, 5  ;;  %v438_v2 = vshll.u32 %v62_v44, 16  ;;  %v443_v9 = vshrl.u32 %v63_v56, 16  ;;  %v69_v39 = vld [vmem:[%s23628_s0 + $0xa8] sm:$0xf] }
  0x33   :  { %14232 = vmatprep.mubr.bf16.mxu0 %v17271_v54  ;;  %14293 = vmatpush3.bf16.msra.mxu0 %v16681_v59  ;;  %v393_v57 = vsel %vm17138_vm2, %v388_v47, %v392_v32  ;;  %v402_v58 = vrot.slane %v401_v48, 4  ;;  %v424_v59 = vrot.slane %v422_v49, 5  ;;  %v412_v0 = vrot.slane %v411_v50, 4  ;;  %v70_v44 = vld [vmem:[%s23628_s0 + $0xac] sm:$0xf] }
  0x34   :  { %14294 = vmatprep.subr.bf16.mxu0 %v16682_v17  ;;  %v17330_v63 = vcombine.low %v383_v46, %v393_v57  ;;  %v434_v5 = vrot.slane %v432_v60, 4  ;;  %v440_v11 = vrot.slane %v438_v2, 5  ;;  %v446_v13 = vshll.u32 %v63_v56, 16  ;;  %v71_v57 = vld [vmem:[%s23628_s0 + $0xb0] sm:$0xf] }
  0x35   :  { %v407_v3 = vsel %vm17138_vm2, %v402_v58, %v406_v41  ;;  %v425_v4 = vor.u32 %v424_v59, %v421_v52  ;;  %v417_v10 = vsel %vm17138_vm2, %v412_v0, %v416_v51  ;;  %v452_v14 = vshll.u32 %v64_v61, 16  ;;  %v17936_v28 = vld [vmem:[%s23628_s0 + $0x64] sm:$0xf] }
  0x36   :  { %23995 = vst [vmem:[#allocation12_spill] sm:$0xff] %v17330_v63  ;;  %v17344_v16 = vcombine.low %v407_v3, %v417_v10  ;;  %v435_v18 = vor.u32 %v434_v5, %v430_v1  ;;  %v445_v19 = vrot.slane %v443_v9, 4  ;;  %v448_v22 = vrot.slane %v446_v13, 5 }
  0x37   :  { %14295 = vmatpush3.bf16.msra.mxu0 %v16682_v17  ;;  %v426_v17 = vrot.slane %v425_v4, 4  ;;  %v454_v23 = vrot.slane %v452_v14, 5  ;;  %v456_v24 = vshrl.u32 %v64_v61, 16  ;;  %v462_v26 = vshll.u32 %v65_v8, 16  ;;  %v73_v8 = vld [vmem:[%s23628_s0 + $0xb8] sm:$0xf] }
  0x38   :  { %14296 = vmatprep.subr.bf16.mxu0 %v16683_v40  ;;  %23996 = vst [vmem:[#allocation13_spill] sm:$0xff] %v17344_v16  ;;  %v436_v30 = vrot.slane %v435_v18, 4  ;;  %v467_v32 = vshrl.u32 %v66_v15, 16  ;;  %v470_v33 = vshll.u32 %v66_v15, 16  ;;  %v449_v34 = vor.u32 %v448_v22, %v445_v19 }
  0x39   :  { %v431_v27 = vsel %vm17138_vm2, %v426_v17, %v430_v1  ;;  %v458_v36 = vrot.slane %v456_v24, 4  ;;  %v464_v37 = vrot.slane %v462_v26, 5  ;;  %v476_v38 = vshll.u32 %v67_v20, 16  ;;  %v72_v1 = vld [vmem:[%s23628_s0 + $0xb4] sm:$0xf] }
  0x3a   :  { %14233 = vmatmul.mubr.bf16.gmra.mrb[12].mxu0 %v17286_v7  ;;  %v469_v41 = vrot.slane %v467_v32, 4  ;;  %v472_v42 = vrot.slane %v470_v33, 5  ;;  %v480_v43 = vshrl.u32 %v67_v20, 16  ;;  %v450_v46 = vrot.slane %v449_v34, 4  ;;  %v74_v17 = vld [vmem:[%s23628_s0 + $0xbc] sm:$0xf] }
  0x3b   :  { %14236 = vmatprep.mubr.bf16.mxu0 %v17306_v35  ;;  %14297 = vmatpush3.bf16.msra.mxu0 %v16683_v40  ;;  %v441_v40 = vsel %vm17138_vm2, %v436_v30, %v440_v11  ;;  %v459_v47 = vor.u32 %v458_v36, %v454_v23  ;;  %v478_v48 = vrot.slane %v476_v38, 5  ;;  %v486_v51 = vshll.u32 %v68_v31, 16  ;;  %v81_v24 = vld [vmem:[%s23628_s0 + $0xd8] sm:$0xf]  ;;  %v82_v32 = vld [vmem:[%s23628_s0 + $0xdc] sm:$0xf] }
  0x3c   :  { %14298 = vmatprep.subr.bf16.mxu0 %v16684_v62  ;;  %v17365_v45 = vcombine.low %v431_v27, %v441_v40  ;;  %v473_v49 = vor.u32 %v472_v42, %v469_v41  ;;  %v482_v50 = vrot.slane %v480_v43, 4  ;;  %v491_v52 = vshrl.u32 %v69_v39, 16  ;;  %v83_v38 = vld [vmem:[%s23628_s0 + $0xe0] sm:$0xf]  ;;  %v84_v43 = vld [vmem:[%s23628_s0 + $0xe4] sm:$0xf] }
  0x3d   :  { %v455_v53 = vsel %vm17138_vm2, %v450_v46, %v454_v23  ;;  %v460_v56 = vrot.slane %v459_v47, 4  ;;  %v494_v58 = vshll.u32 %v69_v39, 16  ;;  %v500_v59 = vshll.u32 %v70_v44, 16 }
  0x3e   :  { %23997 = vst [vmem:[#allocation14_spill] sm:$0xff] %v17365_v45  ;;  %v474_v60 = vrot.slane %v473_v49, 4  ;;  %v483_v61 = vor.u32 %v482_v50, %v478_v48  ;;  %v493_v0 = vrot.slane %v491_v52, 4  ;;  %v504_v5 = vshrl.u32 %v70_v44, 16 }
  0x3f   :  { %14299 = vmatpush3.bf16.msra.mxu0 %v16684_v62  ;;  %v488_v62 = vrot.slane %v486_v51, 5  ;;  %v465_v2 = vsel %vm17138_vm2, %v460_v56, %v464_v37  ;;  %v496_v3 = vrot.slane %v494_v58, 5  ;;  %v502_v4 = vrot.slane %v500_v59, 5 }
  0x40   :  { %14364 = vmatprep.subr.bf16.mxu0 %v16687_v21  ;;  %v17382_v9 = vcombine.low %v455_v53, %v465_v2  ;;  %v479_v10 = vsel %vm17138_vm2, %v474_v60, %v478_v48  ;;  %v484_v11 = vrot.slane %v483_v61, 4  ;;  %v510_v13 = vshll.u32 %v71_v57, 16  ;;  %v17414_v53 = vld [vmem:[%s23628_s0 + $0xe8] sm:$0xf] }
  0x41   :  { %v497_v14 = vor.u32 %v496_v3, %v493_v0  ;;  %v506_v15 = vrot.slane %v504_v5, 4  ;;  %v515_v18 = vshrl.u32 %v72_v1, 16  ;;  %v518_v19 = vshll.u32 %v72_v1, 16  ;;  %v86_v3 = vld [vmem:[%s23628_s0 + $0xec] sm:$0xf] }
  0x42   :  { %14237 = vmatmul.mubr.bf16.gmra.mrb[16].mxu0 %v17330_v63  ;;  %23998 = vst [vmem:[#allocation15_spill] sm:$0xff] %v17382_v9  ;;  %v489_v20 = vsel %vm17138_vm2, %v484_v11, %v488_v62  ;;  %v512_v21 = vrot.slane %v510_v13, 5  ;;  %v524_v22 = vshll.u32 %v73_v8, 16  ;;  %v528_v23 = vshrl.u32 %v73_v8, 16  ;;  %v17429_v8 = vld [vmem:[%s23628_s0 + $0xf0] sm:$0xf] }
  0x43   :  { %14240 = vmatprep.mubr.bf16.mxu0 %v17344_v16  ;;  %v17394_v26 = vcombine.low %v479_v10, %v489_v20  ;;  %v498_v27 = vrot.slane %v497_v14, 4  ;;  %v507_v30 = vor.u32 %v506_v15, %v502_v4  ;;  %v517_v31 = vrot.slane %v515_v18, 4  ;;  %v17436_v15 = vld [vmem:[%s23628_s0 + $0xf4] sm:$0xf] }
  0x44   :  { %v520_v33 = vrot.slane %v518_v19, 5  ;;  %v526_v34 = vrot.slane %v524_v22, 5  ;;  %v530_v36 = vrot.slane %v528_v23, 4  ;;  %v534_v37 = vshll.u32 %v74_v17, 16 }
  0x45   :  { %23999 = vst [vmem:[#allocation16_spill] sm:$0xff] %v17394_v26  ;;  %v503_v39 = vsel %vm17138_vm2, %v498_v27, %v502_v4  ;;  %v508_v40 = vrot.slane %v507_v30, 4  ;;  %v539_v41 = vshrl.u32 %v81_v24, 16  ;;  %v542_v42 = vshll.u32 %v81_v24, 16  ;;  %v89_v24 = vld [vmem:[%s23628_s0 + $0xf8] sm:$0xf] }
  0x46   :  { %v521_v44 = vor.u32 %v520_v33, %v517_v31  ;;  %v531_v46 = vor.u32 %v530_v36, %v526_v34  ;;  %v536_v47 = vrot.slane %v534_v37, 5  ;;  %v548_v48 = vshll.u32 %v82_v32, 16 }
  0x47   :  { %v513_v49 = vsel %vm17138_vm2, %v508_v40, %v512_v21  ;;  %v541_v50 = vrot.slane %v539_v41, 4  ;;  %v544_v51 = vrot.slane %v542_v42, 5  ;;  %v552_v52 = vshrl.u32 %v82_v32, 16 }
  0x48   :  { %v17416_v56 = vcombine.low %v503_v39, %v513_v49  ;;  %v522_v57 = vrot.slane %v521_v44, 4  ;;  %v532_v58 = vrot.slane %v531_v46, 4  ;;  %v550_v59 = vrot.slane %v548_v48, 5  ;;  %v17460_v44 = vld [vmem:[%s23628_s0 + $0x100] sm:$0xf] }
  0x49   :  { %v545_v60 = vor.u32 %v544_v51, %v541_v50  ;;  %v554_v61 = vrot.slane %v552_v52, 4  ;;  %v558_v62 = vshll.u32 %v83_v38, 16  ;;  %v563_v0 = vshrl.u32 %v84_v43, 16 }
  0x4a   :  { %14241 = vmatmul.mubr.bf16.gmra.mrb[20].mxu0 %v17365_v45  ;;  %24000 = vst [vmem:[#allocation17_spill] sm:$0xff] %v17416_v56  ;;  %v527_v1 = vsel %vm17138_vm2, %v522_v57, %v526_v34  ;;  %v537_v2 = vsel %vm17138_vm2, %v532_v58, %v536_v47  ;;  %v566_v4 = vshll.u32 %v84_v43, 16  ;;  %v572_v5 = vshll.u32 %v17414_v53, 16  ;;  %v17452_v34 = vld [vmem:[%s23628_s0 + $0xfc] sm:$0xf] }
  0x4b   :  { %14244 = vmatprep.mubr.bf16.mxu0 %v17382_v9  ;;  %v17431_v10 = vcombine.low %v527_v1, %v537_v2  ;;  %v546_v11 = vrot.slane %v545_v60, 4  ;;  %v555_v13 = vor.u32 %v554_v61, %v550_v59  ;;  %v560_v14 = vrot.slane %v558_v62, 5  ;;  %v92_v57 = vld [vmem:[%s23628_s0 + $0x104] sm:$0xf]  ;;  %v17478_v1 = vld [vmem:[%s23628_s0 + $0x10c] sm:$0xf] }
  0x4c   :  { %v565_v17 = vrot.slane %v563_v0, 4  ;;  %v568_v18 = vrot.slane %v566_v4, 5  ;;  %v574_v19 = vrot.slane %v572_v5, 5  ;;  %v576_v20 = vshrl.u32 %v17414_v53, 16 }
  0x4d   :  { %24001 = vst [vmem:[#allocation18_spill] sm:$0xff] %v17431_v10  ;;  %v551_v21 = vsel %vm17138_vm2, %v546_v11, %v550_v59  ;;  %v556_v22 = vrot.slane %v555_v13, 4  ;;  %v582_v23 = vshll.u32 %v86_v3, 16  ;;  %v587_v27 = vshrl.u32 %v17429_v8, 16  ;;  %v17472_v59 = vld [vmem:[%s23628_s0 + $0x108] sm:$0xf] }
  0x4e   :  { %v569_v30 = vor.u32 %v568_v18, %v565_v17  ;;  %v578_v31 = vrot.slane %v576_v20, 4  ;;  %v590_v32 = vshll.u32 %v17429_v8, 16  ;;  %v596_v33 = vshll.u32 %v17436_v15, 16  ;;  %v95_v11 = vld [vmem:[%s23628_s0 + $0x110] sm:$0xf] }
  0x4f   :  { %v561_v36 = vsel %vm17138_vm2, %v556_v22, %v560_v14  ;;  %v584_v37 = vrot.slane %v582_v23, 5  ;;  %v589_v38 = vrot.slane %v587_v27, 4  ;;  %v600_v39 = vshrl.u32 %v17436_v15, 16 }
  0x50   :  { %v12730_v40 = vcombine.low %v551_v21, %v561_v36  ;;  %v570_v41 = vrot.slane %v569_v30, 4  ;;  %v579_v42 = vor.u32 %v578_v31, %v574_v19  ;;  %v592_v43 = vrot.slane %v590_v32, 5 }
  0x51   :  { %v598_v46 = vrot.slane %v596_v33, 5  ;;  %v602_v47 = vrot.slane %v600_v39, 4  ;;  %v606_v48 = vshll.u32 %v89_v24, 16  ;;  %v611_v49 = vshrl.u32 %v17452_v34, 16  ;;  %v17500_v24 = vld [vmem:[%s23628_s0 + $0x118] sm:$0xf] }
  0x52   :  { %14245 = vmatmul.mubr.bf16.gmra.mrb[24].mxu0 %v17394_v26  ;;  %v575_v50 = vsel %vm17138_vm2, %v570_v41, %v574_v19  ;;  %v580_v51 = vrot.slane %v579_v42, 4  ;;  %v593_v52 = vor.u32 %v592_v43, %v589_v38  ;;  %v614_v58 = vshll.u32 %v17452_v34, 16  ;;  %v17492_v19 = vld [vmem:[%s23628_s0 + $0x114] sm:$0xf]  ;;  %v98_v43 = vld [vmem:[%s23628_s0 + $0x11c] sm:$0xf] }
  0x53   :  { %14248 = vmatprep.mubr.bf16.mxu0 %v17416_v56  ;;  %v603_v60 = vor.u32 %v602_v47, %v598_v46  ;;  %v608_v61 = vrot.slane %v606_v48, 5  ;;  %v613_v62 = vrot.slane %v611_v49, 4  ;;  %v620_v0 = vshll.u32 %v17460_v44, 16 }
  0x54   :  { %v585_v2 = vsel %vm17138_vm2, %v580_v51, %v584_v37  ;;  %v594_v3 = vrot.slane %v593_v52, 4  ;;  %v616_v4 = vrot.slane %v614_v58, 5  ;;  %v624_v5 = vshrl.u32 %v17460_v44, 16  ;;  %v17524_v51 = vld [vmem:[%s23628_s0 + $0x124] sm:$0xf] }
  0x55   :  { %v17487_v13 = vcombine.low %v575_v50, %v585_v2  ;;  %v604_v14 = vrot.slane %v603_v60, 4  ;;  %v622_v17 = vrot.slane %v620_v0, 5  ;;  %v630_v18 = vshll.u32 %v92_v57, 16 }
  0x56   :  { %v599_v20 = vsel %vm17138_vm2, %v594_v3, %v598_v46  ;;  %v617_v21 = vor.u32 %v616_v4, %v613_v62  ;;  %v626_v22 = vrot.slane %v624_v5, 4  ;;  %v635_v23 = vshrl.u32 %v17472_v59, 16  ;;  %v17515_v46 = vld [vmem:[%s23628_s0 + $0x120] sm:$0xf] }
  0x57   :  { %24002 = vst [vmem:[#allocation19_spill] sm:$0xff] %v17487_v13  ;;  %v609_v27 = vsel %vm17138_vm2, %v604_v14, %v608_v61  ;;  %v632_v30 = vrot.slane %v630_v18, 5  ;;  %v638_v31 = vshll.u32 %v17472_v59, 16  ;;  %v644_v32 = vshll.u32 %v17478_v1, 16  ;;  %v101_v14 = vld [vmem:[%s23628_s0 + $0x128] sm:$0xf] }
  0x58   :  { %v17506_v33 = vcombine.low %v599_v20, %v609_v27  ;;  %v618_v36 = vrot.slane %v617_v21, 4  ;;  %v627_v37 = vor.u32 %v626_v22, %v622_v17  ;;  %v637_v38 = vrot.slane %v635_v23, 4  ;;  %v17541_v22 = vld [vmem:[%s23628_s0 + $0x12c] sm:$0xf] }
  0x59   :  { %v640_v39 = vrot.slane %v638_v31, 5  ;;  %v648_v41 = vshrl.u32 %v17478_v1, 16  ;;  %v654_v42 = vshll.u32 %v95_v11, 16  ;;  %v659_v49 = vshrl.u32 %v17492_v19, 16 }
  0x5a   :  { %14249 = vmatmul.mubr.bf16.gmra.mrb[28].mxu0 %v17431_v10  ;;  %24003 = vst [vmem:[#allocation20_spill] sm:$0xff] %v17506_v33  ;;  %v623_v47 = vsel %vm17138_vm2, %v618_v36, %v622_v17  ;;  %v628_v48 = vrot.slane %v627_v37, 4  ;;  %v662_v50 = vshll.u32 %v17492_v19, 16  ;;  %v668_v60 = vshll.u32 %v17500_v24, 16 }
  0x5b   :  { %14252 = vmatprep.mubr.bf16.mxu0 %v12730_v40  ;;  %v646_v40 = vrot.slane %v644_v32, 5  ;;  %v641_v52 = vor.u32 %v640_v39, %v637_v38  ;;  %v650_v57 = vrot.slane %v648_v41, 4  ;;  %v656_v58 = vrot.slane %v654_v42, 5  ;;  %v17550_v32 = vld [vmem:[%s23628_s0 + $0x130] sm:$0xf] }
  0x5c   :  { %v633_v61 = vsel %vm17138_vm2, %v628_v48, %v632_v30  ;;  %v661_v62 = vrot.slane %v659_v49, 4  ;;  %v664_v0 = vrot.slane %v662_v50, 5  ;;  %v672_v2 = vshrl.u32 %v17500_v24, 16 }
  0x5d   :  { %v17532_v3 = vcombine.low %v623_v47, %v633_v61  ;;  %v642_v4 = vrot.slane %v641_v52, 4  ;;  %v651_v5 = vor.u32 %v650_v57, %v646_v40  ;;  %v670_v11 = vrot.slane %v668_v60, 5  ;;  %v104_v47 = vld [vmem:[%s23628_s0 + $0x134] sm:$0xf]  ;;  %v17565_v57 = vld [vmem:[%s23628_s0 + $0x138] sm:$0xf] }
  0x5e   :  { %v665_v17 = vor.u32 %v664_v0, %v661_v62  ;;  %v674_v18 = vrot.slane %v672_v2, 4  ;;  %v678_v20 = vshll.u32 %v98_v43, 16  ;;  %v683_v21 = vshrl.u32 %v17515_v46, 16  ;;  %v17572_v0 = vld [vmem:[%s23628_s0 + $0x13c] sm:$0xf] }
  0x5f   :  { %24004 = vst [vmem:[#allocation21_spill] sm:$0xff] %v17532_v3  ;;  %v647_v23 = vsel %vm17138_vm2, %v642_v4, %v646_v40  ;;  %v652_v27 = vrot.slane %v651_v5, 4  ;;  %v686_v30 = vshll.u32 %v17515_v46, 16  ;;  %v692_v31 = vshll.u32 %v17524_v51, 16 }
  0x60   :  { %v666_v36 = vrot.slane %v665_v17, 4  ;;  %v675_v37 = vor.u32 %v674_v18, %v670_v11  ;;  %v680_v38 = vrot.slane %v678_v20, 5  ;;  %v685_v39 = vrot.slane %v683_v21, 4 }
  0x61   :  { %v657_v41 = vsel %vm17138_vm2, %v652_v27, %v656_v58  ;;  %v688_v42 = vrot.slane %v686_v30, 5  ;;  %v694_v43 = vrot.slane %v692_v31, 5  ;;  %v696_v40 = vshrl.u32 %v17524_v51, 16  ;;  %v107_v31 = vld [vmem:[%s23628_s0 + $0x140] sm:$0xf] }
  0x62   :  { %14253 = vmatmul.mubr.bf16.gmra.mrb[32].mxu0 %v17487_v13  ;;  %v17558_v48 = vcombine.low %v647_v23, %v657_v41  ;;  %v671_v49 = vsel %vm17138_vm2, %v666_v36, %v670_v11  ;;  %v676_v50 = vrot.slane %v675_v37, 4  ;;  %v702_v52 = vshll.u32 %v101_v14, 16  ;;  %v17588_v36 = vld [vmem:[%s23628_s0 + $0x144] sm:$0xf] }
  0x63   :  { %14256 = vmatprep.mubr.bf16.mxu0 %v17506_v33  ;;  %v689_v58 = vor.u32 %v688_v42, %v685_v39  ;;  %v698_v60 = vrot.slane %v696_v40, 4  ;;  %v707_v61 = vshrl.u32 %v17541_v22, 16  ;;  %v710_v62 = vshll.u32 %v17541_v22, 16  ;;  %v17597_v42 = vld [vmem:[%s23628_s0 + $0x148] sm:$0xf] }
  0x64   :  { %24005 = vst [vmem:[#allocation22_spill] sm:$0xff] %v17558_v48  ;;  %v681_v2 = vsel %vm17138_vm2, %v676_v50, %v680_v38  ;;  %v704_v4 = vrot.slane %v702_v52, 5  ;;  %v716_v5 = vshll.u32 %v17550_v32, 16  ;;  %v720_v11 = vshrl.u32 %v17550_v32, 16 }
  0x65   :  { %v17580_v14 = vcombine.low %v671_v49, %v681_v2  ;;  %v690_v17 = vrot.slane %v689_v58, 4  ;;  %v699_v18 = vor.u32 %v698_v60, %v694_v43  ;;  %v709_v20 = vrot.slane %v707_v61, 4 }
  0x66   :  { %v712_v21 = vrot.slane %v710_v62, 5  ;;  %v718_v23 = vrot.slane %v716_v5, 5  ;;  %v722_v27 = vrot.slane %v720_v11, 4  ;;  %v726_v30 = vshll.u32 %v104_v47, 16  ;;  %v110_v11 = vld [vmem:[%s23628_s0 + $0x14c] sm:$0xf] }
  0x67   :  { %24006 = vst [vmem:[#allocation23_spill] sm:$0xff] %v17580_v14  ;;  %v695_v37 = vsel %vm17138_vm2, %v690_v17, %v694_v43  ;;  %v700_v38 = vrot.slane %v699_v18, 4  ;;  %v731_v39 = vshrl.u32 %v17565_v57, 16  ;;  %v734_v41 = vshll.u32 %v17565_v57, 16  ;;  %v17611_v17 = vld [vmem:[%s23628_s0 + $0x150] sm:$0xf] }
  0x68   :  { %v713_v40 = vor.u32 %v712_v21, %v709_v20  ;;  %v723_v47 = vor.u32 %v722_v27, %v718_v23  ;;  %v728_v49 = vrot.slane %v726_v30, 5  ;;  %v740_v50 = vshll.u32 %v17572_v0, 16 }
  0x69   :  { %v705_v52 = vsel %vm17138_vm2, %v700_v38, %v704_v4  ;;  %v733_v58 = vrot.slane %v731_v39, 4  ;;  %v736_v43 = vrot.slane %v734_v41, 5  ;;  %v744_v60 = vshrl.u32 %v17572_v0, 16  ;;  %v17624_v39 = vld [vmem:[%s23628_s0 + $0x154] sm:$0xf] }
  0x6a   :  { %14257 = vmatmul.mubr.bf16.gmra.mrb[36].mxu0 %v17532_v3  ;;  %v17603_v61 = vcombine.low %v695_v37, %v705_v52  ;;  %v714_v62 = vrot.slane %v713_v40, 4  ;;  %v724_v2 = vrot.slane %v723_v47, 4  ;;  %v742_v5 = vrot.slane %v740_v50, 5 }
  0x6b   :  { %14260 = vmatprep.mubr.bf16.mxu0 %v17558_v48  ;;  %v737_v18 = vor.u32 %v736_v43, %v733_v58  ;;  %v746_v4 = vrot.slane %v744_v60, 4  ;;  %v750_v20 = vshll.u32 %v107_v31, 16  ;;  %v755_v21 = vshrl.u32 %v17588_v36, 16  ;;  %v113_v58 = vld [vmem:[%s23628_s0 + $0x158] sm:$0xf] }
  0x6c   :  { %24007 = vst [vmem:[#allocation24_spill] sm:$0xff] %v17603_v61  ;;  %v719_v27 = vsel %vm17138_vm2, %v714_v62, %v718_v23  ;;  %v729_v30 = vsel %vm17138_vm2, %v724_v2, %v728_v49  ;;  %v758_v37 = vshll.u32 %v17588_v36, 16  ;;  %v764_v38 = vshll.u32 %v17597_v42, 16  ;;  %v17636_v43 = vld [vmem:[%s23628_s0 + $0x15c] sm:$0xf] }
  0x6d   :  { %v17627_v31 = vcombine.low %v719_v27, %v729_v30  ;;  %v738_v41 = vrot.slane %v737_v18, 4  ;;  %v747_v40 = vor.u32 %v746_v4, %v742_v5  ;;  %v752_v47 = vrot.slane %v750_v20, 5  ;;  %v17646_v30 = vld [vmem:[%s23628_s0 + $0x160] sm:$0xf] }
  0x6e   :  { %v757_v23 = vrot.slane %v755_v21, 4  ;;  %v760_v50 = vrot.slane %v758_v37, 5  ;;  %v766_v52 = vrot.slane %v764_v38, 5  ;;  %v768_v49 = vshrl.u32 %v17597_v42, 16 }
  0x6f   :  { %24008 = vst [vmem:[#allocation25_spill] sm:$0xff] %v17627_v31  ;;  %v743_v60 = vsel %vm17138_vm2, %v738_v41, %v742_v5  ;;  %v748_v62 = vrot.slane %v747_v40, 4  ;;  %v774_v2 = vshll.u32 %v110_v11, 16  ;;  %v779_v18 = vshrl.u32 %v17611_v17, 16 }
  0x70   :  { %v761_v4 = vor.u32 %v760_v50, %v757_v23  ;;  %v770_v20 = vrot.slane %v768_v49, 4  ;;  %v782_v21 = vshll.u32 %v17611_v17, 16  ;;  %v788_v27 = vshll.u32 %v17624_v39, 16  ;;  %v116_v49 = vld [vmem:[%s23628_s0 + $0x164] sm:$0xf] }
  0x71   :  { %v753_v37 = vsel %vm17138_vm2, %v748_v62, %v752_v47  ;;  %v776_v38 = vrot.slane %v774_v2, 5  ;;  %v781_v5 = vrot.slane %v779_v18, 4  ;;  %v792_v11 = vshrl.u32 %v17624_v39, 16  ;;  %v17660_v47 = vld [vmem:[%s23628_s0 + $0x168] sm:$0xf] }
  0x72   :  { %14261 = vmatmul.mubr.bf16.gmra.mrb[40].mxu0 %v17580_v14  ;;  %v17651_v41 = vcombine.low %v743_v60, %v753_v37  ;;  %v762_v40 = vrot.slane %v761_v4, 4  ;;  %v771_v23 = vor.u32 %v770_v20, %v766_v52  ;;  %v784_v50 = vrot.slane %v782_v21, 5 }
  0x73   :  { %14264 = vmatprep.mubr.bf16.mxu0 %v17603_v61  ;;  %v790_v61 = vrot.slane %v788_v27, 5  ;;  %v794_v14 = vrot.slane %v792_v11, 4  ;;  %v798_v48 = vshll.u32 %v113_v58, 16  ;;  %v803_v3 = vshrl.u32 %v17636_v43, 16  ;;  %v17669_v58 = vld [vmem:[%s23628_s0 + $0x16c] sm:$0xf] }
  0x74   :  { %24009 = vst [vmem:[#allocation26_spill] sm:$0xff] %v17651_v41  ;;  %v767_v60 = vsel %vm17138_vm2, %v762_v40, %v766_v52  ;;  %v772_v62 = vrot.slane %v771_v23, 4  ;;  %v785_v2 = vor.u32 %v784_v50, %v781_v5  ;;  %v806_v18 = vshll.u32 %v17636_v43, 16  ;;  %v17679_v40 = vld [vmem:[%s23628_s0 + $0x170] sm:$0xf] }
  0x75   :  { %v795_v4 = vor.u32 %v794_v14, %v790_v61  ;;  %v800_v20 = vrot.slane %v798_v48, 5  ;;  %v805_v21 = vrot.slane %v803_v3, 4  ;;  %v812_v27 = vshll.u32 %v17646_v30, 16  ;;  %24010 = vst [vmem:[#allocation27_spill] sm:$0xff] %v17679_v40  ;;  %v17686_v3 = vld [vmem:[%s23628_s0 + $0x174] sm:$0xf] }
  0x76   :  { %v777_v37 = vsel %vm17138_vm2, %v772_v62, %v776_v38  ;;  %v786_v52 = vrot.slane %v785_v2, 4  ;;  %v808_v11 = vrot.slane %v806_v18, 5  ;;  %v816_v5 = vshrl.u32 %v17646_v30, 16 }
  0x77   :  { %v17681_v23 = vcombine.low %v767_v60, %v777_v37  ;;  %v796_v50 = vrot.slane %v795_v4, 4  ;;  %v814_v14 = vrot.slane %v812_v27, 5  ;;  %v822_v48 = vshll.u32 %v116_v49, 16  ;;  %v17694_v60 = vld [vmem:[%s23628_s0 + $0x178] sm:$0xf] }
  0x78   :  { %v791_v38 = vsel %vm17138_vm2, %v786_v52, %v790_v61  ;;  %v809_v62 = vor.u32 %v808_v11, %v805_v21  ;;  %v818_v2 = vrot.slane %v816_v5, 4  ;;  %v827_v18 = vshrl.u32 %v17660_v47, 16 }
  0x79   :  { %24011 = vst [vmem:[#allocation28_spill] sm:$0xff] %v17681_v23  ;;  %v801_v49 = vsel %vm17138_vm2, %v796_v50, %v800_v20  ;;  %v824_v4 = vrot.slane %v822_v48, 5  ;;  %v830_v27 = vshll.u32 %v17660_v47, 16  ;;  %v836_v37 = vshll.u32 %v17669_v58, 16  ;;  %v17707_v20 = vld [vmem:[%s23628_s0 + $0x17c] sm:$0xf] }
  0x7a   :  { %14265 = vmatmul.mubr.bf16.gmra.mrb[44].mxu0 %v17627_v31  ;;  %v810_v61 = vrot.slane %v809_v62, 4  ;;  %v819_v21 = vor.u32 %v818_v2, %v814_v14  ;;  %v829_v52 = vrot.slane %v827_v18, 4  ;;  %v840_v31 = vshrl.u32 %v17669_v58, 16  ;;  %24013 = vst [vmem:[#allocation30_spill] sm:$0xff] %v17707_v20  ;;  %v17712_v50 = vld [vmem:[%s23628_s0 + $0x180] sm:$0xf] }
  0x7b   :  { %14268 = vmatprep.mubr.bf16.mxu0 %v17651_v41  ;;  %v17700_v41 = vcombine.low %v791_v38, %v801_v49  ;;  %v832_v11 = vrot.slane %v830_v27, 5  ;;  %v838_v5 = vrot.slane %v836_v37, 5  ;;  %v846_v33 = vshll.u32 %v17679_v40, 16  ;;  %v17722_v18 = vld [vmem:[%s23628_s0 + $0x184] sm:$0xf] }
  0x7c   :  { %v815_v48 = vsel %vm17138_vm2, %v810_v61, %v814_v14  ;;  %v820_v38 = vrot.slane %v819_v21, 4  ;;  %v851_v62 = vshrl.u32 %v17686_v3, 16  ;;  %v854_v2 = vshll.u32 %v17686_v3, 16  ;;  %v18051_v40 = vld [vmem:[%s23628_s0 + $0xb8] sm:$0xf] }
  0x7d   :  { %24012 = vst [vmem:[#allocation29_spill] sm:$0xff] %v17700_v41  ;;  %v833_v49 = vor.u32 %v832_v11, %v829_v52  ;;  %v842_v27 = vrot.slane %v840_v31, 4  ;;  %v848_v37 = vrot.slane %v846_v33, 5  ;;  %v864_v13 = vshrl.u32 %v17694_v60, 16  ;;  %v17734_v52 = vld [vmem:[%s23628_s0 + $0x188] sm:$0xf] }
  0x7e   :  { %v825_v14 = vsel %vm17138_vm2, %v820_v38, %v824_v4  ;;  %v853_v61 = vrot.slane %v851_v62, 4  ;;  %v856_v21 = vrot.slane %v854_v2, 5  ;;  %24015 = vst [vmem:[#allocation32_spill] sm:$0xff] %v17734_v52  ;;  %v870_v11 = vshll.u32 %v17707_v20, 16  ;;  %v17741_v38 = vld [vmem:[%s23628_s0 + $0x18c] sm:$0xf] }
  0x7f   :  { %v17729_v10 = vcombine.low %v815_v48, %v825_v14  ;;  %v834_v56 = vrot.slane %v833_v49, 4  ;;  %v843_v26 = vor.u32 %v842_v27, %v838_v5  ;;  %v866_v31 = vrot.slane %v864_v13, 4  ;;  %v17750_v13 = vld [vmem:[%s23628_s0 + $0x190] sm:$0xf]  ;;  %v18046_v20 = vld [vmem:[%s23628_s0 + $0xb4] sm:$0xf] }
  0x80   :  { %v857_v33 = vor.u32 %v856_v21, %v853_v61  ;;  %v875_v4 = vshrl.u32 %v17712_v50, 16  ;;  %v878_v62 = vshll.u32 %v17712_v50, 16  ;;  %v884_v2 = vshll.u32 %v17722_v18, 16  ;;  %24038 = vst [vmem:[#allocation55_spill] sm:$0xff] %v18046_v20  ;;  %24039 = vst [vmem:[#allocation56_spill] sm:$0xff] %v18051_v40 }
  0x81   :  { %24014 = vst [vmem:[#allocation31_spill] sm:$0xff] %v17729_v10  ;;  %v839_v48 = vsel %vm17138_vm2, %v834_v56, %v838_v5  ;;  %v872_v14 = vrot.slane %v870_v11, 5  ;;  %v17758_v56 = vld [vmem:[%s23628_s0 + $0x194] sm:$0xf]  ;;  %v894_v11 = vshll.u32 %v17734_v52, 16 }
  0x82   :  { %14269 = vmatmul.mubr.bf16.gmra.mrb[48].mxu0 %v17681_v23  ;;  %v860_v23 = vshll.u32 %v17694_v60, 16  ;;  %v858_v49 = vrot.slane %v857_v33, 4  ;;  %v877_v61 = vrot.slane %v875_v4, 4  ;;  %v886_v45 = vrot.slane %v884_v2, 5  ;;  %24016 = vst [vmem:[#allocation33_spill] sm:$0xff] %v17758_v56 }
  0x83   :  { %14272 = vmatprep.mubr.bf16.mxu0 %v17700_v41  ;;  %v880_v41 = vrot.slane %v878_v62, 5  ;;  %v902_v62 = vshll.u32 %v17741_v38, 16  ;;  %v918_v63 = vshll.u32 %v17758_v56, 16  ;;  %vm6228_vm7 = vsmask.f32 256 }
  0x84   :  { %v862_v9 = vrot.slane %v860_v23, 5  ;;  %v844_v23 = vrot.slane %v843_v26, 4  ;;  %v888_v26 = vshrl.u32 %v17722_v18, 16  ;;  %vm19778_vm8 = vmand %vm6227_vm6, %vm6228_vm7 }
  0x86   :  { %v867_v27 = vor.u32 %v866_v31, %v862_v9  ;;  %v849_v21 = vsel %vm17138_vm2, %v844_v23, %v848_v37  ;;  %v863_v33 = vsel %vm17138_vm2, %v858_v49, %v862_v9  ;;  %v881_v37 = vor.u32 %v880_v41, %v877_v61 }
  0x87   :  { %v17761_v5 = vcombine.low %v839_v48, %v849_v21  ;;  %v890_v4 = vrot.slane %v888_v26, 4  ;;  %v899_v23 = vshrl.u32 %v17741_v38, 16  ;;  %v908_v48 = vshll.u32 %v17750_v13, 16 }
  0x88   :  { %v868_v31 = vrot.slane %v867_v27, 4  ;;  %v912_v21 = vshrl.u32 %v17750_v13, 16  ;;  %v882_v49 = vrot.slane %v881_v37, 4  ;;  %v904_v61 = vrot.slane %v902_v62, 5 }
  0x89   :  { %24017 = vst [vmem:[#allocation34_spill] sm:$0xff] %v17761_v5  ;;  %v891_v27 = vor.u32 %v890_v4, %v886_v45  ;;  %v901_v41 = vrot.slane %v899_v23, 4  ;;  %v910_v26 = vrot.slane %v908_v48, 5  ;;  %v17823_v48 = vld [vmem:[%s23628_s0 + $0x18] sm:$0xf] }
  0x8a   :  { %14273 = vmatmul.mubr.bf16.gmra.mrb[52].mxu0 %v17729_v10  ;;  %v873_v2 = vsel %vm17138_vm2, %v868_v31, %v872_v14  ;;  %v896_v10 = vrot.slane %v894_v11, 5  ;;  %v914_v16 = vrot.slane %v912_v21, 4  ;;  %v920_v11 = vrot.slane %v918_v63, 5  ;;  %v17828_v21 = vld [vmem:[%s23628_s0 + $0x1c] sm:$0xf] }
  0x8b   :  { %14276 = vmatprep.mubr.bf16.mxu0 %v17761_v5  ;;  %v17773_v9 = vcombine.low %v863_v33, %v873_v2  ;;  %v887_v5 = vsel %vm17138_vm2, %v882_v49, %v886_v45  ;;  %v892_v35 = vrot.slane %v891_v27, 4  ;;  %v905_v14 = vor.u32 %v904_v61, %v901_v41  ;;  %v16692_v2 = vld [vmem:[%s23627_s1 + $0x88] sm:$0xff]   ;;  %v16895_v27 = vld [vmem:[%s23627_s1 + $0x80] sm:$0xff]   ;;  %v16697_v41 = vld [vmem:[%s23627_s1 + $0x90] sm:$0xff]  }
  0x8c   :  { %v915_v31 = vor.u32 %v914_v16, %v910_v26  ;;  %v17806_v16 = vld [vmem:[%s23628_s0 + $0xc] sm:$0xf]  ;;  %v17832_v49 = vcombine.low %v17823_v48, %v17828_v21  ;;  %v17845_v61 = vld [vmem:[%s23628_s0 + $0x24] sm:$0xf] }
  0x8d   :  { %24018 = vst [vmem:[#allocation35_spill] sm:$0xff] %v17773_v9  ;;  %v897_v7 = vsel %vm17138_vm2, %v892_v35, %v896_v10  ;;  %v906_v37 = vrot.slane %v905_v14, 4  ;;  %v17793_v35 = vld [vmem:[%s23628_s0] sm:$0xf]  ;;  %v17811_v10 = vld [vmem:[%s23628_s0 + $0x10] sm:$0xf] }
  0x8e   :  { %v17781_v33 = vcombine.low %v887_v5, %v897_v7  ;;  %v916_v4 = vrot.slane %v915_v31, 4  ;;  %v17798_v7 = vld [vmem:[%s23628_s0 + $0x4] sm:$0xf]  ;;  %v17815_v5 = vcombine.low %v17806_v16, %v17811_v10  ;;  %24022 = vst [vmem:[#allocation39_spill] sm:$0xff] %v17832_v49  ;;  %v17859_v31 = vld [vmem:[%s23628_s0 + $0x30] sm:$0xf] }
  0x8f   :  { %v911_v23 = vsel %vm17138_vm2, %v906_v37, %v910_v26  ;;  %v12754_v63 = vcombine.low %v17793_v35, %v17798_v7  ;;  %v17850_v26 = vld [vmem:[%s23628_s0 + $0x28] sm:$0xf] }
  0x90   :  { %24019 = vst [vmem:[#allocation36_spill] sm:$0xff] %v17781_v33  ;;  %v921_v45 = vsel %vm17138_vm2, %v916_v4, %v920_v11  ;;  %24021 = vst [vmem:[#allocation38_spill] sm:$0xff] %v17815_v5  ;;  %v17854_v14 = vcombine.low %v17845_v61, %v17850_v26  ;;  %v17864_v11 = vld [vmem:[%s23628_s0 + $0x34] sm:$0xf]  ;;  %v16702_v4 = vld [vmem:[%s23627_s1 + $0x98] sm:$0xff]  }
  0x91   :  { %v17788_v62 = vcombine.low %v911_v23, %v921_v45  ;;  %v17868_v37 = vcombine.low %v17859_v31, %v17864_v11  ;;  %v16707_v23 = vld [vmem:[%s23627_s1 + $0xa0] sm:$0xff]   ;;  %v17881_v45 = vld [vmem:[%s23628_s0 + $0x3c] sm:$0xf] }
  0x92   :  { %14277 = vmatmul.mubr.bf16.gmra.mrb[56].mxu0 %v17773_v9  ;;  %24023 = vst [vmem:[#allocation40_spill] sm:$0xff] %v17854_v14  ;;  %v16717_v9 = vld [vmem:[%s23627_s1 + $0xb0] sm:$0xff]  }
  0x93   :  { %14280 = vmatprep.mubr.bf16.mxu0 %v17781_v33  ;;  %24020 = vst [vmem:[#allocation37_spill] sm:$0xff] %v17788_v62  ;;  %24024 = vst [vmem:[#allocation41_spill] sm:$0xff] %v17868_v37  ;;  %v16712_v33 = vld [vmem:[%s23627_s1 + $0xa8] sm:$0xff]  }
  0x9a   :  { %14281 = vmatmul.mubr.bf16.gmra.mrb[60].mxu0 %v17788_v62 }
  0x9b   :  { %14300 = vmatprep.mubr.bf16.mxu0 %v12754_v63  ;;  %v17886_v63 = vld [vmem:[%s23628_s0 + $0x40] sm:$0xf] }
  0xa2   :  { %14301 = vmatmul.mubr.bf16.vlgmr.msra.gmra.mrb[0].mxu0 %v17815_v5  ;;  %v18021_v5 = vld [vmem:[%s23628_s0 + $0xa0] sm:$0xf] }
  0xa3   :  { %14365 = vmatpush3.bf16.msra.mxu0 %v16895_v27  ;;  %14304 = vmatprep.mubr.bf16.mxu0 %v17832_v49  ;;  %v17895_v27 = vld [vmem:[%s23628_s0 + $0x48] sm:$0xf]  ;;  %v18016_v49 = vld [vmem:[%s23628_s0 + $0x9c] sm:$0xf] }
  0xa4   :  { %14366 = vmatprep.subr.bf16.mxu0 %v16692_v2  ;;  %24033 = vst [vmem:[#allocation50_spill] sm:$0xff] %v18016_v49  ;;  %v18025_v56 = vcombine.low %v18016_v49, %v18021_v5  ;;  %v18055_v49 = vcombine.low %v18046_v20, %v18051_v40  ;;  %v18073_v20 = vld [vmem:[%s23628_s0 + $0xe4] sm:$0xf] }
  0xa5   :  { %v18077_v40 = vcombine.low %v18073_v20, %v17414_v53  ;;  %v18097_v53 = vcombine.low %v17492_v19, %v17500_v24  ;;  %v18131_v19 = vcombine.low %v17660_v47, %v17669_v58  ;;  %v1970_v24 = vrot.slane %v17798_v7, 5  ;;  %v16926_v47 = vld [vmem:[%s23628_s0 + $0x14] sm:$0xf] }
  0xa6   :  { %24034 = vst [vmem:[#allocation51_spill] sm:$0xff] %v18025_v56  ;;  %24040 = vst [vmem:[#allocation57_spill] sm:$0xff] %v18055_v49  ;;  %v1980_v58 = vrot.slane %v16926_v47, 5 }
  0xa7   :  { %14367 = vmatpush3.bf16.msra.mxu0 %v16692_v2  ;;  %v17890_v2 = vcombine.low %v17881_v45, %v17886_v63  ;;  %24044 = vst [vmem:[#allocation61_spill] sm:$0xff] %v18097_v53  ;;  %24051 = vst [vmem:[#allocation68_spill] sm:$0xff] %v18131_v19 }
  0xa8   :  { %14368 = vmatprep.subr.bf16.mxu0 %v16697_v41 }
  0xa9   :  { %24025 = vst [vmem:[#allocation42_spill] sm:$0xff] %v17890_v2 }
  0xaa   :  { %14305 = vmatmul.mubr.bf16.gmra.mrb[4].mxu0 %v17854_v14 }
  0xab   :  { %14308 = vmatprep.mubr.bf16.mxu0 %v17868_v37  ;;  %14369 = vmatpush3.bf16.msra.mxu0 %v16697_v41  ;;  %v17900_v41 = vld [vmem:[%s23628_s0 + $0x4c] sm:$0xf]  ;;  %v17991_v37 = vld [vmem:[%s23628_s0 + $0x88] sm:$0xf] }
  0xac   :  { %14370 = vmatprep.subr.bf16.mxu0 %v16702_v4  ;;  %v17904_v62 = vcombine.low %v17895_v27, %v17900_v41 }
  0xae   :  { %24026 = vst [vmem:[#allocation43_spill] sm:$0xff] %v17904_v62 }
  0xaf   :  { %14371 = vmatpush3.bf16.msra.mxu0 %v16702_v4  ;;  %v17922_v4 = vld [vmem:[%s23628_s0 + $0x58] sm:$0xf] }
  0xb0   :  { %14372 = vmatprep.subr.bf16.mxu0 %v16707_v23  ;;  %v17926_v54 = vcombine.low %v17917_v29, %v17922_v4 }
  0xb2   :  { %14309 = vmatmul.mubr.bf16.gmra.mrb[8].mxu0 %v17890_v2  ;;  %24027 = vst [vmem:[#allocation44_spill] sm:$0xff] %v17926_v54  ;;  %v17986_v2 = vld [vmem:[%s23628_s0 + $0x84] sm:$0xf] }
  0xb3   :  { %14312 = vmatprep.mubr.bf16.mxu0 %v17904_v62  ;;  %14373 = vmatpush3.bf16.msra.mxu0 %v16707_v23  ;;  %v17931_v23 = vld [vmem:[%s23628_s0 + $0x60] sm:$0xf]  ;;  %v17995_v14 = vcombine.low %v17986_v2, %v17991_v37 }
  0xb4   :  { %14374 = vmatprep.subr.bf16.mxu0 %v16712_v33  ;;  %v17940_v12 = vcombine.low %v17931_v23, %v17936_v28 }
  0xb5   :  { %24031 = vst [vmem:[#allocation48_spill] sm:$0xff] %v17995_v14 }
  0xb6   :  { %24028 = vst [vmem:[#allocation45_spill] sm:$0xff] %v17940_v12 }
  0xb7   :  { %14375 = vmatpush3.bf16.msra.mxu0 %v16712_v33  ;;  %v17955_v33 = vld [vmem:[%s23628_s0 + $0x6c] sm:$0xf] }
  0xb8   :  { %14376 = vmatprep.subr.bf16.mxu0 %v16717_v9 }
  0xba   :  { %14313 = vmatmul.mubr.bf16.gmra.mrb[12].mxu0 %v17926_v54  ;;  %v17974_v54 = vld [vmem:[%s23628_s0 + $0x7c] sm:$0xf] }
  0xbb   :  { %14316 = vmatprep.mubr.bf16.mxu0 %v17940_v12  ;;  %14377 = vmatpush3.bf16.msra.mxu0 %v16717_v9  ;;  %v17964_v12 = vcombine.low %v17955_v33, %v17960_v6  ;;  %v17969_v9 = vld [vmem:[%s23628_s0 + $0x78] sm:$0xf] }
  0xbc   :  { %14378 = vmatprep.subr.bf16.mxu0 %v16722_v55  ;;  %v17978_v62 = vcombine.low %v17969_v9, %v17974_v54 }
  0xbd   :  { %24029 = vst [vmem:[#allocation46_spill] sm:$0xff] %v17964_v12 }
  0xbe   :  { %24030 = vst [vmem:[#allocation47_spill] sm:$0xff] %v17978_v62 }
  0xbf   :  { %14379 = vmatpush3.bf16.msra.mxu0 %v16722_v55  ;;  %v18000_v55 = vld [vmem:[%s23628_s0 + $0x90] sm:$0xf] }
  0xc0   :  { %14444 = vmatprep.subr.bf16.mxu0 %v17950_v25 }
  0xc2   :  { %14317 = vmatmul.mubr.bf16.gmra.mrb[16].mxu0 %v17964_v12 }
  0xc3   :  { %14320 = vmatprep.mubr.bf16.mxu0 %v17978_v62  ;;  %v18005_v62 = vld [vmem:[%s23628_s0 + $0x94] sm:$0xf] }
  0xc4   :  { %v18009_v12 = vcombine.low %v18000_v55, %v18005_v62 }
  0xc6   :  { %24032 = vst [vmem:[#allocation49_spill] sm:$0xff] %v18009_v12 }
  0xca   :  { %14321 = vmatmul.mubr.bf16.gmra.mrb[20].mxu0 %v17995_v14  ;;  %v18030_v14 = vld [vmem:[%s23628_s0 + $0xa8] sm:$0xf] }
  0xcb   :  { %14324 = vmatprep.mubr.bf16.mxu0 %v18009_v12  ;;  %24035 = vst [vmem:[#allocation52_spill] sm:$0xff] %v18030_v14  ;;  %v18035_v12 = vld [vmem:[%s23628_s0 + $0xac] sm:$0xf] }
  0xcc   :  { %24036 = vst [vmem:[#allocation53_spill] sm:$0xff] %v18035_v12  ;;  %v18039_v52 = vcombine.low %v18030_v14, %v18035_v12  ;;  %v18081_v12 = vcombine.low %v17429_v8, %v17436_v15  ;;  %v18101_v8 = vcombine.low %v17515_v46, %v17524_v51  ;;  %v18107_v15 = vcombine.low %v17541_v22, %v17550_v32  ;;  %v16925_v22 = vld [vmem:[%s23628_s0 + $0x8] sm:$0xf] }
  0xcd   :  { %v18138_v46 = vcombine.low %v17686_v3, %v17694_v60  ;;  %v18142_v51 = vcombine.low %v17712_v50, %v17722_v18  ;;  %v1973_v32 = vrot.slane %v16925_v22, 5 }
  0xce   :  { %24037 = vst [vmem:[#allocation54_spill] sm:$0xff] %v18039_v52  ;;  %24041 = vst [vmem:[#allocation58_spill] sm:$0xff] %v18081_v12 }
  0xcf   :  { %24045 = vst [vmem:[#allocation62_spill] sm:$0xff] %v18101_v8  ;;  %24046 = vst [vmem:[#allocation63_spill] sm:$0xff] %v18107_v15 }
  0xd0   :  { %24052 = vst [vmem:[#allocation69_spill] sm:$0xff] %v18138_v46  ;;  %24053 = vst [vmem:[#allocation70_spill] sm:$0xff] %v18142_v51 }
  0xd2   :  { %14325 = vmatmul.mubr.bf16.gmra.mrb[24].mxu0 %v18025_v56  ;;  %v18060_v56 = vld [vmem:[%s23628_s0 + $0xd8] sm:$0xf] }
  0xd3   :  { %14328 = vmatprep.mubr.bf16.mxu0 %v18039_v52  ;;  %v18065_v52 = vld [vmem:[%s23628_s0 + $0xdc] sm:$0xf] }
  0xd4   :  { %v12770_v14 = vcombine.low %v18060_v56, %v18065_v52 }
  0xda   :  { %14329 = vmatmul.mubr.bf16.gmra.mrb[28].mxu0 %v18055_v49  ;;  %v18091_v49 = vcombine.low %v17472_v59, %v17478_v1  ;;  %v18121_v59 = vcombine.low %v17611_v17, %v17624_v39  ;;  %v18127_v1 = vcombine.low %v17636_v43, %v17646_v30  ;;  %v1984_v43 = vrot.slane %v17828_v21, 5  ;;  %v16927_v21 = vld [vmem:[%s23628_s0 + $0x20] sm:$0xf] }
  0xdb   :  { %14332 = vmatprep.mubr.bf16.mxu0 %v12770_v14  ;;  %v18087_v14 = vcombine.low %v17452_v34, %v17460_v44  ;;  %v18111_v34 = vcombine.low %v17565_v57, %v17572_v0  ;;  %v18117_v44 = vcombine.low %v17588_v36, %v17597_v42  ;;  %v12794_v57 = vrot.slane %v17793_v35, 9 }
  0xdc   :  { %24043 = vst [vmem:[#allocation60_spill] sm:$0xff] %v18091_v49  ;;  %24049 = vst [vmem:[#allocation66_spill] sm:$0xff] %v18121_v59  ;;  %v1972_v0 = vrot.slane %v1970_v24, 4  ;;  %v24054_v36 = vmov 0  ;;  %v1977_v42 = vrot.slane %v17811_v10, 5  ;;  %v18162_v30 = vcombine.low %v17741_v38, %v17750_v13 }
  0xdd   :  { %24042 = vst [vmem:[#allocation59_spill] sm:$0xff] %v18087_v14  ;;  %24047 = vst [vmem:[#allocation64_spill] sm:$0xff] %v18111_v34  ;;  %v24055_v36 = vsel %vm18148_vm5, 4294967295, %v24054_v36  ;;  %v1971_v17 = vsel %vm18148_vm5, %v12794_v57, %v1970_v24  ;;  %v12795_v35 = vrot.slane %v17806_v16, 9  ;;  %v12796_v10 = vrot.slane %v17823_v48, 9 }
  0xde   :  { %24048 = vst [vmem:[#allocation65_spill] sm:$0xff] %v18117_v44  ;;  %24050 = vst [vmem:[#allocation67_spill] sm:$0xff] %v18127_v1  ;;  %v1974_v39 = vsel %vm18148_vm5, %v1972_v0, %v1973_v32  ;;  %v1979_v7 = vrot.slane %v1977_v42, 4  ;;  %v1986_v24 = vrot.slane %v1984_v43, 4  ;;  %v1987_v22 = vrot.slane %v16927_v21, 5 }
  0xdf   :  { %24056 = vst [vmem:[#allocation71_spill] sm:$0xff] %v24055_v36  ;;  %24057 = vst [vmem:[#allocation72_spill] sm:$0xff] %v18162_v30  ;;  %v12842_v3 = vcombine.low %v1971_v17, %v1974_v39  ;;  %v1978_v32 = vsel %vm18148_vm5, %v12795_v35, %v1977_v42  ;;  %v1991_v16 = vrot.slane %v17850_v26, 5  ;;  %v1985_v48 = vsel %vm18148_vm5, %v12796_v10, %v1984_v43  ;;  %v16726_v10 = vld [vmem:[%s23627_s1 + $0xc8] sm:$0xff]  }
  0xe0   :  { %v1981_v57 = vsel %vm18148_vm5, %v1979_v7, %v1980_v58  ;;  %v1988_v0 = vsel %vm18148_vm5, %v1986_v24, %v1987_v22  ;;  %v1998_v17 = vrot.slane %v17864_v11, 5  ;;  %v16928_v58 = vld [vmem:[%s23628_s0 + $0x2c] sm:$0xf]  ;;  %v12798_v35 = vrot.slane %v17859_v31, 9  ;;  %v16929_v7 = vld [vmem:[%s23628_s0 + $0x38] sm:$0xf] }
  0xe1   :  { %v18183_v39 = vcombine.low %v1978_v32, %v1981_v57  ;;  %v18185_v47 = vcombine.low %v1985_v48, %v1988_v0  ;;  %v1993_v42 = vrot.slane %v1991_v16, 4  ;;  %v1994_v26 = vrot.slane %v16928_v58, 5  ;;  %v16930_v0 = vld [vmem:[%s23628_s0 + $0x44] sm:$0xf] }
  0xe2   :  { %14333 = vmatmul.mubr.bf16.gmra.mrb[32].mxu0 %v18077_v40  ;;  %v2000_v43 = vrot.slane %v1998_v17, 4  ;;  %v2001_v11 = vrot.slane %v16929_v7, 5  ;;  %v2005_v24 = vrot.slane %v17886_v63, 5  ;;  %v1999_v21 = vsel %vm18148_vm5, %v12798_v35, %v1998_v17 }
  0xe3   :  { %14336 = vmatprep.mubr.bf16.mxu0 %v18081_v12  ;;  %v1995_v31 = vsel %vm18148_vm5, %v1993_v42, %v1994_v26  ;;  %v2012_v32 = vrot.slane %v17900_v41, 5  ;;  %v12799_v48 = vrot.slane %v17881_v45, 9  ;;  %v2008_v17 = vrot.slane %v16930_v0, 5  ;;  %v16931_v42 = vld [vmem:[%s23628_s0 + $0x50] sm:$0xf]  ;;  %v16728_v45 = vld [vmem:[%s23627_s1 + $0xd8] sm:$0xff]  }
  0xe4   :  { %v2002_v22 = vsel %vm18148_vm5, %v2000_v43, %v2001_v11  ;;  %v2007_v63 = vrot.slane %v2005_v24, 4  ;;  %v2015_v58 = vrot.slane %v16931_v42, 5  ;;  %v2019_v35 = vrot.slane %v17922_v4, 5  ;;  %v16731_v42 = vld [vmem:[%s23627_s1 + $0xf0] sm:$0xff]  }
  0xe5   :  { %v2014_v41 = vrot.slane %v2012_v32, 4  ;;  %v2006_v26 = vsel %vm18148_vm5, %v12799_v48, %v2005_v24  ;;  %v2026_v11 = vrot.slane %v17936_v28, 5  ;;  %v12801_v4 = vrot.slane %v17917_v29, 9  ;;  %v16730_v29 = vld [vmem:[%s23627_s1 + $0xe8] sm:$0xff]  }
  0xe6   :  { %v2021_v24 = vrot.slane %v2019_v35, 4  ;;  %v12802_v28 = vrot.slane %v17931_v23, 9  ;;  %v2033_v0 = vrot.slane %v17960_v6, 5  ;;  %v12803_v6 = vrot.slane %v17955_v33, 9  ;;  %v16732_v33 = vld [vmem:[%s23627_s1 + $0xf8] sm:$0xff]  }
  0xe7   :  { %v2016_v7 = vsel %vm18148_vm5, %v2014_v41, %v2015_v58  ;;  %v2040_v41 = vrot.slane %v17974_v54, 5  ;;  %v12804_v54 = vrot.slane %v17969_v9, 9 }
  0xea   :  { %14337 = vmatmul.mubr.bf16.gmra.mrb[36].mxu0 %v18087_v14 }
  0xeb   :  { %14340 = vmatprep.mubr.bf16.mxu0 %v18091_v49 }
  0xf2   :  { %14341 = vmatmul.mubr.bf16.gmra.mrb[40].mxu0 %v18097_v53 }
  0xf3   :  { %14344 = vmatprep.mubr.bf16.mxu0 %v18101_v8 }
  0xfa   :  { %14345 = vmatmul.mubr.bf16.gmra.mrb[44].mxu0 %v18107_v15 }
  0xfb   :  { %14348 = vmatprep.mubr.bf16.mxu0 %v18111_v34 }
 0x102   :  { %14349 = vmatmul.mubr.bf16.gmra.mrb[48].mxu0 %v18117_v44 }
 0x103   :  { %14352 = vmatprep.mubr.bf16.mxu0 %v18121_v59 }
 0x10a   :  { %14353 = vmatmul.mubr.bf16.gmra.mrb[52].mxu0 %v18127_v1 }
 0x10b   :  { %14356 = vmatprep.mubr.bf16.mxu0 %v18131_v19 }
 0x112   :  { %14357 = vmatmul.mubr.bf16.gmra.mrb[56].mxu0 %v18138_v46 }
 0x113   :  { %14360 = vmatprep.mubr.bf16.mxu0 %v18142_v51 }
 0x11a   :  { %14361 = vmatmul.mubr.bf16.gmra.mrb[60].mxu0 %v18162_v30 }
 0x11b   :  { %14380 = vmatprep.mubr.bf16.mxu0 %v12842_v3  ;;  %v12797_v3 = vrot.slane %v17845_v61, 9 }
 0x11d   :  { %v1992_v61 = vsel %vm18148_vm5, %v12797_v3, %v1991_v16  ;;  %v18216_v16 = vcombine.low %v1999_v21, %v2002_v22  ;;  %v12800_v3 = vrot.slane %v17895_v27, 9  ;;  %v2009_v27 = vsel %vm18148_vm5, %v2007_v63, %v2008_v17  ;;  %v16932_v21 = vld [vmem:[%s23628_s0 + $0x5c] sm:$0xf] }
 0x11e   :  { %v18214_v57 = vcombine.low %v1992_v61, %v1995_v31  ;;  %v18244_v61 = vcombine.low %v2006_v26, %v2009_v27  ;;  %v2022_v22 = vrot.slane %v16932_v21, 5  ;;  %v2020_v63 = vsel %vm18148_vm5, %v12801_v4, %v2019_v35  ;;  %v16934_v27 = vld [vmem:[%s23628_s0 + $0x74] sm:$0xf] }
 0x11f   :  { %v2013_v43 = vsel %vm18148_vm5, %v12800_v3, %v2012_v32  ;;  %v2028_v32 = vrot.slane %v2026_v11, 4  ;;  %v2027_v17 = vsel %vm18148_vm5, %v12802_v28, %v2026_v11  ;;  %v2035_v26 = vrot.slane %v2033_v0, 4  ;;  %v18304_v28 = vld [vmem:[%s23627_s1 + $0x100] sm:$0xff]  }
 0x120   :  { %v18246_v31 = vcombine.low %v2013_v43, %v2016_v7  ;;  %v2023_v23 = vsel %vm18148_vm5, %v2021_v24, %v2022_v22  ;;  %v2036_v35 = vrot.slane %v16934_v27, 5  ;;  %v2042_v43 = vrot.slane %v2040_v41, 4  ;;  %v16935_v7 = vld [vmem:[%s23628_s0 + $0x80] sm:$0xf] }
 0x121   :  { %v18274_v58 = vcombine.low %v2020_v63, %v2023_v23  ;;  %v2043_v11 = vrot.slane %v16935_v7, 5  ;;  %v2047_v4 = vrot.slane %v17991_v37, 5  ;;  %v2041_v24 = vsel %vm18148_vm5, %v12804_v54, %v2040_v41  ;;  %v24059_v54 = vld [vmem:[#allocation50_spill] sm:$0xff] }
 0x122   :  { %14381 = vmatmul.mubr.bf16.vlgmr.msra.gmra.mrb[0].mxu0 %v18183_v39  ;;  %v2037_v9 = vsel %vm18148_vm5, %v2035_v26, %v2036_v35  ;;  %v2054_v22 = vrot.slane %v18005_v62, 5  ;;  %v12805_v37 = vrot.slane %v17986_v2, 9  ;;  %v12806_v62 = vrot.slane %v18000_v55, 9 }
 0x123   :  { %14445 = vmatpush3.bf16.msra.mxu0 %v17950_v25  ;;  %14384 = vmatprep.mubr.bf16.mxu0 %v18185_v47  ;;  %v16727_v25 = vld [vmem:[%s23627_s1 + $0xd0] sm:$0xff]   ;;  %v2044_v21 = vsel %vm18148_vm5, %v2042_v43, %v2043_v11  ;;  %v2061_v55 = vrot.slane %v18021_v5, 5  ;;  %v12807_v43 = vrot.slane %v24059_v54, 9  ;;  %v16938_v11 = vld [vmem:[%s23628_s0 + $0xa4] sm:$0xf] }
 0x124   :  { %14446 = vmatprep.subr.bf16.mxu0 %v16726_v10  ;;  %v2056_v23 = vrot.slane %v2054_v22, 4  ;;  %v2048_v2 = vsel %vm18148_vm5, %v12805_v37, %v2047_v4  ;;  %v2055_v41 = vsel %vm18148_vm5, %v12806_v62, %v2054_v22  ;;  %v2064_v5 = vrot.slane %v16938_v11, 5  ;;  %v24061_v37 = vld [vmem:[#allocation56_spill] sm:$0xff] }
 0x125   :  { %v2063_v7 = vrot.slane %v2061_v55, 4  ;;  %v2082_v62 = vrot.slane %v18065_v52, 5 }
 0x127   :  { %14447 = vmatpush3.bf16.msra.mxu0 %v16726_v10  ;;  %v16729_v10 = vld [vmem:[%s23627_s1 + $0xe0] sm:$0xff]   ;;  %v2065_v22 = vsel %vm18148_vm5, %v2063_v7, %v2064_v5 }
 0x128   :  { %14448 = vmatprep.subr.bf16.mxu0 %v16727_v25 }
 0x12a   :  { %14385 = vmatmul.mubr.bf16.gmra.mrb[4].mxu0 %v18214_v57 }
 0x12b   :  { %14388 = vmatprep.mubr.bf16.mxu0 %v18216_v16  ;;  %14449 = vmatpush3.bf16.msra.mxu0 %v16727_v25  ;;  %v16933_v25 = vld [vmem:[%s23628_s0 + $0x68] sm:$0xf] }
 0x12c   :  { %14450 = vmatprep.subr.bf16.mxu0 %v16728_v45  ;;  %v2029_v48 = vrot.slane %v16933_v25, 5  ;;  %v18308_v25 = vcombine.low %v2041_v24, %v2044_v21  ;;  %v2062_v21 = vsel %vm18148_vm5, %v12807_v43, %v2061_v55  ;;  %v16940_v55 = vld [vmem:[%s23628_s0 + $0xbc] sm:$0xf] }
 0x12e   :  { %v2030_v3 = vsel %vm18148_vm5, %v2028_v32, %v2029_v48  ;;  %v2049_v48 = vrot.slane %v2047_v4, 4  ;;  %v16939_v4 = vld [vmem:[%s23628_s0 + $0xb0] sm:$0xf] }
 0x12f   :  { %14451 = vmatpush3.bf16.msra.mxu0 %v16728_v45  ;;  %v18276_v45 = vcombine.low %v2027_v17, %v2030_v3  ;;  %v2071_v24 = vrot.slane %v16939_v4, 5 }
 0x130   :  { %14452 = vmatprep.subr.bf16.mxu0 %v16729_v10 }
 0x132   :  { %14389 = vmatmul.mubr.bf16.gmra.mrb[8].mxu0 %v18244_v61 }
 0x133   :  { %14392 = vmatprep.mubr.bf16.mxu0 %v18246_v31  ;;  %14453 = vmatpush3.bf16.msra.mxu0 %v16729_v10  ;;  %v2034_v10 = vsel %vm18148_vm5, %v12803_v6, %v2033_v0  ;;  %v16937_v0 = vld [vmem:[%s23628_s0 + $0x98] sm:$0xf]  ;;  %v24058_v6 = vld [vmem:[#allocation53_spill] sm:$0xff] }
 0x134   :  { %14454 = vmatprep.subr.bf16.mxu0 %v16730_v29  ;;  %v18306_v32 = vcombine.low %v2034_v10, %v2037_v9  ;;  %v2057_v17 = vrot.slane %v16937_v0, 5  ;;  %v2068_v26 = vrot.slane %v24058_v6, 5  ;;  %v2084_v6 = vrot.slane %v2082_v62, 4 }
 0x136   :  { %v2070_v9 = vrot.slane %v2068_v26, 4 }
 0x137   :  { %14455 = vmatpush3.bf16.msra.mxu0 %v16730_v29  ;;  %v16936_v29 = vld [vmem:[%s23628_s0 + $0x8c] sm:$0xf] }
 0x138   :  { %14456 = vmatprep.subr.bf16.mxu0 %v16731_v42  ;;  %v2050_v63 = vrot.slane %v16936_v29, 5 }
 0x13a   :  { %14393 = vmatmul.mubr.bf16.gmra.mrb[12].mxu0 %v18274_v58  ;;  %v2051_v3 = vsel %vm18148_vm5, %v2049_v48, %v2050_v63  ;;  %v2075_v48 = vrot.slane %v24061_v37, 5  ;;  %v2072_v63 = vsel %vm18148_vm5, %v2070_v9, %v2071_v24  ;;  %v12811_v24 = vrot.slane %v18073_v20, 9 }
 0x13b   :  { %14396 = vmatprep.mubr.bf16.mxu0 %v18276_v45  ;;  %14457 = vmatpush3.bf16.msra.mxu0 %v16731_v42  ;;  %v2058_v42 = vsel %vm18148_vm5, %v2056_v23, %v2057_v17  ;;  %v18331_v27 = vcombine.low %v2048_v2, %v2051_v3  ;;  %v18355_v23 = vcombine.low %v2062_v21, %v2065_v22  ;;  %v24062_v17 = vld [vmem:[#allocation55_spill] sm:$0xff]  ;;  %v16944_v22 = vld [vmem:[%s23628_s0 + $0xec] sm:$0xf] }
 0x13c   :  { %14458 = vmatprep.subr.bf16.mxu0 %v16732_v33  ;;  %v18333_v35 = vcombine.low %v2055_v41, %v2058_v42  ;;  %v12809_v2 = vrot.slane %v24062_v17, 9  ;;  %v2077_v3 = vrot.slane %v2075_v48, 4  ;;  %v2078_v41 = vrot.slane %v16940_v55, 5 }
 0x13d   :  { %v12810_v42 = vrot.slane %v18060_v56, 9  ;;  %v16942_v56 = vld [vmem:[%s23628_s0 + $0xe8] sm:$0xf]  ;;  %v2092_v37 = vrot.slane %v16944_v22, 5 }
 0x13e   :  { %v2076_v54 = vsel %vm18148_vm5, %v12809_v2, %v2075_v48  ;;  %v2079_v43 = vsel %vm18148_vm5, %v2077_v3, %v2078_v41  ;;  %v2089_v7 = vrot.slane %v16942_v56, 5  ;;  %v16945_v48 = vld [vmem:[%s23628_s0 + $0xf0] sm:$0xf]  ;;  %v16947_v3 = vld [vmem:[%s23628_s0 + $0x100] sm:$0xf] }
 0x13f   :  { %14459 = vmatpush3.bf16.msra.mxu0 %v16732_v33  ;;  %v24060_v33 = vld [vmem:[#allocation52_spill] sm:$0xff]  ;;  %v2083_v11 = vsel %vm18148_vm5, %v12810_v42, %v2082_v62  ;;  %v18383_v9 = vcombine.low %v2076_v54, %v2079_v43  ;;  %v2103_v55 = vrot.slane %v16947_v3, 5 }
 0x140   :  { %14524 = vmatprep.subr.bf16.mxu0 %v18304_v28  ;;  %v12808_v10 = vrot.slane %v24060_v33, 9  ;;  %v16943_v33 = vld [vmem:[%s23628_s0 + $0xf4] sm:$0xf]  ;;  %v2091_v21 = vrot.slane %v2089_v7, 4  ;;  %v16946_v62 = vld [vmem:[%s23628_s0 + $0xf8] sm:$0xf]  ;;  %v2090_v20 = vsel %vm18148_vm5, %v12811_v24, %v2089_v7 }
 0x141   :  { %v2099_v17 = vrot.slane %v16946_v62, 5  ;;  %v16949_v43 = vld [vmem:[%s23628_s0 + $0xfc] sm:$0xf]  ;;  %v2105_v7 = vrot.slane %v2103_v55, 4  ;;  %v16952_v24 = vld [vmem:[%s23628_s0 + $0x110] sm:$0xf] }
 0x142   :  { %14397 = vmatmul.mubr.bf16.gmra.mrb[16].mxu0 %v18306_v32  ;;  %v2069_v29 = vsel %vm18148_vm5, %v12808_v10, %v2068_v26  ;;  %v16941_v26 = vld [vmem:[%s23628_s0 + $0xe0] sm:$0xf]  ;;  %v2096_v10 = vrot.slane %v16943_v33, 5  ;;  %v2093_v2 = vsel %vm18148_vm5, %v2091_v21, %v2092_v37  ;;  %v12813_v56 = vrot.slane %v16949_v43, 9  ;;  %v16951_v33 = vld [vmem:[%s23628_s0 + $0x108] sm:$0xf] }
 0x143   :  { %14400 = vmatprep.mubr.bf16.mxu0 %v18308_v25  ;;  %v18357_v0 = vcombine.low %v2069_v29, %v2072_v63  ;;  %v2085_v52 = vrot.slane %v16941_v26, 5  ;;  %v12812_v29 = vrot.slane %v16945_v48, 9  ;;  %v2113_v21 = vrot.slane %v16952_v24, 5  ;;  %v16953_v48 = vld [vmem:[%s23628_s0 + $0x118] sm:$0xf] }
 0x144   :  { %v2098_v63 = vrot.slane %v2096_v10, 4  ;;  %v2104_v22 = vsel %vm18148_vm5, %v12813_v56, %v2103_v55  ;;  %v16955_v55 = vld [vmem:[%s23628_s0 + $0x114] sm:$0xf]  ;;  %v16957_v43 = vld [vmem:[%s23628_s0 + $0x120] sm:$0xf] }
 0x145   :  { %v2086_v5 = vsel %vm18148_vm5, %v2084_v6, %v2085_v52  ;;  %v2097_v41 = vsel %vm18148_vm5, %v12812_v29, %v2096_v10  ;;  %v16948_v6 = vld [vmem:[%s23628_s0 + $0x10c] sm:$0xf]  ;;  %v18410_v52 = vcombine.low %v2090_v20, %v2093_v2  ;;  %v12814_v10 = vrot.slane %v16951_v33, 9 }
 0x146   :  { %v12858_v4 = vcombine.low %v2083_v11, %v2086_v5  ;;  %v2100_v42 = vsel %vm18148_vm5, %v2098_v63, %v2099_v17  ;;  %v2110_v26 = vrot.slane %v16948_v6, 5  ;;  %v16950_v11 = vld [vmem:[%s23628_s0 + $0x104] sm:$0xf]  ;;  %v2117_v29 = vrot.slane %v16953_v48, 5  ;;  %v16956_v6 = vld [vmem:[%s23628_s0 + $0x11c] sm:$0xf] }
 0x147   :  { %v18412_v54 = vcombine.low %v2097_v41, %v2100_v42  ;;  %v2106_v5 = vrot.slane %v16950_v11, 5  ;;  %v16954_v17 = vld [vmem:[%s23628_s0 + $0x124] sm:$0xf]  ;;  %v12815_v41 = vrot.slane %v16955_v55, 9  ;;  %v12816_v56 = vrot.slane %v16957_v43, 9 }
 0x148   :  { %v2111_v63 = vsel %vm18148_vm5, %v12814_v10, %v2110_v26  ;;  %v2124_v20 = vrot.slane %v16954_v17, 5  ;;  %v2119_v42 = vrot.slane %v2117_v29, 4  ;;  %v16958_v11 = vld [vmem:[%s23628_s0 + $0x128] sm:$0xf]  ;;  %v16964_v43 = vld [vmem:[%s23628_s0 + $0x140] sm:$0xf] }
 0x149   :  { %v2107_v37 = vsel %vm18148_vm5, %v2105_v7, %v2106_v5  ;;  %v2127_v5 = vrot.slane %v16958_v11, 5  ;;  %v2118_v33 = vsel %vm18148_vm5, %v12815_v41, %v2117_v29 }
 0x14a   :  { %14401 = vmatmul.mubr.bf16.gmra.mrb[20].mxu0 %v18331_v27  ;;  %v18442_v2 = vcombine.low %v2104_v22, %v2107_v37  ;;  %v2126_v7 = vrot.slane %v2124_v20, 4  ;;  %v16960_v37 = vld [vmem:[%s23628_s0 + $0x13c] sm:$0xf] }
 0x14b   :  { %14404 = vmatprep.mubr.bf16.mxu0 %v18333_v35  ;;  %v2138_v48 = vrot.slane %v16960_v37, 5 }
 0x14c   :  { %v2128_v22 = vsel %vm18148_vm5, %v2126_v7, %v2127_v5  ;;  %v16965_v5 = vld [vmem:[%s23628_s0 + $0x148] sm:$0xf] }
 0x152   :  { %14405 = vmatmul.mubr.bf16.gmra.mrb[24].mxu0 %v18355_v23 }
 0x153   :  { %14408 = vmatprep.mubr.bf16.mxu0 %v18357_v0 }
 0x15a   :  { %14409 = vmatmul.mubr.bf16.gmra.mrb[28].mxu0 %v18383_v9 }
 0x15b   :  { %14412 = vmatprep.mubr.bf16.mxu0 %v12858_v4  ;;  %v2112_v4 = vrot.slane %v2110_v26, 4  ;;  %v2120_v26 = vrot.slane %v16956_v6, 5 }
 0x15d   :  { %v2114_v62 = vsel %vm18148_vm5, %v2112_v4, %v2113_v21  ;;  %v2121_v10 = vsel %vm18148_vm5, %v2119_v42, %v2120_v26  ;;  %v16959_v4 = vld [vmem:[%s23628_s0 + $0x130] sm:$0xf]  ;;  %v2125_v21 = vsel %vm18148_vm5, %v12816_v56, %v2124_v20  ;;  %v16962_v20 = vld [vmem:[%s23628_s0 + $0x134] sm:$0xf]  ;;  %v16963_v42 = vld [vmem:[%s23628_s0 + $0x138] sm:$0xf] }
 0x15e   :  { %v18444_v3 = vcombine.low %v2111_v63, %v2114_v62  ;;  %v2131_v24 = vrot.slane %v16959_v4, 5  ;;  %v18474_v29 = vcombine.low %v2118_v33, %v2121_v10  ;;  %v18476_v63 = vcombine.low %v2125_v21, %v2128_v22  ;;  %v16961_v62 = vld [vmem:[%s23628_s0 + $0x12c] sm:$0xf]  ;;  %v16966_v21 = vld [vmem:[%s23628_s0 + $0x154] sm:$0xf] }
 0x15f   :  { %v12817_v17 = vrot.slane %v16961_v62, 9  ;;  %v2134_v41 = vrot.slane %v16962_v20, 5  ;;  %v12818_v6 = vrot.slane %v16963_v42, 9  ;;  %v2140_v26 = vrot.slane %v2138_v48, 4  ;;  %v16967_v62 = vld [vmem:[%s23628_s0 + $0x144] sm:$0xf] }
 0x160   :  { %v2133_v55 = vrot.slane %v2131_v24, 4  ;;  %v2141_v56 = vrot.slane %v16964_v43, 5  ;;  %v2145_v33 = vrot.slane %v16965_v5, 5  ;;  %v2152_v22 = vrot.slane %v16966_v21, 5  ;;  %v16972_v21 = vld [vmem:[%s23628_s0 + $0x16c] sm:$0xf] }
 0x161   :  { %v2132_v7 = vsel %vm18148_vm5, %v12817_v17, %v2131_v24  ;;  %v2139_v10 = vsel %vm18148_vm5, %v12818_v6, %v2138_v48  ;;  %v12819_v17 = vrot.slane %v16967_v62, 9  ;;  %v16968_v48 = vld [vmem:[%s23628_s0 + $0x14c] sm:$0xf]  ;;  %v2166_v62 = vrot.slane %v16972_v21, 5 }
 0x162   :  { %14413 = vmatmul.mubr.bf16.gmra.mrb[32].mxu0 %v18410_v52  ;;  %v2135_v11 = vsel %vm18148_vm5, %v2133_v55, %v2134_v41  ;;  %v2142_v4 = vsel %vm18148_vm5, %v2140_v26, %v2141_v56  ;;  %v2147_v55 = vrot.slane %v2145_v33, 4  ;;  %v2148_v20 = vrot.slane %v16968_v48, 5  ;;  %v16969_v41 = vld [vmem:[%s23628_s0 + $0x150] sm:$0xf]  ;;  %v16970_v26 = vld [vmem:[%s23628_s0 + $0x158] sm:$0xf] }
 0x163   :  { %14416 = vmatprep.mubr.bf16.mxu0 %v18412_v54  ;;  %v18506_v24 = vcombine.low %v2132_v7, %v2135_v11  ;;  %v18508_v37 = vcombine.low %v2139_v10, %v2142_v4  ;;  %v12820_v42 = vrot.slane %v16969_v41, 9  ;;  %v2154_v6 = vrot.slane %v2152_v22, 4  ;;  %v16971_v11 = vld [vmem:[%s23628_s0 + $0x160] sm:$0xf] }
 0x164   :  { %v2155_v43 = vrot.slane %v16970_v26, 5  ;;  %v2146_v56 = vsel %vm18148_vm5, %v12819_v17, %v2145_v33  ;;  %v2149_v7 = vsel %vm18148_vm5, %v2147_v55, %v2148_v20  ;;  %v2159_v5 = vrot.slane %v16971_v11, 5  ;;  %v16973_v55 = vld [vmem:[%s23628_s0 + $0x15c] sm:$0xf] }
 0x165   :  { %v2153_v10 = vsel %vm18148_vm5, %v12820_v42, %v2152_v22  ;;  %v18538_v33 = vcombine.low %v2146_v56, %v2149_v7  ;;  %v12821_v48 = vrot.slane %v16973_v55, 9  ;;  %v16974_v22 = vld [vmem:[%s23628_s0 + $0x164] sm:$0xf]  ;;  %v16975_v42 = vld [vmem:[%s23628_s0 + $0x168] sm:$0xf]  ;;  %v2168_v26 = vrot.slane %v2166_v62, 4 }
 0x166   :  { %v2156_v4 = vsel %vm18148_vm5, %v2154_v6, %v2155_v43  ;;  %v2161_v20 = vrot.slane %v2159_v5, 4  ;;  %v2162_v41 = vrot.slane %v16974_v22, 5  ;;  %v12822_v6 = vrot.slane %v16975_v42, 9  ;;  %v24064_v43 = vld [vmem:[#allocation27_spill] sm:$0xff] }
 0x167   :  { %v18540_v17 = vcombine.low %v2153_v10, %v2156_v4  ;;  %v2169_v56 = vrot.slane %v24064_v43, 5  ;;  %v2160_v7 = vsel %vm18148_vm5, %v12821_v48, %v2159_v5  ;;  %v2173_v10 = vrot.slane %v17694_v60, 5  ;;  %v16976_v5 = vld [vmem:[%s23628_s0 + $0x174] sm:$0xf] }
 0x168   :  { %v2163_v11 = vsel %vm18148_vm5, %v2161_v20, %v2162_v41  ;;  %v2167_v4 = vsel %vm18148_vm5, %v12822_v6, %v2166_v62  ;;  %v2180_v55 = vrot.slane %v17722_v18, 5  ;;  %v12823_v48 = vrot.slane %v16976_v5, 9  ;;  %v24065_v41 = vld [vmem:[#allocation30_spill] sm:$0xff]  ;;  %v24066_v6 = vld [vmem:[#allocation32_spill] sm:$0xff] }
 0x169   :  { %24063 = vst [vmem:[#allocation53_spill] sm:$0xff] %v18540_v17  ;;  %v2170_v21 = vsel %vm18148_vm5, %v2168_v26, %v2169_v56  ;;  %v18564_v22 = vcombine.low %v2160_v7, %v2163_v11  ;;  %v2175_v20 = vrot.slane %v2173_v10, 4  ;;  %v2176_v60 = vrot.slane %v24065_v41, 5  ;;  %v24067_v41 = vld [vmem:[#allocation33_spill] sm:$0xff] }
 0x16a   :  { %14417 = vmatmul.mubr.bf16.gmra.mrb[36].mxu0 %v18442_v2  ;;  %v18566_v42 = vcombine.low %v2167_v4, %v2170_v21  ;;  %v12824_v43 = vrot.slane %v17712_v50, 9  ;;  %v2182_v62 = vrot.slane %v2180_v55, 4  ;;  %v2174_v18 = vsel %vm18148_vm5, %v12823_v48, %v2173_v10  ;;  %v24068_v48 = vld [vmem:[#allocation38_spill] sm:$0xff] }
 0x16b   :  { %14420 = vmatprep.mubr.bf16.mxu0 %v18444_v3  ;;  %v2177_v26 = vsel %vm18148_vm5, %v2175_v20, %v2176_v60  ;;  %v2187_v56 = vrot.slane %v17750_v13, 5  ;;  %v12825_v21 = vrot.slane %v17741_v38, 9  ;;  %v2190_v10 = vrot.slane %v24067_v41, 5  ;;  %v16734_v38 = vld [vmem:[%s23627_s1 + $0x108] sm:$0xff]   ;;  %v24069_v20 = vld [vmem:[#allocation39_spill] sm:$0xff]  ;;  %v24070_v60 = vld [vmem:[#allocation40_spill] sm:$0xff] }
 0x16c   :  { %v2181_v7 = vsel %vm18148_vm5, %v12824_v43, %v2180_v55  ;;  %v18585_v11 = vcombine.low %v2174_v18, %v2177_v26  ;;  %v16735_v43 = vld [vmem:[%s23627_s1 + $0x110] sm:$0xff]   ;;  %v24072_v18 = vld [vmem:[#allocation42_spill] sm:$0xff] }
 0x16d   :  { %v2189_v5 = vrot.slane %v2187_v56, 4  ;;  %v2188_v13 = vsel %vm18148_vm5, %v12825_v21, %v2187_v56  ;;  %v16739_v26 = vld [vmem:[%s23627_s1 + $0x128] sm:$0xff]   ;;  %v24073_v56 = vld [vmem:[#allocation43_spill] sm:$0xff]  ;;  %v16741_v21 = vld [vmem:[%s23627_s1 + $0x138] sm:$0xff]  }
 0x16e   :  { %v24076_v41 = vld [vmem:[#allocation46_spill] sm:$0xff] }
 0x16f   :  { %v2191_v55 = vsel %vm18148_vm5, %v2189_v5, %v2190_v10  ;;  %v24075_v5 = vld [vmem:[#allocation45_spill] sm:$0xff] }
 0x170   :  { %v16743_v10 = vld [vmem:[%s23627_s1 + $0x140] sm:$0xff]  }
 0x172   :  { %14421 = vmatmul.mubr.bf16.gmra.mrb[40].mxu0 %v18474_v29 }
 0x173   :  { %14424 = vmatprep.mubr.bf16.mxu0 %v18476_v63 }
 0x17a   :  { %14425 = vmatmul.mubr.bf16.gmra.mrb[44].mxu0 %v18506_v24 }
 0x17b   :  { %14428 = vmatprep.mubr.bf16.mxu0 %v18508_v37 }
 0x182   :  { %14429 = vmatmul.mubr.bf16.gmra.mrb[48].mxu0 %v18538_v33 }
 0x183   :  { %14432 = vmatprep.mubr.bf16.mxu0 %v18540_v17  ;;  %v2183_v17 = vrot.slane %v24066_v6, 5  ;;  %v24071_v6 = vld [vmem:[#allocation41_spill] sm:$0xff] }
 0x185   :  { %v2184_v50 = vsel %vm18148_vm5, %v2182_v62, %v2183_v17  ;;  %v18597_v17 = vcombine.low %v2188_v13, %v2191_v55  ;;  %v16736_v62 = vld [vmem:[%s23627_s1 + $0x118] sm:$0xff]   ;;  %v24077_v13 = vld [vmem:[#allocation47_spill] sm:$0xff] }
 0x186   :  { %v18587_v4 = vcombine.low %v2181_v7, %v2184_v50  ;;  %v24074_v7 = vld [vmem:[#allocation44_spill] sm:$0xff]  ;;  %v16740_v50 = vld [vmem:[%s23627_s1 + $0x130] sm:$0xff]  }
 0x187   :  { %v24078_v55 = vld [vmem:[#allocation48_spill] sm:$0xff] }
 0x18a   :  { %14433 = vmatmul.mubr.bf16.gmra.mrb[52].mxu0 %v18564_v22 }
 0x18b   :  { %14436 = vmatprep.mubr.bf16.mxu0 %v18566_v42 }
 0x192   :  { %14437 = vmatmul.mubr.bf16.gmra.mrb[56].mxu0 %v18585_v11 }
 0x193   :  { %14440 = vmatprep.mubr.bf16.mxu0 %v18587_v4 }
 0x19a   :  { %14441 = vmatmul.mubr.bf16.gmra.mrb[60].mxu0 %v18597_v17 }
 0x19b   :  { %14460 = vmatprep.mubr.bf16.mxu0 %v24068_v48  ;;  %v24079_v48 = vld [vmem:[#allocation49_spill] sm:$0xff] }
 0x1a2   :  { %14461 = vmatmul.mubr.bf16.vlgmr.msra.gmra.mrb[0].mxu0 %v24069_v20 }
 0x1a3   :  { %14525 = vmatpush3.bf16.msra.mxu0 %v18304_v28  ;;  %14464 = vmatprep.mubr.bf16.mxu0 %v24070_v60  ;;  %v16738_v28 = vld [vmem:[%s23627_s1 + $0x120] sm:$0xff]  }
 0x1a4   :  { %14526 = vmatprep.subr.bf16.mxu0 %v16734_v38 }
 0x1a7   :  { %14527 = vmatpush3.bf16.msra.mxu0 %v16734_v38  ;;  %v24080_v38 = vld [vmem:[#allocation51_spill] sm:$0xff] }
 0x1a8   :  { %14528 = vmatprep.subr.bf16.mxu0 %v16735_v43 }
 0x1aa   :  { %14465 = vmatmul.mubr.bf16.gmra.mrb[4].mxu0 %v24071_v6 }
 0x1ab   :  { %14468 = vmatprep.mubr.bf16.mxu0 %v24072_v18  ;;  %14529 = vmatpush3.bf16.msra.mxu0 %v16735_v43  ;;  %v24081_v43 = vld [vmem:[#allocation54_spill] sm:$0xff] }
 0x1ac   :  { %14530 = vmatprep.subr.bf16.mxu0 %v16736_v62 }
 0x1af   :  { %14531 = vmatpush3.bf16.msra.mxu0 %v16736_v62  ;;  %v24082_v62 = vld [vmem:[#allocation57_spill] sm:$0xff] }
 0x1b0   :  { %14532 = vmatprep.subr.bf16.mxu0 %v16738_v28 }
 0x1b2   :  { %14469 = vmatmul.mubr.bf16.gmra.mrb[8].mxu0 %v24073_v56 }
 0x1b3   :  { %14472 = vmatprep.mubr.bf16.mxu0 %v24074_v7  ;;  %14533 = vmatpush3.bf16.msra.mxu0 %v16738_v28  ;;  %v18643_v28 = vld [vmem:[%s23628_s0 + $0xc0] sm:$0xf] }
 0x1b4   :  { %14534 = vmatprep.subr.bf16.mxu0 %v16739_v26 }
 0x1b7   :  { %14535 = vmatpush3.bf16.msra.mxu0 %v16739_v26  ;;  %v18648_v26 = vld [vmem:[%s23628_s0 + $0xc4] sm:$0xf] }
 0x1b8   :  { %14536 = vmatprep.subr.bf16.mxu0 %v16740_v50 }
 0x1ba   :  { %14473 = vmatmul.mubr.bf16.gmra.mrb[12].mxu0 %v24075_v5 }
 0x1bb   :  { %14476 = vmatprep.mubr.bf16.mxu0 %v24076_v41  ;;  %14537 = vmatpush3.bf16.msra.mxu0 %v16740_v50  ;;  %v18652_v50 = vcombine.low %v18643_v28, %v18648_v26 }
 0x1bc   :  { %14538 = vmatprep.subr.bf16.mxu0 %v16741_v21 }
 0x1bd   :  { %24083 = vst [vmem:[#allocation50_spill] sm:$0xff] %v18652_v50 }
 0x1bf   :  { %14539 = vmatpush3.bf16.msra.mxu0 %v16741_v21  ;;  %v18678_v21 = vld [vmem:[%s23628_s0 + $0x19c] sm:$0xf] }
 0x1c0   :  { %14604 = vmatprep.subr.bf16.mxu0 %v16743_v10 }
 0x1c2   :  { %14477 = vmatmul.mubr.bf16.gmra.mrb[16].mxu0 %v24077_v13 }
 0x1c3   :  { %14480 = vmatprep.mubr.bf16.mxu0 %v24078_v55 }
 0x1ca   :  { %14481 = vmatmul.mubr.bf16.gmra.mrb[20].mxu0 %v24079_v48 }
 0x1cb   :  { %14484 = vmatprep.mubr.bf16.mxu0 %v24080_v38 }
 0x1d2   :  { %14485 = vmatmul.mubr.bf16.gmra.mrb[24].mxu0 %v24081_v43 }
 0x1d3   :  { %14488 = vmatprep.mubr.bf16.mxu0 %v24082_v62 }
 0x1da   :  { %14489 = vmatmul.mubr.bf16.gmra.mrb[28].mxu0 %v18652_v50 }
 0x1db   :  { %14492 = vmatprep.mubr.bf16.mxu0 %v18077_v40  ;;  %v18673_v40 = vld [vmem:[%s23628_s0 + $0x198] sm:$0xf] }
 0x1e2   :  { %14493 = vmatmul.mubr.bf16.gmra.mrb[32].mxu0 %v18081_v12 }
 0x1e3   :  { %14496 = vmatprep.mubr.bf16.mxu0 %v18087_v14 }
 0x1ea   :  { %14497 = vmatmul.mubr.bf16.gmra.mrb[36].mxu0 %v18091_v49  ;;  %v24097_v49 = vld [vmem:[#allocation16_spill] sm:$0xff] }
 0x1eb   :  { %14500 = vmatprep.mubr.bf16.mxu0 %v18097_v53 }
 0x1f2   :  { %14501 = vmatmul.mubr.bf16.gmra.mrb[40].mxu0 %v18101_v8 }
 0x1f3   :  { %14504 = vmatprep.mubr.bf16.mxu0 %v18107_v15 }
 0x1fa   :  { %14505 = vmatmul.mubr.bf16.gmra.mrb[44].mxu0 %v18111_v34  ;;  %v24095_v34 = vld [vmem:[#allocation14_spill] sm:$0xff] }
 0x1fb   :  { %14508 = vmatprep.mubr.bf16.mxu0 %v18117_v44  ;;  %v24089_v44 = vld [vmem:[#allocation8_spill] sm:$0xff] }
 0x202   :  { %14509 = vmatmul.mubr.bf16.gmra.mrb[48].mxu0 %v18121_v59  ;;  %v16745_v59 = vld [vmem:[%s23627_s1 + $0x150] sm:$0xff]  }
 0x203   :  { %14512 = vmatprep.mubr.bf16.mxu0 %v18127_v1  ;;  %v18682_v1 = vcombine.low %v18673_v40, %v18678_v21 }
 0x205   :  { %24084 = vst [vmem:[#allocation52_spill] sm:$0xff] %v18682_v1 }
 0x20a   :  { %14513 = vmatmul.mubr.bf16.gmra.mrb[52].mxu0 %v18131_v19  ;;  %v24087_v19 = vld [vmem:[#allocation6_spill] sm:$0xff] }
 0x20b   :  { %14516 = vmatprep.mubr.bf16.mxu0 %v18138_v46  ;;  %v24085_v46 = vld [vmem:[#allocation4_spill] sm:$0xff] }
 0x212   :  { %14517 = vmatmul.mubr.bf16.gmra.mrb[56].mxu0 %v18142_v51  ;;  %v24086_v51 = vld [vmem:[#allocation5_spill] sm:$0xff] }
 0x213   :  { %14520 = vmatprep.mubr.bf16.mxu0 %v18162_v30  ;;  %v16744_v30 = vld [vmem:[%s23627_s1 + $0x148] sm:$0xff]  }
 0x21a   :  { %14521 = vmatmul.mubr.bf16.gmra.mrb[60].mxu0 %v18682_v1  ;;  %v24088_v1 = vld [vmem:[#allocation7_spill] sm:$0xff] }
 0x21b   :  { %14540 = vmatprep.mubr.bf16.mxu0 %v24085_v46  ;;  %v16746_v46 = vld [vmem:[%s23627_s1 + $0x158] sm:$0xff]  }
 0x222   :  { %14541 = vmatmul.mubr.bf16.vlgmr.msra.gmra.mrb[0].mxu0 %v24086_v51  ;;  %v24091_v51 = vld [vmem:[#allocation10_spill] sm:$0xff] }
 0x223   :  { %14605 = vmatpush3.bf16.msra.mxu0 %v16743_v10  ;;  %14544 = vmatprep.mubr.bf16.mxu0 %v24087_v19  ;;  %v16747_v10 = vld [vmem:[%s23627_s1 + $0x160] sm:$0xff]  }
 0x224   :  { %14606 = vmatprep.subr.bf16.mxu0 %v16744_v30  ;;  %v24090_v19 = vld [vmem:[#allocation9_spill] sm:$0xff] }
 0x227   :  { %14607 = vmatpush3.bf16.msra.mxu0 %v16744_v30  ;;  %v16748_v30 = vld [vmem:[%s23627_s1 + $0x168] sm:$0xff]  }
 0x228   :  { %14608 = vmatprep.subr.bf16.mxu0 %v16745_v59 }
 0x22a   :  { %14545 = vmatmul.mubr.bf16.gmra.mrb[4].mxu0 %v24088_v1  ;;  %v24093_v1 = vld [vmem:[#allocation12_spill] sm:$0xff] }
 0x22b   :  { %14548 = vmatprep.mubr.bf16.mxu0 %v24089_v44  ;;  %14609 = vmatpush3.bf16.msra.mxu0 %v16745_v59  ;;  %v16749_v59 = vld [vmem:[%s23627_s1 + $0x170] sm:$0xff]  }
 0x22c   :  { %14610 = vmatprep.subr.bf16.mxu0 %v16746_v46  ;;  %v24092_v44 = vld [vmem:[#allocation11_spill] sm:$0xff] }
 0x22f   :  { %14611 = vmatpush3.bf16.msra.mxu0 %v16746_v46  ;;  %v16750_v46 = vld [vmem:[%s23627_s1 + $0x178] sm:$0xff]  }
 0x230   :  { %14612 = vmatprep.subr.bf16.mxu0 %v16747_v10 }
 0x232   :  { %14549 = vmatmul.mubr.bf16.gmra.mrb[8].mxu0 %v24090_v19  ;;  %v3172_v19 = vshll.u32 %v18643_v28, 16 }
 0x233   :  { %14552 = vmatprep.mubr.bf16.mxu0 %v24091_v51  ;;  %14613 = vmatpush3.bf16.msra.mxu0 %v16747_v10  ;;  %v18718_v10 = vld [vmem:[%s23627_s1 + $0x180] sm:$0xff]   ;;  %v3169_v51 = vshrl.u32 %v18643_v28, 16 }
 0x234   :  { %14614 = vmatprep.subr.bf16.mxu0 %v16748_v30  ;;  %v3174_v15 = vrot.slane %v3172_v19, 5  ;;  %v24099_v19 = vld [vmem:[#allocation18_spill] sm:$0xff] }
 0x237   :  { %14615 = vmatpush3.bf16.msra.mxu0 %v16748_v30  ;;  %v24094_v30 = vld [vmem:[#allocation13_spill] sm:$0xff] }
 0x238   :  { %14616 = vmatprep.subr.bf16.mxu0 %v16749_v59 }
 0x23a   :  { %14553 = vmatmul.mubr.bf16.gmra.mrb[12].mxu0 %v24092_v44  ;;  %v3182_v44 = vshrl.u32 %v18648_v26, 16 }
 0x23b   :  { %14556 = vmatprep.mubr.bf16.mxu0 %v24093_v1  ;;  %14617 = vmatpush3.bf16.msra.mxu0 %v16749_v59  ;;  %v3178_v59 = vshll.u32 %v18648_v26, 16  ;;  %v3171_v1 = vrot.slane %v3169_v51, 4  ;;  %v24098_v51 = vld [vmem:[#allocation17_spill] sm:$0xff] }
 0x23c   :  { %14618 = vmatprep.subr.bf16.mxu0 %v16750_v46  ;;  %v3184_v53 = vrot.slane %v3182_v44, 4 }
 0x23d   :  { %v3180_v8 = vrot.slane %v3178_v59, 5  ;;  %v3175_v14 = vor.u32 %v3174_v15, %v3171_v1  ;;  %v24103_v15 = vld [vmem:[#allocation20_spill] sm:$0xff]  ;;  %v24106_v1 = vld [vmem:[#allocation23_spill] sm:$0xff] }
 0x23f   :  { %14619 = vmatpush3.bf16.msra.mxu0 %v16750_v46  ;;  %v18730_v46 = vld [vmem:[%s23628_s0 + $0xc8] sm:$0xf]  ;;  %v3185_v12 = vor.u32 %v3184_v53, %v3180_v8  ;;  %v24102_v53 = vld [vmem:[#allocation19_spill] sm:$0xff] }
 0x240   :  { %14684 = vmatprep.subr.bf16.mxu0 %v18718_v10  ;;  %v3188_v50 = vshll.u32 %v18730_v46, 16 }
 0x241   :  { %v3186_v62 = vrot.slane %v3185_v12, 4  ;;  %v24104_v12 = vld [vmem:[#allocation21_spill] sm:$0xff] }
 0x242   :  { %14557 = vmatmul.mubr.bf16.gmra.mrb[16].mxu0 %v24094_v30  ;;  %v24096_v30 = vld [vmem:[#allocation15_spill] sm:$0xff]  ;;  %v3190_v43 = vrot.slane %v3188_v50, 5  ;;  %v24107_v50 = vld [vmem:[#allocation24_spill] sm:$0xff] }
 0x243   :  { %14560 = vmatprep.mubr.bf16.mxu0 %v24095_v34  ;;  %v3176_v34 = vrot.slane %v3175_v14, 4  ;;  %v24105_v14 = vld [vmem:[#allocation22_spill] sm:$0xff] }
 0x244   :  { %v3191_v38 = vsel %vm17138_vm2, %v3186_v62, %v3190_v43  ;;  %v24111_v43 = vld [vmem:[#allocation29_spill] sm:$0xff]  ;;  %v3193_v62 = vshrl.u32 %v18673_v40, 16 }
 0x245   :  { %v3181_v59 = vsel %vm17138_vm2, %v3176_v34, %v3180_v8  ;;  %v24108_v8 = vld [vmem:[#allocation25_spill] sm:$0xff]  ;;  %v24109_v34 = vld [vmem:[#allocation26_spill] sm:$0xff] }
 0x24a   :  { %14561 = vmatmul.mubr.bf16.gmra.mrb[20].mxu0 %v24096_v30  ;;  %v18741_v30 = vcombine.low %v3181_v59, %v3191_v38  ;;  %v24110_v38 = vld [vmem:[#allocation28_spill] sm:$0xff]  ;;  %v3196_v59 = vshll.u32 %v18673_v40, 16 }
 0x24b   :  { %14564 = vmatprep.mubr.bf16.mxu0 %v24097_v49 }
 0x24c   :  { %24101 = vst [vmem:[#allocation56_spill] sm:$0xff] %v18741_v30 }
 0x252   :  { %14565 = vmatmul.mubr.bf16.gmra.mrb[24].mxu0 %v24098_v51 }
 0x253   :  { %14568 = vmatprep.mubr.bf16.mxu0 %v24099_v19 }
 0x25a   :  { %14569 = vmatmul.mubr.bf16.gmra.mrb[28].mxu0 %v18741_v30 }
 0x25b   :  { %14572 = vmatprep.mubr.bf16.mxu0 %v24102_v53  ;;  %v3206_v53 = vshrl.u32 %v18678_v21, 16 }
 0x262   :  { %14573 = vmatmul.mubr.bf16.gmra.mrb[32].mxu0 %v24103_v15 }
 0x263   :  { %14576 = vmatprep.mubr.bf16.mxu0 %v24104_v12  ;;  %v24112_v12 = vld [vmem:[#allocation31_spill] sm:$0xff] }
 0x26a   :  { %14577 = vmatmul.mubr.bf16.gmra.mrb[36].mxu0 %v24105_v14  ;;  %v3195_v14 = vrot.slane %v3193_v62, 4  ;;  %v24115_v62 = vld [vmem:[#allocation36_spill] sm:$0xff] }
 0x26b   :  { %14580 = vmatprep.mubr.bf16.mxu0 %v24106_v1  ;;  %v3202_v1 = vshll.u32 %v18678_v21, 16 }
 0x26d   :  { %v3204_v15 = vrot.slane %v3202_v1, 5  ;;  %v24116_v1 = vld [vmem:[#allocation37_spill] sm:$0xff] }
 0x272   :  { %14581 = vmatmul.mubr.bf16.gmra.mrb[40].mxu0 %v24107_v50  ;;  %v3198_v50 = vrot.slane %v3196_v59, 5 }
 0x273   :  { %14584 = vmatprep.mubr.bf16.mxu0 %v24108_v8  ;;  %v3208_v8 = vrot.slane %v3206_v53, 4 }
 0x274   :  { %v3199_v30 = vor.u32 %v3198_v50, %v3195_v14  ;;  %v12934_v14 = vrot.slane %v18643_v28, 9  ;;  %v24117_v28 = vld [vmem:[#allocation53_spill] sm:$0xff] }
 0x275   :  { %v3209_v19 = vor.u32 %v3208_v8, %v3204_v15  ;;  %v3649_v8 = vrot.slane %v18730_v46, 5 }
 0x277   :  { %v3210_v49 = vrot.slane %v3209_v19, 4  ;;  %v16758_v19 = vld [vmem:[%s23627_s1 + $0x1b8] sm:$0xff]  }
 0x27a   :  { %14585 = vmatmul.mubr.bf16.gmra.mrb[44].mxu0 %v24109_v34  ;;  %v24114_v34 = vld [vmem:[#allocation35_spill] sm:$0xff] }
 0x27b   :  { %14588 = vmatprep.mubr.bf16.mxu0 %v24110_v38  ;;  %v18762_v38 = vld [vmem:[%s23628_s0 + $0x1a0] sm:$0xf] }
 0x27c   :  { %v3212_v51 = vshll.u32 %v18762_v38, 16 }
 0x27e   :  { %v3214_v48 = vrot.slane %v3212_v51, 5  ;;  %v16757_v51 = vld [vmem:[%s23627_s1 + $0x1b0] sm:$0xff]  }
 0x280   :  { %v3215_v53 = vsel %vm17138_vm2, %v3210_v49, %v3214_v48  ;;  %v16753_v49 = vld [vmem:[%s23627_s1 + $0x190] sm:$0xff]   ;;  %v16755_v48 = vld [vmem:[%s23627_s1 + $0x1a0] sm:$0xff]  }
 0x282   :  { %14589 = vmatmul.mubr.bf16.gmra.mrb[48].mxu0 %v24111_v43  ;;  %v24113_v43 = vld [vmem:[#allocation34_spill] sm:$0xff] }
 0x283   :  { %14592 = vmatprep.mubr.bf16.mxu0 %v24112_v12  ;;  %v3200_v12 = vrot.slane %v3199_v30, 4  ;;  %v16752_v30 = vld [vmem:[%s23627_s1 + $0x188] sm:$0xff]  }
 0x285   :  { %v3205_v59 = vsel %vm17138_vm2, %v3200_v12, %v3204_v15  ;;  %v16759_v15 = vld [vmem:[%s23627_s1 + $0x1c0] sm:$0xff]   ;;  %v3646_v12 = vrot.slane %v18648_v26, 5  ;;  %v12935_v26 = vrot.slane %v18673_v40, 9  ;;  %v16760_v40 = vld [vmem:[%s23627_s1 + $0x1c8] sm:$0xff]  }
 0x287   :  { %v3648_v50 = vrot.slane %v3646_v12, 4 }
 0x28a   :  { %14593 = vmatmul.mubr.bf16.gmra.mrb[52].mxu0 %v24113_v43  ;;  %v18773_v43 = vcombine.low %v3205_v59, %v3215_v53  ;;  %v3647_v59 = vsel %vm18148_vm5, %v12934_v14, %v3646_v12  ;;  %v3650_v53 = vsel %vm18148_vm5, %v3648_v50, %v3649_v8  ;;  %v24123_v12 = vld [vmem:[#allocation58_spill] sm:$0xff]  ;;  %v24124_v14 = vld [vmem:[#allocation59_spill] sm:$0xff]  ;;  %v24125_v50 = vld [vmem:[#allocation60_spill] sm:$0xff] }
 0x28b   :  { %14596 = vmatprep.mubr.bf16.mxu0 %v24114_v34  ;;  %v24126_v8 = vld [vmem:[#allocation61_spill] sm:$0xff] }
 0x292   :  { %14597 = vmatmul.mubr.bf16.gmra.mrb[56].mxu0 %v24115_v62 }
 0x293   :  { %14600 = vmatprep.mubr.bf16.mxu0 %v24116_v1 }
 0x29a   :  { %14601 = vmatmul.mubr.bf16.gmra.mrb[60].mxu0 %v18773_v43 }
 0x29b   :  { %14620 = vmatprep.mubr.bf16.mxu0 %v18183_v39  ;;  %v16754_v39 = vld [vmem:[%s23627_s1 + $0x198] sm:$0xff]  }
 0x2a2   :  { %14621 = vmatmul.mubr.bf16.vlgmr.msra.gmra.mrb[0].mxu0 %v18185_v47 }
 0x2a3   :  { %14685 = vmatpush3.bf16.msra.mxu0 %v18718_v10  ;;  %14624 = vmatprep.mubr.bf16.mxu0 %v18214_v57  ;;  %v16756_v10 = vld [vmem:[%s23627_s1 + $0x1a8] sm:$0xff]  }
 0x2a4   :  { %14686 = vmatprep.subr.bf16.mxu0 %v16752_v30 }
 0x2a7   :  { %14687 = vmatpush3.bf16.msra.mxu0 %v16752_v30  ;;  %v18823_v30 = vcombine.low %v3647_v59, %v3650_v53  ;;  %v24127_v59 = vld [vmem:[#allocation62_spill] sm:$0xff]  ;;  %v24128_v53 = vld [vmem:[#allocation63_spill] sm:$0xff] }
 0x2a8   :  { %14688 = vmatprep.subr.bf16.mxu0 %v16753_v49 }
 0x2aa   :  { %14625 = vmatmul.mubr.bf16.gmra.mrb[4].mxu0 %v18216_v16 }
 0x2ab   :  { %14628 = vmatprep.mubr.bf16.mxu0 %v18244_v61  ;;  %14689 = vmatpush3.bf16.msra.mxu0 %v16753_v49  ;;  %v3656_v49 = vrot.slane %v18762_v38, 5  ;;  %v24119_v38 = vld [vmem:[#allocation51_spill] sm:$0xff] }
 0x2ac   :  { %14690 = vmatprep.subr.bf16.mxu0 %v16754_v39 }
 0x2af   :  { %14691 = vmatpush3.bf16.msra.mxu0 %v16754_v39 }
 0x2b0   :  { %14692 = vmatprep.subr.bf16.mxu0 %v16755_v48 }
 0x2b2   :  { %14629 = vmatmul.mubr.bf16.gmra.mrb[8].mxu0 %v18246_v31 }
 0x2b3   :  { %14632 = vmatprep.mubr.bf16.mxu0 %v18274_v58  ;;  %14693 = vmatpush3.bf16.msra.mxu0 %v16755_v48 }
 0x2b4   :  { %14694 = vmatprep.subr.bf16.mxu0 %v16756_v10 }
 0x2b7   :  { %14695 = vmatpush3.bf16.msra.mxu0 %v16756_v10 }
 0x2b8   :  { %14696 = vmatprep.subr.bf16.mxu0 %v16757_v51 }
 0x2ba   :  { %14633 = vmatmul.mubr.bf16.gmra.mrb[12].mxu0 %v18276_v45 }
 0x2bb   :  { %14636 = vmatprep.mubr.bf16.mxu0 %v18306_v32  ;;  %14697 = vmatpush3.bf16.msra.mxu0 %v16757_v51  ;;  %v24120_v51 = vld [vmem:[#allocation54_spill] sm:$0xff] }
 0x2bc   :  { %14698 = vmatprep.subr.bf16.mxu0 %v16758_v19 }
 0x2bf   :  { %14699 = vmatpush3.bf16.msra.mxu0 %v16758_v19  ;;  %v24121_v19 = vld [vmem:[#allocation57_spill] sm:$0xff] }
 0x2c0   :  { %14764 = vmatprep.subr.bf16.mxu0 %v16759_v15 }
 0x2c2   :  { %14637 = vmatmul.mubr.bf16.gmra.mrb[16].mxu0 %v18308_v25 }
 0x2c3   :  { %14640 = vmatprep.mubr.bf16.mxu0 %v18331_v27 }
 0x2ca   :  { %14641 = vmatmul.mubr.bf16.gmra.mrb[20].mxu0 %v18333_v35 }
 0x2cb   :  { %14644 = vmatprep.mubr.bf16.mxu0 %v18355_v23 }
 0x2d2   :  { %14645 = vmatmul.mubr.bf16.gmra.mrb[24].mxu0 %v18357_v0 }
 0x2d3   :  { %14648 = vmatprep.mubr.bf16.mxu0 %v18383_v9 }
 0x2da   :  { %14649 = vmatmul.mubr.bf16.gmra.mrb[28].mxu0 %v18823_v30 }
 0x2db   :  { %14652 = vmatprep.mubr.bf16.mxu0 %v18410_v52  ;;  %v3653_v52 = vrot.slane %v18678_v21, 5  ;;  %v16761_v21 = vld [vmem:[%s23627_s1 + $0x1d0] sm:$0xff]  }
 0x2dd   :  { %v3655_v46 = vrot.slane %v3653_v52, 4  ;;  %v3654_v39 = vsel %vm18148_vm5, %v12935_v26, %v3653_v52  ;;  %v24129_v52 = vld [vmem:[#allocation64_spill] sm:$0xff]  ;;  %v24130_v26 = vld [vmem:[#allocation65_spill] sm:$0xff] }
 0x2df   :  { %v3657_v48 = vsel %vm18148_vm5, %v3655_v46, %v3656_v49  ;;  %v24131_v46 = vld [vmem:[#allocation66_spill] sm:$0xff]  ;;  %v24132_v49 = vld [vmem:[#allocation67_spill] sm:$0xff] }
 0x2e0   :  { %v18848_v10 = vcombine.low %v3654_v39, %v3657_v48  ;;  %v24133_v39 = vld [vmem:[#allocation68_spill] sm:$0xff]  ;;  %v24134_v48 = vld [vmem:[#allocation69_spill] sm:$0xff] }
 0x2e2   :  { %14653 = vmatmul.mubr.bf16.gmra.mrb[32].mxu0 %v18412_v54 }
 0x2e3   :  { %14656 = vmatprep.mubr.bf16.mxu0 %v18442_v2 }
 0x2ea   :  { %14657 = vmatmul.mubr.bf16.gmra.mrb[36].mxu0 %v18444_v3 }
 0x2eb   :  { %14660 = vmatprep.mubr.bf16.mxu0 %v18474_v29 }
 0x2f2   :  { %14661 = vmatmul.mubr.bf16.gmra.mrb[40].mxu0 %v18476_v63 }
 0x2f3   :  { %14664 = vmatprep.mubr.bf16.mxu0 %v18506_v24 }
 0x2fa   :  { %14665 = vmatmul.mubr.bf16.gmra.mrb[44].mxu0 %v18508_v37 }
 0x2fb   :  { %14668 = vmatprep.mubr.bf16.mxu0 %v18538_v33 }
 0x302   :  { %14669 = vmatmul.mubr.bf16.gmra.mrb[48].mxu0 %v24117_v28 }
 0x303   :  { %14672 = vmatprep.mubr.bf16.mxu0 %v18564_v22 }
 0x30a   :  { %14673 = vmatmul.mubr.bf16.gmra.mrb[52].mxu0 %v18566_v42 }
 0x30b   :  { %14676 = vmatprep.mubr.bf16.mxu0 %v18585_v11 }
 0x312   :  { %14677 = vmatmul.mubr.bf16.gmra.mrb[56].mxu0 %v18587_v4 }
 0x313   :  { %14680 = vmatprep.mubr.bf16.mxu0 %v18597_v17 }
 0x31a   :  { %14681 = vmatmul.mubr.bf16.gmra.mrb[60].mxu0 %v18848_v10 }
 0x31b   :  { %14700 = vmatprep.mubr.bf16.mxu0 %v24069_v20  ;;  %v16762_v20 = vld [vmem:[%s23627_s1 + $0x1d8] sm:$0xff]  }
 0x322   :  { %14701 = vmatmul.mubr.bf16.vlgmr.msra.gmra.mrb[0].mxu0 %v24070_v60  ;;  %v16764_v60 = vld [vmem:[%s23627_s1 + $0x1e0] sm:$0xff]  }
 0x323   :  { %14765 = vmatpush3.bf16.msra.mxu0 %v16759_v15  ;;  %14704 = vmatprep.mubr.bf16.mxu0 %v24071_v6  ;;  %v16765_v6 = vld [vmem:[%s23627_s1 + $0x1e8] sm:$0xff]   ;;  %v18898_v15 = vld [vmem:[%s23628_s0 + $0xd0] sm:$0xf] }
 0x324   :  { %14766 = vmatprep.subr.bf16.mxu0 %v16760_v40 }
 0x327   :  { %14767 = vmatpush3.bf16.msra.mxu0 %v16760_v40  ;;  %v24135_v40 = vld [vmem:[#allocation70_spill] sm:$0xff] }
 0x328   :  { %14768 = vmatprep.subr.bf16.mxu0 %v16761_v21 }
 0x32a   :  { %14705 = vmatmul.mubr.bf16.gmra.mrb[4].mxu0 %v24072_v18  ;;  %v16766_v18 = vld [vmem:[%s23627_s1 + $0x1f0] sm:$0xff]  }
 0x32b   :  { %14708 = vmatprep.mubr.bf16.mxu0 %v24073_v56  ;;  %14769 = vmatpush3.bf16.msra.mxu0 %v16761_v21  ;;  %v16767_v56 = vld [vmem:[%s23627_s1 + $0x1f8] sm:$0xff]  }
 0x32c   :  { %14770 = vmatprep.subr.bf16.mxu0 %v16762_v20  ;;  %v24136_v21 = vld [vmem:[#allocation72_spill] sm:$0xff] }
 0x32f   :  { %14771 = vmatpush3.bf16.msra.mxu0 %v16762_v20  ;;  %v24137_v20 = vld [vmem:[#allocation52_spill] sm:$0xff] }
 0x330   :  { %14772 = vmatprep.subr.bf16.mxu0 %v16764_v60 }
 0x332   :  { %14709 = vmatmul.mubr.bf16.gmra.mrb[8].mxu0 %v24074_v7  ;;  %v16769_v7 = vld [vmem:[%s23627_s1 + $0x200] sm:$0xff]  }
 0x333   :  { %14712 = vmatprep.mubr.bf16.mxu0 %v24075_v5  ;;  %14773 = vmatpush3.bf16.msra.mxu0 %v16764_v60  ;;  %v24118_v5 = vld [vmem:[#allocation49_spill] sm:$0xff] }
 0x334   :  { %14774 = vmatprep.subr.bf16.mxu0 %v16765_v6  ;;  %v18920_v60 = vld [vmem:[%s23628_s0 + $0x1a4] sm:$0xf] }
 0x337   :  { %14775 = vmatpush3.bf16.msra.mxu0 %v16765_v6  ;;  %v18925_v6 = vld [vmem:[%s23628_s0 + $0x1a8] sm:$0xf] }
 0x338   :  { %14776 = vmatprep.subr.bf16.mxu0 %v16766_v18 }
 0x33a   :  { %14713 = vmatmul.mubr.bf16.gmra.mrb[12].mxu0 %v24076_v41  ;;  %v24122_v41 = vld [vmem:[#allocation50_spill] sm:$0xff] }
 0x33b   :  { %14716 = vmatprep.mubr.bf16.mxu0 %v24077_v13  ;;  %14777 = vmatpush3.bf16.msra.mxu0 %v16766_v18  ;;  %v18893_v13 = vld [vmem:[%s23628_s0 + $0xcc] sm:$0xf]  ;;  %v12979_v18 = vcombine.low %v18920_v60, %v18925_v6 }
 0x33c   :  { %14778 = vmatprep.subr.bf16.mxu0 %v16767_v56 }
 0x33f   :  { %14779 = vmatpush3.bf16.msra.mxu0 %v16767_v56  ;;  %v24138_v56 = vld [vmem:[#allocation5_spill] sm:$0xff] }
 0x340   :  { %14844 = vmatprep.subr.bf16.mxu0 %v16769_v7 }
 0x342   :  { %14717 = vmatmul.mubr.bf16.gmra.mrb[16].mxu0 %v24078_v55  ;;  %v12978_v55 = vcombine.low %v18893_v13, %v18898_v15 }
 0x343   :  { %14720 = vmatprep.mubr.bf16.mxu0 %v24118_v5  ;;  %v16770_v5 = vld [vmem:[%s23627_s1 + $0x208] sm:$0xff]  }
 0x34a   :  { %14721 = vmatmul.mubr.bf16.gmra.mrb[20].mxu0 %v24119_v38  ;;  %v24139_v38 = vld [vmem:[#allocation6_spill] sm:$0xff] }
 0x34b   :  { %14724 = vmatprep.mubr.bf16.mxu0 %v24120_v51  ;;  %v24140_v51 = vld [vmem:[#allocation7_spill] sm:$0xff] }
 0x352   :  { %14725 = vmatmul.mubr.bf16.gmra.mrb[24].mxu0 %v24121_v19  ;;  %v16771_v19 = vld [vmem:[%s23627_s1 + $0x210] sm:$0xff]  }
 0x353   :  { %14728 = vmatprep.mubr.bf16.mxu0 %v24122_v41  ;;  %v16772_v41 = vld [vmem:[%s23627_s1 + $0x218] sm:$0xff]  }
 0x35a   :  { %14729 = vmatmul.mubr.bf16.gmra.mrb[28].mxu0 %v12978_v55  ;;  %v24141_v55 = vld [vmem:[#allocation8_spill] sm:$0xff] }
 0x35b   :  { %14732 = vmatprep.mubr.bf16.mxu0 %v24123_v12  ;;  %v24142_v12 = vld [vmem:[#allocation9_spill] sm:$0xff] }
 0x362   :  { %14733 = vmatmul.mubr.bf16.gmra.mrb[32].mxu0 %v24124_v14  ;;  %v16774_v14 = vld [vmem:[%s23627_s1 + $0x228] sm:$0xff]  }
 0x363   :  { %14736 = vmatprep.mubr.bf16.mxu0 %v24125_v50  ;;  %v24143_v50 = vld [vmem:[#allocation10_spill] sm:$0xff] }
 0x36a   :  { %14737 = vmatmul.mubr.bf16.gmra.mrb[36].mxu0 %v24126_v8  ;;  %v24144_v8 = vld [vmem:[#allocation11_spill] sm:$0xff] }
 0x36b   :  { %14740 = vmatprep.mubr.bf16.mxu0 %v24127_v59  ;;  %v16775_v59 = vld [vmem:[%s23627_s1 + $0x230] sm:$0xff]  }
 0x372   :  { %14741 = vmatmul.mubr.bf16.gmra.mrb[40].mxu0 %v24128_v53  ;;  %v16776_v53 = vld [vmem:[%s23627_s1 + $0x238] sm:$0xff]  }
 0x373   :  { %14744 = vmatprep.mubr.bf16.mxu0 %v24129_v52  ;;  %v24145_v52 = vld [vmem:[#allocation12_spill] sm:$0xff] }
 0x37a   :  { %14745 = vmatmul.mubr.bf16.gmra.mrb[44].mxu0 %v24130_v26  ;;  %v24146_v26 = vld [vmem:[#allocation13_spill] sm:$0xff] }
 0x37b   :  { %14748 = vmatprep.mubr.bf16.mxu0 %v24131_v46  ;;  %v24147_v46 = vld [vmem:[#allocation14_spill] sm:$0xff] }
 0x382   :  { %14749 = vmatmul.mubr.bf16.gmra.mrb[48].mxu0 %v24132_v49  ;;  %v4515_v49 = vshrl.u32 %v18893_v13, 16 }
 0x383   :  { %14752 = vmatprep.mubr.bf16.mxu0 %v24133_v39  ;;  %v4518_v39 = vshll.u32 %v18893_v13, 16 }
 0x38a   :  { %14753 = vmatmul.mubr.bf16.gmra.mrb[52].mxu0 %v24134_v48  ;;  %v4528_v48 = vshrl.u32 %v18898_v15, 16 }
 0x38b   :  { %14756 = vmatprep.mubr.bf16.mxu0 %v24135_v40  ;;  %v24148_v40 = vld [vmem:[#allocation15_spill] sm:$0xff] }
 0x392   :  { %14757 = vmatmul.mubr.bf16.gmra.mrb[56].mxu0 %v24136_v21  ;;  %v4524_v21 = vshll.u32 %v18898_v15, 16 }
 0x393   :  { %14760 = vmatprep.mubr.bf16.mxu0 %v24137_v20  ;;  %v4517_v20 = vrot.slane %v4515_v49, 4  ;;  %v24154_v49 = vld [vmem:[#allocation21_spill] sm:$0xff] }
 0x39a   :  { %14761 = vmatmul.mubr.bf16.gmra.mrb[60].mxu0 %v12979_v18  ;;  %v4520_v18 = vrot.slane %v4518_v39, 5  ;;  %v24155_v39 = vld [vmem:[#allocation22_spill] sm:$0xff] }
 0x39b   :  { %14780 = vmatprep.mubr.bf16.mxu0 %v24138_v56  ;;  %v4526_v56 = vrot.slane %v4524_v21, 5  ;;  %v24158_v21 = vld [vmem:[#allocation25_spill] sm:$0xff] }
 0x3a2   :  { %14781 = vmatmul.mubr.bf16.vlgmr.msra.gmra.mrb[0].mxu0 %v24139_v38  ;;  %v18968_v38 = vld [vmem:[%s23628_s0 + $0xd4] sm:$0xf] }
 0x3a3   :  { %14845 = vmatpush3.bf16.msra.mxu0 %v16769_v7  ;;  %14784 = vmatprep.mubr.bf16.mxu0 %v24140_v51  ;;  %v16773_v7 = vld [vmem:[%s23627_s1 + $0x220] sm:$0xff]   ;;  %v24149_v51 = vld [vmem:[#allocation16_spill] sm:$0xff] }
 0x3a4   :  { %14846 = vmatprep.subr.bf16.mxu0 %v16770_v5 }
 0x3a7   :  { %14847 = vmatpush3.bf16.msra.mxu0 %v16770_v5  ;;  %v4530_v5 = vrot.slane %v4528_v48, 4  ;;  %v24156_v48 = vld [vmem:[#allocation23_spill] sm:$0xff] }
 0x3a8   :  { %14848 = vmatprep.subr.bf16.mxu0 %v16771_v19 }
 0x3aa   :  { %14785 = vmatmul.mubr.bf16.gmra.mrb[4].mxu0 %v24141_v55  ;;  %v4531_v55 = vor.u32 %v4530_v5, %v4526_v56  ;;  %v24162_v5 = vld [vmem:[#allocation31_spill] sm:$0xff] }
 0x3ab   :  { %14788 = vmatprep.mubr.bf16.mxu0 %v24142_v12  ;;  %14849 = vmatpush3.bf16.msra.mxu0 %v16771_v19  ;;  %v24150_v19 = vld [vmem:[#allocation17_spill] sm:$0xff]  ;;  %v4534_v12 = vshll.u32 %v18968_v38, 16 }
 0x3ac   :  { %14850 = vmatprep.subr.bf16.mxu0 %v16772_v41 }
 0x3af   :  { %14851 = vmatpush3.bf16.msra.mxu0 %v16772_v41  ;;  %v4521_v41 = vor.u32 %v4520_v18, %v4517_v20  ;;  %v24159_v20 = vld [vmem:[#allocation26_spill] sm:$0xff]  ;;  %v24160_v18 = vld [vmem:[#allocation28_spill] sm:$0xff] }
 0x3b0   :  { %14852 = vmatprep.subr.bf16.mxu0 %v16773_v7 }
 0x3b2   :  { %14789 = vmatmul.mubr.bf16.gmra.mrb[8].mxu0 %v24143_v50  ;;  %v4536_v50 = vrot.slane %v4534_v12, 5  ;;  %v4548_v12 = vshll.u32 %v18925_v6, 16 }
 0x3b3   :  { %14792 = vmatprep.mubr.bf16.mxu0 %v24144_v8  ;;  %14853 = vmatpush3.bf16.msra.mxu0 %v16773_v7  ;;  %v4522_v7 = vrot.slane %v4521_v41, 4  ;;  %v24151_v8 = vld [vmem:[#allocation18_spill] sm:$0xff]  ;;  %v4552_v41 = vshrl.u32 %v18925_v6, 16 }
 0x3b4   :  { %14854 = vmatprep.subr.bf16.mxu0 %v16774_v14 }
 0x3b7   :  { %14855 = vmatpush3.bf16.msra.mxu0 %v16774_v14  ;;  %v4532_v14 = vrot.slane %v4531_v55, 4  ;;  %v24163_v55 = vld [vmem:[#allocation34_spill] sm:$0xff] }
 0x3b8   :  { %14856 = vmatprep.subr.bf16.mxu0 %v16775_v59 }
 0x3ba   :  { %14793 = vmatmul.mubr.bf16.gmra.mrb[12].mxu0 %v24145_v52  ;;  %v4537_v52 = vsel %vm17138_vm2, %v4532_v14, %v4536_v50  ;;  %v4550_v50 = vrot.slane %v4548_v12, 5 }
 0x3bb   :  { %14796 = vmatprep.mubr.bf16.mxu0 %v24146_v26  ;;  %14857 = vmatpush3.bf16.msra.mxu0 %v16775_v59  ;;  %v24152_v59 = vld [vmem:[#allocation56_spill] sm:$0xff] }
 0x3bc   :  { %14858 = vmatprep.subr.bf16.mxu0 %v16776_v53 }
 0x3bf   :  { %14859 = vmatpush3.bf16.msra.mxu0 %v16776_v53  ;;  %v4527_v53 = vsel %vm17138_vm2, %v4522_v7, %v4526_v56  ;;  %v24161_v56 = vld [vmem:[#allocation29_spill] sm:$0xff] }
 0x3c0   :  { %v13004_v26 = vcombine.low %v4527_v53, %v4537_v52 }
 0x3c2   :  { %14797 = vmatmul.mubr.bf16.gmra.mrb[16].mxu0 %v24147_v46  ;;  %v24153_v46 = vld [vmem:[#allocation20_spill] sm:$0xff] }
 0x3c3   :  { %14800 = vmatprep.mubr.bf16.mxu0 %v24148_v40  ;;  %v24157_v40 = vld [vmem:[#allocation24_spill] sm:$0xff] }
 0x3ca   :  { %14801 = vmatmul.mubr.bf16.gmra.mrb[20].mxu0 %v24149_v51  ;;  %v4539_v51 = vshrl.u32 %v18920_v60, 16 }
 0x3cb   :  { %14804 = vmatprep.mubr.bf16.mxu0 %v24150_v19  ;;  %v4542_v19 = vshll.u32 %v18920_v60, 16 }
 0x3cc   :  { %v4541_v7 = vrot.slane %v4539_v51, 4 }
 0x3cd   :  { %v4544_v14 = vrot.slane %v4542_v19, 5 }
 0x3cf   :  { %v4545_v53 = vor.u32 %v4544_v14, %v4541_v7 }
 0x3d2   :  { %14805 = vmatmul.mubr.bf16.gmra.mrb[24].mxu0 %v24151_v8  ;;  %v4554_v8 = vrot.slane %v4552_v41, 4 }
 0x3d3   :  { %14808 = vmatprep.mubr.bf16.mxu0 %v24152_v59  ;;  %v134_v59 = vld [vmem:[%s23628_s0 + $0x1ac] sm:$0xf] }
 0x3d4   :  { %v4555_v52 = vor.u32 %v4554_v8, %v4550_v50 }
 0x3da   :  { %14809 = vmatmul.mubr.bf16.gmra.mrb[28].mxu0 %v13004_v26  ;;  %v4558_v26 = vshll.u32 %v134_v59, 16 }
 0x3db   :  { %14812 = vmatprep.mubr.bf16.mxu0 %v24153_v46  ;;  %v4546_v46 = vrot.slane %v4545_v53, 4 }
 0x3e2   :  { %14813 = vmatmul.mubr.bf16.gmra.mrb[32].mxu0 %v24154_v49  ;;  %v4556_v49 = vrot.slane %v4555_v52, 4 }
 0x3e3   :  { %14816 = vmatprep.mubr.bf16.mxu0 %v24155_v39  ;;  %v4560_v39 = vrot.slane %v4558_v26, 5 }
 0x3ea   :  { %14817 = vmatmul.mubr.bf16.gmra.mrb[36].mxu0 %v24156_v48  ;;  %v4551_v48 = vsel %vm17138_vm2, %v4546_v46, %v4550_v50 }
 0x3eb   :  { %14820 = vmatprep.mubr.bf16.mxu0 %v24157_v40  ;;  %v4561_v40 = vsel %vm17138_vm2, %v4556_v49, %v4560_v39 }
 0x3f2   :  { %14821 = vmatmul.mubr.bf16.gmra.mrb[40].mxu0 %v24158_v21  ;;  %v13005_v21 = vcombine.low %v4551_v48, %v4561_v40 }
 0x3f3   :  { %14824 = vmatprep.mubr.bf16.mxu0 %v24159_v20 }
 0x3fa   :  { %14825 = vmatmul.mubr.bf16.gmra.mrb[44].mxu0 %v24160_v18 }
 0x3fb   :  { %14828 = vmatprep.mubr.bf16.mxu0 %v24161_v56 }
 0x402   :  { %14829 = vmatmul.mubr.bf16.gmra.mrb[48].mxu0 %v24162_v5 }
 0x403   :  { %14832 = vmatprep.mubr.bf16.mxu0 %v24163_v55 }
 0x40a   :  { %14833 = vmatmul.mubr.bf16.gmra.mrb[52].mxu0 %v24114_v34 }
 0x40b   :  { %14836 = vmatprep.mubr.bf16.mxu0 %v24115_v62 }
 0x412   :  { %14837 = vmatmul.mubr.bf16.gmra.mrb[56].mxu0 %v24116_v1 }
 0x413   :  { %14840 = vmatprep.mubr.bf16.mxu0 %v18773_v43 }
 0x41a   :  { %14841 = vmatmul.mubr.bf16.gmra.mrb[60].mxu0 %v13005_v21 }
 0x41b   :  { %14860 = vmatprep.mubr.bf16.mxu0 %v18185_v47  ;;  %v4992_v47 = vrot.slane %v18898_v15, 5 }
 0x422   :  { %14861 = vmatmul.mubr.bf16.vlgmr.msra.gmra.mrb[0].mxu0 %v18214_v57  ;;  %v13014_v57 = vrot.slane %v18893_v13, 9 }
 0x423   :  { %14864 = vmatprep.mubr.bf16.mxu0 %v18216_v16  ;;  %v4994_v16 = vrot.slane %v4992_v47, 4 }
 0x42a   :  { %14865 = vmatmul.mubr.bf16.gmra.mrb[4].mxu0 %v18244_v61  ;;  %v4995_v61 = vrot.slane %v18968_v38, 5 }
 0x42b   :  { %14868 = vmatprep.mubr.bf16.mxu0 %v18246_v31  ;;  %v4993_v31 = vsel %vm18148_vm5, %v13014_v57, %v4992_v47 }
 0x432   :  { %14869 = vmatmul.mubr.bf16.gmra.mrb[8].mxu0 %v18274_v58  ;;  %v4996_v58 = vsel %vm18148_vm5, %v4994_v16, %v4995_v61 }
 0x433   :  { %14872 = vmatprep.mubr.bf16.mxu0 %v18276_v45  ;;  %v13032_v45 = vcombine.low %v4993_v31, %v4996_v58 }
 0x43a   :  { %14873 = vmatmul.mubr.bf16.gmra.mrb[12].mxu0 %v18306_v32  ;;  %v4999_v32 = vrot.slane %v18925_v6, 5 }
 0x43b   :  { %14876 = vmatprep.mubr.bf16.mxu0 %v18308_v25  ;;  %v13015_v25 = vrot.slane %v18920_v60, 9 }
 0x442   :  { %14877 = vmatmul.mubr.bf16.gmra.mrb[16].mxu0 %v18331_v27  ;;  %v5001_v27 = vrot.slane %v4999_v32, 4 }
 0x443   :  { %14880 = vmatprep.mubr.bf16.mxu0 %v18333_v35  ;;  %v5002_v35 = vrot.slane %v134_v59, 5 }
 0x44a   :  { %14881 = vmatmul.mubr.bf16.gmra.mrb[20].mxu0 %v18355_v23  ;;  %v5000_v23 = vsel %vm18148_vm5, %v13015_v25, %v4999_v32 }
 0x44b   :  { %14884 = vmatprep.mubr.bf16.mxu0 %v18357_v0  ;;  %v5003_v0 = vsel %vm18148_vm5, %v5001_v27, %v5002_v35 }
 0x452   :  { %14885 = vmatmul.mubr.bf16.gmra.mrb[24].mxu0 %v18383_v9  ;;  %v13033_v9 = vcombine.low %v5000_v23, %v5003_v0 }
 0x453   :  { %14888 = vmatprep.mubr.bf16.mxu0 %v18823_v30 }
 0x45a   :  { %14889 = vmatmul.mubr.bf16.gmra.mrb[28].mxu0 %v13032_v45 }
 0x45b   :  { %14892 = vmatprep.mubr.bf16.mxu0 %v18412_v54 }
 0x462   :  { %14893 = vmatmul.mubr.bf16.gmra.mrb[32].mxu0 %v18442_v2 }
 0x463   :  { %14896 = vmatprep.mubr.bf16.mxu0 %v18444_v3 }
 0x46a   :  { %14897 = vmatmul.mubr.bf16.gmra.mrb[36].mxu0 %v18474_v29 }
 0x46b   :  { %14900 = vmatprep.mubr.bf16.mxu0 %v18476_v63 }
 0x472   :  { %14901 = vmatmul.mubr.bf16.gmra.mrb[40].mxu0 %v18506_v24 }
 0x473   :  { %14904 = vmatprep.mubr.bf16.mxu0 %v18508_v37 }
 0x47a   :  { %14905 = vmatmul.mubr.bf16.gmra.mrb[44].mxu0 %v18538_v33 }
 0x47b   :  { %14908 = vmatprep.mubr.bf16.mxu0 %v24117_v28 }
 0x482   :  { %14909 = vmatmul.mubr.bf16.gmra.mrb[48].mxu0 %v18564_v22 }
 0x483   :  { %14912 = vmatprep.mubr.bf16.mxu0 %v18566_v42 }
 0x48a   :  { %14913 = vmatmul.mubr.bf16.gmra.mrb[52].mxu0 %v18585_v11 }
 0x48b   :  { %14916 = vmatprep.mubr.bf16.mxu0 %v18587_v4 }
 0x492   :  { %14917 = vmatmul.mubr.bf16.gmra.mrb[56].mxu0 %v18597_v17 }
 0x493   :  { %14920 = vmatprep.mubr.bf16.mxu0 %v18848_v10 }
 0x49a   :  { %14921 = vmatmul.mubr.bf16.gmra.mrb[60].mxu0 %v13033_v9 }
 0x4f5   :  { %v19048_v54 = vpop.f32.mrb[0].mxu0 }
 0x4f6   :  { %v19050_v2 = vpop.f32.mrb[1].mxu0 }
 0x4f7   :  { %v19052_v3 = vpop.f32.mrb[2].mxu0 }
 0x4f8   :  { %v19054_v29 = vpop.f32.mrb[3].mxu0 }
 0x4f9   :  { %v5430_v63 = vadd.f32 %v19054_v29, %v19050_v2 }
 0x4fb   :  { %v5431_v24 = vadd.f32 %v19048_v54, %v5430_v63 }
 0x4fd   :  { %v19059_v37 = vpop.f32.mrb[4].mxu0  ;;  %v5432_v33 = vadd.f32 %v19052_v3, %v5431_v24 }
 0x4fe   :  { %v19062_v22 = vpop.f32.mrb[5].mxu0 }
 0x4ff   :  { %v5433_v42 = vadd.f32 %v5432_v33, %v19062_v22  ;;  %v19065_v11 = vpop.f32.mrb[6].mxu0 }
 0x500   :  { %v19067_v4 = vpop.f32.mrb[7].mxu0 }
 0x501   :  { %v5434_v17 = vadd.f32 %v5433_v42, %v19067_v4 }
 0x503   :  { %v5435_v34 = vadd.f32 %v19059_v37, %v5434_v17 }
 0x505   :  { %v19071_v43 = vpop.f32.mrb[8].mxu0  ;;  %v5436_v62 = vadd.f32 %v19065_v11, %v5435_v34 }
 0x506   :  { %v19074_v1 = vpop.f32.mrb[9].mxu0 }
 0x507   :  { %v5437_v30 = vadd.f32 %v5436_v62, %v19074_v1  ;;  %v19077_v28 = vpop.f32.mrb[10].mxu0 }
 0x508   :  { %v19079_v10 = vpop.f32.mrb[11].mxu0 }
 0x509   :  { %v5438_v13 = vadd.f32 %v5437_v30, %v19079_v10 }
 0x50b   :  { %v5439_v15 = vadd.f32 %v19071_v43, %v5438_v13 }
 0x50d   :  { %v19083_v60 = vpop.f32.mrb[12].mxu0  ;;  %v5440_v6 = vadd.f32 %v19077_v28, %v5439_v15 }
 0x50e   :  { %v19086_v38 = vpop.f32.mrb[13].mxu0 }
 0x50f   :  { %v5441_v20 = vadd.f32 %v5440_v6, %v19086_v38  ;;  %v19089_v18 = vpop.f32.mrb[14].mxu0 }
 0x510   :  { %v19091_v56 = vpop.f32.mrb[15].mxu0 }
 0x511   :  { %v5442_v5 = vadd.f32 %v5441_v20, %v19091_v56 }
 0x513   :  { %v5443_v51 = vadd.f32 %v19083_v60, %v5442_v5 }
 0x515   :  { %v19095_v19 = vpop.f32.mrb[16].mxu0  ;;  %v5444_v41 = vadd.f32 %v19089_v18, %v5443_v51 }
 0x516   :  { %v19098_v55 = vpop.f32.mrb[17].mxu0 }
 0x517   :  { %v5445_v12 = vadd.f32 %v5444_v41, %v19098_v55  ;;  %v19101_v7 = vpop.f32.mrb[18].mxu0 }
 0x518   :  { %v19103_v14 = vpop.f32.mrb[19].mxu0 }
 0x519   :  { %v5446_v50 = vadd.f32 %v5445_v12, %v19103_v14 }
 0x51b   :  { %v5447_v8 = vadd.f32 %v19095_v19, %v5446_v50 }
 0x51d   :  { %v19107_v59 = vpop.f32.mrb[20].mxu0  ;;  %v5448_v53 = vadd.f32 %v19101_v7, %v5447_v8 }
 0x51e   :  { %v19110_v52 = vpop.f32.mrb[21].mxu0 }
 0x51f   :  { %v5449_v26 = vadd.f32 %v5448_v53, %v19110_v52  ;;  %v19113_v46 = vpop.f32.mrb[22].mxu0 }
 0x520   :  { %v19115_v49 = vpop.f32.mrb[23].mxu0 }
 0x521   :  { %v5450_v39 = vadd.f32 %v5449_v26, %v19115_v49 }
 0x523   :  { %v5451_v48 = vadd.f32 %v19107_v59, %v5450_v39 }
 0x525   :  { %v19119_v40 = vpop.f32.mrb[24].mxu0  ;;  %v5452_v21 = vadd.f32 %v19113_v46, %v5451_v48 }
 0x526   :  { %v19122_v47 = vpop.f32.mrb[25].mxu0 }
 0x527   :  { %v5453_v57 = vadd.f32 %v5452_v21, %v19122_v47  ;;  %v19125_v16 = vpop.f32.mrb[26].mxu0 }
 0x528   :  { %v19127_v61 = vpop.f32.mrb[27].mxu0 }
 0x529   :  { %v5454_v31 = vadd.f32 %v5453_v57, %v19127_v61 }
 0x52b   :  { %v5455_v58 = vadd.f32 %v19119_v40, %v5454_v31 }
 0x52d   :  { %v19131_v45 = vpop.f32.mrb[28].mxu0  ;;  %v5456_v32 = vadd.f32 %v19125_v16, %v5455_v58 }
 0x52e   :  { %v19134_v25 = vpop.f32.mrb[29].mxu0 }
 0x52f   :  { %v5457_v27 = vadd.f32 %v5456_v32, %v19134_v25  ;;  %v19137_v35 = vpop.f32.mrb[30].mxu0 }
 0x530   :  { %v19139_v23 = vpop.f32.mrb[31].mxu0 }
 0x531   :  { %v5458_v0 = vadd.f32 %v5457_v27, %v19139_v23 }
 0x533   :  { %v5459_v9 = vadd.f32 %v19131_v45, %v5458_v0 }
 0x535   :  { %v19143_v63 = vpop.f32.mrb[32].mxu0  ;;  %v5460_v24 = vadd.f32 %v19137_v35, %v5459_v9 }
 0x536   :  { %v19146_v33 = vpop.f32.mrb[33].mxu0 }
 0x537   :  { %v5461_v42 = vadd.f32 %v5460_v24, %v19146_v33  ;;  %v19149_v17 = vpop.f32.mrb[34].mxu0 }
 0x538   :  { %v19151_v34 = vpop.f32.mrb[35].mxu0 }
 0x539   :  { %v5462_v62 = vadd.f32 %v5461_v42, %v19151_v34 }
 0x53b   :  { %v5463_v30 = vadd.f32 %v19143_v63, %v5462_v62 }
 0x53d   :  { %v19155_v13 = vpop.f32.mrb[36].mxu0  ;;  %v5464_v15 = vadd.f32 %v19149_v17, %v5463_v30 }
 0x53e   :  { %v19158_v6 = vpop.f32.mrb[37].mxu0 }
 0x53f   :  { %v5465_v20 = vadd.f32 %v5464_v15, %v19158_v6  ;;  %v19161_v5 = vpop.f32.mrb[38].mxu0 }
 0x540   :  { %v19163_v51 = vpop.f32.mrb[39].mxu0 }
 0x541   :  { %v5466_v41 = vadd.f32 %v5465_v20, %v19163_v51 }
 0x543   :  { %v5467_v12 = vadd.f32 %v19155_v13, %v5466_v41 }
 0x545   :  { %v19167_v50 = vpop.f32.mrb[40].mxu0  ;;  %v5468_v8 = vadd.f32 %v19161_v5, %v5467_v12 }
 0x546   :  { %v19170_v53 = vpop.f32.mrb[41].mxu0 }
 0x547   :  { %v5469_v26 = vadd.f32 %v5468_v8, %v19170_v53  ;;  %v19173_v39 = vpop.f32.mrb[42].mxu0 }
 0x548   :  { %v19175_v48 = vpop.f32.mrb[43].mxu0 }
 0x549   :  { %v5470_v21 = vadd.f32 %v5469_v26, %v19175_v48 }
 0x54b   :  { %v5471_v57 = vadd.f32 %v19167_v50, %v5470_v21 }
 0x54d   :  { %v19179_v31 = vpop.f32.mrb[44].mxu0  ;;  %v5472_v58 = vadd.f32 %v19173_v39, %v5471_v57 }
 0x54e   :  { %v19182_v32 = vpop.f32.mrb[45].mxu0 }
 0x54f   :  { %v5473_v27 = vadd.f32 %v5472_v58, %v19182_v32  ;;  %v19185_v0 = vpop.f32.mrb[46].mxu0 }
 0x550   :  { %v19187_v9 = vpop.f32.mrb[47].mxu0 }
 0x551   :  { %v5474_v24 = vadd.f32 %v5473_v27, %v19187_v9 }
 0x553   :  { %v5475_v42 = vadd.f32 %v19179_v31, %v5474_v24 }
 0x555   :  { %v19191_v62 = vpop.f32.mrb[48].mxu0  ;;  %v5476_v30 = vadd.f32 %v19185_v0, %v5475_v42 }
 0x556   :  { %24164 = vst [vmem:[#allocation55_spill] sm:$0xff] %v19191_v62  ;;  %v19194_v15 = vpop.f32.mrb[49].mxu0 }
 0x557   :  { %24165 = vst [vmem:[#allocation27_spill] sm:$0xff] %v19194_v15  ;;  %v5477_v20 = vadd.f32 %v5476_v30, %v19194_v15  ;;  %v19197_v41 = vpop.f32.mrb[50].mxu0 }
 0x558   :  { %24166 = vst [vmem:[#allocation30_spill] sm:$0xff] %v19197_v41  ;;  %v19199_v12 = vpop.f32.mrb[51].mxu0 }
 0x559   :  { %24167 = vst [vmem:[#allocation32_spill] sm:$0xff] %v19199_v12  ;;  %v5478_v8 = vadd.f32 %v5477_v20, %v19199_v12 }
 0x55b   :  { %v5479_v26 = vadd.f32 %v19191_v62, %v5478_v8 }
 0x55d   :  { %v19203_v21 = vpop.f32.mrb[52].mxu0  ;;  %v5480_v57 = vadd.f32 %v19197_v41, %v5479_v26 }
 0x55e   :  { %24168 = vst [vmem:[#allocation33_spill] sm:$0xff] %v19203_v21  ;;  %v19206_v58 = vpop.f32.mrb[53].mxu0 }
 0x55f   :  { %24169 = vst [vmem:[#allocation38_spill] sm:$0xff] %v19206_v58  ;;  %v5481_v27 = vadd.f32 %v5480_v57, %v19206_v58  ;;  %v19209_v24 = vpop.f32.mrb[54].mxu0 }
 0x560   :  { %24170 = vst [vmem:[#allocation39_spill] sm:$0xff] %v19209_v24  ;;  %v19211_v42 = vpop.f32.mrb[55].mxu0 }
 0x561   :  { %24171 = vst [vmem:[#allocation40_spill] sm:$0xff] %v19211_v42  ;;  %v5482_v30 = vadd.f32 %v5481_v27, %v19211_v42 }
 0x563   :  { %v5483_v36 = vadd.f32 %v19203_v21, %v5482_v30 }
 0x565   :  { %v19215_v44 = vpop.f32.mrb[56].mxu0  ;;  %v5484_v20 = vadd.f32 %v19209_v24, %v5483_v36 }
 0x566   :  { %24172 = vst [vmem:[#allocation41_spill] sm:$0xff] %v19215_v44  ;;  %v19218_v8 = vpop.f32.mrb[57].mxu0 }
 0x567   :  { %24173 = vst [vmem:[#allocation42_spill] sm:$0xff] %v19218_v8  ;;  %v5485_v26 = vadd.f32 %v5484_v20, %v19218_v8  ;;  %v19221_v41 = vpop.f32.mrb[58].mxu0 }
 0x568   :  { %24174 = vst [vmem:[#allocation43_spill] sm:$0xff] %v19221_v41  ;;  %v19223_v62 = vpop.f32.mrb[59].mxu0 }
 0x569   :  { %24175 = vst [vmem:[#allocation44_spill] sm:$0xff] %v19223_v62  ;;  %v5486_v57 = vadd.f32 %v5485_v26, %v19223_v62 }
 0x56b   :  { %v5487_v58 = vadd.f32 %v19215_v44, %v5486_v57 }
 0x56d   :  { %v19227_v12 = vpop.f32.mrb[60].mxu0  ;;  %v5488_v27 = vadd.f32 %v19221_v41, %v5487_v58 }
 0x56e   :  { %v19230_v30 = vpop.f32.mrb[61].mxu0 }
 0x56f   :  { %24176 = vst [vmem:[#allocation45_spill] sm:$0xff] %v19230_v30  ;;  %v5489_v36 = vadd.f32 %v5488_v27, %v19230_v30  ;;  %v19233_v24 = vpop.f32.mrb[62].mxu0 }
 0x570   :  { %v19235_v21 = vpop.f32.mrb[63].mxu0 }
 0x571   :  { %v5490_v20 = vadd.f32 %v5489_v36, %v19235_v21 }
 0x573   :  { %v5491_v8 = vadd.f32 %v19227_v12, %v5490_v20  ;;  %v24190_v20 = vld [vmem:[#allocation30_spill] sm:$0xff] }
 0x575   :  { %v5492_v26 = vadd.f32 %v19233_v24, %v5491_v8  ;;  %v24188_v8 = vld [vmem:[#allocation55_spill] sm:$0xff] }
 0x577   :  { %v5493_v62 = vrot.slane %v5492_v26, 4 }
 0x579   :  { %v5494_v57 = vadd.f32 %v5493_v62, %v5492_v26  ;;  %v24192_v26 = vld [vmem:[#allocation38_spill] sm:$0xff] }
 0x57b   :  { %v5495_v44 = vrot.slane %v5494_v57, 2 }
 0x57d   :  { %v5496_v42 = vadd.f32 %v5495_v44, %v5494_v57  ;;  %v24194_v57 = vld [vmem:[#allocation40_spill] sm:$0xff] }
 0x57f   :  { %v5497_v15 = vrot.slane %v5496_v42, 1 }
 0x581   :  { %v5498_v58 = vadd.f32 %v5497_v15, %v5496_v42  ;;  %v24184_v15 = vld [vmem:[#allocation27_spill] sm:$0xff]  ;;  %v24186_v42 = vld [vmem:[#allocation32_spill] sm:$0xff] }
 0x583   :  { %v19240_v41 = vmul.f32 0.001953125, %v5498_v58 }
 0x585   :  { %v19244_v27 = vsub.f32 %v19050_v2, %v19240_v41  ;;  %v19248_v30 = vsub.f32 %v19054_v29, %v19240_v41  ;;  %v19252_v36 = vsub.f32 %v19048_v54, %v19240_v41  ;;  %v19256_v62 = vsub.f32 %v19052_v3, %v19240_v41 }
 0x586   :  { %v19260_v44 = vsub.f32 %v19062_v22, %v19240_v41  ;;  %v19264_v2 = vsub.f32 %v19067_v4, %v19240_v41  ;;  %v19268_v29 = vsub.f32 %v19059_v37, %v19240_v41  ;;  %v19272_v54 = vsub.f32 %v19065_v11, %v19240_v41 }
 0x587   :  { %24177 = vst [vmem:[#allocation46_spill] sm:$0xff] %v19244_v27  ;;  %24178 = vst [vmem:[#allocation47_spill] sm:$0xff] %v19248_v30  ;;  %v19276_v3 = vsub.f32 %v19074_v1, %v19240_v41  ;;  %v19280_v22 = vsub.f32 %v19079_v10, %v19240_v41  ;;  %v19284_v4 = vsub.f32 %v19071_v43, %v19240_v41 }
 0x588   :  { %24179 = vst [vmem:[#allocation48_spill] sm:$0xff] %v19252_v36  ;;  %v19288_v37 = vsub.f32 %v19077_v28, %v19240_v41  ;;  %v19292_v11 = vsub.f32 %v19086_v38, %v19240_v41  ;;  %v19296_v1 = vsub.f32 %v19091_v56, %v19240_v41  ;;  %v19300_v10 = vsub.f32 %v19083_v60, %v19240_v41 }
 0x589   :  { %v19304_v43 = vsub.f32 %v19089_v18, %v19240_v41  ;;  %v19308_v28 = vsub.f32 %v19098_v55, %v19240_v41  ;;  %v19312_v38 = vsub.f32 %v19103_v14, %v19240_v41  ;;  %v19316_v56 = vsub.f32 %v19095_v19, %v19240_v41 }
 0x58a   :  { %v19320_v60 = vsub.f32 %v19101_v7, %v19240_v41  ;;  %v19324_v18 = vsub.f32 %v19110_v52, %v19240_v41  ;;  %v19328_v55 = vsub.f32 %v19115_v49, %v19240_v41  ;;  %v19332_v14 = vsub.f32 %v19107_v59, %v19240_v41 }
 0x58b   :  { %v19336_v19 = vsub.f32 %v19113_v46, %v19240_v41  ;;  %v19340_v7 = vsub.f32 %v19122_v47, %v19240_v41  ;;  %v19344_v52 = vsub.f32 %v19127_v61, %v19240_v41  ;;  %v19348_v49 = vsub.f32 %v19119_v40, %v19240_v41 }
 0x58c   :  { %v19352_v59 = vsub.f32 %v19125_v16, %v19240_v41  ;;  %v19356_v46 = vsub.f32 %v19134_v25, %v19240_v41  ;;  %v19360_v47 = vsub.f32 %v19139_v23, %v19240_v41  ;;  %v19364_v61 = vsub.f32 %v19131_v45, %v19240_v41 }
 0x58d   :  { %v19368_v40 = vsub.f32 %v19137_v35, %v19240_v41  ;;  %v19372_v16 = vsub.f32 %v19146_v33, %v19240_v41  ;;  %v19376_v25 = vsub.f32 %v19151_v34, %v19240_v41  ;;  %v19380_v23 = vsub.f32 %v19143_v63, %v19240_v41 }
 0x58e   :  { %v19384_v45 = vsub.f32 %v19149_v17, %v19240_v41  ;;  %v19388_v35 = vsub.f32 %v19158_v6, %v19240_v41  ;;  %v19392_v33 = vsub.f32 %v19163_v51, %v19240_v41  ;;  %v19396_v34 = vsub.f32 %v19155_v13, %v19240_v41 }
 0x58f   :  { %v19400_v63 = vsub.f32 %v19161_v5, %v19240_v41  ;;  %v19404_v17 = vsub.f32 %v19170_v53, %v19240_v41  ;;  %v19408_v6 = vsub.f32 %v19175_v48, %v19240_v41  ;;  %v19412_v51 = vsub.f32 %v19167_v50, %v19240_v41 }
 0x590   :  { %v19416_v13 = vsub.f32 %v19173_v39, %v19240_v41  ;;  %v19420_v5 = vsub.f32 %v19182_v32, %v19240_v41  ;;  %v19424_v53 = vsub.f32 %v19187_v9, %v19240_v41  ;;  %v19428_v48 = vsub.f32 %v19179_v31, %v19240_v41 }
 0x591   :  { %v19432_v50 = vsub.f32 %v19185_v0, %v19240_v41  ;;  %v19436_v39 = vsub.f32 %v24184_v15, %v19240_v41  ;;  %v19440_v32 = vsub.f32 %v24186_v42, %v19240_v41  ;;  %v19444_v9 = vsub.f32 %v24188_v8, %v19240_v41  ;;  %v24196_v15 = vld [vmem:[#allocation33_spill] sm:$0xff] }
 0x592   :  { %24180 = vst [vmem:[#allocation4_spill] sm:$0xff] %v19420_v5  ;;  %24181 = vst [vmem:[#allocation19_spill] sm:$0xff] %v19424_v53  ;;  %v19448_v31 = vsub.f32 %v24190_v20, %v19240_v41  ;;  %v19452_v0 = vsub.f32 %v24192_v26, %v19240_v41  ;;  %v19456_v58 = vsub.f32 %v24194_v57, %v19240_v41 }
 0x593   :  { %24182 = vst [vmem:[#allocation35_spill] sm:$0xff] %v19428_v48  ;;  %24183 = vst [vmem:[#allocation36_spill] sm:$0xff] %v19432_v50  ;;  %v19460_v42 = vsub.f32 %v24196_v15, %v19240_v41 }
 0x594   :  { %24185 = vst [vmem:[#allocation37_spill] sm:$0xff] %v19436_v39  ;;  %24187 = vst [vmem:[#allocation53_spill] sm:$0xff] %v19440_v32  ;;  %v24198_v32 = vld [vmem:[#allocation39_spill] sm:$0xff] }
 0x595   :  { %24189 = vst [vmem:[#allocation49_spill] sm:$0xff] %v19444_v9  ;;  %24191 = vst [vmem:[#allocation51_spill] sm:$0xff] %v19448_v31  ;;  %v19464_v8 = vsub.f32 %v24198_v32, %v19240_v41  ;;  %v24200_v9 = vld [vmem:[#allocation42_spill] sm:$0xff]  ;;  %v24202_v31 = vld [vmem:[#allocation44_spill] sm:$0xff] }
 0x596   :  { %24193 = vst [vmem:[#allocation54_spill] sm:$0xff] %v19452_v0  ;;  %24195 = vst [vmem:[#allocation57_spill] sm:$0xff] %v19456_v58  ;;  %v19468_v20 = vsub.f32 %v24200_v9, %v19240_v41  ;;  %v19472_v26 = vsub.f32 %v24202_v31, %v19240_v41  ;;  %v24204_v0 = vld [vmem:[#allocation41_spill] sm:$0xff]  ;;  %v24206_v58 = vld [vmem:[#allocation43_spill] sm:$0xff]  ;;  %v19488_v9 = vsub.f32 %v19235_v21, %v19240_v41 }
 0x597   :  { %24197 = vst [vmem:[#allocation50_spill] sm:$0xff] %v19460_v42  ;;  %24199 = vst [vmem:[#allocation58_spill] sm:$0xff] %v19464_v8  ;;  %v19476_v57 = vsub.f32 %v24204_v0, %v19240_v41  ;;  %v19480_v15 = vsub.f32 %v24206_v58, %v19240_v41  ;;  %v24208_v42 = vld [vmem:[#allocation45_spill] sm:$0xff]  ;;  %v19492_v31 = vsub.f32 %v19227_v12, %v19240_v41 }
 0x598   :  { %24201 = vst [vmem:[#allocation59_spill] sm:$0xff] %v19468_v20  ;;  %24203 = vst [vmem:[#allocation60_spill] sm:$0xff] %v19472_v26  ;;  %v19484_v32 = vsub.f32 %v24208_v42, %v19240_v41  ;;  %v19496_v0 = vsub.f32 %v19233_v24, %v19240_v41  ;;  %v5564_v58 = vmul.f32 %v19244_v27, %v19244_v27 }
 0x599   :  { %24205 = vst [vmem:[#allocation61_spill] sm:$0xff] %v19476_v57  ;;  %24207 = vst [vmem:[#allocation62_spill] sm:$0xff] %v19480_v15  ;;  %v5565_v15 = vmul.f32 %v19248_v30, %v19248_v30  ;;  %v5566_v42 = vmul.f32 %v19252_v36, %v19252_v36  ;;  %v5567_v21 = vmul.f32 %v19256_v62, %v19256_v62 }
 0x59a   :  { %24209 = vst [vmem:[#allocation63_spill] sm:$0xff] %v19484_v32  ;;  %24210 = vst [vmem:[#allocation64_spill] sm:$0xff] %v19488_v9  ;;  %v5568_v12 = vmul.f32 %v19260_v44, %v19260_v44  ;;  %v5569_v41 = vmul.f32 %v19264_v2, %v19264_v2  ;;  %v5570_v27 = vmul.f32 %v19268_v29, %v19268_v29 }
 0x59b   :  { %24211 = vst [vmem:[#allocation65_spill] sm:$0xff] %v19492_v31  ;;  %v5628_v32 = vadd.f32 %v5565_v15, %v5564_v58  ;;  %v5571_v36 = vmul.f32 %v19272_v54, %v19272_v54  ;;  %v5572_v58 = vmul.f32 %v19276_v3, %v19276_v3 }
 0x59d   :  { %v5629_v9 = vadd.f32 %v5628_v32, %v5566_v42  ;;  %v5573_v42 = vmul.f32 %v19280_v22, %v19280_v22 }
 0x59f   :  { %v5630_v31 = vadd.f32 %v5629_v9, %v5567_v21  ;;  %v5574_v21 = vmul.f32 %v19284_v4, %v19284_v4 }
 0x5a1   :  { %v5631_v24 = vadd.f32 %v5630_v31, %v5568_v12  ;;  %v5575_v12 = vmul.f32 %v19288_v37, %v19288_v37 }
 0x5a3   :  { %v5632_v30 = vadd.f32 %v5631_v24, %v5569_v41  ;;  %v5576_v24 = vmul.f32 %v19292_v11, %v19292_v11 }
 0x5a5   :  { %v5633_v15 = vadd.f32 %v5632_v30, %v5570_v27  ;;  %v5577_v27 = vmul.f32 %v19296_v1, %v19296_v1 }
 0x5a7   :  { %v5634_v32 = vadd.f32 %v5633_v15, %v5571_v36  ;;  %v5578_v15 = vmul.f32 %v19300_v10, %v19300_v10 }
 0x5a9   :  { %v5635_v9 = vadd.f32 %v5634_v32, %v5572_v58  ;;  %v5579_v32 = vmul.f32 %v19304_v43, %v19304_v43 }
 0x5ab   :  { %v5636_v31 = vadd.f32 %v5635_v9, %v5573_v42  ;;  %v5580_v9 = vmul.f32 %v19308_v28, %v19308_v28 }
 0x5ad   :  { %v5637_v41 = vadd.f32 %v5636_v31, %v5574_v21  ;;  %v5581_v31 = vmul.f32 %v19312_v38, %v19312_v38 }
 0x5af   :  { %v5638_v30 = vadd.f32 %v5637_v41, %v5575_v12  ;;  %v5582_v41 = vmul.f32 %v19316_v56, %v19316_v56 }
 0x5b1   :  { %v5639_v36 = vadd.f32 %v5638_v30, %v5576_v24  ;;  %v5583_v30 = vmul.f32 %v19320_v60, %v19320_v60 }
 0x5b3   :  { %v5640_v58 = vadd.f32 %v5639_v36, %v5577_v27  ;;  %v5584_v36 = vmul.f32 %v19324_v18, %v19324_v18 }
 0x5b5   :  { %v5641_v42 = vadd.f32 %v5640_v58, %v5578_v15  ;;  %v5585_v58 = vmul.f32 %v19328_v55, %v19328_v55 }
 0x5b7   :  { %v5642_v21 = vadd.f32 %v5641_v42, %v5579_v32  ;;  %v5586_v42 = vmul.f32 %v19332_v14, %v19332_v14 }
 0x5b9   :  { %v5643_v12 = vadd.f32 %v5642_v21, %v5580_v9  ;;  %v5587_v21 = vmul.f32 %v19336_v19, %v19336_v19 }
 0x5bb   :  { %v5644_v24 = vadd.f32 %v5643_v12, %v5581_v31  ;;  %v5588_v12 = vmul.f32 %v19340_v7, %v19340_v7 }
 0x5bd   :  { %v5645_v27 = vadd.f32 %v5644_v24, %v5582_v41  ;;  %v5589_v24 = vmul.f32 %v19344_v52, %v19344_v52 }
 0x5bf   :  { %v5646_v15 = vadd.f32 %v5645_v27, %v5583_v30  ;;  %v5590_v27 = vmul.f32 %v19348_v49, %v19348_v49 }
 0x5c1   :  { %v5647_v32 = vadd.f32 %v5646_v15, %v5584_v36  ;;  %v5591_v15 = vmul.f32 %v19352_v59, %v19352_v59 }
 0x5c3   :  { %v5648_v9 = vadd.f32 %v5647_v32, %v5585_v58  ;;  %v5592_v32 = vmul.f32 %v19356_v46, %v19356_v46 }
 0x5c5   :  { %v5649_v31 = vadd.f32 %v5648_v9, %v5586_v42  ;;  %v5593_v9 = vmul.f32 %v19360_v47, %v19360_v47 }
 0x5c7   :  { %v5650_v41 = vadd.f32 %v5649_v31, %v5587_v21  ;;  %v5594_v31 = vmul.f32 %v19364_v61, %v19364_v61 }
 0x5c9   :  { %v5651_v30 = vadd.f32 %v5650_v41, %v5588_v12  ;;  %v5595_v41 = vmul.f32 %v19368_v40, %v19368_v40 }
 0x5cb   :  { %v5652_v36 = vadd.f32 %v5651_v30, %v5589_v24  ;;  %v5596_v30 = vmul.f32 %v19372_v16, %v19372_v16 }
 0x5cd   :  { %v5653_v58 = vadd.f32 %v5652_v36, %v5590_v27  ;;  %v5597_v36 = vmul.f32 %v19376_v25, %v19376_v25 }
 0x5cf   :  { %v5654_v42 = vadd.f32 %v5653_v58, %v5591_v15  ;;  %v5598_v58 = vmul.f32 %v19380_v23, %v19380_v23 }
 0x5d1   :  { %v5655_v21 = vadd.f32 %v5654_v42, %v5592_v32  ;;  %v5599_v42 = vmul.f32 %v19384_v45, %v19384_v45 }
 0x5d3   :  { %v5656_v12 = vadd.f32 %v5655_v21, %v5593_v9  ;;  %v5600_v21 = vmul.f32 %v19388_v35, %v19388_v35 }
 0x5d5   :  { %v5657_v24 = vadd.f32 %v5656_v12, %v5594_v31  ;;  %v5601_v12 = vmul.f32 %v19392_v33, %v19392_v33 }
 0x5d7   :  { %v5658_v27 = vadd.f32 %v5657_v24, %v5595_v41  ;;  %v5602_v24 = vmul.f32 %v19396_v34, %v19396_v34 }
 0x5d9   :  { %v5659_v15 = vadd.f32 %v5658_v27, %v5596_v30  ;;  %v5603_v27 = vmul.f32 %v19400_v63, %v19400_v63 }
 0x5db   :  { %v5660_v32 = vadd.f32 %v5659_v15, %v5597_v36  ;;  %v5604_v15 = vmul.f32 %v19404_v17, %v19404_v17 }
 0x5dd   :  { %v5661_v9 = vadd.f32 %v5660_v32, %v5598_v58  ;;  %v5605_v32 = vmul.f32 %v19408_v6, %v19408_v6 }
 0x5df   :  { %v5662_v31 = vadd.f32 %v5661_v9, %v5599_v42  ;;  %v5606_v9 = vmul.f32 %v19412_v51, %v19412_v51 }
 0x5e1   :  { %v5663_v41 = vadd.f32 %v5662_v31, %v5600_v21  ;;  %v5607_v31 = vmul.f32 %v19416_v13, %v19416_v13 }
 0x5e3   :  { %v5664_v30 = vadd.f32 %v5663_v41, %v5601_v12  ;;  %v5608_v41 = vmul.f32 %v19420_v5, %v19420_v5 }
 0x5e5   :  { %v5665_v36 = vadd.f32 %v5664_v30, %v5602_v24  ;;  %v5609_v30 = vmul.f32 %v19424_v53, %v19424_v53 }
 0x5e7   :  { %v5666_v58 = vadd.f32 %v5665_v36, %v5603_v27  ;;  %v5610_v36 = vmul.f32 %v19428_v48, %v19428_v48 }
 0x5e9   :  { %v5667_v42 = vadd.f32 %v5666_v58, %v5604_v15  ;;  %v5611_v58 = vmul.f32 %v19432_v50, %v19432_v50 }
 0x5eb   :  { %v5668_v21 = vadd.f32 %v5667_v42, %v5605_v32  ;;  %v5612_v42 = vmul.f32 %v19436_v39, %v19436_v39 }
 0x5ed   :  { %v5669_v12 = vadd.f32 %v5668_v21, %v5606_v9  ;;  %v24212_v21 = vld [vmem:[#allocation53_spill] sm:$0xff] }
 0x5ee   :  { %v5613_v5 = vmul.f32 %v24212_v21, %v24212_v21 }
 0x5ef   :  { %v5670_v24 = vadd.f32 %v5669_v12, %v5607_v31  ;;  %v24213_v12 = vld [vmem:[#allocation49_spill] sm:$0xff] }
 0x5f0   :  { %v5614_v53 = vmul.f32 %v24213_v12, %v24213_v12 }
 0x5f1   :  { %v5671_v27 = vadd.f32 %v5670_v24, %v5608_v41  ;;  %v24214_v24 = vld [vmem:[#allocation51_spill] sm:$0xff] }
 0x5f2   :  { %v5615_v48 = vmul.f32 %v24214_v24, %v24214_v24  ;;  %v5703_v24 = vlaneseq }
 0x5f3   :  { %v5672_v15 = vadd.f32 %v5671_v27, %v5609_v30  ;;  %v24215_v27 = vld [vmem:[#allocation54_spill] sm:$0xff] }
 0x5f4   :  { %v5616_v50 = vmul.f32 %v24215_v27, %v24215_v27 }
 0x5f5   :  { %v5673_v32 = vadd.f32 %v5672_v15, %v5610_v36  ;;  %v24216_v15 = vld [vmem:[#allocation57_spill] sm:$0xff] }
 0x5f6   :  { %v5617_v39 = vmul.f32 %v24216_v15, %v24216_v15 }
 0x5f7   :  { %v5674_v9 = vadd.f32 %v5673_v32, %v5611_v58  ;;  %v24217_v32 = vld [vmem:[#allocation50_spill] sm:$0xff] }
 0x5f8   :  { %v5618_v21 = vmul.f32 %v24217_v32, %v24217_v32 }
 0x5f9   :  { %v5675_v31 = vadd.f32 %v5674_v9, %v5612_v42  ;;  %v5619_v9 = vmul.f32 %v19464_v8, %v19464_v8 }
 0x5fb   :  { %v5676_v41 = vadd.f32 %v5675_v31, %v5613_v5  ;;  %v5620_v31 = vmul.f32 %v19468_v20, %v19468_v20 }
 0x5fd   :  { %v5677_v30 = vadd.f32 %v5676_v41, %v5614_v53  ;;  %v5621_v41 = vmul.f32 %v19472_v26, %v19472_v26 }
 0x5ff   :  { %v5678_v36 = vadd.f32 %v5677_v30, %v5615_v48  ;;  %v5622_v30 = vmul.f32 %v19476_v57, %v19476_v57 }
 0x601   :  { %v5679_v58 = vadd.f32 %v5678_v36, %v5616_v50  ;;  %v24218_v36 = vld [vmem:[#allocation62_spill] sm:$0xff] }
 0x602   :  { %v5623_v32 = vmul.f32 %v24218_v36, %v24218_v36 }
 0x603   :  { %v5680_v42 = vadd.f32 %v5679_v58, %v5617_v39  ;;  %v24219_v58 = vld [vmem:[#allocation63_spill] sm:$0xff] }
 0x604   :  { %v5624_v8 = vmul.f32 %v24219_v58, %v24219_v58 }
 0x605   :  { %v5681_v5 = vadd.f32 %v5680_v42, %v5618_v21  ;;  %v24220_v42 = vld [vmem:[#allocation64_spill] sm:$0xff] }
 0x606   :  { %v5625_v20 = vmul.f32 %v24220_v42, %v24220_v42 }
 0x607   :  { %v5682_v53 = vadd.f32 %v5681_v5, %v5619_v9  ;;  %v24221_v5 = vld [vmem:[#allocation65_spill] sm:$0xff] }
 0x608   :  { %v5626_v26 = vmul.f32 %v24221_v5, %v24221_v5 }
 0x609   :  { %v5683_v48 = vadd.f32 %v5682_v53, %v5620_v31  ;;  %v5627_v53 = vmul.f32 %v19496_v0, %v19496_v0 }
 0x60b   :  { %v5684_v50 = vadd.f32 %v5683_v48, %v5621_v41 }
 0x60d   :  { %v5685_v39 = vadd.f32 %v5684_v50, %v5622_v30 }
 0x60f   :  { %v5686_v21 = vadd.f32 %v5685_v39, %v5623_v32 }
 0x611   :  { %v5687_v9 = vadd.f32 %v5686_v21, %v5624_v8  ;;  %v16777_v8 = vld [vmem:[%s23629_s4 + $0x40] sm:$0xff]  }
 0x612   :  { %14924 = vmatprep.subr.bf16.mxu1 %v16777_v8 }
 0x613   :  { %v5688_v31 = vadd.f32 %v5687_v9, %v5625_v20  ;;  %v19629_v20 = vshrl.u32 %v5703_v24, 7  ;;  %14925 = vmatpush3.bf16.msra.mxu1 %v16777_v8  ;;  %v16779_v24 = vld [vmem:[%s23629_s4 + $0x50] sm:$0xff]   ;;  %v19648_v9 = vld [vmem:[%s23631_s3] ss:$0 sm:$0xff] }
 0x615   :  { %v5689_v41 = vadd.f32 %v5688_v31, %v5626_v26  ;;  %24222 = vst [vmem:[#allocation66_spill] sm:$0xff] %v19629_v20  ;;  %v16778_v26 = vld [vmem:[%s23629_s4 + $0x48] sm:$0xff]  }
 0x616   :  { %14926 = vmatprep.subr.bf16.mxu1 %v16778_v26 }
 0x617   :  { %v5690_v48 = vadd.f32 %v5689_v41, %v5627_v53  ;;  %14927 = vmatpush3.bf16.msra.mxu1 %v16778_v26  ;;  %v24223_v41 = vld [vmem:[#allocation46_spill] sm:$0xff] }
 0x618   :  { %14928 = vmatprep.subr.bf16.mxu1 %v16779_v24 }
 0x619   :  { %v5691_v57 = vrot.slane %v5690_v48, 4 }
 0x61b   :  { %v5692_v36 = vadd.f32 %v5691_v57, %v5690_v48  ;;  %v5698_v57 = vld [vmem:[%s23630_s2] sm:$0x1]  ;;  %14929 = vmatpush3.bf16.msra.mxu1 %v16779_v24 }
 0x61d   :  { %v5693_v30 = vrot.slane %v5692_v36, 2 }
 0x61f   :  { %v5694_v50 = vadd.f32 %v5693_v30, %v5692_v36  ;;  %v24224_v30 = vld [vmem:[#allocation47_spill] sm:$0xff] }
 0x621   :  { %v5695_v15 = vrot.slane %v5694_v50, 1 }
 0x623   :  { %v5696_v27 = vadd.f32 %v5695_v15, %v5694_v50 }
 0x625   :  { %v5697_v32 = vmul.f32 0.001953125, %v5696_v27  ;;  %v23790_v27 = vsub.s32 0, %v19629_v20 }
 0x627   :  { %v5699_v39 = vadd.f32 1e-05, %v5697_v32  ;;  %v16780_v32 = vld [vmem:[%s23629_s4 + $0x58] sm:$0xff]  }
 0x628   :  { %14930 = vmatprep.subr.bf16.mxu1 %v16780_v32 }
 0x629   :  { %16885 = vrsqrt.f32 %v5699_v39  ;;  %v24225_v39 = vld [vmem:[#allocation48_spill] sm:$0xff]  ;;  %14931 = vmatpush3.bf16.msra.mxu1 %v16780_v32 }
 0x633   :  { %v16886_v15 = vpop.eup %16885 }
 0x634   :  { %v5701_v36 = vmul.f32 %v16886_v15, %v5698_v57  ;;  %v16781_v57 = vld [vmem:[%s23629_s4 + $0x60] sm:$0xff]  }
 0x635   :  { %14932 = vmatprep.subr.bf16.mxu1 %v16781_v57 }
 0x636   :  { %v19643_v21 = vrot.slane %v5701_v36, %v23790_v27  ;;  %14933 = vmatpush3.bf16.msra.mxu1 %v16781_v57 }
 0x638   :  { %v5768_v31 = vmul.f32 %v19643_v21, %v24219_v58  ;;  %v5769_v53 = vmul.f32 %v19643_v21, %v24220_v42  ;;  %v19656_v48 = vmul.f32 %v19643_v21, %v24223_v41  ;;  %v19660_v50 = vmul.f32 %v19643_v21, %v24224_v30 }
 0x639   :  { %v19667_v8 = vmul.f32 %v19643_v21, %v24225_v39  ;;  %v19671_v58 = vmul.f32 %v19643_v21, %v19256_v62  ;;  %v19675_v42 = vmul.f32 %v19643_v21, %v19260_v44  ;;  %v19679_v26 = vmul.f32 %v19643_v21, %v19264_v2 }
 0x63a   :  { %v5839_v15 = vadd.f32 %v19648_v9, %v5768_v31  ;;  %v5840_v36 = vadd.f32 %v19648_v9, %v5769_v53  ;;  %v19688_v62 = vmul.f32 %v19643_v21, %v19268_v29  ;;  %v19692_v44 = vmul.f32 %v19643_v21, %v19272_v54 }
 0x63b   :  { %v19696_v2 = vmul.f32 %v19643_v21, %v19276_v3  ;;  %v19700_v24 = vmul.f32 %v19643_v21, %v19280_v22  ;;  %v19704_v31 = vmul.f32 %v19643_v21, %v19284_v4  ;;  %v19708_v29 = vmul.f32 %v19643_v21, %v19288_v37  ;;  %v16782_v22 = vld [vmem:[%s23629_s4 + $0x68] sm:$0xff]  }
 0x63c   :  { %v5903_v54 = vmax.f32 %v5839_v15, 0.0  ;;  %v5904_v53 = vmax.f32 %v5840_v36, 0.0  ;;  %v19712_v41 = vmul.f32 %v19643_v21, %v19292_v11  ;;  %v19716_v3 = vmul.f32 %v19643_v21, %v19296_v1  ;;  %14934 = vmatprep.subr.bf16.mxu1 %v16782_v22 }
 0x63d   :  { %v19723_v4 = vmul.f32 %v19643_v21, %v19300_v10  ;;  %v19727_v37 = vmul.f32 %v19643_v21, %v19304_v43  ;;  %v19731_v11 = vmul.f32 %v19643_v21, %v19308_v28  ;;  %v19735_v1 = vmul.f32 %v19643_v21, %v19312_v38  ;;  %14935 = vmatpush3.bf16.msra.mxu1 %v16782_v22 }
 0x63e   :  { %v5937_v30 = vpack.c.bf16 %v5904_v53, %v5903_v54  ;;  %v19739_v32 = vmul.f32 %v19643_v21, %v19316_v56  ;;  %v19743_v10 = vmul.f32 %v19643_v21, %v19320_v60  ;;  %v19747_v43 = vmul.f32 %v19643_v21, %v19324_v18 }
 0x63f   :  { %v19751_v28 = vmul.f32 %v19643_v21, %v19328_v55  ;;  %v19755_v38 = vmul.f32 %v19643_v21, %v19332_v14  ;;  %v19759_v56 = vmul.f32 %v19643_v21, %v19336_v19  ;;  %v19763_v60 = vmul.f32 %v19643_v21, %v19340_v7  ;;  %v16783_v14 = vld [vmem:[%s23629_s4 + $0x70] sm:$0xff]  }
 0x640   :  { %v6150_v39 = vshrl.u32 %v5937_v30, 16  ;;  %v6153_v18 = vshll.u32 %v5937_v30, 16  ;;  %v19767_v15 = vmul.f32 %v19643_v21, %v19344_v52  ;;  %v19771_v55 = vmul.f32 %v19643_v21, %v19348_v49  ;;  %14936 = vmatprep.subr.bf16.mxu1 %v16783_v14 }
 0x641   :  { %v24226_v19 = vmov 0  ;;  %v19784_v7 = vmul.f32 %v19643_v21, %v19352_v59  ;;  %v19788_v52 = vmul.f32 %v19643_v21, %v19356_v46  ;;  %v19792_v49 = vmul.f32 %v19643_v21, %v19360_v47  ;;  %14937 = vmatpush3.bf16.msra.mxu1 %v16783_v14  ;;  %v24240_v14 = vld [vmem:[#allocation54_spill] sm:$0xff] }
 0x642   :  { %v24227_v19 = vsel %vm19778_vm8, 4294967295, %v24226_v19  ;;  %v19796_v57 = vmul.f32 %v19643_v21, %v19364_v61  ;;  %v6152_v36 = vrot.slane %v6150_v39, 7  ;;  %v19800_v54 = vmul.f32 %v19643_v21, %v19368_v40 }
 0x643   :  { %24228 = vst [vmem:[#allocation67_spill] sm:$0xff] %v24227_v19  ;;  %v19804_v59 = vmul.f32 %v19643_v21, %v19372_v16  ;;  %v19808_v46 = vmul.f32 %v19643_v21, %v19376_v25  ;;  %v19812_v47 = vmul.f32 %v19643_v21, %v19380_v23  ;;  %v19816_v61 = vmul.f32 %v19643_v21, %v19384_v45 }
 0x644   :  { %v19820_v40 = vmul.f32 %v19643_v21, %v19388_v35  ;;  %v19824_v16 = vmul.f32 %v19643_v21, %v19392_v33  ;;  %v6155_v53 = vor.u32 %v6153_v18, %v6152_v36  ;;  %v6292_v25 = vsel %vm19778_vm8, %v6152_v36, 0  ;;  %v16784_v35 = vld [vmem:[%s23629_s4 + $0x78] sm:$0xff]  }
 0x645   :  { %v19830_v23 = vmul.f32 %v19643_v21, %v19396_v34  ;;  %v19834_v45 = vmul.f32 %v19643_v21, %v19400_v63  ;;  %v13135_v33 = vcombine.low %v6292_v25, %v6292_v25  ;;  %v19841_v22 = vmul.f32 %v19643_v21, %v19404_v17  ;;  %v24229_v18 = vld [vmem:[#allocation4_spill] sm:$0xff]  ;;  %v24231_v17 = vld [vmem:[#allocation19_spill] sm:$0xff]  ;;  %14938 = vmatprep.subr.bf16.mxu1 %v16784_v35 }
 0x646   :  { %v19845_v30 = vmul.f32 %v19643_v21, %v19408_v6  ;;  %v19849_v34 = vmul.f32 %v19643_v21, %v19412_v51  ;;  %v6260_v63 = vsel %vm19778_vm8, 0, %v6155_v53  ;;  %v19855_v39 = vmul.f32 %v19643_v21, %v19416_v13  ;;  %v24232_v51 = vld [vmem:[#allocation35_spill] sm:$0xff]  ;;  %v24233_v53 = vld [vmem:[#allocation36_spill] sm:$0xff]  ;;  %v24234_v13 = vld [vmem:[#allocation37_spill] sm:$0xff]  ;;  %14939 = vmatpush3.bf16.msra.mxu1 %v16784_v35 }
 0x647   :  { %v19859_v36 = vmul.f32 %v19643_v21, %v24229_v18  ;;  %v19863_v25 = vmul.f32 %v19643_v21, %v24231_v17  ;;  %v13133_v6 = vcombine.low %v6260_v63, %v6260_v63  ;;  %v13134_v27 = vcombine.high %v6260_v63, %v6260_v63  ;;  %6739 = vst [vmem:[#allocation2 + $0x194] sm:$0xf] %v13135_v33  ;;  %v24239_v63 = vld [vmem:[#allocation51_spill] sm:$0xff] }
 0x648   :  { %v19867_v20 = vmul.f32 %v19643_v21, %v24232_v51  ;;  %v19871_v19 = vmul.f32 %v19643_v21, %v24233_v53  ;;  %v19875_v18 = vmul.f32 %v19643_v21, %v24234_v13  ;;  %v19883_v33 = vmul.f32 %v19643_v21, %v24213_v12  ;;  %v24242_v13 = vld [vmem:[#allocation57_spill] sm:$0xff]  ;;  %v24245_v12 = vld [vmem:[#allocation58_spill] sm:$0xff] }
 0x649   :  { %24230 = vst [vmem:[#allocation68_spill] sm:$0xff] %v19859_v36  ;;  %v24236_v36 = vld [vmem:[#allocation53_spill] sm:$0xff]  ;;  %v19887_v51 = vmul.f32 %v19643_v21, %v24239_v63  ;;  %6737 = vst [vmem:[#allocation2 + $0x18c] sm:$0xf] %v13133_v6  ;;  %v19891_v53 = vmul.f32 %v19643_v21, %v24240_v14  ;;  %v24246_v63 = vld [vmem:[#allocation59_spill] sm:$0xff] }
 0x64a   :  { %24235 = vst [vmem:[#allocation69_spill] sm:$0xff] %v19875_v18  ;;  %v19879_v17 = vmul.f32 %v19643_v21, %v24236_v36  ;;  %24238 = vst [vmem:[#allocation72_spill] sm:$0xff] %v19883_v33  ;;  %v19895_v18 = vmul.f32 %v19643_v21, %v24242_v13  ;;  %v24244_v36 = vld [vmem:[#allocation50_spill] sm:$0xff]  ;;  %v19903_v33 = vmul.f32 %v19643_v21, %v24245_v12 }
 0x64b   :  { %6738 = vst [vmem:[#allocation2 + $0x190] sm:$0xf] %v13134_v27  ;;  %24241 = vst [vmem:[#allocation52_spill] sm:$0xff] %v19891_v53  ;;  %v19907_v6 = vmul.f32 %v19643_v21, %v24246_v63  ;;  %v24247_v27 = vld [vmem:[#allocation60_spill] sm:$0xff]  ;;  %v24248_v53 = vld [vmem:[#allocation61_spill] sm:$0xff]  ;;  %v19923_v12 = vmul.f32 %v19643_v21, %v24221_v5  ;;  %v19927_v63 = vmul.f32 %v19643_v21, %v19496_v0 }
 0x64c   :  { %24237 = vst [vmem:[#allocation70_spill] sm:$0xff] %v19879_v17  ;;  %24243 = vst [vmem:[#allocation5_spill] sm:$0xff] %v19895_v18  ;;  %v19899_v17 = vmul.f32 %v19643_v21, %v24244_v36  ;;  %v19911_v14 = vmul.f32 %v19643_v21, %v24247_v27  ;;  %v19915_v13 = vmul.f32 %v19643_v21, %v24248_v53  ;;  %v24249_v18 = vld [vmem:[#allocation62_spill] sm:$0xff] }
 0x64d   :  { %v19919_v36 = vmul.f32 %v19643_v21, %v24249_v18  ;;  %v19931_v27 = vadd.f32 %v19648_v9, %v19656_v48  ;;  %v19935_v53 = vadd.f32 %v19648_v9, %v19660_v50  ;;  %v19939_v18 = vadd.f32 %v19648_v9, %v19667_v8 }
 0x64e   :  { %v19943_v5 = vadd.f32 %v19648_v9, %v19671_v58  ;;  %v19947_v0 = vadd.f32 %v19648_v9, %v19675_v42  ;;  %v19951_v21 = vadd.f32 %v19648_v9, %v19679_v26  ;;  %v19955_v48 = vadd.f32 %v19648_v9, %v19688_v62  ;;  %v16785_v42 = vld [vmem:[%s23629_s4] sm:$0xff]  }
 0x64f   :  { %v19959_v50 = vadd.f32 %v19648_v9, %v19692_v44  ;;  %v19963_v8 = vadd.f32 %v19648_v9, %v19696_v2  ;;  %v19967_v58 = vadd.f32 %v19648_v9, %v19700_v24  ;;  %v19974_v26 = vadd.f32 %v19648_v9, %v19704_v31  ;;  %15004 = vmatprep.subr.bf16.mxu1 %v16785_v42 }
 0x650   :  { %v19978_v62 = vadd.f32 %v19648_v9, %v19708_v29  ;;  %v19982_v44 = vadd.f32 %v19648_v9, %v19712_v41  ;;  %v19986_v2 = vadd.f32 %v19648_v9, %v19716_v3  ;;  %v19990_v24 = vadd.f32 %v19648_v9, %v19723_v4  ;;  %v24251_v35 = vld [vmem:[#allocation68_spill] sm:$0xff] }
 0x651   :  { %v19994_v31 = vadd.f32 %v19648_v9, %v19727_v37  ;;  %v19998_v29 = vadd.f32 %v19648_v9, %v19731_v11  ;;  %v20002_v41 = vadd.f32 %v19648_v9, %v19735_v1  ;;  %v20006_v3 = vadd.f32 %v19648_v9, %v19739_v32  ;;  %v24255_v42 = vld [vmem:[#allocation69_spill] sm:$0xff] }
 0x652   :  { %v20010_v4 = vadd.f32 %v19648_v9, %v19743_v10  ;;  %v20014_v37 = vadd.f32 %v19648_v9, %v19747_v43  ;;  %v20018_v11 = vadd.f32 %v19648_v9, %v19751_v28  ;;  %v20022_v1 = vadd.f32 %v19648_v9, %v19755_v38 }
 0x653   :  { %v20026_v32 = vadd.f32 %v19648_v9, %v19759_v56  ;;  %v20030_v10 = vadd.f32 %v19648_v9, %v19763_v60  ;;  %v20034_v43 = vadd.f32 %v19648_v9, %v19767_v15  ;;  %v20038_v28 = vadd.f32 %v19648_v9, %v19771_v55 }
 0x654   :  { %v20042_v38 = vadd.f32 %v19648_v9, %v19784_v7  ;;  %v20046_v56 = vadd.f32 %v19648_v9, %v19788_v52  ;;  %v20050_v60 = vadd.f32 %v19648_v9, %v19792_v49  ;;  %v20054_v15 = vadd.f32 %v19648_v9, %v19796_v57 }
 0x655   :  { %v20058_v55 = vadd.f32 %v19648_v9, %v19800_v54  ;;  %v20062_v7 = vadd.f32 %v19648_v9, %v19804_v59  ;;  %v20066_v52 = vadd.f32 %v19648_v9, %v19808_v46  ;;  %v20070_v49 = vadd.f32 %v19648_v9, %v19812_v47 }
 0x656   :  { %v20074_v57 = vadd.f32 %v19648_v9, %v19816_v61  ;;  %v20078_v54 = vadd.f32 %v19648_v9, %v19820_v40  ;;  %v20082_v59 = vadd.f32 %v19648_v9, %v19824_v16  ;;  %v20086_v46 = vadd.f32 %v19648_v9, %v19830_v23 }
 0x657   :  { %v20090_v47 = vadd.f32 %v19648_v9, %v19834_v45  ;;  %v20094_v61 = vadd.f32 %v19648_v9, %v19841_v22  ;;  %v20098_v40 = vadd.f32 %v19648_v9, %v19845_v30  ;;  %v20102_v16 = vadd.f32 %v19648_v9, %v19849_v34 }
 0x658   :  { %v20106_v23 = vadd.f32 %v19648_v9, %v19855_v39  ;;  %v20110_v45 = vadd.f32 %v19648_v9, %v24251_v35  ;;  %v20114_v22 = vadd.f32 %v19648_v9, %v19863_v25  ;;  %v20118_v30 = vadd.f32 %v19648_v9, %v19867_v20 }
 0x659   :  { %v20122_v34 = vadd.f32 %v19648_v9, %v19871_v19  ;;  %v20126_v39 = vadd.f32 %v19648_v9, %v24255_v42  ;;  %v20138_v20 = vadd.f32 %v19648_v9, %v19887_v51  ;;  %v20158_v51 = vadd.f32 %v19648_v9, %v19907_v6 }
 0x65a   :  { %24250 = vst [vmem:[#allocation6_spill] sm:$0xff] %v20106_v23  ;;  %24252 = vst [vmem:[#allocation7_spill] sm:$0xff] %v20110_v45  ;;  %v24256_v23 = vld [vmem:[#allocation70_spill] sm:$0xff]  ;;  %v24257_v45 = vld [vmem:[#allocation72_spill] sm:$0xff]  ;;  %v20178_v6 = vadd.f32 %v19648_v9, %v19927_v63  ;;  %v5853_v63 = vmax.f32 %v19974_v26, 0.0  ;;  %v5864_v26 = vmax.f32 %v20018_v11, 0.0 }
 0x65b   :  { %24253 = vst [vmem:[#allocation8_spill] sm:$0xff] %v20118_v30  ;;  %24254 = vst [vmem:[#allocation9_spill] sm:$0xff] %v20122_v34  ;;  %v20130_v35 = vadd.f32 %v19648_v9, %v24256_v23  ;;  %v20134_v25 = vadd.f32 %v19648_v9, %v24257_v45  ;;  %v24258_v30 = vld [vmem:[#allocation52_spill] sm:$0xff]  ;;  %v24259_v34 = vld [vmem:[#allocation5_spill] sm:$0xff]  ;;  %v20150_v23 = vadd.f32 %v19648_v9, %v19899_v17  ;;  %v5875_v11 = vmax.f32 %v20062_v7, 0.0 }
 0x65c   :  { %v20142_v19 = vadd.f32 %v19648_v9, %v24258_v30  ;;  %v20146_v42 = vadd.f32 %v19648_v9, %v24259_v34  ;;  %v20154_v45 = vadd.f32 %v19648_v9, %v19903_v33  ;;  %24262 = vst [vmem:[#allocation12_spill] sm:$0xff] %v20158_v51  ;;  %v20162_v30 = vadd.f32 %v19648_v9, %v19911_v14 }
 0x65d   :  { %24260 = vst [vmem:[#allocation10_spill] sm:$0xff] %v20150_v23  ;;  %v20166_v34 = vadd.f32 %v19648_v9, %v19915_v13  ;;  %v20170_v17 = vadd.f32 %v19648_v9, %v19919_v36  ;;  %v20174_v33 = vadd.f32 %v19648_v9, %v19923_v12  ;;  %24267 = vst [vmem:[#allocation17_spill] sm:$0xff] %v20178_v6  ;;  %v5843_v51 = vmax.f32 %v19931_v27, 0.0 }
 0x65e   :  { %24261 = vst [vmem:[#allocation11_spill] sm:$0xff] %v20154_v45  ;;  %24263 = vst [vmem:[#allocation13_spill] sm:$0xff] %v20162_v30  ;;  %v5844_v14 = vmax.f32 %v19935_v53, 0.0  ;;  %v5845_v30 = vmax.f32 %v19939_v18, 0.0  ;;  %v5846_v13 = vmax.f32 %v19943_v5, 0.0  ;;  %v5848_v36 = vmax.f32 %v19951_v21, 0.0 }
 0x65f   :  { %24264 = vst [vmem:[#allocation14_spill] sm:$0xff] %v20166_v34  ;;  %24265 = vst [vmem:[#allocation15_spill] sm:$0xff] %v20170_v17  ;;  %v5847_v34 = vmax.f32 %v19947_v0, 0.0  ;;  %v5849_v17 = vmax.f32 %v19955_v48, 0.0  ;;  %v5850_v12 = vmax.f32 %v19959_v50, 0.0  ;;  %v5852_v9 = vmax.f32 %v19967_v58, 0.0 }
 0x660   :  { %24266 = vst [vmem:[#allocation16_spill] sm:$0xff] %v20174_v33  ;;  %v5851_v33 = vmax.f32 %v19963_v8, 0.0  ;;  %v5854_v27 = vmax.f32 %v19978_v62, 0.0  ;;  %v5855_v53 = vmax.f32 %v19982_v44, 0.0  ;;  %v5856_v18 = vmax.f32 %v19986_v2, 0.0 }
 0x661   :  { %v5857_v5 = vmax.f32 %v19990_v24, 0.0  ;;  %v5858_v0 = vmax.f32 %v19994_v31, 0.0  ;;  %v5859_v21 = vmax.f32 %v19998_v29, 0.0  ;;  %v5860_v48 = vmax.f32 %v20002_v41, 0.0  ;;  %v24268_v7 = vld [vmem:[#allocation6_spill] sm:$0xff]  ;;  %v24269_v6 = vld [vmem:[#allocation7_spill] sm:$0xff] }
 0x662   :  { %v5861_v50 = vmax.f32 %v20006_v3, 0.0  ;;  %v5862_v8 = vmax.f32 %v20010_v4, 0.0  ;;  %v5863_v58 = vmax.f32 %v20014_v37, 0.0  ;;  %v5865_v62 = vmax.f32 %v20022_v1, 0.0  ;;  %v24270_v45 = vld [vmem:[#allocation8_spill] sm:$0xff]  ;;  %v24271_v23 = vld [vmem:[#allocation9_spill] sm:$0xff] }
 0x663   :  { %v5866_v44 = vmax.f32 %v20026_v32, 0.0  ;;  %v5867_v2 = vmax.f32 %v20030_v10, 0.0  ;;  %v5868_v24 = vmax.f32 %v20034_v43, 0.0  ;;  %v5869_v31 = vmax.f32 %v20038_v28, 0.0 }
 0x664   :  { %v5870_v29 = vmax.f32 %v20042_v38, 0.0  ;;  %v5871_v41 = vmax.f32 %v20046_v56, 0.0  ;;  %v5872_v3 = vmax.f32 %v20050_v60, 0.0  ;;  %v5873_v4 = vmax.f32 %v20054_v15, 0.0 }
 0x665   :  { %v5874_v37 = vmax.f32 %v20058_v55, 0.0  ;;  %v5876_v1 = vmax.f32 %v20066_v52, 0.0  ;;  %v5877_v32 = vmax.f32 %v20070_v49, 0.0  ;;  %v5878_v10 = vmax.f32 %v20074_v57, 0.0 }
 0x666   :  { %v5879_v43 = vmax.f32 %v20078_v54, 0.0  ;;  %v5880_v28 = vmax.f32 %v20082_v59, 0.0  ;;  %v5881_v38 = vmax.f32 %v20086_v46, 0.0  ;;  %v5882_v56 = vmax.f32 %v20090_v47, 0.0 }
 0x667   :  { %v5883_v60 = vmax.f32 %v20094_v61, 0.0  ;;  %v5884_v15 = vmax.f32 %v20098_v40, 0.0  ;;  %v5885_v55 = vmax.f32 %v20102_v16, 0.0  ;;  %v5886_v52 = vmax.f32 %v24268_v7, 0.0 }
 0x668   :  { %v5887_v49 = vmax.f32 %v24269_v6, 0.0  ;;  %v5888_v57 = vmax.f32 %v20114_v22, 0.0  ;;  %v5889_v54 = vmax.f32 %v24270_v45, 0.0  ;;  %v5890_v59 = vmax.f32 %v24271_v23, 0.0  ;;  %v24272_v6 = vld [vmem:[#allocation10_spill] sm:$0xff]  ;;  %v24273_v45 = vld [vmem:[#allocation11_spill] sm:$0xff] }
 0x669   :  { %v5891_v46 = vmax.f32 %v20126_v39, 0.0  ;;  %v5892_v47 = vmax.f32 %v20130_v35, 0.0  ;;  %v5893_v61 = vmax.f32 %v20134_v25, 0.0  ;;  %v5894_v40 = vmax.f32 %v20138_v20, 0.0  ;;  %v24274_v39 = vld [vmem:[#allocation12_spill] sm:$0xff]  ;;  %v24275_v25 = vld [vmem:[#allocation13_spill] sm:$0xff] }
 0x66a   :  { %v5895_v16 = vmax.f32 %v20142_v19, 0.0  ;;  %v5896_v7 = vmax.f32 %v20146_v42, 0.0  ;;  %v5897_v22 = vmax.f32 %v24272_v6, 0.0  ;;  %v5898_v23 = vmax.f32 %v24273_v45, 0.0  ;;  %v24276_v19 = vld [vmem:[#allocation14_spill] sm:$0xff]  ;;  %v24277_v6 = vld [vmem:[#allocation15_spill] sm:$0xff] }
 0x66b   :  { %v5899_v35 = vmax.f32 %v24274_v39, 0.0  ;;  %v5900_v20 = vmax.f32 %v24275_v25, 0.0  ;;  %v5901_v42 = vmax.f32 %v24276_v19, 0.0  ;;  %v5902_v45 = vmax.f32 %v24277_v6, 0.0  ;;  %v24278_v39 = vld [vmem:[#allocation16_spill] sm:$0xff]  ;;  %v24279_v19 = vld [vmem:[#allocation17_spill] sm:$0xff] }
 0x66c   :  { %v5905_v25 = vmax.f32 %v24278_v39, 0.0  ;;  %v5906_v6 = vmax.f32 %v24279_v19, 0.0  ;;  %v5907_v39 = vpack.c.bf16 %v5844_v14, %v5843_v51  ;;  %v5908_v19 = vpack.c.bf16 %v5846_v13, %v5845_v30 }
 0x66d   :  { %v5909_v14 = vpack.c.bf16 %v5848_v36, %v5847_v34  ;;  %v5910_v51 = vpack.c.bf16 %v5850_v12, %v5849_v17  ;;  %v5911_v13 = vpack.c.bf16 %v5852_v9, %v5851_v33  ;;  %v5912_v30 = vpack.c.bf16 %v5854_v27, %v5853_v63 }
 0x66e   :  { %v5913_v34 = vpack.c.bf16 %v5856_v18, %v5855_v53  ;;  %v20242_v36 = vpack.c.bf16 %v5858_v0, %v5857_v5  ;;  %v20244_v12 = vpack.c.bf16 %v5860_v48, %v5859_v21  ;;  %v20246_v17 = vpack.c.bf16 %v5862_v8, %v5861_v50 }
 0x66f   :  { %v20248_v9 = vpack.c.bf16 %v5864_v26, %v5863_v58  ;;  %v20250_v33 = vpack.c.bf16 %v5866_v44, %v5865_v62  ;;  %v20252_v27 = vpack.c.bf16 %v5868_v24, %v5867_v2  ;;  %v20254_v63 = vpack.c.bf16 %v5870_v29, %v5869_v31 }
 0x670   :  { %v20256_v18 = vpack.c.bf16 %v5872_v3, %v5871_v41  ;;  %v20258_v53 = vpack.c.bf16 %v5874_v37, %v5873_v4  ;;  %v20260_v0 = vpack.c.bf16 %v5876_v1, %v5875_v11  ;;  %v20262_v5 = vpack.c.bf16 %v5878_v10, %v5877_v32 }
 0x671   :  { %v20264_v21 = vpack.c.bf16 %v5880_v28, %v5879_v43  ;;  %v20266_v48 = vpack.c.bf16 %v5882_v56, %v5881_v38  ;;  %v20268_v50 = vpack.c.bf16 %v5884_v15, %v5883_v60  ;;  %v20270_v8 = vpack.c.bf16 %v5886_v52, %v5885_v55 }
 0x672   :  { %v20272_v58 = vpack.c.bf16 %v5888_v57, %v5887_v49  ;;  %v20274_v26 = vpack.c.bf16 %v5890_v59, %v5889_v54  ;;  %v20276_v62 = vpack.c.bf16 %v5892_v47, %v5891_v46  ;;  %v20278_v44 = vpack.c.bf16 %v5894_v40, %v5893_v61 }
 0x673   :  { %v20280_v2 = vpack.c.bf16 %v5896_v7, %v5895_v16  ;;  %v20282_v24 = vpack.c.bf16 %v5898_v23, %v5897_v22  ;;  %v20284_v31 = vpack.c.bf16 %v5900_v20, %v5899_v35  ;;  %v20286_v29 = vpack.c.bf16 %v5902_v45, %v5901_v42 }
 0x674   :  { %v20288_v41 = vpack.c.bf16 %v5906_v6, %v5905_v25  ;;  %v5940_v3 = vshrl.u32 %v5907_v39, 16  ;;  %v5943_v4 = vshll.u32 %v5907_v39, 16  ;;  %v5947_v37 = vshrl.u32 %v5908_v19, 16 }
 0x675   :  { %v5950_v11 = vshll.u32 %v5908_v19, 16  ;;  %v5954_v1 = vshrl.u32 %v5909_v14, 16  ;;  %v5957_v32 = vshll.u32 %v5909_v14, 16  ;;  %v5961_v10 = vshrl.u32 %v5910_v51, 16 }
 0x676   :  { %v20290_v43 = vrot.slane %v5940_v3, 7  ;;  %v20292_v28 = vrot.slane %v5947_v37, 7  ;;  %v5964_v38 = vshll.u32 %v5910_v51, 16  ;;  %v5968_v56 = vshrl.u32 %v5911_v13, 16 }
 0x677   :  { %v20294_v60 = vrot.slane %v5954_v1, 7  ;;  %v20296_v15 = vrot.slane %v5961_v10, 7  ;;  %v5971_v55 = vshll.u32 %v5911_v13, 16  ;;  %v5975_v52 = vshrl.u32 %v5912_v30, 16 }
 0x678   :  { %v20299_v49 = vor.u32 %v5943_v4, %v20290_v43  ;;  %v20302_v57 = vor.u32 %v5950_v11, %v20292_v28  ;;  %v20304_v54 = vrot.slane %v5968_v56, 7  ;;  %v5978_v59 = vshll.u32 %v5912_v30, 16 }
 0x679   :  { %v20307_v46 = vor.u32 %v5957_v32, %v20294_v60  ;;  %v20310_v47 = vor.u32 %v5964_v38, %v20296_v15  ;;  %v20312_v61 = vrot.slane %v5975_v52, 7  ;;  %v5982_v40 = vshrl.u32 %v5913_v34, 16 }
 0x67a   :  { %v20315_v16 = vor.u32 %v5971_v55, %v20304_v54  ;;  %v5985_v7 = vshll.u32 %v5913_v34, 16  ;;  %v5989_v22 = vshrl.u32 %v20242_v36, 16  ;;  %v5992_v23 = vshll.u32 %v20242_v36, 16 }
 0x67b   :  { %v20320_v35 = vor.u32 %v5978_v59, %v20312_v61  ;;  %v20322_v20 = vrot.slane %v5982_v40, 7  ;;  %v5996_v42 = vshrl.u32 %v20244_v12, 16  ;;  %v5999_v45 = vshll.u32 %v20244_v12, 16 }
 0x67c   :  { %v20326_v25 = vrot.slane %v5989_v22, 7  ;;  %v6003_v6 = vshrl.u32 %v20246_v17, 16  ;;  %v6006_v39 = vshll.u32 %v20246_v17, 16  ;;  %v6010_v19 = vshrl.u32 %v20248_v9, 16 }
 0x67d   :  { %v20332_v14 = vor.u32 %v5985_v7, %v20322_v20  ;;  %v20334_v51 = vrot.slane %v5996_v42, 7  ;;  %v6013_v13 = vshll.u32 %v20248_v9, 16  ;;  %v6017_v30 = vshrl.u32 %v20250_v33, 16 }
 0x67e   :  { %v20339_v34 = vor.u32 %v5992_v23, %v20326_v25  ;;  %v20341_v36 = vrot.slane %v6003_v6, 7  ;;  %v20343_v12 = vrot.slane %v6010_v19, 7  ;;  %v6020_v17 = vshll.u32 %v20250_v33, 16 }
 0x67f   :  { %v20347_v3 = vor.u32 %v5999_v45, %v20334_v51  ;;  %v20349_v4 = vrot.slane %v6017_v30, 7  ;;  %v6024_v37 = vshrl.u32 %v20252_v27, 16  ;;  %v6027_v9 = vshll.u32 %v20252_v27, 16 }
 0x680   :  { %v20354_v11 = vor.u32 %v6006_v39, %v20341_v36  ;;  %v20357_v1 = vor.u32 %v6013_v13, %v20343_v12  ;;  %v6031_v32 = vshrl.u32 %v20254_v63, 16  ;;  %v6034_v10 = vshll.u32 %v20254_v63, 16 }
 0x681   :  { %v20362_v33 = vor.u32 %v6020_v17, %v20349_v4  ;;  %v20364_v38 = vrot.slane %v6024_v37, 7  ;;  %v6038_v56 = vshrl.u32 %v20256_v18, 16  ;;  %v6041_v55 = vshll.u32 %v20256_v18, 16 }
 0x682   :  { %v20368_v27 = vrot.slane %v6031_v32, 7  ;;  %v6045_v52 = vshrl.u32 %v20258_v53, 16  ;;  %v6048_v59 = vshll.u32 %v20258_v53, 16  ;;  %v6052_v40 = vshrl.u32 %v20260_v0, 16 }
 0x683   :  { %v20374_v7 = vor.u32 %v6027_v9, %v20364_v38  ;;  %v20376_v63 = vrot.slane %v6038_v56, 7  ;;  %v6055_v22 = vshll.u32 %v20260_v0, 16  ;;  %v6059_v23 = vshrl.u32 %v20262_v5, 16 }
 0x684   :  { %v20381_v42 = vor.u32 %v6034_v10, %v20368_v27  ;;  %v20383_v18 = vrot.slane %v6045_v52, 7  ;;  %v20385_v45 = vrot.slane %v6052_v40, 7  ;;  %v6062_v53 = vshll.u32 %v20262_v5, 16 }
 0x685   :  { %v20389_v6 = vor.u32 %v6041_v55, %v20376_v63  ;;  %v20391_v39 = vrot.slane %v6059_v23, 7  ;;  %v6066_v19 = vshrl.u32 %v20264_v21, 16  ;;  %v6069_v0 = vshll.u32 %v20264_v21, 16 }
 0x686   :  { %v20396_v13 = vor.u32 %v6048_v59, %v20383_v18  ;;  %v20399_v30 = vor.u32 %v6055_v22, %v20385_v45  ;;  %v6073_v17 = vshrl.u32 %v20266_v48, 16  ;;  %v6076_v37 = vshll.u32 %v20266_v48, 16 }
 0x687   :  { %v20404_v5 = vor.u32 %v6062_v53, %v20391_v39  ;;  %v20406_v9 = vrot.slane %v6066_v19, 7  ;;  %v6080_v32 = vshrl.u32 %v20268_v50, 16  ;;  %v6083_v10 = vshll.u32 %v20268_v50, 16 }
 0x688   :  { %v20410_v21 = vrot.slane %v6073_v17, 7  ;;  %v6087_v56 = vshrl.u32 %v20270_v8, 16  ;;  %v6090_v55 = vshll.u32 %v20270_v8, 16  ;;  %v6094_v52 = vshrl.u32 %v20272_v58, 16 }
 0x689   :  { %24280 = vst [vmem:[#allocation18_spill] sm:$0xff] %v20406_v9  ;;  %v6071_v59 = vor.u32 %v6069_v0, %v20406_v9  ;;  %v20416_v48 = vrot.slane %v6080_v32, 7  ;;  %v6097_v40 = vshll.u32 %v20272_v58, 16  ;;  %v6101_v22 = vshrl.u32 %v20274_v26, 16 }
 0x68a   :  { %24281 = vst [vmem:[#allocation56_spill] sm:$0xff] %v20410_v21  ;;  %v6078_v23 = vor.u32 %v6076_v37, %v20410_v21  ;;  %v20421_v53 = vrot.slane %v6087_v56, 7  ;;  %v20423_v50 = vrot.slane %v6094_v52, 7  ;;  %v6104_v19 = vshll.u32 %v20274_v26, 16 }
 0x68b   :  { %24282 = vst [vmem:[#allocation20_spill] sm:$0xff] %v20416_v48  ;;  %v6085_v8 = vor.u32 %v6083_v10, %v20416_v48  ;;  %v20427_v17 = vrot.slane %v6101_v22, 7  ;;  %v6108_v0 = vshrl.u32 %v20276_v62, 16  ;;  %v6111_v32 = vshll.u32 %v20276_v62, 16 }
 0x68c   :  { %24283 = vst [vmem:[#allocation21_spill] sm:$0xff] %v20421_v53  ;;  %24284 = vst [vmem:[#allocation22_spill] sm:$0xff] %v20423_v50  ;;  %v6092_v58 = vor.u32 %v6090_v55, %v20421_v53  ;;  %v6099_v9 = vor.u32 %v6097_v40, %v20423_v50  ;;  %v6115_v37 = vshrl.u32 %v20278_v44, 16  ;;  %v6118_v56 = vshll.u32 %v20278_v44, 16 }
 0x68d   :  { %24285 = vst [vmem:[#allocation23_spill] sm:$0xff] %v20427_v17  ;;  %v6106_v52 = vor.u32 %v6104_v19, %v20427_v17  ;;  %v20436_v21 = vrot.slane %v6108_v0, 7  ;;  %v6122_v26 = vshrl.u32 %v20280_v2, 16  ;;  %v6125_v10 = vshll.u32 %v20280_v2, 16 }
 0x68e   :  { %v20440_v22 = vrot.slane %v6115_v37, 7  ;;  %v6129_v62 = vshrl.u32 %v20282_v24, 16  ;;  %v6132_v55 = vshll.u32 %v20282_v24, 16  ;;  %v6136_v40 = vshrl.u32 %v20284_v31, 16 }
 0x68f   :  { %24286 = vst [vmem:[#allocation24_spill] sm:$0xff] %v20436_v21  ;;  %v6113_v50 = vor.u32 %v6111_v32, %v20436_v21  ;;  %v20446_v53 = vrot.slane %v6122_v26, 7  ;;  %v6139_v44 = vshll.u32 %v20284_v31, 16  ;;  %v6143_v19 = vshrl.u32 %v20286_v29, 16 }
 0x690   :  { %v6120_v0 = vor.u32 %v6118_v56, %v20440_v22  ;;  %v20451_v17 = vrot.slane %v6129_v62, 7  ;;  %v20453_v2 = vrot.slane %v6136_v40, 7  ;;  %v6146_v37 = vshll.u32 %v20286_v29, 16 }
 0x691   :  { %v6127_v24 = vor.u32 %v6125_v10, %v20446_v53  ;;  %v20457_v48 = vrot.slane %v6143_v19, 7  ;;  %v6157_v32 = vshrl.u32 %v20288_v41, 16  ;;  %v6160_v26 = vshll.u32 %v20288_v41, 16 }
 0x692   :  { %v6134_v31 = vor.u32 %v6132_v55, %v20451_v17  ;;  %v6141_v21 = vor.u32 %v6139_v44, %v20453_v2  ;;  %v20466_v62 = vsel %vm19778_vm8, 0, %v20299_v49  ;;  %v20471_v29 = vsel %vm19778_vm8, 0, %v20302_v57 }
 0x693   :  { %v6148_v10 = vor.u32 %v6146_v37, %v20457_v48  ;;  %v6159_v40 = vrot.slane %v6157_v32, 7  ;;  %v20477_v41 = vsel %vm19778_vm8, 0, %v20307_v46  ;;  %v20482_v55 = vsel %vm19778_vm8, 0, %v20310_v47 }
 0x694   :  { %v20487_v49 = vsel %vm19778_vm8, 0, %v20315_v16  ;;  %v20492_v57 = vsel %vm19778_vm8, 0, %v20320_v35  ;;  %v20497_v46 = vsel %vm19778_vm8, 0, %v20332_v14  ;;  %v20502_v47 = vsel %vm19778_vm8, 0, %v20339_v34 }
 0x695   :  { %v6162_v44 = vor.u32 %v6160_v26, %v6159_v40  ;;  %v20507_v16 = vsel %vm19778_vm8, 0, %v20347_v3  ;;  %v20512_v35 = vsel %vm19778_vm8, 0, %v20354_v11  ;;  %v20517_v14 = vsel %vm19778_vm8, 0, %v20357_v1 }
 0x696   :  { %v20522_v34 = vsel %vm19778_vm8, 0, %v20362_v33  ;;  %v20527_v3 = vsel %vm19778_vm8, 0, %v20374_v7  ;;  %v20532_v11 = vsel %vm19778_vm8, 0, %v20381_v42  ;;  %v20537_v1 = vsel %vm19778_vm8, 0, %v20389_v6 }
 0x697   :  { %v20542_v33 = vsel %vm19778_vm8, 0, %v20396_v13  ;;  %v20547_v7 = vsel %vm19778_vm8, 0, %v20399_v30  ;;  %v20552_v42 = vsel %vm19778_vm8, 0, %v20404_v5  ;;  %v20556_v19 = vsel %vm19778_vm8, 0, %v6071_v59 }
 0x698   :  { %v20560_v6 = vsel %vm19778_vm8, 0, %v6078_v23  ;;  %v20564_v13 = vsel %vm19778_vm8, 0, %v6085_v8  ;;  %v20568_v30 = vsel %vm19778_vm8, 0, %v6092_v58  ;;  %v20572_v5 = vsel %vm19778_vm8, 0, %v6099_v9 }
 0x699   :  { %v20576_v59 = vsel %vm19778_vm8, 0, %v6106_v52  ;;  %v20580_v23 = vsel %vm19778_vm8, 0, %v6113_v50  ;;  %v20584_v8 = vsel %vm19778_vm8, 0, %v6120_v0  ;;  %v20588_v58 = vsel %vm19778_vm8, 0, %v6127_v24 }
 0x69a   :  { %v20592_v9 = vsel %vm19778_vm8, 0, %v6134_v31  ;;  %v20596_v52 = vsel %vm19778_vm8, 0, %v6141_v21  ;;  %v20600_v50 = vsel %vm19778_vm8, 0, %v6148_v10  ;;  %v20604_v0 = vsel %vm19778_vm8, 0, %v6162_v44  ;;  %v24293_v31 = vld [vmem:[#allocation56_spill] sm:$0xff]  ;;  %v24295_v44 = vld [vmem:[#allocation21_spill] sm:$0xff] }
 0x69b   :  { %24288 = vst [vmem:[#allocation25_spill] sm:$0xff] %v20592_v9  ;;  %24289 = vst [vmem:[#allocation26_spill] sm:$0xff] %v20596_v52  ;;  %v6262_v37 = vsel %vm19778_vm8, %v20290_v43, 0  ;;  %v6263_v24 = vsel %vm19778_vm8, %v20292_v28, 0  ;;  %v6264_v21 = vsel %vm19778_vm8, %v20294_v60, 0  ;;  %v6265_v32 = vsel %vm19778_vm8, %v20296_v15, 0 }
 0x69c   :  { %24290 = vst [vmem:[#allocation28_spill] sm:$0xff] %v20600_v50  ;;  %24291 = vst [vmem:[#allocation29_spill] sm:$0xff] %v20604_v0  ;;  %v20621_v26 = vsel %vm19778_vm8, %v20304_v54, 0  ;;  %v20626_v43 = vsel %vm19778_vm8, %v20312_v61, 0  ;;  %v20631_v28 = vsel %vm19778_vm8, %v20322_v20, 0  ;;  %v20636_v60 = vsel %vm19778_vm8, %v20326_v25, 0 }
 0x69d   :  { %v20641_v15 = vsel %vm19778_vm8, %v20334_v51, 0  ;;  %v20646_v54 = vsel %vm19778_vm8, %v20341_v36, 0  ;;  %v20651_v61 = vsel %vm19778_vm8, %v20343_v12, 0  ;;  %v20656_v20 = vsel %vm19778_vm8, %v20349_v4, 0  ;;  %v24294_v10 = vld [vmem:[#allocation20_spill] sm:$0xff]  ;;  %v24296_v0 = vld [vmem:[#allocation22_spill] sm:$0xff] }
 0x69e   :  { %v20661_v25 = vsel %vm19778_vm8, %v20364_v38, 0  ;;  %v20666_v51 = vsel %vm19778_vm8, %v20368_v27, 0  ;;  %v20671_v36 = vsel %vm19778_vm8, %v20376_v63, 0  ;;  %v20676_v12 = vsel %vm19778_vm8, %v20383_v18, 0  ;;  %v24292_v27 = vld [vmem:[#allocation18_spill] sm:$0xff]  ;;  %v24297_v50 = vld [vmem:[#allocation23_spill] sm:$0xff] }
 0x69f   :  { %v20681_v4 = vsel %vm19778_vm8, %v20385_v45, 0  ;;  %v20686_v38 = vsel %vm19778_vm8, %v20391_v39, 0  ;;  %v20691_v63 = vsel %vm19778_vm8, %v24292_v27, 0  ;;  %v20696_v18 = vsel %vm19778_vm8, %v24293_v31, 0  ;;  %v24298_v52 = vld [vmem:[#allocation24_spill] sm:$0xff] }
 0x6a0   :  { %v20701_v45 = vsel %vm19778_vm8, %v24294_v10, 0  ;;  %v20706_v39 = vsel %vm19778_vm8, %v24295_v44, 0  ;;  %v20711_v27 = vsel %vm19778_vm8, %v24296_v0, 0  ;;  %v20716_v31 = vsel %vm19778_vm8, %v24297_v50, 0 }
 0x6a1   :  { %v20721_v10 = vsel %vm19778_vm8, %v24298_v52, 0  ;;  %v20726_v44 = vsel %vm19778_vm8, %v20440_v22, 0  ;;  %v20731_v0 = vsel %vm19778_vm8, %v20446_v53, 0  ;;  %v20736_v50 = vsel %vm19778_vm8, %v20451_v17, 0 }
 0x6a2   :  { %24299 = vst [vmem:[#allocation31_spill] sm:$0xff] %v20731_v0  ;;  %24300 = vst [vmem:[#allocation34_spill] sm:$0xff] %v20736_v50  ;;  %v20741_v52 = vsel %vm19778_vm8, %v20453_v2, 0  ;;  %v20746_v22 = vsel %vm19778_vm8, %v20457_v48, 0  ;;  %v20750_v9 = vsel %vm19778_vm8, %v6159_v40, 0  ;;  %v13043_v53 = vcombine.low %v20466_v62, %v20466_v62 }
 0x6a3   :  { %24301 = vst [vmem:[#allocation27_spill] sm:$0xff] %v20741_v52  ;;  %24302 = vst [vmem:[#allocation32_spill] sm:$0xff] %v20746_v22  ;;  %v13044_v17 = vcombine.high %v20466_v62, %v20466_v62  ;;  %v13045_v50 = vcombine.low %v6262_v37, %v6262_v37  ;;  %v13046_v2 = vcombine.low %v20471_v29, %v20471_v29 }
 0x6a4   :  { %24303 = vst [vmem:[#allocation55_spill] sm:$0xff] %v20750_v9  ;;  %v13047_v52 = vcombine.high %v20471_v29, %v20471_v29  ;;  %v13048_v0 = vcombine.low %v6263_v24, %v6263_v24  ;;  %v13049_v48 = vcombine.low %v20477_v41, %v20477_v41  ;;  %v13050_v56 = vcombine.high %v20477_v41, %v20477_v41 }
 0x6a5   :  { %v13051_v40 = vcombine.low %v6264_v21, %v6264_v21  ;;  %6647 = vst [vmem:[#allocation2 + $0xc] sm:$0xf] %v13043_v53  ;;  %v13052_v9 = vcombine.low %v20482_v55, %v20482_v55  ;;  %v13053_v62 = vcombine.high %v20482_v55, %v20482_v55  ;;  %v13054_v37 = vcombine.low %v6265_v32, %v6265_v32 }
 0x6a6   :  { %v13055_v22 = vcombine.low %v20487_v49, %v20487_v49  ;;  %6648 = vst [vmem:[#allocation2 + $0x10] sm:$0xf] %v13044_v17  ;;  %6649 = vst [vmem:[#allocation2 + $0x14] sm:$0xf] %v13045_v50  ;;  %v13056_v29 = vcombine.high %v20487_v49, %v20487_v49  ;;  %v13057_v41 = vcombine.low %v20621_v26, %v20621_v26 }
 0x6a7   :  { %6650 = vst [vmem:[#allocation2 + $0x18] sm:$0xf] %v13046_v2  ;;  %6651 = vst [vmem:[#allocation2 + $0x1c] sm:$0xf] %v13047_v52  ;;  %v13058_v24 = vcombine.low %v20492_v57, %v20492_v57  ;;  %v13059_v55 = vcombine.high %v20492_v57, %v20492_v57  ;;  %v13060_v21 = vcombine.low %v20626_v43, %v20626_v43 }
 0x6a8   :  { %6652 = vst [vmem:[#allocation2 + $0x20] sm:$0xf] %v13048_v0  ;;  %6653 = vst [vmem:[#allocation2 + $0x24] sm:$0xf] %v13049_v48  ;;  %v13061_v32 = vcombine.low %v20497_v46, %v20497_v46  ;;  %v13062_v49 = vcombine.high %v20497_v46, %v20497_v46  ;;  %v13063_v26 = vcombine.low %v20631_v28, %v20631_v28 }
 0x6a9   :  { %6654 = vst [vmem:[#allocation2 + $0x28] sm:$0xf] %v13050_v56  ;;  %6655 = vst [vmem:[#allocation2 + $0x2c] sm:$0xf] %v13051_v40  ;;  %v13064_v57 = vcombine.low %v20502_v47, %v20502_v47  ;;  %v13065_v0 = vcombine.high %v20502_v47, %v20502_v47  ;;  %v13066_v43 = vcombine.low %v20636_v60, %v20636_v60 }
 0x6aa   :  { %6656 = vst [vmem:[#allocation2 + $0x30] sm:$0xf] %v13052_v9  ;;  %6657 = vst [vmem:[#allocation2 + $0x34] sm:$0xf] %v13053_v62  ;;  %v13067_v50 = vcombine.low %v20507_v16, %v20507_v16  ;;  %v13068_v46 = vcombine.high %v20507_v16, %v20507_v16  ;;  %v13069_v9 = vcombine.low %v20641_v15, %v20641_v15 }
 0x6ab   :  { %6658 = vst [vmem:[#allocation2 + $0x38] sm:$0xf] %v13054_v37  ;;  %6659 = vst [vmem:[#allocation2 + $0x3c] sm:$0xf] %v13055_v22  ;;  %v13070_v28 = vcombine.low %v20512_v35, %v20512_v35  ;;  %v13071_v47 = vcombine.high %v20512_v35, %v20512_v35  ;;  %v13072_v60 = vcombine.low %v20646_v54, %v20646_v54 }
 0x6ac   :  { %6660 = vst [vmem:[#allocation2 + $0x40] sm:$0xf] %v13056_v29  ;;  %6661 = vst [vmem:[#allocation2 + $0x44] sm:$0xf] %v13057_v41  ;;  %v13073_v52 = vcombine.low %v20517_v14, %v20517_v14  ;;  %v13074_v16 = vcombine.high %v20517_v14, %v20517_v14  ;;  %v13075_v15 = vcombine.low %v20651_v61, %v20651_v61 }
 0x6ad   :  { %6662 = vst [vmem:[#allocation2 + $0x48] sm:$0xf] %v13058_v24  ;;  %6663 = vst [vmem:[#allocation2 + $0x4c] sm:$0xf] %v13059_v55  ;;  %v13076_v35 = vcombine.low %v20522_v34, %v20522_v34  ;;  %v13077_v22 = vcombine.high %v20522_v34, %v20522_v34  ;;  %v13078_v54 = vcombine.low %v20656_v20, %v20656_v20 }
 0x6ae   :  { %6664 = vst [vmem:[#allocation2 + $0x50] sm:$0xf] %v13060_v21  ;;  %6665 = vst [vmem:[#allocation2 + $0x54] sm:$0xf] %v13061_v32  ;;  %v13079_v53 = vcombine.low %v20527_v3, %v20527_v3  ;;  %v13080_v14 = vcombine.high %v20527_v3, %v20527_v3  ;;  %v13081_v61 = vcombine.low %v20661_v25, %v20661_v25 }
 0x6af   :  { %6666 = vst [vmem:[#allocation2 + $0x58] sm:$0xf] %v13062_v49  ;;  %6667 = vst [vmem:[#allocation2 + $0x5c] sm:$0xf] %v13063_v26  ;;  %v13082_v17 = vcombine.low %v20532_v11, %v20532_v11  ;;  %v13083_v34 = vcombine.high %v20532_v11, %v20532_v11  ;;  %v13084_v20 = vcombine.low %v20666_v51, %v20666_v51 }
 0x6b0   :  { %6668 = vst [vmem:[#allocation2 + $0x60] sm:$0xf] %v13064_v57  ;;  %6669 = vst [vmem:[#allocation2 + $0x64] sm:$0xf] %v13065_v0  ;;  %v13085_v2 = vcombine.low %v20537_v1, %v20537_v1  ;;  %v13086_v3 = vcombine.high %v20537_v1, %v20537_v1  ;;  %v13087_v25 = vcombine.low %v20671_v36, %v20671_v36 }
 0x6b1   :  { %6670 = vst [vmem:[#allocation2 + $0x68] sm:$0xf] %v13066_v43  ;;  %6671 = vst [vmem:[#allocation2 + $0x6c] sm:$0xf] %v13067_v50  ;;  %v13088_v11 = vcombine.low %v20542_v33, %v20542_v33  ;;  %v13089_v48 = vcombine.high %v20542_v33, %v20542_v33  ;;  %v13090_v51 = vcombine.low %v20676_v12, %v20676_v12  ;;  %v24307_v50 = vld [vmem:[#allocation26_spill] sm:$0xff] }
 0x6b2   :  { %6672 = vst [vmem:[#allocation2 + $0x70] sm:$0xf] %v13068_v46  ;;  %6673 = vst [vmem:[#allocation2 + $0x74] sm:$0xf] %v13069_v9  ;;  %v13091_v56 = vcombine.low %v20547_v7, %v20547_v7  ;;  %v13092_v1 = vcombine.high %v20547_v7, %v20547_v7  ;;  %v13093_v36 = vcombine.low %v20681_v4, %v20681_v4  ;;  %v6760_v9 = vld [vmem:[#allocation2 + $0x10] sm:$0xf] }
 0x6b3   :  { %6674 = vst [vmem:[#allocation2 + $0x78] sm:$0xf] %v13070_v28  ;;  %6675 = vst [vmem:[#allocation2 + $0x7c] sm:$0xf] %v13071_v47  ;;  %v13094_v40 = vcombine.low %v20552_v42, %v20552_v42  ;;  %v13095_v33 = vcombine.high %v20552_v42, %v20552_v42  ;;  %v13096_v12 = vcombine.low %v20686_v38, %v20686_v38  ;;  %v24308_v47 = vld [vmem:[#allocation27_spill] sm:$0xff] }
 0x6b4   :  { %6676 = vst [vmem:[#allocation2 + $0x80] sm:$0xf] %v13072_v60  ;;  %6677 = vst [vmem:[#allocation2 + $0x84] sm:$0xf] %v13073_v52  ;;  %v13097_v62 = vcombine.low %v20556_v19, %v20556_v19  ;;  %v13098_v7 = vcombine.high %v20556_v19, %v20556_v19  ;;  %v13099_v4 = vcombine.low %v20691_v63, %v20691_v63  ;;  %v24309_v52 = vld [vmem:[#allocation28_spill] sm:$0xff] }
 0x6b5   :  { %6678 = vst [vmem:[#allocation2 + $0x88] sm:$0xf] %v13074_v16  ;;  %6679 = vst [vmem:[#allocation2 + $0x8c] sm:$0xf] %v13075_v15  ;;  %v13100_v42 = vcombine.low %v20560_v6, %v20560_v6  ;;  %v13101_v37 = vcombine.high %v20560_v6, %v20560_v6  ;;  %v13102_v38 = vcombine.low %v20696_v18, %v20696_v18 }
 0x6b6   :  { %6680 = vst [vmem:[#allocation2 + $0x90] sm:$0xf] %v13076_v35  ;;  %6681 = vst [vmem:[#allocation2 + $0x94] sm:$0xf] %v13077_v22  ;;  %v13103_v29 = vcombine.low %v20564_v13, %v20564_v13  ;;  %v13104_v19 = vcombine.high %v20564_v13, %v20564_v13  ;;  %v13105_v63 = vcombine.low %v20701_v45, %v20701_v45  ;;  %v6761_v35 = vld [vmem:[#allocation2 + $0x14] sm:$0xf] }
 0x6b7   :  { %6682 = vst [vmem:[#allocation2 + $0x98] sm:$0xf] %v13078_v54  ;;  %6683 = vst [vmem:[#allocation2 + $0x9c] sm:$0xf] %v13079_v53  ;;  %v13106_v41 = vcombine.low %v20568_v30, %v20568_v30  ;;  %v13107_v6 = vcombine.high %v20568_v30, %v20568_v30  ;;  %v13108_v18 = vcombine.low %v20706_v39, %v20706_v39  ;;  %v6762_v22 = vld [vmem:[#allocation2 + $0x18] sm:$0xf] }
 0x6b8   :  { %6684 = vst [vmem:[#allocation2 + $0xa0] sm:$0xf] %v13080_v14  ;;  %6685 = vst [vmem:[#allocation2 + $0xa4] sm:$0xf] %v13081_v61  ;;  %v13109_v24 = vcombine.low %v20572_v5, %v20572_v5  ;;  %v13110_v13 = vcombine.high %v20572_v5, %v20572_v5  ;;  %v13111_v45 = vcombine.low %v20711_v27, %v20711_v27  ;;  %v24310_v54 = vld [vmem:[#allocation32_spill] sm:$0xff]  ;;  %v24311_v14 = vld [vmem:[#allocation29_spill] sm:$0xff] }
 0x6b9   :  { %6686 = vst [vmem:[#allocation2 + $0xa8] sm:$0xf] %v13082_v17  ;;  %6687 = vst [vmem:[#allocation2 + $0xac] sm:$0xf] %v13083_v34  ;;  %v13112_v30 = vcombine.low %v20576_v59, %v20576_v59  ;;  %v13113_v55 = vcombine.high %v20576_v59, %v20576_v59  ;;  %v13114_v39 = vcombine.low %v20716_v31, %v20716_v31  ;;  %v24312_v34 = vld [vmem:[#allocation55_spill] sm:$0xff] }
 0x6ba   :  { %6688 = vst [vmem:[#allocation2 + $0xb0] sm:$0xf] %v13084_v20  ;;  %6689 = vst [vmem:[#allocation2 + $0xb4] sm:$0xf] %v13085_v2  ;;  %v13115_v21 = vcombine.low %v20580_v23, %v20580_v23  ;;  %v13116_v5 = vcombine.high %v20580_v23, %v20580_v23  ;;  %v13117_v27 = vcombine.low %v20721_v10, %v20721_v10  ;;  %v24304_v10 = vld [vmem:[#allocation31_spill] sm:$0xff] }
 0x6bb   :  { %6690 = vst [vmem:[#allocation2 + $0xb8] sm:$0xf] %v13086_v3  ;;  %6691 = vst [vmem:[#allocation2 + $0xbc] sm:$0xf] %v13087_v25  ;;  %v13118_v32 = vcombine.low %v20584_v8, %v20584_v8  ;;  %v13119_v59 = vcombine.high %v20584_v8, %v20584_v8  ;;  %v13120_v31 = vcombine.low %v20726_v44, %v20726_v44  ;;  %v24305_v8 = vld [vmem:[#allocation25_spill] sm:$0xff]  ;;  %v24306_v44 = vld [vmem:[#allocation34_spill] sm:$0xff] }
 0x6bc   :  { %6692 = vst [vmem:[#allocation2 + $0xc0] sm:$0xf] %v13088_v11  ;;  %6693 = vst [vmem:[#allocation2 + $0xc4] sm:$0xf] %v13089_v48  ;;  %v13121_v49 = vcombine.low %v20588_v58, %v20588_v58  ;;  %v13122_v23 = vcombine.high %v20588_v58, %v20588_v58  ;;  %v13123_v26 = vcombine.low %v24304_v10, %v24304_v10  ;;  %v6759_v58 = vld [vmem:[#allocation2 + $0xc] sm:$0xf] }
 0x6bd   :  { %6694 = vst [vmem:[#allocation2 + $0xc8] sm:$0xf] %v13090_v51  ;;  %6695 = vst [vmem:[#allocation2 + $0xe4] sm:$0xf] %v13091_v56  ;;  %v13124_v57 = vcombine.low %v24305_v8, %v24305_v8  ;;  %v13125_v0 = vcombine.high %v24305_v8, %v24305_v8  ;;  %v13126_v43 = vcombine.low %v24306_v44, %v24306_v44  ;;  %v6905_v2 = vshrl.u32 %v6759_v58, 16 }
 0x6be   :  { %6696 = vst [vmem:[#allocation2 + $0xe8] sm:$0xf] %v13092_v1  ;;  %6697 = vst [vmem:[#allocation2 + $0xec] sm:$0xf] %v13093_v36  ;;  %v13127_v46 = vcombine.low %v24307_v50, %v24307_v50  ;;  %v13128_v28 = vcombine.high %v24307_v50, %v24307_v50  ;;  %v13129_v60 = vcombine.low %v24308_v47, %v24308_v47  ;;  %v6908_v3 = vshll.u32 %v6759_v58, 16 }
 0x6bf   :  { %6698 = vst [vmem:[#allocation2 + $0xf0] sm:$0xf] %v13094_v40  ;;  %6699 = vst [vmem:[#allocation2 + $0xf4] sm:$0xf] %v13095_v33  ;;  %v13130_v16 = vcombine.low %v24309_v52, %v24309_v52  ;;  %v13131_v15 = vcombine.high %v24309_v52, %v24309_v52  ;;  %v13132_v53 = vcombine.low %v24310_v54, %v24310_v54  ;;  %v6914_v25 = vshll.u32 %v6760_v9, 16 }
 0x6c0   :  { %6700 = vst [vmem:[#allocation2 + $0xf8] sm:$0xf] %v13096_v12  ;;  %6701 = vst [vmem:[#allocation2 + $0xfc] sm:$0xf] %v13097_v62  ;;  %v13136_v61 = vcombine.low %v24311_v14, %v24311_v14  ;;  %v13137_v17 = vcombine.high %v24311_v14, %v24311_v14  ;;  %v13138_v20 = vcombine.low %v24312_v34, %v24312_v34  ;;  %v6763_v11 = vld [vmem:[#allocation2 + $0x1c] sm:$0xf] }
 0x6c1   :  { %6702 = vst [vmem:[#allocation2 + $0x100] sm:$0xf] %v13098_v7  ;;  %6703 = vst [vmem:[#allocation2 + $0x104] sm:$0xf] %v13099_v4  ;;  %v17059_v48 = vmov 0   ;;  %v6918_v51 = vshrl.u32 %v6760_v9, 16 }
 0x6c2   :  { %6704 = vst [vmem:[#allocation2 + $0x108] sm:$0xf] %v13100_v42  ;;  %6705 = vst [vmem:[#allocation2 + $0x10c] sm:$0xf] %v13101_v37  ;;  %v6924_v56 = vshll.u32 %v6761_v35, 16  ;;  %v6929_v1 = vshrl.u32 %v6762_v22, 16 }
 0x6c3   :  { %6706 = vst [vmem:[#allocation2 + $0x110] sm:$0xf] %v13102_v38  ;;  %6707 = vst [vmem:[#allocation2 + $0x114] sm:$0xf] %v13103_v29  ;;  %v6907_v36 = vrot.slane %v6905_v2, 4  ;;  %v6910_v40 = vrot.slane %v6908_v3, 5 }
 0x6c4   :  { %6708 = vst [vmem:[#allocation2 + $0x118] sm:$0xf] %v13104_v19  ;;  %6709 = vst [vmem:[#allocation2 + $0x11c] sm:$0xf] %v13105_v63  ;;  %v6916_v33 = vrot.slane %v6914_v25, 5  ;;  %v6932_v12 = vshll.u32 %v6762_v22, 16 }
 0x6c5   :  { %6710 = vst [vmem:[#allocation2 + $0x120] sm:$0xf] %v13106_v41  ;;  %6711 = vst [vmem:[#allocation2 + $0x124] sm:$0xf] %v13107_v6  ;;  %v6765_v62 = vld [vmem:[#allocation2 + $0x24] sm:$0xf]  ;;  %v6911_v38 = vor.u32 %v6910_v40, %v6907_v36 }
 0x6c6   :  { %6712 = vst [vmem:[#allocation2 + $0x128] sm:$0xf] %v13108_v18  ;;  %6713 = vst [vmem:[#allocation2 + $0x12c] sm:$0xf] %v13109_v24  ;;  %v6920_v7 = vrot.slane %v6918_v51, 4  ;;  %v6931_v42 = vrot.slane %v6929_v1, 4 }
 0x6c7   :  { %6714 = vst [vmem:[#allocation2 + $0x130] sm:$0xf] %v13110_v13  ;;  %6715 = vst [vmem:[#allocation2 + $0x134] sm:$0xf] %v13111_v45  ;;  %v6764_v4 = vld [vmem:[#allocation2 + $0x20] sm:$0xf] }
 0x6c8   :  { %6716 = vst [vmem:[#allocation2 + $0x138] sm:$0xf] %v13112_v30  ;;  %6717 = vst [vmem:[#allocation2 + $0x13c] sm:$0xf] %v13113_v55  ;;  %v6938_v37 = vshll.u32 %v6763_v11, 16  ;;  %v6926_v29 = vrot.slane %v6924_v56, 5  ;;  %v6921_v6 = vor.u32 %v6920_v7, %v6916_v33 }
 0x6c9   :  { %6718 = vst [vmem:[#allocation2 + $0x140] sm:$0xf] %v13114_v39  ;;  %6719 = vst [vmem:[#allocation2 + $0x144] sm:$0xf] %v13115_v21  ;;  %v6934_v19 = vrot.slane %v6932_v12, 5  ;;  %v6942_v63 = vshrl.u32 %v6763_v11, 16 }
 0x6ca   :  { %6720 = vst [vmem:[#allocation2 + $0x148] sm:$0xf] %v13116_v5  ;;  %6721 = vst [vmem:[#allocation2 + $0x14c] sm:$0xf] %v13117_v27  ;;  %v6766_v41 = vld [vmem:[#allocation2 + $0x28] sm:$0xf] }
 0x6cb   :  { %6722 = vst [vmem:[#allocation2 + $0x150] sm:$0xf] %v13118_v32  ;;  %6723 = vst [vmem:[#allocation2 + $0x154] sm:$0xf] %v13119_v59  ;;  %v6940_v18 = vrot.slane %v6938_v37, 5  ;;  %v6953_v24 = vshrl.u32 %v6765_v62, 16  ;;  %v6935_v30 = vor.u32 %v6934_v19, %v6931_v42 }
 0x6cc   :  { %6724 = vst [vmem:[#allocation2 + $0x158] sm:$0xf] %v13120_v31  ;;  %6725 = vst [vmem:[#allocation2 + $0x15c] sm:$0xf] %v13121_v49  ;;  %v6956_v13 = vshll.u32 %v6765_v62, 16  ;;  %v6912_v45 = vrot.slane %v6911_v38, 4 }
 0x6cd   :  { %6726 = vst [vmem:[#allocation2 + $0x160] sm:$0xf] %v13122_v23  ;;  %6727 = vst [vmem:[#allocation2 + $0x164] sm:$0xf] %v13123_v26  ;;  %v6944_v55 = vrot.slane %v6942_v63, 4  ;;  %v6948_v39 = vshll.u32 %v6764_v4, 16 }
 0x6ce   :  { %6728 = vst [vmem:[#allocation2 + $0x168] sm:$0xf] %v13124_v57  ;;  %6729 = vst [vmem:[#allocation2 + $0x16c] sm:$0xf] %v13125_v0  ;;  %v6922_v21 = vrot.slane %v6921_v6, 4  ;;  %v6955_v5 = vrot.slane %v6953_v24, 4  ;;  %v6917_v10 = vsel %vm17138_vm2, %v6912_v45, %v6916_v33 }
 0x6cf   :  { %6730 = vst [vmem:[#allocation2 + $0x170] sm:$0xf] %v13126_v43  ;;  %6731 = vst [vmem:[#allocation2 + $0x174] sm:$0xf] %v13127_v46  ;;  %v6958_v27 = vrot.slane %v6956_v13, 5  ;;  %v6962_v32 = vshll.u32 %v6766_v41, 16  ;;  %v6945_v26 = vor.u32 %v6944_v55, %v6940_v18 }
 0x6d0   :  { %6732 = vst [vmem:[#allocation2 + $0x178] sm:$0xf] %v13128_v28  ;;  %6733 = vst [vmem:[#allocation2 + $0x17c] sm:$0xf] %v13129_v60  ;;  %v6927_v50 = vsel %vm17138_vm2, %v6922_v21, %v6926_v29  ;;  %v6936_v46 = vrot.slane %v6935_v30, 4  ;;  %v6950_v58 = vrot.slane %v6948_v39, 5 }
 0x6d1   :  { %6734 = vst [vmem:[#allocation2 + $0x180] sm:$0xf] %v13130_v16  ;;  %6735 = vst [vmem:[#allocation2 + $0x184] sm:$0xf] %v13131_v15  ;;  %v6767_v9 = vld [vmem:[#allocation2 + $0x2c] sm:$0xf]  ;;  %v20934_v35 = vcombine.low %v6917_v10, %v6927_v50 }
 0x6d2   :  { %6736 = vst [vmem:[#allocation2 + $0x188] sm:$0xf] %v13132_v53  ;;  %6740 = vst [vmem:[#allocation2 + $0x198] sm:$0xf] %v13136_v61  ;;  %v6768_v16 = vld [vmem:[#allocation2 + $0x30] sm:$0xf]  ;;  %v6941_v22 = vsel %vm17138_vm2, %v6936_v46, %v6940_v18  ;;  %v6959_v61 = vor.u32 %v6958_v27, %v6955_v5 }
 0x6d3   :  { %6741 = vst [vmem:[#allocation2 + $0x19c] sm:$0xf] %v13137_v17  ;;  %6742 = vst [vmem:[#allocation2 + $0x1a0] sm:$0xf] %v13138_v20  ;;  %v6946_v54 = vrot.slane %v6945_v26, 4  ;;  %v6964_v17 = vrot.slane %v6962_v32, 5 }
 0x6d4   :  { %6743 = vst [vmem:[#allocation2] sm:$0xf] %v17059_v48  ;;  %6744 = vst [vmem:[#allocation2 + $0x4] sm:$0xf] %v17059_v48  ;;  %v6966_v20 = vshrl.u32 %v6766_v41, 16  ;;  %v6972_v2 = vshll.u32 %v6767_v9, 16 }
 0x6d5   :  { %6745 = vst [vmem:[#allocation2 + $0x8] sm:$0xf] %v17059_v48  ;;  %6746 = vst [vmem:[#allocation2 + $0xd8] sm:$0xf] %v17059_v48  ;;  %v6951_v34 = vsel %vm17138_vm2, %v6946_v54, %v6950_v58  ;;  %v6769_v3 = vld [vmem:[#allocation2 + $0x34] sm:$0xf] }
 0x6d6   :  { %6747 = vst [vmem:[#allocation2 + $0xdc] sm:$0xf] %v17059_v48  ;;  %6748 = vst [vmem:[#allocation2 + $0xe0] sm:$0xf] %v17059_v48  ;;  %v6977_v25 = vshrl.u32 %v6768_v16, 16  ;;  %v20940_v51 = vcombine.low %v6941_v22, %v6951_v34  ;;  %v6960_v56 = vrot.slane %v6959_v61, 4 }
 0x6d7   :  { %6750 = vst [vmem:[#allocation2 + $0xcc] sm:$0xf] %v17059_v48  ;;  %6751 = vst [vmem:[#allocation2 + $0xd0] sm:$0xf] %v17059_v48  ;;  %v6770_v1 = vld [vmem:[#allocation2 + $0x38] sm:$0xf] }
 0x6d8   :  { %6752 = vst [vmem:[#allocation2 + $0xd4] sm:$0xf] %v17059_v48  ;;  %6753 = vst [vmem:[#allocation2 + $0x1a4] sm:$0xf] %v17059_v48  ;;  %v6968_v36 = vrot.slane %v6966_v20, 4  ;;  %v6974_v40 = vrot.slane %v6972_v2, 5  ;;  %v6965_v42 = vsel %vm17138_vm2, %v6960_v56, %v6964_v17 }
 0x6d9   :  { %6754 = vst [vmem:[#allocation2 + $0x1a8] sm:$0xf] %v17059_v48  ;;  %6755 = vst [vmem:[#allocation2 + $0x1ac] sm:$0xf] %v17059_v48  ;;  %v6979_v33 = vrot.slane %v6977_v25, 4  ;;  %v6980_v12 = vshll.u32 %v6768_v16, 16 }
 0x6da   :  { %24314 = vst [vmem:[#allocation30_spill] sm:$0xff] %v20934_v35  ;;  %24315 = vst [vmem:[#allocation38_spill] sm:$0xff] %v20940_v51  ;;  %v6771_v62 = vld [vmem:[#allocation2 + $0x3c] sm:$0xf]  ;;  %v6986_v37 = vshll.u32 %v6769_v3, 16  ;;  %v6969_v19 = vor.u32 %v6968_v36, %v6964_v17  ;;  %v6990_v41 = vshrl.u32 %v6769_v3, 16 }
 0x6db   :  { %v6756_v59 = vld [vmem:[#allocation2] sm:$0xf]  ;;  %v6757_v31 = vld [vmem:[#allocation2 + $0x4] sm:$0xf]  ;;  %v6982_v63 = vrot.slane %v6980_v12, 5  ;;  %v6996_v18 = vshll.u32 %v6770_v1, 16 }
 0x6dc   :  { %v6758_v49 = vld [vmem:[#allocation2 + $0x8] sm:$0xf]  ;;  %v6881_v8 = vshrl.u32 %v6756_v59, 16  ;;  %v6884_v57 = vshll.u32 %v6756_v59, 16  ;;  %v6890_v0 = vshll.u32 %v6757_v31, 16  ;;  %v6894_v44 = vshrl.u32 %v6757_v31, 16 }
 0x6dd   :  { %v6900_v43 = vshll.u32 %v6758_v49, 16  ;;  %v6772_v38 = vld [vmem:[#allocation2 + $0x40] sm:$0xf]  ;;  %v6988_v6 = vrot.slane %v6986_v37, 5  ;;  %v7001_v24 = vshrl.u32 %v6771_v62, 16  ;;  %v7004_v13 = vshll.u32 %v6771_v62, 16 }
 0x6de   :  { %v6883_v28 = vrot.slane %v6881_v8, 4  ;;  %v6886_v47 = vrot.slane %v6884_v57, 5  ;;  %v6892_v60 = vrot.slane %v6890_v0, 5  ;;  %v6896_v52 = vrot.slane %v6894_v44, 4  ;;  %v16786_v45 = vld [vmem:[%s23629_s4 + $0x8] sm:$0xff]   ;;  %v16977_v10 = vld [vmem:[%s23629_s4] sm:$0xff]  }
 0x6df   :  { %v6902_v15 = vrot.slane %v6900_v43, 5  ;;  %v6970_v30 = vrot.slane %v6969_v19, 4  ;;  %v6983_v55 = vor.u32 %v6982_v63, %v6979_v33  ;;  %v6992_v39 = vrot.slane %v6990_v41, 4  ;;  %v6773_v21 = vld [vmem:[#allocation2 + $0x44] sm:$0xf]  ;;  %v16787_v9 = vld [vmem:[%s23629_s4 + $0x10] sm:$0xff]  }
 0x6e0   :  { %v6887_v53 = vor.u32 %v6886_v47, %v6883_v28  ;;  %v6897_v14 = vor.u32 %v6896_v52, %v6892_v60  ;;  %v7010_v5 = vshll.u32 %v6772_v38, 16  ;;  %v6998_v27 = vrot.slane %v6996_v18, 5  ;;  %v6774_v49 = vld [vmem:[#allocation2 + $0x48] sm:$0xf]  ;;  %v6775_v44 = vld [vmem:[#allocation2 + $0x4c] sm:$0xf] }
 0x6e1   :  { %v7003_v32 = vrot.slane %v7001_v24, 4  ;;  %v7006_v59 = vrot.slane %v7004_v13, 5  ;;  %v7014_v31 = vshrl.u32 %v6772_v38, 16  ;;  %v6975_v26 = vsel %vm17138_vm2, %v6970_v30, %v6974_v40  ;;  %v6778_v2 = vld [vmem:[#allocation2 + $0x58] sm:$0xf] }
 0x6e2   :  { %v6888_v11 = vrot.slane %v6887_v53, 4  ;;  %v6898_v48 = vrot.slane %v6897_v14, 4  ;;  %v6984_v8 = vrot.slane %v6983_v55, 4  ;;  %v6993_v57 = vor.u32 %v6992_v39, %v6988_v6  ;;  %v6777_v14 = vld [vmem:[#allocation2 + $0x54] sm:$0xf]  ;;  %v16788_v56 = vld [vmem:[%s23629_s4 + $0x18] sm:$0xff]  }
 0x6e3   :  { %v7012_v0 = vrot.slane %v7010_v5, 5  ;;  %v20958_v43 = vcombine.low %v6965_v42, %v6975_v26  ;;  %v7007_v50 = vor.u32 %v7006_v59, %v7003_v32  ;;  %v7016_v46 = vrot.slane %v7014_v31, 4  ;;  %v6779_v33 = vld [vmem:[#allocation2 + $0x5c] sm:$0xf]  ;;  %v6780_v37 = vld [vmem:[#allocation2 + $0x60] sm:$0xf] }
 0x6e4   :  { %v6893_v7 = vsel %vm17138_vm2, %v6888_v11, %v6892_v60  ;;  %v6903_v4 = vsel %vm17138_vm2, %v6898_v48, %v6902_v15  ;;  %v7020_v58 = vshll.u32 %v6773_v21, 16  ;;  %v6989_v28 = vsel %vm17138_vm2, %v6984_v8, %v6988_v6  ;;  %v6776_v60 = vld [vmem:[#allocation2 + $0x50] sm:$0xf]  ;;  %v6781_v41 = vld [vmem:[#allocation2 + $0x64] sm:$0xf] }
 0x6e5   :  { %v13155_v29 = vcombine.low %v6893_v7, %v6903_v4  ;;  %24316 = vst [vmem:[#allocation40_spill] sm:$0xff] %v20958_v43  ;;  %v6994_v47 = vrot.slane %v6993_v57, 4  ;;  %v7025_v52 = vshrl.u32 %v6774_v49, 16  ;;  %v7028_v16 = vshll.u32 %v6774_v49, 16  ;;  %v6782_v32 = vld [vmem:[#allocation2 + $0x68] sm:$0xf] }
 0x6e6   :  { %v7008_v15 = vrot.slane %v7007_v50, 4  ;;  %v7017_v22 = vor.u32 %v7016_v46, %v7012_v0  ;;  %v7022_v54 = vrot.slane %v7020_v58, 5  ;;  %v7034_v53 = vshll.u32 %v6775_v44, 16  ;;  %v6783_v49 = vld [vmem:[#allocation2 + $0x6c] sm:$0xf] }
 0x6e7   :  { %14940 = vmatprep.mubr.bf16.mxu1 %v13155_v29  ;;  %v6999_v61 = vsel %vm17138_vm2, %v6994_v47, %v6998_v27  ;;  %v7027_v17 = vrot.slane %v7025_v52, 4  ;;  %v7030_v34 = vrot.slane %v7028_v16, 5  ;;  %v7038_v20 = vshrl.u32 %v6775_v44, 16  ;;  %v16790_v58 = vld [vmem:[%s23629_s4 + $0x28] sm:$0xff]  }
 0x6e8   :  { %14941 = vmatmul.mubr.bf16.vlgmr.msra.gmra.mrb[0].mxu1 %v20934_v35  ;;  %v20967_v3 = vcombine.low %v6989_v28, %v6999_v61  ;;  %v7013_v25 = vsel %vm17138_vm2, %v7008_v15, %v7012_v0  ;;  %v7018_v11 = vrot.slane %v7017_v22, 4  ;;  %v7036_v48 = vrot.slane %v7034_v53, 5 }
 0x6e9   :  { %14944 = vmatprep.mubr.bf16.mxu1 %v20940_v51  ;;  %15005 = vmatpush3.bf16.msra.mxu1 %v16977_v10  ;;  %v7031_v1 = vor.u32 %v7030_v34, %v7027_v17  ;;  %v7040_v36 = vrot.slane %v7038_v20, 4  ;;  %v7044_v40 = vshll.u32 %v6776_v60, 16  ;;  %v7049_v12 = vshrl.u32 %v6777_v14, 16  ;;  %v6784_v60 = vld [vmem:[#allocation2 + $0x70] sm:$0xf] }
 0x6ea   :  { %15006 = vmatprep.subr.bf16.mxu1 %v16786_v45  ;;  %24317 = vst [vmem:[#allocation33_spill] sm:$0xff] %v20967_v3  ;;  %v7023_v62 = vsel %vm17138_vm2, %v7018_v11, %v7022_v54  ;;  %v7052_v7 = vshll.u32 %v6777_v14, 16  ;;  %v7058_v4 = vshll.u32 %v6778_v2, 16  ;;  %v7062_v42 = vshrl.u32 %v6778_v2, 16  ;;  %v6785_v54 = vld [vmem:[#allocation2 + $0x74] sm:$0xf] }
 0x6eb   :  { %v20978_v38 = vcombine.low %v7013_v25, %v7023_v62  ;;  %v7032_v29 = vrot.slane %v7031_v1, 4  ;;  %v7041_v19 = vor.u32 %v7040_v36, %v7036_v48  ;;  %v7046_v63 = vrot.slane %v7044_v40, 5  ;;  %v6786_v14 = vld [vmem:[#allocation2 + $0x78] sm:$0xf]  ;;  %v6787_v40 = vld [vmem:[#allocation2 + $0x7c] sm:$0xf] }
 0x6ec   :  { %v7051_v6 = vrot.slane %v7049_v12, 4  ;;  %v7054_v18 = vrot.slane %v7052_v7, 5  ;;  %v7060_v24 = vrot.slane %v7058_v4, 5  ;;  %v7064_v13 = vrot.slane %v7062_v42, 4 }
 0x6ed   :  { %15007 = vmatpush3.bf16.msra.mxu1 %v16786_v45  ;;  %24318 = vst [vmem:[#allocation39_spill] sm:$0xff] %v20978_v38  ;;  %v16789_v45 = vld [vmem:[%s23629_s4 + $0x20] sm:$0xff]   ;;  %v7037_v30 = vsel %vm17138_vm2, %v7032_v29, %v7036_v48  ;;  %v7042_v55 = vrot.slane %v7041_v19, 4  ;;  %v7068_v39 = vshll.u32 %v6779_v33, 16  ;;  %v7073_v21 = vshrl.u32 %v6780_v37, 16 }
 0x6ee   :  { %15008 = vmatprep.subr.bf16.mxu1 %v16787_v9  ;;  %v7055_v5 = vor.u32 %v7054_v18, %v7051_v6  ;;  %v7065_v27 = vor.u32 %v7064_v13, %v7060_v24  ;;  %v7076_v59 = vshll.u32 %v6780_v37, 16  ;;  %v7082_v31 = vshll.u32 %v6781_v41, 16  ;;  %v6788_v37 = vld [vmem:[#allocation2 + $0x80] sm:$0xf]  ;;  %v6789_v29 = vld [vmem:[#allocation2 + $0x84] sm:$0xf] }
 0x6ef   :  { %v7047_v10 = vsel %vm17138_vm2, %v7042_v55, %v7046_v63  ;;  %v7070_v26 = vrot.slane %v7068_v39, 5  ;;  %v7075_v8 = vrot.slane %v7073_v21, 4  ;;  %v7086_v57 = vshrl.u32 %v6781_v41, 16 }
 0x6f0   :  { %14945 = vmatmul.mubr.bf16.gmra.mrb[4].mxu1 %v20958_v43  ;;  %v20987_v0 = vcombine.low %v7037_v30, %v7047_v10  ;;  %v7056_v44 = vrot.slane %v7055_v5, 4  ;;  %v7066_v50 = vrot.slane %v7065_v27, 4  ;;  %v7078_v46 = vrot.slane %v7076_v59, 5  ;;  %v16792_v30 = vld [vmem:[%s23629_s4 + $0x38] sm:$0xff]   ;;  %v21012_v5 = vld [vmem:[#allocation2 + $0x88] sm:$0xf] }
 0x6f1   :  { %14948 = vmatprep.mubr.bf16.mxu1 %v20967_v3  ;;  %15009 = vmatpush3.bf16.msra.mxu1 %v16787_v9  ;;  %v7084_v9 = vrot.slane %v7082_v31, 5  ;;  %v7088_v28 = vrot.slane %v7086_v57, 4  ;;  %v7092_v47 = vshll.u32 %v6782_v32, 16  ;;  %v7097_v52 = vshrl.u32 %v6783_v49, 16 }
 0x6f2   :  { %15010 = vmatprep.subr.bf16.mxu1 %v16788_v56  ;;  %24319 = vst [vmem:[#allocation42_spill] sm:$0xff] %v20987_v0  ;;  %v7061_v16 = vsel %vm17138_vm2, %v7056_v44, %v7060_v24  ;;  %v7071_v15 = vsel %vm17138_vm2, %v7066_v50, %v7070_v26  ;;  %v7079_v22 = vor.u32 %v7078_v46, %v7075_v8  ;;  %v7100_v53 = vshll.u32 %v6783_v49, 16  ;;  %v6791_v49 = vld [vmem:[#allocation2 + $0x8c] sm:$0xf]  ;;  %v21018_v50 = vld [vmem:[#allocation2 + $0x90] sm:$0xf] }
 0x6f3   :  { %v20998_v61 = vcombine.low %v7061_v16, %v7071_v15  ;;  %v7089_v17 = vor.u32 %v7088_v28, %v7084_v9  ;;  %v7094_v34 = vrot.slane %v7092_v47, 5  ;;  %v7099_v20 = vrot.slane %v7097_v52, 4  ;;  %v21024_v47 = vld [vmem:[#allocation2 + $0x94] sm:$0xf] }
 0x6f4   :  { %v7080_v2 = vrot.slane %v7079_v22, 4  ;;  %v7102_v25 = vrot.slane %v7100_v53, 5  ;;  %v7106_v11 = vshll.u32 %v6784_v60, 16  ;;  %v7110_v48 = vshrl.u32 %v6784_v60, 16  ;;  %v21029_v60 = vld [vmem:[%s23629_s4 + $0x80] sm:$0xff]  }
 0x6f5   :  { %15011 = vmatpush3.bf16.msra.mxu1 %v16788_v56  ;;  %24320 = vst [vmem:[#allocation44_spill] sm:$0xff] %v20998_v61  ;;  %v16791_v56 = vld [vmem:[%s23629_s4 + $0x30] sm:$0xff]   ;;  %v7090_v1 = vrot.slane %v7089_v17, 4  ;;  %v7116_v36 = vshll.u32 %v6785_v54, 16  ;;  %v7121_v33 = vshrl.u32 %v6786_v14, 16  ;;  %v7124_v12 = vshll.u32 %v6786_v14, 16 }
 0x6f6   :  { %15012 = vmatprep.subr.bf16.mxu1 %v16789_v45  ;;  %v7085_v62 = vsel %vm17138_vm2, %v7080_v2, %v7084_v9  ;;  %v7103_v7 = vor.u32 %v7102_v25, %v7099_v20  ;;  %v7108_v4 = vrot.slane %v7106_v11, 5  ;;  %v7112_v42 = vrot.slane %v7110_v48, 4  ;;  %v6794_v17 = vld [vmem:[#allocation2 + $0x98] sm:$0xf] }
 0x6f7   :  { %v7095_v19 = vsel %vm17138_vm2, %v7090_v1, %v7094_v34  ;;  %v7118_v63 = vrot.slane %v7116_v36, 5  ;;  %v7123_v41 = vrot.slane %v7121_v33, 4  ;;  %v7126_v6 = vrot.slane %v7124_v12, 5 }
 0x6f8   :  { %14949 = vmatmul.mubr.bf16.gmra.mrb[8].mxu1 %v20978_v38  ;;  %v21007_v18 = vcombine.low %v7085_v62, %v7095_v19  ;;  %v7104_v24 = vrot.slane %v7103_v7, 4  ;;  %v7113_v13 = vor.u32 %v7112_v42, %v7108_v4  ;;  %v7134_v39 = vshrl.u32 %v6787_v40, 16 }
 0x6f9   :  { %14952 = vmatprep.mubr.bf16.mxu1 %v20987_v0  ;;  %15013 = vmatpush3.bf16.msra.mxu1 %v16789_v45  ;;  %v7130_v45 = vshll.u32 %v6787_v40, 16  ;;  %v7127_v55 = vor.u32 %v7126_v6, %v7123_v41  ;;  %v7140_v21 = vshll.u32 %v6788_v37, 16  ;;  %v7145_v27 = vshrl.u32 %v6789_v29, 16  ;;  %v21039_v40 = vld [vmem:[#allocation2 + $0x9c] sm:$0xf] }
 0x6fa   :  { %15014 = vmatprep.subr.bf16.mxu1 %v16790_v58  ;;  %24321 = vst [vmem:[#allocation41_spill] sm:$0xff] %v21007_v18  ;;  %v7109_v32 = vsel %vm17138_vm2, %v7104_v24, %v7108_v4  ;;  %v7114_v59 = vrot.slane %v7113_v13, 4  ;;  %v7148_v10 = vshll.u32 %v6789_v29, 16  ;;  %v7136_v8 = vrot.slane %v7134_v39, 4  ;;  %v21044_v4 = vld [vmem:[#allocation2 + $0xa0] sm:$0xf] }
 0x6fb   :  { %v7132_v31 = vrot.slane %v7130_v45, 5  ;;  %v7128_v26 = vrot.slane %v7127_v55, 4  ;;  %v7142_v57 = vrot.slane %v7140_v21, 5  ;;  %v7147_v44 = vrot.slane %v7145_v27, 4  ;;  %v6797_v6 = vld [vmem:[#allocation2 + $0xa4] sm:$0xf] }
 0x6fc   :  { %v7119_v46 = vsel %vm17138_vm2, %v7114_v59, %v7118_v63  ;;  %v7154_v9 = vshll.u32 %v21012_v5, 16  ;;  %v7158_v28 = vshrl.u32 %v21012_v5, 16  ;;  %v7164_v22 = vshll.u32 %v6791_v49, 16  ;;  %v21058_v21 = vld [vmem:[#allocation2 + $0xa8] sm:$0xf] }
 0x6fd   :  { %15015 = vmatpush3.bf16.msra.mxu1 %v16790_v58  ;;  %v7150_v58 = vrot.slane %v7148_v10, 5  ;;  %v21031_v52 = vcombine.low %v7109_v32, %v7119_v46  ;;  %v7133_v16 = vsel %vm17138_vm2, %v7128_v26, %v7132_v31  ;;  %v7137_v15 = vor.u32 %v7136_v8, %v7132_v31  ;;  %v21062_v49 = vld [vmem:[#allocation2 + $0xac] sm:$0xf] }
 0x6fe   :  { %15016 = vmatprep.subr.bf16.mxu1 %v16791_v56  ;;  %v7156_v53 = vrot.slane %v7154_v9, 5  ;;  %v7160_v14 = vrot.slane %v7158_v28, 4  ;;  %v7169_v34 = vshrl.u32 %v21018_v50, 16  ;;  %v7166_v2 = vrot.slane %v7164_v22, 5 }
 0x6ff   :  { %24322 = vst [vmem:[#allocation43_spill] sm:$0xff] %v21031_v52  ;;  %v7151_v54 = vor.u32 %v7150_v58, %v7147_v44  ;;  %v7138_v20 = vrot.slane %v7137_v15, 4  ;;  %v7172_v25 = vshll.u32 %v21018_v50, 16  ;;  %v7178_v11 = vshll.u32 %v21024_v47, 16  ;;  %v6800_v58 = vld [vmem:[#allocation2 + $0xb0] sm:$0xf] }
 0x700   :  { %14953 = vmatmul.mubr.bf16.gmra.mrb[12].mxu1 %v20998_v61  ;;  %v7171_v1 = vrot.slane %v7169_v34, 4  ;;  %v7182_v36 = vshrl.u32 %v21024_v47, 16  ;;  %v7188_v7 = vshll.u32 %v6794_v17, 16  ;;  %v7193_v24 = vshrl.u32 %v21039_v40, 16 }
 0x701   :  { %14956 = vmatprep.mubr.bf16.mxu1 %v21007_v18  ;;  %15017 = vmatpush3.bf16.msra.mxu1 %v16791_v56  ;;  %v7152_v48 = vrot.slane %v7151_v54, 4  ;;  %v7161_v56 = vor.u32 %v7160_v14, %v7156_v53  ;;  %v7143_v33 = vsel %vm17138_vm2, %v7138_v20, %v7142_v57  ;;  %v7174_v12 = vrot.slane %v7172_v25, 5 }
 0x702   :  { %15018 = vmatprep.subr.bf16.mxu1 %v16792_v30  ;;  %v7180_v62 = vrot.slane %v7178_v11, 5  ;;  %v21047_v42 = vcombine.low %v7133_v16, %v7143_v33  ;;  %v7184_v19 = vrot.slane %v7182_v36, 4  ;;  %v7190_v41 = vrot.slane %v7188_v7, 5  ;;  %v6803_v33 = vld [vmem:[#allocation2 + $0xbc] sm:$0xf] }
 0x703   :  { %v7157_v37 = vsel %vm17138_vm2, %v7152_v48, %v7156_v53  ;;  %v7162_v29 = vrot.slane %v7161_v56, 4  ;;  %v7175_v63 = vor.u32 %v7174_v12, %v7171_v1  ;;  %v7196_v13 = vshll.u32 %v21039_v40, 16  ;;  %v21071_v53 = vld [vmem:[#allocation2 + $0xb4] sm:$0xf] }
 0x704   :  { %24323 = vst [vmem:[#allocation45_spill] sm:$0xff] %v21047_v42  ;;  %v7202_v55 = vshll.u32 %v21044_v4, 16  ;;  %v7206_v39 = vshrl.u32 %v21044_v4, 16  ;;  %v7195_v59 = vrot.slane %v7193_v24, 4  ;;  %v7212_v57 = vshll.u32 %v6797_v6, 16 }
 0x705   :  { %15019 = vmatpush3.bf16.msra.mxu1 %v16792_v30  ;;  %v7167_v45 = vsel %vm17138_vm2, %v7162_v29, %v7166_v2  ;;  %v7185_v30 = vor.u32 %v7184_v19, %v7180_v62  ;;  %v7176_v32 = vrot.slane %v7175_v63, 4  ;;  %v7198_v31 = vrot.slane %v7196_v13, 5  ;;  %v21075_v2 = vld [vmem:[#allocation2 + $0xb8] sm:$0xf] }
 0x706   :  { %15084 = vmatprep.subr.bf16.mxu1 %v21029_v60  ;;  %v21060_v27 = vcombine.low %v7157_v37, %v7167_v45  ;;  %v7204_v26 = vrot.slane %v7202_v55, 5  ;;  %v7208_v8 = vrot.slane %v7206_v39, 4  ;;  %v7217_v9 = vshrl.u32 %v21058_v21, 16  ;;  %v21087_v63 = vld [vmem:[#allocation2 + $0xd8] sm:$0xf] }
 0x707   :  { %v7186_v10 = vrot.slane %v7185_v30, 4  ;;  %v7181_v44 = vsel %vm17138_vm2, %v7176_v32, %v7180_v62  ;;  %v7199_v46 = vor.u32 %v7198_v31, %v7195_v59  ;;  %v7220_v28 = vshll.u32 %v21058_v21, 16  ;;  %v21091_v45 = vld [vmem:[#allocation2 + $0xdc] sm:$0xf] }
 0x708   :  { %14957 = vmatmul.mubr.bf16.gmra.mrb[16].mxu1 %v21031_v52  ;;  %24324 = vst [vmem:[#allocation49_spill] sm:$0xff] %v21060_v27  ;;  %v7209_v15 = vor.u32 %v7208_v8, %v7204_v26  ;;  %v7214_v22 = vrot.slane %v7212_v57, 5  ;;  %v7226_v54 = vshll.u32 %v21062_v49, 16  ;;  %v7219_v34 = vrot.slane %v7217_v9, 4 }
 0x709   :  { %14960 = vmatprep.mubr.bf16.mxu1 %v21047_v42  ;;  %v7191_v16 = vsel %vm17138_vm2, %v7186_v10, %v7190_v41  ;;  %v7200_v17 = vrot.slane %v7199_v46, 4  ;;  %v7222_v20 = vrot.slane %v7220_v28, 5  ;;  %v7230_v48 = vshrl.u32 %v21062_v49, 16  ;;  %v6812_v10 = vld [vmem:[#allocation2 + $0xe0] sm:$0xf] }
 0x70a   :  { %v21073_v14 = vcombine.low %v7181_v44, %v7191_v16  ;;  %v7210_v25 = vrot.slane %v7209_v15, 4  ;;  %v7228_v11 = vrot.slane %v7226_v54, 5  ;;  %v7236_v56 = vshll.u32 %v6800_v58, 16  ;;  %v6842_v42 = vld [vmem:[#allocation2 + $0x158] sm:$0xf] }
 0x70b   :  { %v7205_v1 = vsel %vm17138_vm2, %v7200_v17, %v7204_v26  ;;  %v7223_v36 = vor.u32 %v7222_v20, %v7219_v34  ;;  %v7241_v12 = vshrl.u32 %v21071_v53, 16  ;;  %v7244_v62 = vshll.u32 %v21071_v53, 16 }
 0x70c   :  { %24325 = vst [vmem:[#allocation63_spill] sm:$0xff] %v21073_v14  ;;  %v7215_v7 = vsel %vm17138_vm2, %v7210_v25, %v7214_v22  ;;  %v7232_v37 = vrot.slane %v7230_v48, 4  ;;  %v7238_v29 = vrot.slane %v7236_v56, 5  ;;  %v7250_v19 = vshll.u32 %v21075_v2, 16  ;;  %v21100_v22 = vld [vmem:[#allocation2 + $0xe4] sm:$0xf] }
 0x70d   :  { %v21089_v41 = vcombine.low %v7205_v1, %v7215_v7  ;;  %v7224_v6 = vrot.slane %v7223_v36, 4  ;;  %v7243_v24 = vrot.slane %v7241_v12, 4  ;;  %v7246_v13 = vrot.slane %v7244_v62, 5  ;;  %v21105_v25 = vld [vmem:[#allocation2 + $0xe8] sm:$0xf] }
 0x70e   :  { %v7233_v30 = vor.u32 %v7232_v37, %v7228_v11  ;;  %v7252_v55 = vrot.slane %v7250_v19, 5  ;;  %v7254_v39 = vshrl.u32 %v21075_v2, 16  ;;  %v7260_v32 = vshll.u32 %v6803_v33, 16  ;;  %v6815_v36 = vld [vmem:[#allocation2 + $0xec] sm:$0xf] }
 0x70f   :  { %24326 = vst [vmem:[#allocation64_spill] sm:$0xff] %v21089_v41  ;;  %v7229_v59 = vsel %vm17138_vm2, %v7224_v6, %v7228_v11  ;;  %v7247_v31 = vor.u32 %v7246_v13, %v7243_v24  ;;  %v7265_v26 = vshrl.u32 %v21087_v63, 16  ;;  %v7268_v8 = vshll.u32 %v21087_v63, 16  ;;  %v21116_v24 = vld [vmem:[#allocation2 + $0xf0] sm:$0xf] }
 0x710   :  { %14961 = vmatmul.mubr.bf16.gmra.mrb[20].mxu1 %v21060_v27  ;;  %v7234_v57 = vrot.slane %v7233_v30, 4  ;;  %v7256_v44 = vrot.slane %v7254_v39, 4  ;;  %v7262_v46 = vrot.slane %v7260_v32, 5  ;;  %v7274_v58 = vshll.u32 %v21091_v45, 16  ;;  %v21120_v32 = vld [vmem:[#allocation2 + $0xf4] sm:$0xf] }
 0x711   :  { %14964 = vmatprep.mubr.bf16.mxu1 %v21073_v14  ;;  %v7248_v9 = vrot.slane %v7247_v31, 4  ;;  %v7267_v28 = vrot.slane %v7265_v26, 4  ;;  %v7270_v16 = vrot.slane %v7268_v8, 5  ;;  %v7278_v15 = vshrl.u32 %v21091_v45, 16 }
 0x712   :  { %v7239_v54 = vsel %vm17138_vm2, %v7234_v57, %v7238_v29  ;;  %v7257_v17 = vor.u32 %v7256_v44, %v7252_v55  ;;  %v7276_v34 = vrot.slane %v7274_v58, 5  ;;  %v7284_v20 = vshll.u32 %v6812_v10, 16  ;;  %v6818_v58 = vld [vmem:[#allocation2 + $0xf8] sm:$0xf] }
 0x713   :  { %v21107_v11 = vcombine.low %v7229_v59, %v7239_v54  ;;  %v7253_v48 = vsel %vm17138_vm2, %v7248_v9, %v7252_v55  ;;  %v7271_v56 = vor.u32 %v7270_v16, %v7267_v28  ;;  %v7280_v1 = vrot.slane %v7278_v15, 4  ;;  %v21132_v54 = vld [vmem:[#allocation2 + $0xfc] sm:$0xf] }
 0x714   :  { %v7258_v33 = vrot.slane %v7257_v17, 4  ;;  %v7286_v12 = vrot.slane %v7284_v20, 5  ;;  %v7289_v62 = vshrl.u32 %v21100_v22, 16  ;;  %v7292_v7 = vshll.u32 %v21100_v22, 16 }
 0x715   :  { %24327 = vst [vmem:[#allocation65_spill] sm:$0xff] %v21107_v11  ;;  %v7272_v37 = vrot.slane %v7271_v56, 4  ;;  %v7281_v29 = vor.u32 %v7280_v1, %v7276_v34  ;;  %v7298_v19 = vshll.u32 %v21105_v25, 16  ;;  %v7302_v6 = vshrl.u32 %v21105_v25, 16  ;;  %v21135_v56 = vld [vmem:[#allocation2 + $0x100] sm:$0xf] }
 0x716   :  { %v7263_v13 = vsel %vm17138_vm2, %v7258_v33, %v7262_v46  ;;  %v7291_v30 = vrot.slane %v7289_v62, 4  ;;  %v7294_v55 = vrot.slane %v7292_v7, 5  ;;  %v7308_v39 = vshll.u32 %v6815_v36, 16 }
 0x717   :  { %v21122_v59 = vcombine.low %v7253_v48, %v7263_v13  ;;  %v7277_v31 = vsel %vm17138_vm2, %v7272_v37, %v7276_v34  ;;  %v7282_v10 = vrot.slane %v7281_v29, 4  ;;  %v7300_v26 = vrot.slane %v7298_v19, 5 }
 0x718   :  { %14965 = vmatmul.mubr.bf16.gmra.mrb[24].mxu1 %v21089_v41  ;;  %v7295_v8 = vor.u32 %v7294_v55, %v7291_v30  ;;  %v7304_v57 = vrot.slane %v7302_v6, 4  ;;  %v7310_v44 = vrot.slane %v7308_v39, 5  ;;  %v7313_v9 = vshrl.u32 %v21116_v24, 16  ;;  %v6821_v30 = vld [vmem:[#allocation2 + $0x104] sm:$0xf] }
 0x719   :  { %14968 = vmatprep.mubr.bf16.mxu1 %v21107_v11  ;;  %24328 = vst [vmem:[#allocation46_spill] sm:$0xff] %v21122_v59  ;;  %v7287_v46 = vsel %vm17138_vm2, %v7282_v10, %v7286_v12  ;;  %v7316_v28 = vshll.u32 %v21116_v24, 16  ;;  %v7322_v16 = vshll.u32 %v21120_v32, 16  ;;  %v7326_v15 = vshrl.u32 %v21120_v32, 16  ;;  %v21142_v39 = vld [vmem:[#allocation2 + $0x108] sm:$0xf] }
 0x71a   :  { %v13171_v17 = vcombine.low %v7277_v31, %v7287_v46  ;;  %v7296_v34 = vrot.slane %v7295_v8, 4  ;;  %v7305_v20 = vor.u32 %v7304_v57, %v7300_v26  ;;  %v7315_v48 = vrot.slane %v7313_v9, 4  ;;  %v21147_v57 = vld [vmem:[#allocation2 + $0x10c] sm:$0xf] }
 0x71b   :  { %v7318_v1 = vrot.slane %v7316_v28, 5  ;;  %v7324_v36 = vrot.slane %v7322_v16, 5  ;;  %v7328_v33 = vrot.slane %v7326_v15, 4  ;;  %v7332_v12 = vshll.u32 %v6818_v58, 16 }
 0x71c   :  { %v7301_v62 = vsel %vm17138_vm2, %v7296_v34, %v7300_v26  ;;  %v7306_v7 = vrot.slane %v7305_v20, 4  ;;  %v7337_v37 = vshrl.u32 %v21132_v54, 16  ;;  %v7340_v29 = vshll.u32 %v21132_v54, 16 }
 0x71d   :  { %v7319_v19 = vor.u32 %v7318_v1, %v7315_v48  ;;  %v7329_v6 = vor.u32 %v7328_v33, %v7324_v36  ;;  %v7334_v13 = vrot.slane %v7332_v12, 5  ;;  %v7346_v55 = vshll.u32 %v21135_v56, 16  ;;  %v6824_v48 = vld [vmem:[#allocation2 + $0x110] sm:$0xf]  ;;  %v21158_v12 = vld [vmem:[#allocation2 + $0x114] sm:$0xf] }
 0x71e   :  { %v7311_v31 = vsel %vm17138_vm2, %v7306_v7, %v7310_v44  ;;  %v7339_v10 = vrot.slane %v7337_v37, 4  ;;  %v7342_v8 = vrot.slane %v7340_v29, 5  ;;  %v7350_v26 = vshrl.u32 %v21135_v56, 16 }
 0x71f   :  { %v21149_v58 = vcombine.low %v7301_v62, %v7311_v31  ;;  %v7320_v9 = vrot.slane %v7319_v19, 4  ;;  %v7330_v46 = vrot.slane %v7329_v6, 4  ;;  %v7348_v28 = vrot.slane %v7346_v55, 5  ;;  %v21163_v19 = vld [vmem:[#allocation2 + $0x118] sm:$0xf] }
 0x720   :  { %14969 = vmatmul.mubr.bf16.gmra.mrb[28].mxu1 %v21122_v59  ;;  %v7343_v16 = vor.u32 %v7342_v8, %v7339_v10  ;;  %v7352_v15 = vrot.slane %v7350_v26, 4  ;;  %v7361_v34 = vshrl.u32 %v21142_v39, 16  ;;  %v7364_v1 = vshll.u32 %v21142_v39, 16  ;;  %v6827_v8 = vld [vmem:[#allocation2 + $0x11c] sm:$0xf] }
 0x721   :  { %14972 = vmatprep.mubr.bf16.mxu1 %v13171_v17  ;;  %24329 = vst [vmem:[#allocation47_spill] sm:$0xff] %v21149_v58  ;;  %v7356_v17 = vshll.u32 %v6821_v30, 16  ;;  %v7325_v20 = vsel %vm17138_vm2, %v7320_v9, %v7324_v36  ;;  %v7335_v44 = vsel %vm17138_vm2, %v7330_v46, %v7334_v13  ;;  %v7370_v33 = vshll.u32 %v21147_v57, 16  ;;  %v6833_v59 = vld [vmem:[#allocation2 + $0x134] sm:$0xf] }
 0x722   :  { %v21161_v62 = vcombine.low %v7325_v20, %v7335_v44  ;;  %v7344_v7 = vrot.slane %v7343_v16, 4  ;;  %v7353_v37 = vor.u32 %v7352_v15, %v7348_v28  ;;  %v7363_v36 = vrot.slane %v7361_v34, 4 }
 0x723   :  { %v7358_v29 = vrot.slane %v7356_v17, 5  ;;  %v7366_v6 = vrot.slane %v7364_v1, 5  ;;  %v7372_v30 = vrot.slane %v7370_v33, 5  ;;  %v7374_v13 = vshrl.u32 %v21147_v57, 16  ;;  %v21172_v17 = vld [vmem:[#allocation2 + $0x120] sm:$0xf] }
 0x724   :  { %24330 = vst [vmem:[#allocation48_spill] sm:$0xff] %v21161_v62  ;;  %v7349_v55 = vsel %vm17138_vm2, %v7344_v7, %v7348_v28  ;;  %v7354_v31 = vrot.slane %v7353_v37, 4  ;;  %v7380_v10 = vshll.u32 %v6824_v48, 16  ;;  %v7385_v26 = vshrl.u32 %v21158_v12, 16  ;;  %v21179_v37 = vld [vmem:[#allocation2 + $0x124] sm:$0xf] }
 0x725   :  { %v7367_v9 = vor.u32 %v7366_v6, %v7363_v36  ;;  %v7376_v46 = vrot.slane %v7374_v13, 4  ;;  %v7388_v16 = vshll.u32 %v21158_v12, 16  ;;  %v7394_v15 = vshll.u32 %v21163_v19, 16 }
 0x726   :  { %v7359_v34 = vsel %vm17138_vm2, %v7354_v31, %v7358_v29  ;;  %v7382_v20 = vrot.slane %v7380_v10, 5  ;;  %v7387_v44 = vrot.slane %v7385_v26, 4  ;;  %v7398_v28 = vshrl.u32 %v21163_v19, 16  ;;  %v6830_v10 = vld [vmem:[#allocation2 + $0x128] sm:$0xf] }
 0x727   :  { %v21177_v1 = vcombine.low %v7349_v55, %v7359_v34  ;;  %v7368_v48 = vrot.slane %v7367_v9, 4  ;;  %v7377_v33 = vor.u32 %v7376_v46, %v7372_v30  ;;  %v7390_v7 = vrot.slane %v7388_v16, 5 }
 0x728   :  { %14973 = vmatmul.mubr.bf16.gmra.mrb[32].mxu1 %v21149_v58  ;;  %v7396_v36 = vrot.slane %v7394_v15, 5  ;;  %v7400_v6 = vrot.slane %v7398_v28, 4  ;;  %v7404_v13 = vshll.u32 %v6827_v8, 16  ;;  %v7412_v26 = vshll.u32 %v21172_v17, 16  ;;  %v21187_v15 = vld [vmem:[#allocation2 + $0x12c] sm:$0xf] }
 0x729   :  { %14976 = vmatprep.mubr.bf16.mxu1 %v21161_v62  ;;  %24331 = vst [vmem:[#allocation4_spill] sm:$0xff] %v21177_v1  ;;  %v7409_v62 = vshrl.u32 %v21172_v17, 16  ;;  %v7373_v58 = vsel %vm17138_vm2, %v7368_v48, %v7372_v30  ;;  %v7378_v29 = vrot.slane %v7377_v33, 4  ;;  %v7391_v31 = vor.u32 %v7390_v7, %v7387_v44  ;;  %v21192_v44 = vld [vmem:[#allocation2 + $0x130] sm:$0xf] }
 0x72a   :  { %v7401_v55 = vor.u32 %v7400_v6, %v7396_v36  ;;  %v7406_v9 = vrot.slane %v7404_v13, 5  ;;  %v7418_v16 = vshll.u32 %v21179_v37, 16  ;;  %v7414_v28 = vrot.slane %v7412_v26, 5  ;;  %v21204_v26 = vld [vmem:[#allocation2 + $0x138] sm:$0xf] }
 0x72b   :  { %v7411_v46 = vrot.slane %v7409_v62, 4  ;;  %v7383_v8 = vsel %vm17138_vm2, %v7378_v29, %v7382_v20  ;;  %v7392_v34 = vrot.slane %v7391_v31, 4  ;;  %v7422_v30 = vshrl.u32 %v21179_v37, 16 }
 0x72c   :  { %v21194_v48 = vcombine.low %v7373_v58, %v7383_v8  ;;  %v7402_v33 = vrot.slane %v7401_v55, 4  ;;  %v7420_v7 = vrot.slane %v7418_v16, 5  ;;  %v7428_v6 = vshll.u32 %v6830_v10, 16  ;;  %v21208_v16 = vld [vmem:[#allocation2 + $0x13c] sm:$0xf] }
 0x72d   :  { %v7397_v62 = vsel %vm17138_vm2, %v7392_v34, %v7396_v36  ;;  %v7415_v13 = vor.u32 %v7414_v28, %v7411_v46  ;;  %v7433_v11 = vshrl.u32 %v21187_v15, 16  ;;  %v7436_v58 = vshll.u32 %v21187_v15, 16 }
 0x72e   :  { %24332 = vst [vmem:[#allocation19_spill] sm:$0xff] %v21194_v48  ;;  %v7407_v20 = vsel %vm17138_vm2, %v7402_v33, %v7406_v9  ;;  %v7430_v29 = vrot.slane %v7428_v6, 5  ;;  %v7442_v31 = vshll.u32 %v21192_v44, 16  ;;  %v7446_v28 = vshrl.u32 %v21192_v44, 16  ;;  %v6836_v6 = vld [vmem:[#allocation2 + $0x140] sm:$0xf] }
 0x72f   :  { %v21206_v10 = vcombine.low %v7397_v62, %v7407_v20  ;;  %v7416_v36 = vrot.slane %v7415_v13, 4  ;;  %v7435_v46 = vrot.slane %v7433_v11, 4  ;;  %v7438_v8 = vrot.slane %v7436_v58, 5  ;;  %v21217_v58 = vld [vmem:[#allocation2 + $0x144] sm:$0xf] }
 0x730   :  { %14977 = vmatmul.mubr.bf16.gmra.mrb[36].mxu1 %v21177_v1  ;;  %v7424_v1 = vrot.slane %v7422_v30, 4  ;;  %v7444_v34 = vrot.slane %v7442_v31, 5  ;;  %v7452_v30 = vshll.u32 %v6833_v59, 16  ;;  %v7460_v62 = vshll.u32 %v21204_v26, 16 }
 0x731   :  { %14980 = vmatprep.mubr.bf16.mxu1 %v21194_v48  ;;  %24333 = vst [vmem:[#allocation35_spill] sm:$0xff] %v21206_v10  ;;  %v7421_v9 = vsel %vm17138_vm2, %v7416_v36, %v7420_v7  ;;  %v7457_v48 = vshrl.u32 %v21204_v26, 16  ;;  %v7448_v11 = vrot.slane %v7446_v28, 4  ;;  %v7466_v20 = vshll.u32 %v21208_v16, 16 }
 0x732   :  { %v7425_v55 = vor.u32 %v7424_v1, %v7420_v7  ;;  %v7439_v1 = vor.u32 %v7438_v8, %v7435_v46  ;;  %v7454_v13 = vrot.slane %v7452_v30, 5  ;;  %v7462_v7 = vrot.slane %v7460_v62, 5 }
 0x733   :  { %v7459_v31 = vrot.slane %v7457_v48, 4  ;;  %v7470_v36 = vshrl.u32 %v21208_v16, 16  ;;  %v7468_v46 = vrot.slane %v7466_v20, 5  ;;  %v7476_v30 = vshll.u32 %v6836_v6, 16 }
 0x734   :  { %v7426_v33 = vrot.slane %v7425_v55, 4  ;;  %v21222_v55 = vld [vmem:[#allocation2 + $0x148] sm:$0xf]  ;;  %v7440_v14 = vrot.slane %v7439_v1, 4  ;;  %v7481_v27 = vshrl.u32 %v21217_v58, 16  ;;  %v7484_v62 = vshll.u32 %v21217_v58, 16 }
 0x735   :  { %v7463_v8 = vor.u32 %v7462_v7, %v7459_v31  ;;  %v7472_v28 = vrot.slane %v7470_v36, 4  ;;  %v21232_v31 = vld [vmem:[#allocation2 + $0x150] sm:$0xf]  ;;  %v7524_v18 = vshll.u32 %v6842_v42, 16 }
 0x736   :  { %v7431_v59 = vsel %vm17138_vm2, %v7426_v33, %v7430_v29  ;;  %v7445_v48 = vsel %vm17138_vm2, %v7440_v14, %v7444_v34  ;;  %v6839_v33 = vld [vmem:[#allocation2 + $0x14c] sm:$0xf]  ;;  %v7483_v20 = vrot.slane %v7481_v27, 4  ;;  %v7486_v7 = vrot.slane %v7484_v62, 5  ;;  %v21237_v14 = vld [vmem:[#allocation2 + $0x154] sm:$0xf] }
 0x737   :  { %v21224_v41 = vcombine.low %v7421_v9, %v7431_v59  ;;  %v7490_v9 = vshll.u32 %v21222_v55, 16  ;;  %v7464_v59 = vrot.slane %v7463_v8, 4  ;;  %v7473_v1 = vor.u32 %v7472_v28, %v7468_v46 }
 0x738   :  { %14981 = vmatmul.mubr.bf16.gmra.mrb[40].mxu1 %v21206_v10  ;;  %v7449_v10 = vor.u32 %v7448_v11, %v7444_v34  ;;  %v7478_v11 = vrot.slane %v7476_v30, 5  ;;  %v7500_v28 = vshll.u32 %v6839_v33, 16  ;;  %v7487_v30 = vor.u32 %v7486_v7, %v7483_v20  ;;  %v21254_v20 = vld [vmem:[#allocation2 + $0x160] sm:$0xf] }
 0x739   :  { %24334 = vst [vmem:[#allocation36_spill] sm:$0xff] %v21224_v41  ;;  %14984 = vmatprep.mubr.bf16.mxu1 %v21224_v41  ;;  %v7492_v36 = vrot.slane %v7490_v9, 5  ;;  %v7494_v41 = vshrl.u32 %v21222_v55, 16  ;;  %v7469_v34 = vsel %vm17138_vm2, %v7464_v59, %v7468_v46  ;;  %v7474_v8 = vrot.slane %v7473_v1, 4  ;;  %v21250_v46 = vld [vmem:[#allocation2 + $0x15c] sm:$0xf] }
 0x73a   :  { %v7450_v29 = vrot.slane %v7449_v10, 4  ;;  %v7505_v52 = vshrl.u32 %v21232_v31, 16  ;;  %v7502_v62 = vrot.slane %v7500_v28, 5  ;;  %v7518_v9 = vshrl.u32 %v21237_v14, 16 }
 0x73b   :  { %v7496_v27 = vrot.slane %v7494_v41, 4  ;;  %v7488_v41 = vrot.slane %v7487_v30, 4  ;;  %v7529_v28 = vshrl.u32 %v21250_v46, 16 }
 0x73c   :  { %v7455_v6 = vsel %vm17138_vm2, %v7450_v29, %v7454_v13  ;;  %v7508_v13 = vshll.u32 %v21232_v31, 16  ;;  %v7479_v29 = vsel %vm17138_vm2, %v7474_v8, %v7478_v11  ;;  %v7507_v1 = vrot.slane %v7505_v52, 4  ;;  %v21261_v52 = vld [vmem:[#allocation2 + $0x164] sm:$0xf] }
 0x73d   :  { %v21239_v10 = vcombine.low %v7445_v48, %v7455_v6  ;;  %v7514_v48 = vshll.u32 %v21237_v14, 16  ;;  %v21252_v33 = vcombine.low %v7469_v34, %v7479_v29  ;;  %v7497_v59 = vor.u32 %v7496_v27, %v7492_v36  ;;  %24337 = vst [vmem:[#allocation51_spill] sm:$0xff] %v21261_v52 }
 0x73e   :  { %v7510_v6 = vrot.slane %v7508_v13, 5  ;;  %v7493_v11 = vsel %vm17138_vm2, %v7488_v41, %v7492_v36  ;;  %v7532_v34 = vshll.u32 %v21250_v46, 16  ;;  %v7526_v27 = vrot.slane %v7524_v18, 5  ;;  %v21269_v41 = vld [vmem:[#allocation2 + $0x16c] sm:$0xf] }
 0x73f   :  { %24335 = vst [vmem:[#allocation37_spill] sm:$0xff] %v21239_v10  ;;  %24336 = vst [vmem:[#allocation53_spill] sm:$0xff] %v21252_v33  ;;  %v7516_v7 = vrot.slane %v7514_v48, 5  ;;  %v7498_v8 = vrot.slane %v7497_v59, 4  ;;  %v7538_v13 = vshll.u32 %v21254_v20, 16  ;;  %v7542_v36 = vshrl.u32 %v21254_v20, 16 }
 0x740   :  { %14985 = vmatmul.mubr.bf16.gmra.mrb[44].mxu1 %v21239_v10  ;;  %v7520_v10 = vrot.slane %v7518_v9, 4  ;;  %v7511_v29 = vor.u32 %v7510_v6, %v7507_v1  ;;  %v21264_v48 = vld [vmem:[#allocation2 + $0x168] sm:$0xf]  ;;  %v7531_v9 = vrot.slane %v7529_v28, 4  ;;  %v7548_v0 = vshll.u32 %v21261_v52, 16 }
 0x741   :  { %14988 = vmatprep.mubr.bf16.mxu1 %v21252_v33  ;;  %v7503_v42 = vsel %vm17138_vm2, %v7498_v8, %v7502_v62  ;;  %v7534_v33 = vrot.slane %v7532_v34, 5  ;;  %v7540_v18 = vrot.slane %v7538_v13, 5  ;;  %v7544_v61 = vrot.slane %v7542_v36, 4  ;;  %v21280_v28 = vld [vmem:[#allocation2 + $0x170] sm:$0xf] }
 0x742   :  { %v7521_v30 = vor.u32 %v7520_v10, %v7516_v7  ;;  %v21271_v59 = vcombine.low %v7493_v11, %v7503_v42  ;;  %v7512_v1 = vrot.slane %v7511_v29, 4  ;;  %v7553_v38 = vshrl.u32 %v21264_v48, 16  ;;  %24339 = vst [vmem:[#allocation57_spill] sm:$0xff] %v21280_v28 }
 0x743   :  { %v7535_v6 = vor.u32 %v7534_v33, %v7531_v9  ;;  %v7556_v11 = vshll.u32 %v21264_v48, 16  ;;  %v7562_v34 = vshll.u32 %v21269_v41, 16  ;;  %v21284_v33 = vld [vmem:[#allocation2 + $0x174] sm:$0xf]  ;;  %v7545_v13 = vor.u32 %v7544_v61, %v7540_v18  ;;  %v21288_v9 = vld [vmem:[#allocation2 + $0x178] sm:$0xf] }
 0x744   :  { %24338 = vst [vmem:[#allocation54_spill] sm:$0xff] %v21271_v59  ;;  %v7522_v10 = vrot.slane %v7521_v30, 4  ;;  %v7517_v62 = vsel %vm17138_vm2, %v7512_v1, %v7516_v7  ;;  %24340 = vst [vmem:[#allocation50_spill] sm:$0xff] %v21284_v33  ;;  %v7550_v42 = vrot.slane %v7548_v0, 5  ;;  %v7555_v36 = vrot.slane %v7553_v38, 4 }
 0x745   :  { %v7536_v30 = vrot.slane %v7535_v6, 4  ;;  %v7558_v7 = vrot.slane %v7556_v11, 5  ;;  %v7564_v1 = vrot.slane %v7562_v34, 5  ;;  %v7572_v3 = vshll.u32 %v21280_v28, 16  ;;  %v21300_v11 = vld [vmem:[#allocation2 + $0x180] sm:$0xf] }
 0x746   :  { %v7527_v8 = vsel %vm17138_vm2, %v7522_v10, %v7526_v27  ;;  %v7566_v27 = vshrl.u32 %v21269_v41, 16  ;;  %v7577_v61 = vshrl.u32 %v21284_v33, 16  ;;  %v7580_v38 = vshll.u32 %v21284_v33, 16  ;;  %24343 = vst [vmem:[#allocation60_spill] sm:$0xff] %v21300_v11 }
 0x747   :  { %v21286_v29 = vcombine.low %v7517_v62, %v7527_v8  ;;  %v7541_v10 = vsel %vm17138_vm2, %v7536_v30, %v7540_v18  ;;  %v21295_v62 = vld [vmem:[#allocation2 + $0x17c] sm:$0xf]  ;;  %v7559_v0 = vor.u32 %v7558_v7, %v7555_v36  ;;  %v7586_v8 = vshll.u32 %v21288_v9, 16  ;;  %v21307_v36 = vld [vmem:[#allocation2 + $0x184] sm:$0xf] }
 0x748   :  { %14989 = vmatmul.mubr.bf16.gmra.mrb[48].mxu1 %v21271_v59  ;;  %v7546_v59 = vrot.slane %v7545_v13, 4  ;;  %24342 = vst [vmem:[#allocation59_spill] sm:$0xff] %v21295_v62  ;;  %v7568_v6 = vrot.slane %v7566_v27, 4  ;;  %v7579_v18 = vrot.slane %v7577_v61, 4  ;;  %v7590_v30 = vshrl.u32 %v21288_v9, 16 }
 0x749   :  { %24341 = vst [vmem:[#allocation58_spill] sm:$0xff] %v21286_v29  ;;  %14992 = vmatprep.mubr.bf16.mxu1 %v21286_v29  ;;  %v7574_v29 = vrot.slane %v7572_v3, 5  ;;  %v7560_v43 = vrot.slane %v7559_v0, 4  ;;  %v7582_v35 = vrot.slane %v7580_v38, 5  ;;  %v7588_v7 = vrot.slane %v7586_v8, 5 }
 0x74a   :  { %v7551_v34 = vsel %vm17138_vm2, %v7546_v59, %v7550_v42  ;;  %v7569_v51 = vor.u32 %v7568_v6, %v7564_v1  ;;  %v7592_v27 = vrot.slane %v7590_v30, 4  ;;  %v7596_v28 = vshll.u32 %v21295_v62, 16 }
 0x74b   :  { %v21305_v13 = vcombine.low %v7541_v10, %v7551_v34  ;;  %v7601_v52 = vshrl.u32 %v21300_v11, 16  ;;  %v7565_v3 = vsel %vm17138_vm2, %v7560_v43, %v7564_v1  ;;  %v7583_v42 = vor.u32 %v7582_v35, %v7579_v18  ;;  %v21314_v10 = vld [vmem:[#allocation2 + $0x188] sm:$0xf]  ;;  %v21318_v34 = vld [vmem:[#allocation2 + $0x18c] sm:$0xf] }
 0x74c   :  { %v7570_v59 = vrot.slane %v7569_v51, 4  ;;  %24345 = vst [vmem:[#allocation62_spill] sm:$0xff] %v21314_v10  ;;  %v7604_v61 = vshll.u32 %v21300_v11, 16  ;;  %v7593_v0 = vor.u32 %v7592_v27, %v7588_v7  ;;  %v7598_v6 = vrot.slane %v7596_v28, 5  ;;  %24346 = vst [vmem:[#allocation68_spill] sm:$0xff] %v21318_v34 }
 0x74d   :  { %24344 = vst [vmem:[#allocation61_spill] sm:$0xff] %v21305_v13  ;;  %v7603_v38 = vrot.slane %v7601_v52, 4  ;;  %v7610_v8 = vshll.u32 %v21307_v36, 16  ;;  %v7614_v43 = vshrl.u32 %v21307_v36, 16  ;;  %v21323_v51 = vld [vmem:[#allocation2 + $0x190] sm:$0xf] }
 0x74e   :  { %v7575_v30 = vsel %vm17138_vm2, %v7570_v59, %v7574_v29  ;;  %v7606_v62 = vrot.slane %v7604_v61, 5  ;;  %v7594_v1 = vrot.slane %v7593_v0, 4  ;;  %v7620_v28 = vshll.u32 %v21314_v10, 16  ;;  %v21460_v10 = vld [vmem:[%s23629_s4 + $0xc0] sm:$0xff]  }
 0x74f   :  { %v21325_v35 = vcombine.low %v7565_v3, %v7575_v30  ;;  %v7612_v18 = vrot.slane %v7610_v8, 5  ;;  %v7616_v11 = vrot.slane %v7614_v43, 4  ;;  %v7625_v33 = vshrl.u32 %v21318_v34, 16  ;;  %v21338_v8 = vld [vmem:[#allocation2 + $0x194] sm:$0xf]  ;;  %24373 = vst [vmem:[#allocation25_spill] sm:$0xff] %v21460_v10 }
 0x750   :  { %14993 = vmatmul.mubr.bf16.gmra.mrb[52].mxu1 %v21305_v13  ;;  %v7584_v13 = vrot.slane %v7583_v42, 4  ;;  %v7607_v27 = vor.u32 %v7606_v62, %v7603_v38  ;;  %v7599_v29 = vsel %vm17138_vm2, %v7594_v1, %v7598_v6  ;;  %v7628_v59 = vshll.u32 %v21318_v34, 16 }
 0x751   :  { %24347 = vst [vmem:[#allocation69_spill] sm:$0xff] %v21325_v35  ;;  %14996 = vmatprep.mubr.bf16.mxu1 %v21325_v35  ;;  %v7634_v3 = vshll.u32 %v21323_v51, 16  ;;  %v7617_v0 = vor.u32 %v7616_v11, %v7612_v18  ;;  %v7638_v38 = vshrl.u32 %v21323_v51, 16  ;;  %v7622_v43 = vrot.slane %v7620_v28, 5 }
 0x752   :  { %v7589_v52 = vsel %vm17138_vm2, %v7584_v13, %v7588_v7  ;;  %v7608_v61 = vrot.slane %v7607_v27, 4  ;;  %v7627_v13 = vrot.slane %v7625_v33, 4  ;;  %v7630_v62 = vrot.slane %v7628_v59, 5 }
 0x753   :  { %v21336_v42 = vcombine.low %v7589_v52, %v7599_v29  ;;  %v7636_v7 = vrot.slane %v7634_v3, 5  ;;  %v7618_v30 = vrot.slane %v7617_v0, 4  ;;  %v7640_v35 = vrot.slane %v7638_v38, 4  ;;  %v21356_v0 = vld [vmem:[#allocation2 + $0x4] sm:$0xf] }
 0x754   :  { %v7613_v6 = vsel %vm17138_vm2, %v7608_v61, %v7612_v18  ;;  %v7631_v1 = vor.u32 %v7630_v62, %v7627_v13  ;;  %v7644_v52 = vshll.u32 %v21338_v8, 16  ;;  %v21354_v61 = vld [vmem:[#allocation2] sm:$0xf] }
 0x755   :  { %24348 = vst [vmem:[#allocation70_spill] sm:$0xff] %v21336_v42  ;;  %v7623_v11 = vsel %vm17138_vm2, %v7618_v30, %v7622_v43  ;;  %v7641_v29 = vor.u32 %v7640_v35, %v7636_v7  ;;  %v13195_v13 = vcombine.low %v21354_v61, %v21356_v0  ;;  %v21363_v35 = vld [vmem:[#allocation2 + $0xc] sm:$0xf]  ;;  %v21374_v30 = vld [vmem:[#allocation2 + $0x18] sm:$0xf] }
 0x756   :  { %v21347_v27 = vcombine.low %v7613_v6, %v7623_v11  ;;  %v7632_v33 = vrot.slane %v7631_v1, 4  ;;  %v7646_v18 = vrot.slane %v7644_v52, 5  ;;  %24351 = vst [vmem:[#allocation5_spill] sm:$0xff] %v21363_v35  ;;  %v16800_v6 = vld [vmem:[%s23629_s4 + $0x88] sm:$0xff]   ;;  %24353 = vst [vmem:[#allocation7_spill] sm:$0xff] %v21374_v30  ;;  %v16805_v52 = vld [vmem:[%s23629_s4 + $0x90] sm:$0xff]  }
 0x757   :  { %v7642_v3 = vrot.slane %v7641_v29, 4  ;;  %v21376_v43 = vld [vmem:[#allocation2 + $0x1c] sm:$0xf]  ;;  %v21388_v11 = vld [vmem:[#allocation2 + $0x24] sm:$0xf] }
 0x758   :  { %14997 = vmatmul.mubr.bf16.gmra.mrb[56].mxu1 %v21336_v42  ;;  %24349 = vst [vmem:[#allocation72_spill] sm:$0xff] %v21347_v27  ;;  %v7637_v59 = vsel %vm17138_vm2, %v7632_v33, %v7636_v7  ;;  %v21365_v7 = vld [vmem:[#allocation2 + $0x10] sm:$0xf]  ;;  %v21380_v1 = vcombine.low %v21374_v30, %v21376_v43  ;;  %24355 = vst [vmem:[#allocation9_spill] sm:$0xff] %v21388_v11  ;;  %v21390_v33 = vld [vmem:[#allocation2 + $0x28] sm:$0xf] }
 0x759   :  { %15000 = vmatprep.mubr.bf16.mxu1 %v21347_v27  ;;  %v7647_v28 = vsel %vm17138_vm2, %v7642_v3, %v7646_v18  ;;  %v21369_v38 = vcombine.low %v21363_v35, %v21365_v7  ;;  %24356 = vst [vmem:[#allocation10_spill] sm:$0xff] %v21390_v33  ;;  %v21394_v29 = vcombine.low %v21388_v11, %v21390_v33  ;;  %v21401_v3 = vld [vmem:[#allocation2 + $0x34] sm:$0xf]  ;;  %v16820_v27 = vld [vmem:[%s23629_s4 + $0xa8] sm:$0xff]  }
 0x75a   :  { %v21360_v62 = vcombine.low %v7637_v59, %v7647_v28  ;;  %24354 = vst [vmem:[#allocation8_spill] sm:$0xff] %v21380_v1  ;;  %v16810_v59 = vld [vmem:[%s23629_s4 + $0x98] sm:$0xff]   ;;  %24359 = vst [vmem:[#allocation13_spill] sm:$0xff] %v21401_v3  ;;  %v16815_v28 = vld [vmem:[%s23629_s4 + $0xa0] sm:$0xff]  }
 0x75b   :  { %24352 = vst [vmem:[#allocation6_spill] sm:$0xff] %v21369_v38  ;;  %24357 = vst [vmem:[#allocation11_spill] sm:$0xff] %v21394_v29  ;;  %v21425_v42 = vld [vmem:[#allocation2 + $0x4c] sm:$0xf] }
 0x75c   :  { %24350 = vst [vmem:[#allocation52_spill] sm:$0xff] %v21360_v62  ;;  %24365 = vst [vmem:[#allocation18_spill] sm:$0xff] %v21425_v42 }
 0x760   :  { %15001 = vmatmul.mubr.bf16.gmra.mrb[60].mxu1 %v21360_v62 }
 0x761   :  { %15020 = vmatprep.mubr.bf16.mxu1 %v13195_v13  ;;  %v21412_v13 = vld [vmem:[#allocation2 + $0x3c] sm:$0xf] }
 0x762   :  { %24361 = vst [vmem:[#allocation15_spill] sm:$0xff] %v21412_v13 }
 0x768   :  { %15021 = vmatmul.mubr.bf16.vlgmr.msra.gmra.mrb[0].mxu1 %v21369_v38 }
 0x769   :  { %15024 = vmatprep.mubr.bf16.mxu1 %v21380_v1  ;;  %15085 = vmatpush3.bf16.msra.mxu1 %v21029_v60  ;;  %v21399_v60 = vld [vmem:[#allocation2 + $0x30] sm:$0xf]  ;;  %v21438_v1 = vld [vmem:[#allocation2 + $0x58] sm:$0xf] }
 0x76a   :  { %15086 = vmatprep.subr.bf16.mxu1 %v16800_v6  ;;  %24358 = vst [vmem:[#allocation12_spill] sm:$0xff] %v21399_v60  ;;  %v21405_v18 = vcombine.low %v21399_v60, %v21401_v3  ;;  %24368 = vst [vmem:[#allocation21_spill] sm:$0xff] %v21438_v1  ;;  %v6860_v3 = vld [vmem:[#allocation2 + $0x1a0] sm:$0xf] }
 0x76c   :  { %24360 = vst [vmem:[#allocation14_spill] sm:$0xff] %v21405_v18 }
 0x76d   :  { %15087 = vmatpush3.bf16.msra.mxu1 %v16800_v6  ;;  %v21414_v6 = vld [vmem:[#allocation2 + $0x40] sm:$0xf] }
 0x76e   :  { %15088 = vmatprep.subr.bf16.mxu1 %v16805_v52  ;;  %24362 = vst [vmem:[#allocation16_spill] sm:$0xff] %v21414_v6  ;;  %v21418_v62 = vcombine.low %v21412_v13, %v21414_v6  ;;  %v24454_v6 = vld [vmem:[#allocation44_spill] sm:$0xff] }
 0x770   :  { %15025 = vmatmul.mubr.bf16.gmra.mrb[4].mxu1 %v21394_v29  ;;  %24363 = vst [vmem:[#allocation17_spill] sm:$0xff] %v21418_v62  ;;  %v21436_v29 = vld [vmem:[#allocation2 + $0x54] sm:$0xf] }
 0x771   :  { %15028 = vmatprep.mubr.bf16.mxu1 %v21405_v18  ;;  %15089 = vmatpush3.bf16.msra.mxu1 %v16805_v52  ;;  %v21423_v52 = vld [vmem:[#allocation2 + $0x48] sm:$0xf]  ;;  %v16825_v18 = vld [vmem:[%s23629_s4 + $0xb0] sm:$0xff]   ;;  %24367 = vst [vmem:[#allocation20_spill] sm:$0xff] %v21436_v29  ;;  %v21442_v38 = vcombine.low %v21436_v29, %v21438_v1  ;;  %v21462_v29 = vld [vmem:[#allocation2 + $0x6c] sm:$0xf] }
 0x772   :  { %15090 = vmatprep.subr.bf16.mxu1 %v16810_v59  ;;  %24364 = vst [vmem:[#allocation67_spill] sm:$0xff] %v21423_v52  ;;  %24374 = vst [vmem:[#allocation34_spill] sm:$0xff] %v21462_v29  ;;  %v21464_v1 = vld [vmem:[#allocation2 + $0x70] sm:$0xf] }
 0x773   :  { %24369 = vst [vmem:[#allocation22_spill] sm:$0xff] %v21442_v38  ;;  %24375 = vst [vmem:[#allocation26_spill] sm:$0xff] %v21464_v1 }
 0x775   :  { %15091 = vmatpush3.bf16.msra.mxu1 %v16810_v59  ;;  %v21429_v59 = vcombine.low %v21423_v52, %v21425_v42  ;;  %v6806_v42 = vld [vmem:[#allocation2 + $0xc8] sm:$0xf] }
 0x776   :  { %15092 = vmatprep.subr.bf16.mxu1 %v16815_v28  ;;  %v9911_v33 = vshll.u32 %v6806_v42, 16 }
 0x777   :  { %24366 = vst [vmem:[#allocation56_spill] sm:$0xff] %v21429_v59 }
 0x778   :  { %15029 = vmatmul.mubr.bf16.gmra.mrb[8].mxu1 %v21418_v62  ;;  %v21449_v62 = vld [vmem:[#allocation2 + $0x64] sm:$0xf] }
 0x779   :  { %15032 = vmatprep.mubr.bf16.mxu1 %v21429_v59  ;;  %15093 = vmatpush3.bf16.msra.mxu1 %v16815_v28  ;;  %v16830_v59 = vld [vmem:[%s23629_s4 + $0xb8] sm:$0xff]   ;;  %v21447_v28 = vld [vmem:[#allocation2 + $0x60] sm:$0xf]  ;;  %24371 = vst [vmem:[#allocation24_spill] sm:$0xff] %v21449_v62 }
 0x77a   :  { %15094 = vmatprep.subr.bf16.mxu1 %v16820_v27  ;;  %24370 = vst [vmem:[#allocation23_spill] sm:$0xff] %v21447_v28 }
 0x77d   :  { %15095 = vmatpush3.bf16.msra.mxu1 %v16820_v27  ;;  %v21453_v27 = vcombine.low %v21447_v28, %v21449_v62  ;;  %v21468_v28 = vcombine.low %v21462_v29, %v21464_v1  ;;  %v21489_v1 = vcombine.low %v21018_v50, %v21024_v47  ;;  %v21499_v62 = vld [vmem:[#allocation2 + $0x198] sm:$0xf]  ;;  %v21503_v47 = vld [vmem:[#allocation2 + $0x19c] sm:$0xf] }
 0x77e   :  { %15096 = vmatprep.subr.bf16.mxu1 %v16825_v18  ;;  %v9916_v11 = vshrl.u32 %v21499_v62, 16  ;;  %v9925_v35 = vshll.u32 %v21503_v47, 16 }
 0x77f   :  { %24372 = vst [vmem:[#allocation31_spill] sm:$0xff] %v21453_v27  ;;  %24376 = vst [vmem:[#allocation27_spill] sm:$0xff] %v21468_v28 }
 0x780   :  { %15033 = vmatmul.mubr.bf16.gmra.mrb[12].mxu1 %v21442_v38  ;;  %v21471_v38 = vld [vmem:[#allocation2 + $0x78] sm:$0xf]  ;;  %24382 = vst [vmem:[#allocation74_spill] sm:$0xff] %v21489_v1 }
 0x781   :  { %15036 = vmatprep.mubr.bf16.mxu1 %v21453_v27  ;;  %15097 = vmatpush3.bf16.msra.mxu1 %v16825_v18  ;;  %24377 = vst [vmem:[#allocation28_spill] sm:$0xff] %v21471_v38  ;;  %v21473_v18 = vld [vmem:[#allocation2 + $0x7c] sm:$0xf] }
 0x782   :  { %15098 = vmatprep.subr.bf16.mxu1 %v16830_v59  ;;  %24378 = vst [vmem:[#allocation32_spill] sm:$0xff] %v21473_v18  ;;  %v21477_v27 = vcombine.low %v21471_v38, %v21473_v18  ;;  %v21493_v38 = vld [vmem:[#allocation2 + $0xc0] sm:$0xf]  ;;  %v21497_v18 = vld [vmem:[#allocation2 + $0xc4] sm:$0xf] }
 0x783   :  { %v9892_v50 = vshrl.u32 %v21493_v38, 16  ;;  %v9895_v52 = vshll.u32 %v21493_v38, 16  ;;  %v9905_v13 = vshrl.u32 %v21497_v18, 16 }
 0x784   :  { %24379 = vst [vmem:[#allocation29_spill] sm:$0xff] %v21477_v27 }
 0x785   :  { %15099 = vmatpush3.bf16.msra.mxu1 %v16830_v59  ;;  %v21481_v59 = vld [vmem:[#allocation2 + $0x84] sm:$0xf] }
 0x786   :  { %15164 = vmatprep.subr.bf16.mxu1 %v21460_v10  ;;  %24380 = vst [vmem:[#allocation55_spill] sm:$0xff] %v21481_v59  ;;  %v21485_v29 = vcombine.low %v21481_v59, %v21012_v5  ;;  %v8913_v59 = vrot.slane %v21338_v8, 5  ;;  %v9897_v10 = vrot.slane %v9895_v52, 5  ;;  %v13375_v52 = vrot.slane %v21493_v38, 9 }
 0x788   :  { %15037 = vmatmul.mubr.bf16.gmra.mrb[16].mxu1 %v21468_v28  ;;  %24381 = vst [vmem:[#allocation73_spill] sm:$0xff] %v21485_v29  ;;  %v13266_v28 = vrot.slane %v21318_v34, 9 }
 0x789   :  { %15040 = vmatprep.mubr.bf16.mxu1 %v21477_v27  ;;  %v8910_v27 = vrot.slane %v21323_v51, 5 }
 0x78b   :  { %v8912_v5 = vrot.slane %v8910_v27, 4  ;;  %v8911_v8 = vsel %vm18148_vm5, %v13266_v28, %v8910_v27  ;;  %v9901_v28 = vshll.u32 %v21497_v18, 16  ;;  %v9907_v27 = vrot.slane %v9905_v13, 4 }
 0x78c   :  { %v10369_v13 = vrot.slane %v21497_v18, 5 }
 0x78d   :  { %v8914_v60 = vsel %vm18148_vm5, %v8912_v5, %v8913_v59  ;;  %v9918_v59 = vrot.slane %v9916_v11, 4 }
 0x790   :  { %15041 = vmatmul.mubr.bf16.gmra.mrb[20].mxu1 %v21485_v29  ;;  %v21511_v29 = vcombine.low %v21058_v21, %v21062_v49  ;;  %v9929_v21 = vshrl.u32 %v21503_v47, 16  ;;  %v9894_v49 = vrot.slane %v9892_v50, 4  ;;  %v9935_v50 = vshll.u32 %v6860_v3, 16 }
 0x791   :  { %15044 = vmatprep.mubr.bf16.mxu1 %v21489_v1  ;;  %v21507_v1 = vcombine.low %v21039_v40, %v21044_v4  ;;  %v9919_v40 = vshll.u32 %v21499_v62, 16  ;;  %v21522_v4 = vcombine.low %v8911_v8, %v8914_v60  ;;  %v21530_v60 = vcombine.low %v21071_v53, %v21075_v2 }
 0x792   :  { %24384 = vst [vmem:[#allocation76_spill] sm:$0xff] %v21511_v29  ;;  %v9898_v5 = vor.u32 %v9897_v10, %v9894_v49  ;;  %v9931_v34 = vrot.slane %v9929_v21, 4  ;;  %v9903_v8 = vrot.slane %v9901_v28, 5  ;;  %v13211_v10 = vcombine.low %v21087_v63, %v21091_v45 }
 0x793   :  { %24383 = vst [vmem:[#allocation75_spill] sm:$0xff] %v21507_v1  ;;  %24386 = vst [vmem:[#allocation77_spill] sm:$0xff] %v21522_v4  ;;  %v9921_v30 = vrot.slane %v9919_v40, 5  ;;  %v9927_v4 = vrot.slane %v9925_v35, 5  ;;  %v9913_v40 = vrot.slane %v9911_v33, 5  ;;  %v13376_v21 = vrot.slane %v21499_v62, 9 }
 0x794   :  { %v9908_v11 = vor.u32 %v9907_v27, %v9903_v8  ;;  %v10370_v28 = vsel %vm18148_vm5, %v13375_v52, %v10369_v13  ;;  %v10372_v35 = vrot.slane %v6806_v42, 5  ;;  %v9937_v45 = vrot.slane %v9935_v50, 5 }
 0x795   :  { %v9932_v49 = vor.u32 %v9931_v34, %v9927_v4  ;;  %v10379_v50 = vrot.slane %v6860_v3, 5  ;;  %v21575_v3 = vcombine.low %v21132_v54, %v21135_v56  ;;  %v21605_v54 = vcombine.low %v21217_v58, %v21222_v55 }
 0x796   :  { %v21609_v56 = vcombine.low %v21232_v31, %v21237_v14 }
 0x797   :  { %v9933_v33 = vrot.slane %v9932_v49, 4 }
 0x798   :  { %15045 = vmatmul.mubr.bf16.gmra.mrb[24].mxu1 %v21507_v1  ;;  %v9899_v1 = vrot.slane %v9898_v5, 4  ;;  %v9909_v5 = vrot.slane %v9908_v11, 4 }
 0x799   :  { %15048 = vmatprep.mubr.bf16.mxu1 %v21511_v29  ;;  %v9922_v29 = vor.u32 %v9921_v30, %v9918_v59  ;;  %v10371_v30 = vrot.slane %v10369_v13, 4  ;;  %v10376_v59 = vrot.slane %v21503_v47, 5 }
 0x79a   :  { %v9904_v53 = vsel %vm17138_vm2, %v9899_v1, %v9903_v8  ;;  %v9914_v1 = vsel %vm17138_vm2, %v9909_v5, %v9913_v40  ;;  %v9938_v8 = vsel %vm17138_vm2, %v9933_v33, %v9937_v45  ;;  %v21569_v40 = vcombine.low %v21116_v24, %v21120_v32  ;;  %v17002_v5 = vld [vmem:[#allocation2 + $0x14] sm:$0xf]  ;;  %v24395_v33 = vld [vmem:[#allocation10_spill] sm:$0xff] }
 0x79b   :  { %v9923_v2 = vrot.slane %v9922_v29, 4  ;;  %v10373_v34 = vsel %vm18148_vm5, %v10371_v30, %v10372_v35  ;;  %v10377_v29 = vsel %vm18148_vm5, %v13376_v21, %v10376_v59  ;;  %v21551_v42 = vcombine.low %v9904_v53, %v9914_v1  ;;  %v24392_v53 = vld [vmem:[#allocation68_spill] sm:$0xff]  ;;  %v24393_v35 = vld [vmem:[#allocation5_spill] sm:$0xff] }
 0x79c   :  { %v21553_v27 = vcombine.low %v10370_v28, %v10373_v34  ;;  %v21579_v21 = vcombine.low %v21142_v39, %v21147_v57  ;;  %v21595_v24 = vcombine.low %v21187_v15, %v21192_v44  ;;  %v21599_v32 = vcombine.low %v21204_v26, %v21208_v16  ;;  %v24391_v16 = vld [vmem:[#allocation60_spill] sm:$0xff]  ;;  %v17003_v1 = vld [vmem:[#allocation2 + $0x20] sm:$0xf] }
 0x79d   :  { %v9928_v63 = vsel %vm17138_vm2, %v9923_v2, %v9927_v4  ;;  %24387 = vst [vmem:[#allocation78_spill] sm:$0xff] %v21551_v42  ;;  %v10378_v4 = vrot.slane %v10376_v59, 4  ;;  %v21615_v39 = vcombine.low %v21250_v46, %v21254_v20  ;;  %v21619_v57 = vcombine.low %v21264_v48, %v21269_v41 }
 0x79e   :  { %24388 = vst [vmem:[#allocation79_spill] sm:$0xff] %v21553_v27  ;;  %v21557_v52 = vcombine.low %v9928_v63, %v9938_v8  ;;  %v13235_v44 = vrot.slane %v21354_v61, 9  ;;  %v21631_v58 = vcombine.low %v24391_v16, %v21307_v36  ;;  %v8700_v46 = vrot.slane %v21365_v7, 5  ;;  %v24394_v63 = vld [vmem:[#allocation7_spill] sm:$0xff] }
 0x79f   :  { %v10380_v13 = vsel %vm18148_vm5, %v10378_v4, %v10379_v50  ;;  %v21643_v2 = vcombine.low %v24392_v53, %v21323_v51  ;;  %v8703_v30 = vrot.slane %v17002_v5, 5  ;;  %v13236_v59 = vrot.slane %v24393_v35, 9  ;;  %v24399_v53 = vld [vmem:[#allocation12_spill] sm:$0xff]  ;;  %v16835_v5 = vld [vmem:[%s23629_s4 + $0xd0] sm:$0xff]  }
 0x7a0   :  { %15049 = vmatmul.mubr.bf16.gmra.mrb[28].mxu1 %v21530_v60  ;;  %v21565_v11 = vcombine.low %v10377_v29, %v10380_v13  ;;  %v8702_v49 = vrot.slane %v8700_v46, 4  ;;  %v13237_v45 = vrot.slane %v24394_v63, 9  ;;  %v8710_v7 = vrot.slane %v17003_v1, 5  ;;  %v24396_v29 = vld [vmem:[#allocation13_spill] sm:$0xff]  ;;  %v24400_v35 = vld [vmem:[#allocation16_spill] sm:$0xff] }
 0x7a1   :  { %15052 = vmatprep.mubr.bf16.mxu1 %v13211_v10  ;;  %v21563_v10 = vcombine.low %v21100_v22, %v21105_v25  ;;  %v21585_v22 = vcombine.low %v21158_v12, %v21163_v19  ;;  %v21589_v25 = vcombine.low %v21172_v17, %v21179_v37  ;;  %v8693_v12 = vrot.slane %v21356_v0, 5  ;;  %v17001_v19 = vld [vmem:[#allocation2 + $0x8] sm:$0xf] }
 0x7a2   :  { %24389 = vst [vmem:[#allocation80_spill] sm:$0xff] %v21565_v11  ;;  %v8696_v17 = vrot.slane %v17001_v19, 5  ;;  %v24390_v37 = vld [vmem:[#allocation50_spill] sm:$0xff]  ;;  %v8707_v0 = vrot.slane %v21376_v43, 5  ;;  %v8704_v43 = vsel %vm18148_vm5, %v8702_v49, %v8703_v30  ;;  %v8714_v34 = vrot.slane %v24395_v33, 5 }
 0x7a3   :  { %v21626_v15 = vcombine.low %v24390_v37, %v21288_v9  ;;  %v8695_v26 = vrot.slane %v8693_v12, 4  ;;  %v8694_v55 = vsel %vm18148_vm5, %v13235_v44, %v8693_v12  ;;  %v8721_v8 = vrot.slane %v24396_v29, 5  ;;  %v16834_v12 = vld [vmem:[%s23629_s4 + $0xc8] sm:$0xff]   ;;  %v17005_v49 = vld [vmem:[#allocation2 + $0x38] sm:$0xf] }
 0x7a4   :  { %v8709_v28 = vrot.slane %v8707_v0, 4  ;;  %v8701_v4 = vsel %vm18148_vm5, %v13236_v59, %v8700_v46  ;;  %v8708_v13 = vsel %vm18148_vm5, %v13237_v45, %v8707_v0  ;;  %v17004_v46 = vld [vmem:[#allocation2 + $0x2c] sm:$0xf]  ;;  %v13239_v0 = vrot.slane %v24399_v53, 9  ;;  %v24404_v53 = vld [vmem:[#allocation21_spill] sm:$0xff] }
 0x7a5   :  { %v8697_v31 = vsel %vm18148_vm5, %v8695_v26, %v8696_v17  ;;  %v21656_v50 = vcombine.low %v8701_v4, %v8704_v43  ;;  %v8716_v17 = vrot.slane %v8714_v34, 4  ;;  %v8723_v44 = vrot.slane %v8721_v8, 4  ;;  %v24397_v26 = vld [vmem:[#allocation25_spill] sm:$0xff]  ;;  %v24401_v45 = vld [vmem:[#allocation18_spill] sm:$0xff] }
 0x7a6   :  { %v13283_v61 = vcombine.low %v8694_v55, %v8697_v31  ;;  %v8711_v51 = vsel %vm18148_vm5, %v8709_v28, %v8710_v7  ;;  %v24398_v55 = vld [vmem:[#allocation9_spill] sm:$0xff]  ;;  %v8724_v28 = vrot.slane %v17005_v49, 5  ;;  %v8728_v59 = vrot.slane %v24400_v35, 5 }
 0x7a7   :  { %v21663_v19 = vcombine.low %v8708_v13, %v8711_v51  ;;  %v13238_v31 = vrot.slane %v24398_v55, 9  ;;  %v8735_v1 = vrot.slane %v24401_v45, 5  ;;  %v8722_v33 = vsel %vm18148_vm5, %v13239_v0, %v8721_v8  ;;  %v16836_v51 = vld [vmem:[%s23629_s4 + $0xd8] sm:$0xff]   ;;  %v17007_v55 = vld [vmem:[#allocation2 + $0x50] sm:$0xf]  ;;  %v16838_v45 = vld [vmem:[%s23629_s4 + $0xe8] sm:$0xff]  }
 0x7a8   :  { %15053 = vmatmul.mubr.bf16.gmra.mrb[32].mxu1 %v21563_v10  ;;  %v8725_v63 = vsel %vm18148_vm5, %v8723_v44, %v8724_v28  ;;  %v8730_v4 = vrot.slane %v8728_v59, 4  ;;  %v8742_v0 = vrot.slane %v24404_v53, 5  ;;  %v24405_v28 = vld [vmem:[#allocation24_spill] sm:$0xff] }
 0x7a9   :  { %15056 = vmatprep.mubr.bf16.mxu1 %v21569_v40  ;;  %v8715_v7 = vsel %vm18148_vm5, %v13238_v31, %v8714_v34  ;;  %v21688_v29 = vcombine.low %v8722_v33, %v8725_v63  ;;  %v8737_v13 = vrot.slane %v8735_v1, 4  ;;  %v24402_v34 = vld [vmem:[#allocation15_spill] sm:$0xff]  ;;  %v8738_v31 = vrot.slane %v17007_v55, 5  ;;  %v24410_v55 = vld [vmem:[#allocation26_spill] sm:$0xff]  ;;  %v24411_v53 = vld [vmem:[#allocation32_spill] sm:$0xff] }
 0x7aa   :  { %v8744_v33 = vrot.slane %v8742_v0, 4 }
 0x7ab   :  { %v8739_v49 = vsel %vm18148_vm5, %v8737_v13, %v8738_v31  ;;  %v17008_v13 = vld [vmem:[#allocation2 + $0x5c] sm:$0xf]  ;;  %v8756_v31 = vrot.slane %v24410_v55, 5 }
 0x7b0   :  { %15057 = vmatmul.mubr.bf16.gmra.mrb[36].mxu1 %v21575_v3 }
 0x7b1   :  { %15060 = vmatprep.mubr.bf16.mxu1 %v21579_v21 }
 0x7b8   :  { %15061 = vmatmul.mubr.bf16.gmra.mrb[40].mxu1 %v21585_v22 }
 0x7b9   :  { %15064 = vmatprep.mubr.bf16.mxu1 %v21589_v25 }
 0x7c0   :  { %15065 = vmatmul.mubr.bf16.gmra.mrb[44].mxu1 %v21595_v24 }
 0x7c1   :  { %15068 = vmatprep.mubr.bf16.mxu1 %v21599_v32 }
 0x7c8   :  { %15069 = vmatmul.mubr.bf16.gmra.mrb[48].mxu1 %v21605_v54 }
 0x7c9   :  { %15072 = vmatprep.mubr.bf16.mxu1 %v21609_v56 }
 0x7d0   :  { %15073 = vmatmul.mubr.bf16.gmra.mrb[52].mxu1 %v21615_v39 }
 0x7d1   :  { %15076 = vmatprep.mubr.bf16.mxu1 %v21619_v57 }
 0x7d8   :  { %15077 = vmatmul.mubr.bf16.gmra.mrb[56].mxu1 %v21626_v15 }
 0x7d9   :  { %15080 = vmatprep.mubr.bf16.mxu1 %v21631_v58 }
 0x7e0   :  { %15081 = vmatmul.mubr.bf16.gmra.mrb[60].mxu1 %v21643_v2 }
 0x7e1   :  { %15100 = vmatprep.mubr.bf16.mxu1 %v13283_v61  ;;  %v8717_v61 = vrot.slane %v17004_v46, 5  ;;  %v16837_v46 = vld [vmem:[%s23629_s4 + $0xe0] sm:$0xff]  }
 0x7e3   :  { %v8718_v30 = vsel %vm18148_vm5, %v8716_v17, %v8717_v61  ;;  %v17006_v17 = vld [vmem:[#allocation2 + $0x44] sm:$0xf] }
 0x7e4   :  { %v21681_v43 = vcombine.low %v8715_v7, %v8718_v30  ;;  %v8731_v44 = vrot.slane %v17006_v17, 5  ;;  %v8749_v30 = vrot.slane %v24405_v28, 5  ;;  %v17009_v17 = vld [vmem:[#allocation2 + $0x68] sm:$0xf] }
 0x7e6   :  { %v8732_v61 = vsel %vm18148_vm5, %v8730_v4, %v8731_v44  ;;  %v8751_v4 = vrot.slane %v8749_v30, 4  ;;  %v8752_v44 = vrot.slane %v17009_v17, 5  ;;  %v21745_v17 = vld [vmem:[%s23629_s4 + $0x100] sm:$0xff]  }
 0x7e8   :  { %15101 = vmatmul.mubr.bf16.vlgmr.msra.gmra.mrb[0].mxu1 %v21656_v50 }
 0x7e9   :  { %15104 = vmatprep.mubr.bf16.mxu1 %v21663_v19  ;;  %15165 = vmatpush3.bf16.msra.mxu1 %v24397_v26  ;;  %v24403_v26 = vld [vmem:[#allocation67_spill] sm:$0xff] }
 0x7ea   :  { %15166 = vmatprep.subr.bf16.mxu1 %v16834_v12  ;;  %v13241_v8 = vrot.slane %v24403_v26, 9  ;;  %v16839_v26 = vld [vmem:[%s23629_s4 + $0xf0] sm:$0xff]  }
 0x7ec   :  { %v8736_v63 = vsel %vm18148_vm5, %v13241_v8, %v8735_v1 }
 0x7ed   :  { %15167 = vmatpush3.bf16.msra.mxu1 %v16834_v12  ;;  %v13240_v12 = vrot.slane %v24402_v34, 9  ;;  %v21712_v7 = vcombine.low %v8736_v63, %v8739_v49  ;;  %v8745_v34 = vrot.slane %v17008_v13, 5  ;;  %v8763_v49 = vrot.slane %v24411_v53, 5  ;;  %v16840_v63 = vld [vmem:[%s23629_s4 + $0xf8] sm:$0xff]   ;;  %v17013_v53 = vld [vmem:[#allocation2 + $0x94] sm:$0xf] }
 0x7ee   :  { %15168 = vmatprep.subr.bf16.mxu1 %v16835_v5 }
 0x7ef   :  { %24407 = vst [vmem:[#allocation60_spill] sm:$0xff] %v21712_v7  ;;  %v8746_v8 = vsel %vm18148_vm5, %v8744_v33, %v8745_v34  ;;  %v24415_v34 = vld [vmem:[#allocation28_spill] sm:$0xff] }
 0x7f0   :  { %15105 = vmatmul.mubr.bf16.gmra.mrb[4].mxu1 %v21681_v43 }
 0x7f1   :  { %15108 = vmatprep.mubr.bf16.mxu1 %v21688_v29  ;;  %15169 = vmatpush3.bf16.msra.mxu1 %v16835_v5  ;;  %v8729_v5 = vsel %vm18148_vm5, %v13240_v12, %v8728_v59  ;;  %v24408_v59 = vld [vmem:[#allocation20_spill] sm:$0xff]  ;;  %v24409_v12 = vld [vmem:[#allocation23_spill] sm:$0xff] }
 0x7f2   :  { %15170 = vmatprep.subr.bf16.mxu1 %v16836_v51  ;;  %v21705_v35 = vcombine.low %v8729_v5, %v8732_v61  ;;  %v13243_v1 = vrot.slane %v24409_v12, 9  ;;  %v8753_v61 = vsel %vm18148_vm5, %v8751_v4, %v8752_v44  ;;  %v8765_v4 = vrot.slane %v8763_v49, 4  ;;  %v17011_v12 = vld [vmem:[#allocation2 + $0x80] sm:$0xf] }
 0x7f4   :  { %24406 = vst [vmem:[#allocation50_spill] sm:$0xff] %v21705_v35  ;;  %v8750_v5 = vsel %vm18148_vm5, %v13243_v1, %v8749_v30  ;;  %v13245_v30 = vrot.slane %v24415_v34, 9  ;;  %v8766_v1 = vrot.slane %v17011_v12, 5  ;;  %v17014_v12 = vld [vmem:[#allocation2 + $0x8c] sm:$0xf] }
 0x7f5   :  { %15171 = vmatpush3.bf16.msra.mxu1 %v16836_v51  ;;  %v13242_v51 = vrot.slane %v24408_v59, 9  ;;  %v21736_v33 = vcombine.low %v8750_v5, %v8753_v61  ;;  %v8758_v59 = vrot.slane %v8756_v31, 4 }
 0x7f6   :  { %15172 = vmatprep.subr.bf16.mxu1 %v16837_v46  ;;  %v8767_v61 = vsel %vm18148_vm5, %v8765_v4, %v8766_v1  ;;  %v24417_v4 = vld [vmem:[#allocation55_spill] sm:$0xff]  ;;  %v17016_v1 = vld [vmem:[#allocation2 + $0x98] sm:$0xf] }
 0x7f7   :  { %24413 = vst [vmem:[#allocation5_spill] sm:$0xff] %v21736_v33  ;;  %v13246_v34 = vrot.slane %v24417_v4, 9 }
 0x7f8   :  { %15109 = vmatmul.mubr.bf16.gmra.mrb[8].mxu1 %v21705_v35 }
 0x7f9   :  { %15112 = vmatprep.mubr.bf16.mxu1 %v21712_v7  ;;  %15173 = vmatpush3.bf16.msra.mxu1 %v16837_v46  ;;  %v8743_v46 = vsel %vm18148_vm5, %v13242_v51, %v8742_v0  ;;  %v24414_v0 = vld [vmem:[#allocation34_spill] sm:$0xff]  ;;  %v17010_v51 = vld [vmem:[#allocation2 + $0x74] sm:$0xf] }
 0x7fa   :  { %15174 = vmatprep.subr.bf16.mxu1 %v16838_v45  ;;  %v21729_v28 = vcombine.low %v8743_v46, %v8746_v8  ;;  %v8759_v13 = vrot.slane %v17010_v51, 5  ;;  %v17012_v8 = vld [vmem:[#allocation2 + $0x88] sm:$0xf] }
 0x7fb   :  { %v8770_v55 = vrot.slane %v17012_v8, 5 }
 0x7fc   :  { %24412 = vst [vmem:[#allocation68_spill] sm:$0xff] %v21729_v28  ;;  %v8760_v44 = vsel %vm18148_vm5, %v8758_v59, %v8759_v13 }
 0x7fd   :  { %15175 = vmatpush3.bf16.msra.mxu1 %v16838_v45  ;;  %v13244_v45 = vrot.slane %v24414_v0, 9  ;;  %v8764_v0 = vsel %vm18148_vm5, %v13245_v30, %v8763_v49  ;;  %v8772_v59 = vrot.slane %v8770_v55, 4  ;;  %v17017_v30 = vld [vmem:[#allocation2 + $0xa0] sm:$0xf] }
 0x7fe   :  { %15176 = vmatprep.subr.bf16.mxu1 %v16839_v26  ;;  %v21758_v51 = vcombine.low %v8764_v0, %v8767_v61  ;;  %v8784_v8 = vrot.slane %v17017_v30, 5  ;;  %v8771_v0 = vsel %vm18148_vm5, %v13246_v34, %v8770_v55  ;;  %v17022_v55 = vld [vmem:[#allocation2 + $0xb0] sm:$0xf] }
 0x7ff   :  { %v8757_v46 = vsel %vm18148_vm5, %v13244_v45, %v8756_v31  ;;  %v8773_v31 = vrot.slane %v17014_v12, 5  ;;  %v8794_v34 = vrot.slane %v17022_v55, 5 }
 0x800   :  { %15113 = vmatmul.mubr.bf16.gmra.mrb[12].mxu1 %v21729_v28  ;;  %v21753_v5 = vcombine.low %v8757_v46, %v8760_v44  ;;  %v8780_v44 = vrot.slane %v17016_v1, 5  ;;  %v8786_v1 = vrot.slane %v8784_v8, 4 }
 0x801   :  { %15116 = vmatprep.mubr.bf16.mxu1 %v21736_v33  ;;  %15177 = vmatpush3.bf16.msra.mxu1 %v16839_v26  ;;  %v8777_v26 = vrot.slane %v17013_v53, 5  ;;  %v8774_v49 = vsel %vm18148_vm5, %v8772_v59, %v8773_v31  ;;  %v17018_v53 = vld [vmem:[#allocation2 + $0xac] sm:$0xf]  ;;  %v17019_v31 = vld [vmem:[#allocation2 + $0x9c] sm:$0xf] }
 0x802   :  { %15178 = vmatprep.subr.bf16.mxu1 %v16840_v63  ;;  %24416 = vst [vmem:[#allocation7_spill] sm:$0xff] %v21753_v5  ;;  %v8791_v46 = vrot.slane %v17018_v53, 5  ;;  %v21769_v4 = vcombine.low %v8771_v0, %v8774_v49  ;;  %v17021_v53 = vld [vmem:[#allocation2 + $0xa8] sm:$0xf]  ;;  %v17023_v49 = vld [vmem:[#allocation2 + $0xdc] sm:$0xf] }
 0x803   :  { %v8779_v13 = vrot.slane %v8777_v26, 4  ;;  %v13249_v23 = vrot.slane %v17021_v53, 9  ;;  %v8805_v0 = vrot.slane %v17023_v49, 5  ;;  %v17025_v53 = vld [vmem:[#allocation2 + $0xd8] sm:$0xf] }
 0x804   :  { %24418 = vst [vmem:[#allocation10_spill] sm:$0xff] %v21769_v4  ;;  %v8793_v59 = vrot.slane %v8791_v46, 4  ;;  %v13251_v55 = vrot.slane %v17025_v53, 9  ;;  %v17026_v49 = vld [vmem:[#allocation2 + $0xe0] sm:$0xf] }
 0x805   :  { %15179 = vmatpush3.bf16.msra.mxu1 %v16840_v63  ;;  %v17015_v63 = vld [vmem:[#allocation2 + $0x90] sm:$0xf]  ;;  %v8781_v61 = vsel %vm18148_vm5, %v8779_v13, %v8780_v44  ;;  %v13248_v13 = vrot.slane %v17019_v31, 9  ;;  %v17020_v44 = vld [vmem:[#allocation2 + $0xa4] sm:$0xf]  ;;  %v8792_v31 = vsel %vm18148_vm5, %v13249_v23, %v8791_v46  ;;  %v8807_v27 = vrot.slane %v8805_v0, 4 }
 0x806   :  { %15244 = vmatprep.subr.bf16.mxu1 %v21745_v17  ;;  %v13247_v45 = vrot.slane %v17015_v63, 9  ;;  %v8787_v30 = vrot.slane %v17020_v44, 5  ;;  %v8806_v23 = vsel %vm18148_vm5, %v13251_v55, %v8805_v0  ;;  %v17031_v55 = vld [vmem:[#allocation2 + $0xe4] sm:$0xf] }
 0x807   :  { %v8785_v11 = vsel %vm18148_vm5, %v13248_v13, %v8784_v8  ;;  %v17028_v8 = vld [vmem:[#allocation2 + $0xbc] sm:$0xf] }
 0x808   :  { %15117 = vmatmul.mubr.bf16.gmra.mrb[16].mxu1 %v21753_v5  ;;  %v8778_v12 = vsel %vm18148_vm5, %v13247_v45, %v8777_v26  ;;  %v8788_v26 = vsel %vm18148_vm5, %v8786_v1, %v8787_v30  ;;  %v17024_v45 = vld [vmem:[#allocation2 + $0xb8] sm:$0xf]  ;;  %v8801_v13 = vrot.slane %v17028_v8, 5 }
 0x809   :  { %15120 = vmatprep.mubr.bf16.mxu1 %v21758_v51  ;;  %v21773_v63 = vcombine.low %v8778_v12, %v8781_v61  ;;  %v8798_v61 = vrot.slane %v17024_v45, 5  ;;  %v8795_v12 = vsel %vm18148_vm5, %v8793_v59, %v8794_v34  ;;  %v21785_v44 = vcombine.low %v8785_v11, %v8788_v26  ;;  %v17027_v59 = vld [vmem:[#allocation2 + $0xb4] sm:$0xf]  ;;  %v17029_v34 = vld [vmem:[#allocation2 + $0xe8] sm:$0xf] }
 0x80a   :  { %v13250_v30 = vrot.slane %v17027_v59, 9  ;;  %v8812_v26 = vrot.slane %v17029_v34, 5  ;;  %v17030_v45 = vld [vmem:[#allocation2 + $0xf4] sm:$0xf]  ;;  %v17034_v34 = vld [vmem:[#allocation2 + $0xf8] sm:$0xf] }
 0x80b   :  { %24419 = vst [vmem:[#allocation13_spill] sm:$0xff] %v21773_v63  ;;  %v8800_v1 = vrot.slane %v8798_v61, 4 }
 0x80c   :  { %v8814_v59 = vrot.slane %v8812_v26, 4 }
 0x80d   :  { %v8802_v46 = vsel %vm18148_vm5, %v8800_v1, %v8801_v13  ;;  %v17033_v1 = vld [vmem:[#allocation2 + $0xf0] sm:$0xf] }
 0x80e   :  { %v13253_v13 = vrot.slane %v17033_v1, 9 }
 0x810   :  { %15121 = vmatmul.mubr.bf16.gmra.mrb[20].mxu1 %v21769_v4  ;;  %v21787_v4 = vcombine.low %v8792_v31, %v8795_v12  ;;  %v8819_v12 = vrot.slane %v17030_v45, 5  ;;  %v8799_v31 = vsel %vm18148_vm5, %v13250_v30, %v8798_v61  ;;  %v17035_v61 = vld [vmem:[#allocation2 + $0x100] sm:$0xf] }
 0x811   :  { %15124 = vmatprep.mubr.bf16.mxu1 %v21773_v63  ;;  %v8808_v63 = vrot.slane %v17026_v49, 5  ;;  %v21799_v49 = vcombine.low %v8799_v31, %v8802_v46  ;;  %v8826_v30 = vrot.slane %v17035_v61, 5  ;;  %v17039_v61 = vld [vmem:[#allocation2 + $0x108] sm:$0xf] }
 0x812   :  { %24420 = vst [vmem:[#allocation25_spill] sm:$0xff] %v21787_v4  ;;  %v8821_v0 = vrot.slane %v8819_v12, 4 }
 0x813   :  { %v8809_v11 = vsel %vm18148_vm5, %v8807_v27, %v8808_v63  ;;  %v13252_v27 = vrot.slane %v17031_v55, 9  ;;  %v17032_v63 = vld [vmem:[#allocation2 + $0xec] sm:$0xf]  ;;  %v8820_v55 = vsel %vm18148_vm5, %v13253_v13, %v8819_v12  ;;  %v8828_v1 = vrot.slane %v8826_v30, 4  ;;  %v17041_v12 = vld [vmem:[#allocation2 + $0x118] sm:$0xf] }
 0x814   :  { %v13299_v53 = vcombine.low %v8806_v23, %v8809_v11  ;;  %v8815_v8 = vrot.slane %v17032_v63, 5  ;;  %v17036_v11 = vld [vmem:[#allocation2 + $0x10c] sm:$0xf]  ;;  %v8840_v13 = vrot.slane %v17041_v12, 5 }
 0x815   :  { %v8833_v46 = vrot.slane %v17036_v11, 5  ;;  %v8813_v31 = vsel %vm18148_vm5, %v13252_v27, %v8812_v26  ;;  %v13255_v11 = vrot.slane %v17039_v61, 9  ;;  %v17040_v26 = vld [vmem:[#allocation2 + $0x110] sm:$0xf] }
 0x816   :  { %v8816_v45 = vsel %vm18148_vm5, %v8814_v59, %v8815_v8  ;;  %v17037_v8 = vld [vmem:[#allocation2 + $0xfc] sm:$0xf]  ;;  %v8836_v27 = vrot.slane %v17040_v26, 5  ;;  %v8842_v26 = vrot.slane %v8840_v13, 4 }
 0x817   :  { %v8835_v59 = vrot.slane %v8833_v46, 4 }
 0x818   :  { %15125 = vmatmul.mubr.bf16.gmra.mrb[24].mxu1 %v21785_v44 }
 0x819   :  { %15128 = vmatprep.mubr.bf16.mxu1 %v21787_v4  ;;  %v8822_v4 = vrot.slane %v17034_v34, 5 }
 0x81b   :  { %v8823_v23 = vsel %vm18148_vm5, %v8821_v0, %v8822_v4  ;;  %v13254_v4 = vrot.slane %v17037_v8, 9  ;;  %v17038_v0 = vld [vmem:[#allocation2 + $0x104] sm:$0xf] }
 0x81c   :  { %v21812_v63 = vcombine.low %v8820_v55, %v8823_v23  ;;  %v8829_v34 = vrot.slane %v17038_v0, 5  ;;  %v8837_v23 = vsel %vm18148_vm5, %v8835_v59, %v8836_v27  ;;  %v8834_v0 = vsel %vm18148_vm5, %v13255_v11, %v8833_v46  ;;  %v17044_v27 = vld [vmem:[#allocation2 + $0x11c] sm:$0xf]  ;;  %v17047_v46 = vld [vmem:[#allocation2 + $0x130] sm:$0xf] }
 0x81d   :  { %v21826_v61 = vcombine.low %v8834_v0, %v8837_v23  ;;  %v8843_v12 = vrot.slane %v17044_v27, 5  ;;  %v8854_v11 = vrot.slane %v17047_v46, 5  ;;  %v17048_v23 = vld [vmem:[#allocation2 + $0x13c] sm:$0xf] }
 0x81e   :  { %24422 = vst [vmem:[#allocation12_spill] sm:$0xff] %v21812_v63  ;;  %v8861_v0 = vrot.slane %v17048_v23, 5  ;;  %v17051_v23 = vld [vmem:[#allocation2 + $0x138] sm:$0xf] }
 0x81f   :  { %24424 = vst [vmem:[#allocation18_spill] sm:$0xff] %v21826_v61 }
 0x820   :  { %15129 = vmatmul.mubr.bf16.gmra.mrb[28].mxu1 %v21799_v49 }
 0x821   :  { %15132 = vmatprep.mubr.bf16.mxu1 %v13299_v53  ;;  %v21808_v53 = vcombine.low %v8813_v31, %v8816_v45  ;;  %v8830_v45 = vsel %vm18148_vm5, %v8828_v1, %v8829_v34  ;;  %v17042_v31 = vld [vmem:[#allocation2 + $0x124] sm:$0xf]  ;;  %v17043_v34 = vld [vmem:[#allocation2 + $0x114] sm:$0xf] }
 0x822   :  { %v8847_v55 = vrot.slane %v17042_v31, 5  ;;  %v13256_v59 = vrot.slane %v17043_v34, 9  ;;  %v17045_v31 = vld [vmem:[#allocation2 + $0x120] sm:$0xf] }
 0x823   :  { %24421 = vst [vmem:[#allocation9_spill] sm:$0xff] %v21808_v53 }
 0x824   :  { %v8849_v1 = vrot.slane %v8847_v55, 4 }
 0x828   :  { %15133 = vmatmul.mubr.bf16.gmra.mrb[32].mxu1 %v21808_v53  ;;  %v13257_v53 = vrot.slane %v17045_v31, 9 }
 0x829   :  { %15136 = vmatprep.mubr.bf16.mxu1 %v21812_v63  ;;  %v8827_v63 = vsel %vm18148_vm5, %v13254_v4, %v8826_v30  ;;  %v17046_v30 = vld [vmem:[#allocation2 + $0x128] sm:$0xf]  ;;  %v8844_v4 = vsel %vm18148_vm5, %v8842_v26, %v8843_v12  ;;  %v8863_v26 = vrot.slane %v8861_v0, 4  ;;  %v17049_v12 = vld [vmem:[#allocation2 + $0x12c] sm:$0xf] }
 0x82a   :  { %v21822_v8 = vcombine.low %v8827_v63, %v8830_v45  ;;  %v8850_v63 = vrot.slane %v17046_v30, 5  ;;  %v8848_v27 = vsel %vm18148_vm5, %v13257_v53, %v8847_v55  ;;  %v8856_v30 = vrot.slane %v8854_v11, 4  ;;  %v17053_v53 = vld [vmem:[#allocation2 + $0x148] sm:$0xf] }
 0x82b   :  { %v8868_v55 = vrot.slane %v17053_v53, 5  ;;  %v17056_v53 = vld [vmem:[#allocation2 + $0x150] sm:$0xf] }
 0x82c   :  { %24423 = vst [vmem:[#allocation16_spill] sm:$0xff] %v21822_v8  ;;  %v8851_v45 = vsel %vm18148_vm5, %v8849_v1, %v8850_v63  ;;  %v13258_v1 = vrot.slane %v17049_v12, 9  ;;  %v17050_v63 = vld [vmem:[#allocation2 + $0x134] sm:$0xf] }
 0x82d   :  { %v21840_v31 = vcombine.low %v8848_v27, %v8851_v45  ;;  %v8857_v46 = vrot.slane %v17050_v63, 5  ;;  %v8875_v45 = vrot.slane %v21237_v14, 5 }
 0x82e   :  { %v8855_v27 = vsel %vm18148_vm5, %v13258_v1, %v8854_v11  ;;  %v17057_v11 = vld [vmem:[#allocation2 + $0x158] sm:$0xf] }
 0x82f   :  { %24425 = vst [vmem:[#allocation15_spill] sm:$0xff] %v21840_v31  ;;  %v8878_v1 = vrot.slane %v17057_v11, 5  ;;  %v13263_v11 = vrot.slane %v21264_v48, 9 }
 0x830   :  { %15137 = vmatmul.mubr.bf16.gmra.mrb[36].mxu1 %v21822_v8  ;;  %v13259_v8 = vrot.slane %v17051_v23, 9 }
 0x831   :  { %15140 = vmatprep.mubr.bf16.mxu1 %v21826_v61  ;;  %v8841_v61 = vsel %vm18148_vm5, %v13256_v59, %v8840_v13  ;;  %v17052_v13 = vld [vmem:[#allocation2 + $0x140] sm:$0xf]  ;;  %v8858_v59 = vsel %vm18148_vm5, %v8856_v30, %v8857_v46  ;;  %v8877_v30 = vrot.slane %v8875_v45, 4  ;;  %v17054_v46 = vld [vmem:[#allocation2 + $0x144] sm:$0xf] }
 0x832   :  { %v21836_v34 = vcombine.low %v8841_v61, %v8844_v4  ;;  %v8864_v61 = vrot.slane %v17052_v13, 5  ;;  %v21851_v12 = vcombine.low %v8855_v27, %v8858_v59  ;;  %v8862_v63 = vsel %vm18148_vm5, %v13259_v8, %v8861_v0 }
 0x833   :  { %v8870_v13 = vrot.slane %v8868_v55, 4  ;;  %v8882_v8 = vrot.slane %v21254_v20, 5  ;;  %v8879_v0 = vsel %vm18148_vm5, %v8877_v30, %v8878_v1  ;;  %v17058_v20 = vld [vmem:[#allocation2 + $0x15c] sm:$0xf] }
 0x834   :  { %v8865_v4 = vsel %vm18148_vm5, %v8863_v26, %v8864_v61  ;;  %v13260_v26 = vrot.slane %v17054_v46, 9  ;;  %v17055_v61 = vld [vmem:[#allocation2 + $0x14c] sm:$0xf]  ;;  %v13262_v30 = vrot.slane %v17058_v20, 9 }
 0x835   :  { %v21855_v23 = vcombine.low %v8862_v63, %v8865_v4  ;;  %v8871_v14 = vrot.slane %v17055_v61, 5  ;;  %v8889_v4 = vrot.slane %v21269_v41, 5 }
 0x836   :  { %v8869_v27 = vsel %vm18148_vm5, %v13260_v26, %v8868_v55  ;;  %v24428_v55 = vld [vmem:[#allocation57_spill] sm:$0xff] }
 0x837   :  { %v8872_v59 = vsel %vm18148_vm5, %v8870_v13, %v8871_v14  ;;  %v8891_v13 = vrot.slane %v8889_v4, 4  ;;  %v24427_v14 = vld [vmem:[#allocation51_spill] sm:$0xff]  ;;  %v8892_v26 = vrot.slane %v24428_v55, 5  ;;  %v8890_v48 = vsel %vm18148_vm5, %v13263_v11, %v8889_v4 }
 0x838   :  { %15141 = vmatmul.mubr.bf16.gmra.mrb[40].mxu1 %v21836_v34  ;;  %v21867_v63 = vcombine.low %v8869_v27, %v8872_v59  ;;  %v8885_v41 = vrot.slane %v24427_v14, 5  ;;  %v8903_v59 = vrot.slane %v21307_v36, 5  ;;  %v13265_v14 = vrot.slane %v24391_v16, 9  ;;  %v24432_v16 = vld [vmem:[#allocation77_spill] sm:$0xff] }
 0x839   :  { %15144 = vmatprep.mubr.bf16.mxu1 %v21840_v31  ;;  %v13261_v31 = vrot.slane %v17056_v53, 9  ;;  %v8884_v53 = vrot.slane %v8882_v8, 4 }
 0x83a   :  { %24426 = vst [vmem:[#allocation67_spill] sm:$0xff] %v21867_v63 }
 0x83b   :  { %v8876_v46 = vsel %vm18148_vm5, %v13261_v31, %v8875_v45  ;;  %v8886_v1 = vsel %vm18148_vm5, %v8884_v53, %v8885_v41  ;;  %v8896_v31 = vrot.slane %v21288_v9, 5  ;;  %v8893_v45 = vsel %vm18148_vm5, %v8891_v13, %v8892_v26  ;;  %v24429_v13 = vld [vmem:[#allocation59_spill] sm:$0xff] }
 0x83c   :  { %v21871_v61 = vcombine.low %v8876_v46, %v8879_v0  ;;  %v8883_v0 = vsel %vm18148_vm5, %v13262_v30, %v8882_v8  ;;  %v21890_v46 = vcombine.low %v8890_v48, %v8893_v45  ;;  %v8905_v53 = vrot.slane %v8903_v59, 4  ;;  %v24430_v8 = vld [vmem:[#allocation62_spill] sm:$0xff]  ;;  %v16844_v48 = vld [vmem:[%s23629_s4 + $0x118] sm:$0xff]  }
 0x83d   :  { %v21886_v27 = vcombine.low %v8883_v0, %v8886_v1  ;;  %v8898_v20 = vrot.slane %v8896_v31, 4  ;;  %v13264_v9 = vrot.slane %v24390_v37, 9  ;;  %v8899_v36 = vrot.slane %v24429_v13, 5  ;;  %v24433_v1 = vld [vmem:[#allocation6_spill] sm:$0xff]  ;;  %v24435_v0 = vld [vmem:[#allocation11_spill] sm:$0xff]  ;;  %v24438_v13 = vld [vmem:[#allocation56_spill] sm:$0xff] }
 0x83e   :  { %v8906_v30 = vrot.slane %v24430_v8, 5  ;;  %v8904_v37 = vsel %vm18148_vm5, %v13265_v14, %v8903_v59  ;;  %v16842_v45 = vld [vmem:[%s23629_s4 + $0x108] sm:$0xff]   ;;  %v16843_v59 = vld [vmem:[%s23629_s4 + $0x110] sm:$0xff]   ;;  %v16849_v8 = vld [vmem:[%s23629_s4 + $0x138] sm:$0xff]  }
 0x83f   :  { %v8900_v41 = vsel %vm18148_vm5, %v8898_v20, %v8899_v36  ;;  %v8897_v11 = vsel %vm18148_vm5, %v13264_v9, %v8896_v31  ;;  %v24434_v31 = vld [vmem:[#allocation8_spill] sm:$0xff]  ;;  %v24436_v20 = vld [vmem:[#allocation14_spill] sm:$0xff]  ;;  %v16848_v14 = vld [vmem:[%s23629_s4 + $0x130] sm:$0xff]  }
 0x840   :  { %15145 = vmatmul.mubr.bf16.gmra.mrb[44].mxu1 %v21851_v12  ;;  %v8907_v4 = vsel %vm18148_vm5, %v8905_v53, %v8906_v30  ;;  %v21904_v55 = vcombine.low %v8897_v11, %v8900_v41  ;;  %v24437_v53 = vld [vmem:[#allocation17_spill] sm:$0xff]  ;;  %v16847_v9 = vld [vmem:[%s23629_s4 + $0x128] sm:$0xff]   ;;  %v24440_v30 = vld [vmem:[#allocation31_spill] sm:$0xff] }
 0x841   :  { %15148 = vmatprep.mubr.bf16.mxu1 %v21855_v23  ;;  %v21908_v26 = vcombine.low %v8904_v37, %v8907_v4  ;;  %v24439_v36 = vld [vmem:[#allocation22_spill] sm:$0xff]  ;;  %v24441_v41 = vld [vmem:[#allocation27_spill] sm:$0xff]  ;;  %v16851_v4 = vld [vmem:[%s23629_s4 + $0x140] sm:$0xff]  }
 0x842   :  { %v24442_v11 = vld [vmem:[#allocation29_spill] sm:$0xff] }
 0x843   :  { %24431 = vst [vmem:[#allocation21_spill] sm:$0xff] %v21908_v26  ;;  %v24443_v37 = vld [vmem:[#allocation73_spill] sm:$0xff] }
 0x848   :  { %15149 = vmatmul.mubr.bf16.gmra.mrb[48].mxu1 %v21867_v63 }
 0x849   :  { %15152 = vmatprep.mubr.bf16.mxu1 %v21871_v61 }
 0x850   :  { %15153 = vmatmul.mubr.bf16.gmra.mrb[52].mxu1 %v21886_v27 }
 0x851   :  { %15156 = vmatprep.mubr.bf16.mxu1 %v21890_v46 }
 0x858   :  { %15157 = vmatmul.mubr.bf16.gmra.mrb[56].mxu1 %v21904_v55 }
 0x859   :  { %15160 = vmatprep.mubr.bf16.mxu1 %v21908_v26 }
 0x860   :  { %15161 = vmatmul.mubr.bf16.gmra.mrb[60].mxu1 %v24432_v16 }
 0x861   :  { %15180 = vmatprep.mubr.bf16.mxu1 %v24433_v1  ;;  %v24444_v1 = vld [vmem:[#allocation74_spill] sm:$0xff] }
 0x868   :  { %15181 = vmatmul.mubr.bf16.vlgmr.msra.gmra.mrb[0].mxu1 %v24434_v31 }
 0x869   :  { %15184 = vmatprep.mubr.bf16.mxu1 %v24435_v0  ;;  %15245 = vmatpush3.bf16.msra.mxu1 %v21745_v17  ;;  %v16846_v17 = vld [vmem:[%s23629_s4 + $0x120] sm:$0xff]  }
 0x86a   :  { %15246 = vmatprep.subr.bf16.mxu1 %v16842_v45 }
 0x86d   :  { %15247 = vmatpush3.bf16.msra.mxu1 %v16842_v45  ;;  %v24445_v45 = vld [vmem:[#allocation75_spill] sm:$0xff] }
 0x86e   :  { %15248 = vmatprep.subr.bf16.mxu1 %v16843_v59 }
 0x870   :  { %15185 = vmatmul.mubr.bf16.gmra.mrb[4].mxu1 %v24436_v20 }
 0x871   :  { %15188 = vmatprep.mubr.bf16.mxu1 %v24437_v53  ;;  %15249 = vmatpush3.bf16.msra.mxu1 %v16843_v59  ;;  %v24446_v59 = vld [vmem:[#allocation76_spill] sm:$0xff] }
 0x872   :  { %15250 = vmatprep.subr.bf16.mxu1 %v16844_v48 }
 0x875   :  { %15251 = vmatpush3.bf16.msra.mxu1 %v16844_v48  ;;  %v21955_v48 = vcombine.low %v21493_v38, %v21497_v18  ;;  %v21975_v38 = vcombine.low %v21499_v62, %v21503_v47  ;;  %v24448_v18 = vld [vmem:[#allocation30_spill] sm:$0xff]  ;;  %v16854_v62 = vld [vmem:[%s23629_s4 + $0x158] sm:$0xff]   ;;  %v24451_v47 = vld [vmem:[#allocation33_spill] sm:$0xff] }
 0x876   :  { %15252 = vmatprep.subr.bf16.mxu1 %v16846_v17 }
 0x877   :  { %24447 = vst [vmem:[#allocation24_spill] sm:$0xff] %v21975_v38 }
 0x878   :  { %15189 = vmatmul.mubr.bf16.gmra.mrb[8].mxu1 %v24438_v13 }
 0x879   :  { %15192 = vmatprep.mubr.bf16.mxu1 %v24439_v36  ;;  %15253 = vmatpush3.bf16.msra.mxu1 %v16846_v17  ;;  %v24449_v17 = vld [vmem:[#allocation38_spill] sm:$0xff] }
 0x87a   :  { %15254 = vmatprep.subr.bf16.mxu1 %v16847_v9 }
 0x87d   :  { %15255 = vmatpush3.bf16.msra.mxu1 %v16847_v9  ;;  %v24450_v9 = vld [vmem:[#allocation40_spill] sm:$0xff] }
 0x87e   :  { %15256 = vmatprep.subr.bf16.mxu1 %v16848_v14 }
 0x880   :  { %15193 = vmatmul.mubr.bf16.gmra.mrb[12].mxu1 %v24440_v30 }
 0x881   :  { %15196 = vmatprep.mubr.bf16.mxu1 %v24441_v41  ;;  %15257 = vmatpush3.bf16.msra.mxu1 %v16848_v14  ;;  %v16853_v14 = vld [vmem:[%s23629_s4 + $0x150] sm:$0xff]  }
 0x882   :  { %15258 = vmatprep.subr.bf16.mxu1 %v16849_v8 }
 0x885   :  { %15259 = vmatpush3.bf16.msra.mxu1 %v16849_v8  ;;  %v24452_v8 = vld [vmem:[#allocation39_spill] sm:$0xff] }
 0x886   :  { %15324 = vmatprep.subr.bf16.mxu1 %v16851_v4 }
 0x888   :  { %15197 = vmatmul.mubr.bf16.gmra.mrb[16].mxu1 %v24442_v11 }
 0x889   :  { %15200 = vmatprep.mubr.bf16.mxu1 %v24443_v37 }
 0x890   :  { %15201 = vmatmul.mubr.bf16.gmra.mrb[20].mxu1 %v24444_v1 }
 0x891   :  { %15204 = vmatprep.mubr.bf16.mxu1 %v24445_v45 }
 0x898   :  { %15205 = vmatmul.mubr.bf16.gmra.mrb[24].mxu1 %v24446_v59 }
 0x899   :  { %15208 = vmatprep.mubr.bf16.mxu1 %v21530_v60 }
 0x8a0   :  { %15209 = vmatmul.mubr.bf16.gmra.mrb[28].mxu1 %v21955_v48 }
 0x8a1   :  { %15212 = vmatprep.mubr.bf16.mxu1 %v21563_v10  ;;  %v16852_v10 = vld [vmem:[%s23629_s4 + $0x148] sm:$0xff]  }
 0x8a8   :  { %15213 = vmatmul.mubr.bf16.gmra.mrb[32].mxu1 %v21569_v40 }
 0x8a9   :  { %15216 = vmatprep.mubr.bf16.mxu1 %v21575_v3 }
 0x8b0   :  { %15217 = vmatmul.mubr.bf16.gmra.mrb[36].mxu1 %v21579_v21 }
 0x8b1   :  { %15220 = vmatprep.mubr.bf16.mxu1 %v21585_v22 }
 0x8b8   :  { %15221 = vmatmul.mubr.bf16.gmra.mrb[40].mxu1 %v21589_v25 }
 0x8b9   :  { %15224 = vmatprep.mubr.bf16.mxu1 %v21595_v24 }
 0x8c0   :  { %15225 = vmatmul.mubr.bf16.gmra.mrb[44].mxu1 %v21599_v32 }
 0x8c1   :  { %15228 = vmatprep.mubr.bf16.mxu1 %v21605_v54 }
 0x8c8   :  { %15229 = vmatmul.mubr.bf16.gmra.mrb[48].mxu1 %v21609_v56 }
 0x8c9   :  { %15232 = vmatprep.mubr.bf16.mxu1 %v21615_v39 }
 0x8d0   :  { %15233 = vmatmul.mubr.bf16.gmra.mrb[52].mxu1 %v21619_v57 }
 0x8d1   :  { %15236 = vmatprep.mubr.bf16.mxu1 %v21626_v15 }
 0x8d8   :  { %15237 = vmatmul.mubr.bf16.gmra.mrb[56].mxu1 %v21631_v58 }
 0x8d9   :  { %15240 = vmatprep.mubr.bf16.mxu1 %v21643_v2 }
 0x8e0   :  { %15241 = vmatmul.mubr.bf16.gmra.mrb[60].mxu1 %v21975_v38  ;;  %v24466_v38 = vld [vmem:[#allocation19_spill] sm:$0xff] }
 0x8e1   :  { %15260 = vmatprep.mubr.bf16.mxu1 %v24448_v18  ;;  %v16856_v18 = vld [vmem:[%s23629_s4 + $0x168] sm:$0xff]  }
 0x8e8   :  { %15261 = vmatmul.mubr.bf16.vlgmr.msra.gmra.mrb[0].mxu1 %v24449_v17  ;;  %v24461_v17 = vld [vmem:[#allocation65_spill] sm:$0xff] }
 0x8e9   :  { %15264 = vmatprep.mubr.bf16.mxu1 %v24450_v9  ;;  %15325 = vmatpush3.bf16.msra.mxu1 %v16851_v4  ;;  %v16855_v4 = vld [vmem:[%s23629_s4 + $0x160] sm:$0xff]   ;;  %v24460_v9 = vld [vmem:[#allocation64_spill] sm:$0xff] }
 0x8ea   :  { %15326 = vmatprep.subr.bf16.mxu1 %v16852_v10 }
 0x8ed   :  { %15327 = vmatpush3.bf16.msra.mxu1 %v16852_v10  ;;  %v24453_v10 = vld [vmem:[#allocation42_spill] sm:$0xff] }
 0x8ee   :  { %15328 = vmatprep.subr.bf16.mxu1 %v16853_v14 }
 0x8f0   :  { %15265 = vmatmul.mubr.bf16.gmra.mrb[4].mxu1 %v24451_v47  ;;  %v24456_v47 = vld [vmem:[#allocation43_spill] sm:$0xff] }
 0x8f1   :  { %15268 = vmatprep.mubr.bf16.mxu1 %v24452_v8  ;;  %15329 = vmatpush3.bf16.msra.mxu1 %v16853_v14  ;;  %v16857_v14 = vld [vmem:[%s23629_s4 + $0x170] sm:$0xff]   ;;  %v24455_v8 = vld [vmem:[#allocation41_spill] sm:$0xff] }
 0x8f2   :  { %15330 = vmatprep.subr.bf16.mxu1 %v16854_v62 }
 0x8f5   :  { %15331 = vmatpush3.bf16.msra.mxu1 %v16854_v62  ;;  %v16858_v62 = vld [vmem:[%s23629_s4 + $0x178] sm:$0xff]  }
 0x8f6   :  { %15332 = vmatprep.subr.bf16.mxu1 %v16855_v4 }
 0x8f8   :  { %15269 = vmatmul.mubr.bf16.gmra.mrb[8].mxu1 %v24453_v10  ;;  %v24459_v10 = vld [vmem:[#allocation63_spill] sm:$0xff] }
 0x8f9   :  { %15272 = vmatprep.mubr.bf16.mxu1 %v24454_v6  ;;  %15333 = vmatpush3.bf16.msra.mxu1 %v16855_v4  ;;  %v16859_v4 = vld [vmem:[%s23629_s4 + $0x180] sm:$0xff]  }
 0x8fa   :  { %15334 = vmatprep.subr.bf16.mxu1 %v16856_v18  ;;  %v24457_v6 = vld [vmem:[#allocation45_spill] sm:$0xff] }
 0x8fd   :  { %15335 = vmatpush3.bf16.msra.mxu1 %v16856_v18  ;;  %v24458_v18 = vld [vmem:[#allocation49_spill] sm:$0xff] }
 0x8fe   :  { %15336 = vmatprep.subr.bf16.mxu1 %v16857_v14 }
 0x900   :  { %15273 = vmatmul.mubr.bf16.gmra.mrb[12].mxu1 %v24455_v8  ;;  %v24462_v8 = vld [vmem:[#allocation46_spill] sm:$0xff] }
 0x901   :  { %15276 = vmatprep.mubr.bf16.mxu1 %v24456_v47  ;;  %15337 = vmatpush3.bf16.msra.mxu1 %v16857_v14  ;;  %v24463_v14 = vld [vmem:[#allocation47_spill] sm:$0xff]  ;;  %v24464_v47 = vld [vmem:[#allocation48_spill] sm:$0xff] }
 0x902   :  { %15338 = vmatprep.subr.bf16.mxu1 %v16858_v62 }
 0x905   :  { %15339 = vmatpush3.bf16.msra.mxu1 %v16858_v62  ;;  %v24465_v62 = vld [vmem:[#allocation4_spill] sm:$0xff] }
 0x906   :  { %15404 = vmatprep.subr.bf16.mxu1 %v16859_v4 }
 0x908   :  { %15277 = vmatmul.mubr.bf16.gmra.mrb[16].mxu1 %v24457_v6  ;;  %v24467_v6 = vld [vmem:[#allocation35_spill] sm:$0xff] }
 0x909   :  { %15280 = vmatprep.mubr.bf16.mxu1 %v24458_v18  ;;  %v24468_v18 = vld [vmem:[#allocation36_spill] sm:$0xff] }
 0x910   :  { %15281 = vmatmul.mubr.bf16.gmra.mrb[20].mxu1 %v24459_v10  ;;  %v24469_v10 = vld [vmem:[#allocation37_spill] sm:$0xff] }
 0x911   :  { %15284 = vmatprep.mubr.bf16.mxu1 %v24460_v9  ;;  %v24470_v9 = vld [vmem:[#allocation53_spill] sm:$0xff] }
 0x918   :  { %15285 = vmatmul.mubr.bf16.gmra.mrb[24].mxu1 %v24461_v17  ;;  %v24471_v17 = vld [vmem:[#allocation54_spill] sm:$0xff] }
 0x919   :  { %15288 = vmatprep.mubr.bf16.mxu1 %v24462_v8  ;;  %v24472_v8 = vld [vmem:[#allocation58_spill] sm:$0xff] }
 0x920   :  { %15289 = vmatmul.mubr.bf16.gmra.mrb[28].mxu1 %v21551_v42  ;;  %v24473_v42 = vld [vmem:[#allocation61_spill] sm:$0xff] }
 0x921   :  { %15292 = vmatprep.mubr.bf16.mxu1 %v24463_v14  ;;  %v24474_v14 = vld [vmem:[#allocation69_spill] sm:$0xff] }
 0x928   :  { %15293 = vmatmul.mubr.bf16.gmra.mrb[32].mxu1 %v24464_v47  ;;  %v24475_v47 = vld [vmem:[#allocation70_spill] sm:$0xff] }
 0x929   :  { %15296 = vmatprep.mubr.bf16.mxu1 %v24465_v62  ;;  %v24476_v62 = vld [vmem:[#allocation72_spill] sm:$0xff] }
 0x930   :  { %15297 = vmatmul.mubr.bf16.gmra.mrb[36].mxu1 %v24466_v38  ;;  %v24477_v38 = vld [vmem:[#allocation52_spill] sm:$0xff] }
 0x931   :  { %15300 = vmatprep.mubr.bf16.mxu1 %v24467_v6 }
 0x938   :  { %15301 = vmatmul.mubr.bf16.gmra.mrb[40].mxu1 %v24468_v18 }
 0x939   :  { %15304 = vmatprep.mubr.bf16.mxu1 %v24469_v10 }
 0x940   :  { %15305 = vmatmul.mubr.bf16.gmra.mrb[44].mxu1 %v24470_v9 }
 0x941   :  { %15308 = vmatprep.mubr.bf16.mxu1 %v24471_v17  ;;  %v16860_v17 = vld [vmem:[%s23629_s4 + $0x188] sm:$0xff]  }
 0x948   :  { %15309 = vmatmul.mubr.bf16.gmra.mrb[48].mxu1 %v24472_v8 }
 0x949   :  { %15312 = vmatprep.mubr.bf16.mxu1 %v24473_v42 }
 0x950   :  { %15313 = vmatmul.mubr.bf16.gmra.mrb[52].mxu1 %v24474_v14 }
 0x951   :  { %15316 = vmatprep.mubr.bf16.mxu1 %v24475_v47 }
 0x958   :  { %15317 = vmatmul.mubr.bf16.gmra.mrb[56].mxu1 %v24476_v62  ;;  %v16861_v62 = vld [vmem:[%s23629_s4 + $0x190] sm:$0xff]  }
 0x959   :  { %15320 = vmatprep.mubr.bf16.mxu1 %v24477_v38 }
 0x960   :  { %15321 = vmatmul.mubr.bf16.gmra.mrb[60].mxu1 %v21557_v52 }
 0x961   :  { %15340 = vmatprep.mubr.bf16.mxu1 %v21656_v50  ;;  %v16862_v50 = vld [vmem:[%s23629_s4 + $0x198] sm:$0xff]  }
 0x968   :  { %15341 = vmatmul.mubr.bf16.vlgmr.msra.gmra.mrb[0].mxu1 %v21663_v19 }
 0x969   :  { %15344 = vmatprep.mubr.bf16.mxu1 %v21681_v43  ;;  %15405 = vmatpush3.bf16.msra.mxu1 %v16859_v4  ;;  %v16863_v4 = vld [vmem:[%s23629_s4 + $0x1a0] sm:$0xff]  }
 0x96a   :  { %15406 = vmatprep.subr.bf16.mxu1 %v16860_v17 }
 0x96d   :  { %15407 = vmatpush3.bf16.msra.mxu1 %v16860_v17  ;;  %v16864_v17 = vld [vmem:[%s23629_s4 + $0x1a8] sm:$0xff]  }
 0x96e   :  { %15408 = vmatprep.subr.bf16.mxu1 %v16861_v62 }
 0x970   :  { %15345 = vmatmul.mubr.bf16.gmra.mrb[4].mxu1 %v21688_v29 }
 0x971   :  { %15348 = vmatprep.mubr.bf16.mxu1 %v21705_v35  ;;  %15409 = vmatpush3.bf16.msra.mxu1 %v16861_v62  ;;  %v16865_v62 = vld [vmem:[%s23629_s4 + $0x1b0] sm:$0xff]   ;;  %v24485_v35 = vld [vmem:[#allocation18_spill] sm:$0xff] }
 0x972   :  { %15410 = vmatprep.subr.bf16.mxu1 %v16862_v50 }
 0x975   :  { %15411 = vmatpush3.bf16.msra.mxu1 %v16862_v50  ;;  %v16866_v50 = vld [vmem:[%s23629_s4 + $0x1b8] sm:$0xff]  }
 0x976   :  { %15412 = vmatprep.subr.bf16.mxu1 %v16863_v4 }
 0x978   :  { %15349 = vmatmul.mubr.bf16.gmra.mrb[8].mxu1 %v21712_v7  ;;  %v24480_v7 = vld [vmem:[#allocation25_spill] sm:$0xff] }
 0x979   :  { %15352 = vmatprep.mubr.bf16.mxu1 %v21729_v28  ;;  %15413 = vmatpush3.bf16.msra.mxu1 %v16863_v4  ;;  %v16867_v4 = vld [vmem:[%s23629_s4 + $0x1c0] sm:$0xff]  }
 0x97a   :  { %15414 = vmatprep.subr.bf16.mxu1 %v16864_v17  ;;  %v24479_v28 = vld [vmem:[#allocation13_spill] sm:$0xff] }
 0x97d   :  { %15415 = vmatpush3.bf16.msra.mxu1 %v16864_v17  ;;  %v24478_v17 = vld [vmem:[#allocation10_spill] sm:$0xff] }
 0x97e   :  { %15416 = vmatprep.subr.bf16.mxu1 %v16865_v62 }
 0x980   :  { %15353 = vmatmul.mubr.bf16.gmra.mrb[12].mxu1 %v21736_v33  ;;  %v24483_v33 = vld [vmem:[#allocation12_spill] sm:$0xff] }
 0x981   :  { %15356 = vmatprep.mubr.bf16.mxu1 %v21753_v5  ;;  %15417 = vmatpush3.bf16.msra.mxu1 %v16865_v62  ;;  %v24481_v62 = vld [vmem:[#allocation79_spill] sm:$0xff]  ;;  %v24482_v5 = vld [vmem:[#allocation9_spill] sm:$0xff] }
 0x982   :  { %15418 = vmatprep.subr.bf16.mxu1 %v16866_v50 }
 0x985   :  { %15419 = vmatpush3.bf16.msra.mxu1 %v16866_v50  ;;  %v24484_v50 = vld [vmem:[#allocation16_spill] sm:$0xff] }
 0x986   :  { %15484 = vmatprep.subr.bf16.mxu1 %v16867_v4 }
 0x988   :  { %15357 = vmatmul.mubr.bf16.gmra.mrb[16].mxu1 %v21758_v51 }
 0x989   :  { %15360 = vmatprep.mubr.bf16.mxu1 %v24478_v17  ;;  %v24486_v17 = vld [vmem:[#allocation15_spill] sm:$0xff] }
 0x990   :  { %15361 = vmatmul.mubr.bf16.gmra.mrb[20].mxu1 %v24479_v28 }
 0x991   :  { %15364 = vmatprep.mubr.bf16.mxu1 %v21785_v44 }
 0x998   :  { %15365 = vmatmul.mubr.bf16.gmra.mrb[24].mxu1 %v24480_v7 }
 0x999   :  { %15368 = vmatprep.mubr.bf16.mxu1 %v21799_v49 }
 0x9a0   :  { %15369 = vmatmul.mubr.bf16.gmra.mrb[28].mxu1 %v24481_v62 }
 0x9a1   :  { %15372 = vmatprep.mubr.bf16.mxu1 %v24482_v5  ;;  %v24487_v5 = vld [vmem:[#allocation80_spill] sm:$0xff] }
 0x9a8   :  { %15373 = vmatmul.mubr.bf16.gmra.mrb[32].mxu1 %v24483_v33 }
 0x9a9   :  { %15376 = vmatprep.mubr.bf16.mxu1 %v24484_v50 }
 0x9b0   :  { %15377 = vmatmul.mubr.bf16.gmra.mrb[36].mxu1 %v24485_v35 }
 0x9b1   :  { %15380 = vmatprep.mubr.bf16.mxu1 %v21836_v34 }
 0x9b8   :  { %15381 = vmatmul.mubr.bf16.gmra.mrb[40].mxu1 %v24486_v17 }
 0x9b9   :  { %15384 = vmatprep.mubr.bf16.mxu1 %v21851_v12 }
 0x9c0   :  { %15385 = vmatmul.mubr.bf16.gmra.mrb[44].mxu1 %v21855_v23 }
 0x9c1   :  { %15388 = vmatprep.mubr.bf16.mxu1 %v21867_v63  ;;  %v16868_v63 = vld [vmem:[%s23629_s4 + $0x1c8] sm:$0xff]  }
 0x9c8   :  { %15389 = vmatmul.mubr.bf16.gmra.mrb[48].mxu1 %v21871_v61 }
 0x9c9   :  { %15392 = vmatprep.mubr.bf16.mxu1 %v21886_v27 }
 0x9d0   :  { %15393 = vmatmul.mubr.bf16.gmra.mrb[52].mxu1 %v21890_v46 }
 0x9d1   :  { %15396 = vmatprep.mubr.bf16.mxu1 %v21904_v55 }
 0x9d8   :  { %15397 = vmatmul.mubr.bf16.gmra.mrb[56].mxu1 %v21908_v26  ;;  %v16869_v26 = vld [vmem:[%s23629_s4 + $0x1d0] sm:$0xff]  }
 0x9d9   :  { %15400 = vmatprep.mubr.bf16.mxu1 %v24432_v16 }
 0x9e0   :  { %15401 = vmatmul.mubr.bf16.gmra.mrb[60].mxu1 %v24487_v5 }
 0x9e1   :  { %15420 = vmatprep.mubr.bf16.mxu1 %v24434_v31  ;;  %v16870_v31 = vld [vmem:[%s23629_s4 + $0x1d8] sm:$0xff]  }
 0x9e8   :  { %15421 = vmatmul.mubr.bf16.vlgmr.msra.gmra.mrb[0].mxu1 %v24435_v0  ;;  %v16872_v0 = vld [vmem:[%s23629_s4 + $0x1e0] sm:$0xff]  }
 0x9e9   :  { %15424 = vmatprep.mubr.bf16.mxu1 %v24436_v20  ;;  %15485 = vmatpush3.bf16.msra.mxu1 %v16867_v4  ;;  %v16875_v20 = vld [vmem:[%s23629_s4 + $0x1f8] sm:$0xff]  }
 0x9ea   :  { %15486 = vmatprep.subr.bf16.mxu1 %v16868_v63 }
 0x9ed   :  { %15487 = vmatpush3.bf16.msra.mxu1 %v16868_v63  ;;  %v16873_v63 = vld [vmem:[%s23629_s4 + $0x1e8] sm:$0xff]  }
 0x9ee   :  { %15488 = vmatprep.subr.bf16.mxu1 %v16869_v26 }
 0x9f0   :  { %15425 = vmatmul.mubr.bf16.gmra.mrb[4].mxu1 %v24437_v53  ;;  %v16877_v53 = vld [vmem:[%s23629_s4 + $0x200] sm:$0xff]  }
 0x9f1   :  { %15428 = vmatprep.mubr.bf16.mxu1 %v24438_v13  ;;  %15489 = vmatpush3.bf16.msra.mxu1 %v16869_v26  ;;  %v16874_v26 = vld [vmem:[%s23629_s4 + $0x1f0] sm:$0xff]   ;;  %v22129_v13 = vld [vmem:[#allocation2 + $0xcc] sm:$0xf] }
 0x9f2   :  { %15490 = vmatprep.subr.bf16.mxu1 %v16870_v31  ;;  %v11241_v4 = vshll.u32 %v22129_v13, 16 }
 0x9f5   :  { %15491 = vmatpush3.bf16.msra.mxu1 %v16870_v31 }
 0x9f6   :  { %15492 = vmatprep.subr.bf16.mxu1 %v16872_v0 }
 0x9f8   :  { %15429 = vmatmul.mubr.bf16.gmra.mrb[8].mxu1 %v24439_v36  ;;  %v22131_v36 = vld [vmem:[#allocation2 + $0xd0] sm:$0xf] }
 0x9f9   :  { %15432 = vmatprep.mubr.bf16.mxu1 %v24440_v30  ;;  %15493 = vmatpush3.bf16.msra.mxu1 %v16872_v0  ;;  %v13419_v30 = vcombine.low %v22129_v13, %v22131_v36  ;;  %v11251_v31 = vshrl.u32 %v22131_v36, 16  ;;  %v24499_v0 = vld [vmem:[#allocation63_spill] sm:$0xff] }
 0x9fa   :  { %15494 = vmatprep.subr.bf16.mxu1 %v16873_v63 }
 0x9fd   :  { %15495 = vmatpush3.bf16.msra.mxu1 %v16873_v63  ;;  %v11247_v63 = vshll.u32 %v22131_v36, 16 }
 0x9fe   :  { %15496 = vmatprep.subr.bf16.mxu1 %v16874_v26 }
 0xa00   :  { %15433 = vmatmul.mubr.bf16.gmra.mrb[12].mxu1 %v24441_v41  ;;  %v24495_v41 = vld [vmem:[#allocation41_spill] sm:$0xff] }
 0xa01   :  { %15436 = vmatprep.mubr.bf16.mxu1 %v24442_v11  ;;  %15497 = vmatpush3.bf16.msra.mxu1 %v16874_v26  ;;  %v16883_v11 = vld [vmem:[%s23629_s4 + $0x230] sm:$0xff]  }
 0xa02   :  { %15498 = vmatprep.subr.bf16.mxu1 %v16875_v20 }
 0xa05   :  { %15499 = vmatpush3.bf16.msra.mxu1 %v16875_v20  ;;  %v11243_v20 = vrot.slane %v11241_v4, 5 }
 0xa06   :  { %15564 = vmatprep.subr.bf16.mxu1 %v16877_v53 }
 0xa08   :  { %15437 = vmatmul.mubr.bf16.gmra.mrb[16].mxu1 %v24443_v37  ;;  %v16884_v37 = vld [vmem:[%s23629_s4 + $0x238] sm:$0xff]  }
 0xa09   :  { %15440 = vmatprep.mubr.bf16.mxu1 %v24444_v1  ;;  %v24496_v1 = vld [vmem:[#allocation43_spill] sm:$0xff] }
 0xa10   :  { %15441 = vmatmul.mubr.bf16.gmra.mrb[20].mxu1 %v24445_v45  ;;  %v24497_v45 = vld [vmem:[#allocation45_spill] sm:$0xff] }
 0xa11   :  { %15444 = vmatprep.mubr.bf16.mxu1 %v24446_v59  ;;  %v24498_v59 = vld [vmem:[#allocation49_spill] sm:$0xff] }
 0xa18   :  { %15445 = vmatmul.mubr.bf16.gmra.mrb[24].mxu1 %v21530_v60  ;;  %v24488_v60 = vld [vmem:[#allocation24_spill] sm:$0xff] }
 0xa19   :  { %15448 = vmatprep.mubr.bf16.mxu1 %v21955_v48  ;;  %v11238_v48 = vshrl.u32 %v22129_v13, 16 }
 0xa1b   :  { %v11240_v26 = vrot.slane %v11238_v48, 4 }
 0xa20   :  { %15449 = vmatmul.mubr.bf16.gmra.mrb[28].mxu1 %v13419_v30  ;;  %v11253_v30 = vrot.slane %v11251_v31, 4 }
 0xa21   :  { %15452 = vmatprep.mubr.bf16.mxu1 %v21569_v40  ;;  %v22150_v40 = vld [vmem:[#allocation2 + $0x1a4] sm:$0xf] }
 0xa22   :  { %v11262_v48 = vshrl.u32 %v22150_v40, 16  ;;  %v11265_v4 = vshll.u32 %v22150_v40, 16 }
 0xa28   :  { %15453 = vmatmul.mubr.bf16.gmra.mrb[32].mxu1 %v21575_v3  ;;  %v22152_v3 = vld [vmem:[#allocation2 + $0x1a8] sm:$0xf] }
 0xa29   :  { %15456 = vmatprep.mubr.bf16.mxu1 %v21579_v21  ;;  %v13420_v21 = vcombine.low %v22150_v40, %v22152_v3  ;;  %v11275_v31 = vshrl.u32 %v22152_v3, 16 }
 0xa30   :  { %15457 = vmatmul.mubr.bf16.gmra.mrb[36].mxu1 %v21585_v22  ;;  %v24489_v22 = vld [vmem:[#allocation38_spill] sm:$0xff] }
 0xa31   :  { %15460 = vmatprep.mubr.bf16.mxu1 %v21589_v25  ;;  %v16878_v25 = vld [vmem:[%s23629_s4 + $0x208] sm:$0xff]  }
 0xa38   :  { %15461 = vmatmul.mubr.bf16.gmra.mrb[40].mxu1 %v21595_v24  ;;  %v24490_v24 = vld [vmem:[#allocation40_spill] sm:$0xff] }
 0xa39   :  { %15464 = vmatprep.mubr.bf16.mxu1 %v21599_v32  ;;  %v24491_v32 = vld [vmem:[#allocation33_spill] sm:$0xff] }
 0xa40   :  { %15465 = vmatmul.mubr.bf16.gmra.mrb[44].mxu1 %v21605_v54  ;;  %v16879_v54 = vld [vmem:[%s23629_s4 + $0x210] sm:$0xff]  }
 0xa41   :  { %15468 = vmatprep.mubr.bf16.mxu1 %v21609_v56  ;;  %v16880_v56 = vld [vmem:[%s23629_s4 + $0x218] sm:$0xff]  }
 0xa48   :  { %15469 = vmatmul.mubr.bf16.gmra.mrb[48].mxu1 %v21615_v39  ;;  %v24492_v39 = vld [vmem:[#allocation39_spill] sm:$0xff] }
 0xa49   :  { %15472 = vmatprep.mubr.bf16.mxu1 %v21619_v57  ;;  %v24493_v57 = vld [vmem:[#allocation42_spill] sm:$0xff] }
 0xa50   :  { %15473 = vmatmul.mubr.bf16.gmra.mrb[52].mxu1 %v21626_v15  ;;  %v16881_v15 = vld [vmem:[%s23629_s4 + $0x220] sm:$0xff]  }
 0xa51   :  { %15476 = vmatprep.mubr.bf16.mxu1 %v21631_v58  ;;  %v16882_v58 = vld [vmem:[%s23629_s4 + $0x228] sm:$0xff]  }
 0xa58   :  { %15477 = vmatmul.mubr.bf16.gmra.mrb[56].mxu1 %v21643_v2  ;;  %v24494_v2 = vld [vmem:[#allocation44_spill] sm:$0xff] }
 0xa59   :  { %15480 = vmatprep.mubr.bf16.mxu1 %v24488_v60  ;;  %v22192_v60 = vld [vmem:[#allocation2 + $0xd4] sm:$0xf] }
 0xa60   :  { %15481 = vmatmul.mubr.bf16.gmra.mrb[60].mxu1 %v13420_v21  ;;  %v24500_v21 = vld [vmem:[#allocation64_spill] sm:$0xff] }
 0xa61   :  { %15500 = vmatprep.mubr.bf16.mxu1 %v24489_v22  ;;  %v24501_v22 = vld [vmem:[#allocation65_spill] sm:$0xff] }
 0xa68   :  { %15501 = vmatmul.mubr.bf16.vlgmr.msra.gmra.mrb[0].mxu1 %v24490_v24 }
 0xa69   :  { %15504 = vmatprep.mubr.bf16.mxu1 %v24491_v32  ;;  %15565 = vmatpush3.bf16.msra.mxu1 %v16877_v53  ;;  %v11249_v53 = vrot.slane %v11247_v63, 5  ;;  %v11257_v32 = vshll.u32 %v22192_v60, 16  ;;  %v6863_v63 = vld [vmem:[#allocation2 + $0x1ac] sm:$0xf] }
 0xa6a   :  { %15566 = vmatprep.subr.bf16.mxu1 %v16878_v25 }
 0xa6b   :  { %v11254_v24 = vor.u32 %v11253_v30, %v11249_v53 }
 0xa6d   :  { %15567 = vmatpush3.bf16.msra.mxu1 %v16878_v25  ;;  %v11244_v25 = vor.u32 %v11243_v20, %v11240_v26  ;;  %v11281_v20 = vshll.u32 %v6863_v63, 16 }
 0xa6e   :  { %15568 = vmatprep.subr.bf16.mxu1 %v16879_v54 }
 0xa70   :  { %15505 = vmatmul.mubr.bf16.gmra.mrb[4].mxu1 %v24492_v39  ;;  %v11259_v39 = vrot.slane %v11257_v32, 5  ;;  %v24514_v32 = vld [vmem:[#allocation7_spill] sm:$0xff] }
 0xa71   :  { %15508 = vmatprep.mubr.bf16.mxu1 %v24493_v57  ;;  %15569 = vmatpush3.bf16.msra.mxu1 %v16879_v54  ;;  %v11245_v54 = vrot.slane %v11244_v25, 4  ;;  %v24502_v57 = vld [vmem:[#allocation46_spill] sm:$0xff] }
 0xa72   :  { %15570 = vmatprep.subr.bf16.mxu1 %v16880_v56 }
 0xa75   :  { %15571 = vmatpush3.bf16.msra.mxu1 %v16880_v56  ;;  %v11255_v56 = vrot.slane %v11254_v24, 4  ;;  %v24511_v24 = vld [vmem:[#allocation60_spill] sm:$0xff] }
 0xa76   :  { %15572 = vmatprep.subr.bf16.mxu1 %v16881_v15 }
 0xa78   :  { %15509 = vmatmul.mubr.bf16.gmra.mrb[8].mxu1 %v24494_v2  ;;  %v11250_v2 = vsel %vm17138_vm2, %v11245_v54, %v11249_v53  ;;  %v24515_v54 = vld [vmem:[#allocation10_spill] sm:$0xff] }
 0xa79   :  { %15512 = vmatprep.mubr.bf16.mxu1 %v24495_v41  ;;  %15573 = vmatpush3.bf16.msra.mxu1 %v16881_v15  ;;  %v24503_v15 = vld [vmem:[#allocation78_spill] sm:$0xff]  ;;  %v11260_v41 = vsel %vm17138_vm2, %v11255_v56, %v11259_v39  ;;  %v11718_v56 = vrot.slane %v22192_v60, 5 }
 0xa7a   :  { %15574 = vmatprep.subr.bf16.mxu1 %v16882_v58 }
 0xa7d   :  { %15575 = vmatpush3.bf16.msra.mxu1 %v16882_v58 }
 0xa7e   :  { %15576 = vmatprep.subr.bf16.mxu1 %v16883_v11 }
 0xa80   :  { %15513 = vmatmul.mubr.bf16.gmra.mrb[12].mxu1 %v24496_v1  ;;  %v24506_v1 = vld [vmem:[#allocation4_spill] sm:$0xff] }
 0xa81   :  { %15516 = vmatprep.mubr.bf16.mxu1 %v24497_v45  ;;  %15577 = vmatpush3.bf16.msra.mxu1 %v16883_v11  ;;  %v13445_v11 = vcombine.low %v11250_v2, %v11260_v41  ;;  %v24507_v45 = vld [vmem:[#allocation19_spill] sm:$0xff] }
 0xa82   :  { %15578 = vmatprep.subr.bf16.mxu1 %v16884_v37 }
 0xa85   :  { %15579 = vmatpush3.bf16.msra.mxu1 %v16884_v37  ;;  %v24505_v37 = vld [vmem:[#allocation48_spill] sm:$0xff] }
 0xa88   :  { %15517 = vmatmul.mubr.bf16.gmra.mrb[16].mxu1 %v24498_v59  ;;  %v24508_v59 = vld [vmem:[#allocation54_spill] sm:$0xff] }
 0xa89   :  { %15520 = vmatprep.mubr.bf16.mxu1 %v24499_v0 }
 0xa90   :  { %15521 = vmatmul.mubr.bf16.gmra.mrb[20].mxu1 %v24500_v21  ;;  %v11283_v21 = vrot.slane %v11281_v20, 5 }
 0xa91   :  { %15524 = vmatprep.mubr.bf16.mxu1 %v24501_v22 }
 0xa98   :  { %15525 = vmatmul.mubr.bf16.gmra.mrb[24].mxu1 %v24502_v57 }
 0xa99   :  { %15528 = vmatprep.mubr.bf16.mxu1 %v24503_v15 }
 0xaa0   :  { %15529 = vmatmul.mubr.bf16.gmra.mrb[28].mxu1 %v13445_v11 }
 0xaa1   :  { %15532 = vmatprep.mubr.bf16.mxu1 %v24505_v37 }
 0xaa8   :  { %15533 = vmatmul.mubr.bf16.gmra.mrb[32].mxu1 %v24506_v1 }
 0xaa9   :  { %15536 = vmatprep.mubr.bf16.mxu1 %v24507_v45 }
 0xab0   :  { %15537 = vmatmul.mubr.bf16.gmra.mrb[36].mxu1 %v24467_v6  ;;  %v11271_v6 = vshll.u32 %v22152_v3, 16 }
 0xab1   :  { %15540 = vmatprep.mubr.bf16.mxu1 %v24468_v18  ;;  %v11264_v18 = vrot.slane %v11262_v48, 4 }
 0xab2   :  { %v11273_v0 = vrot.slane %v11271_v6, 5 }
 0xab8   :  { %15541 = vmatmul.mubr.bf16.gmra.mrb[40].mxu1 %v24469_v10  ;;  %v11267_v10 = vrot.slane %v11265_v4, 5 }
 0xab9   :  { %15544 = vmatprep.mubr.bf16.mxu1 %v24470_v9  ;;  %v11277_v9 = vrot.slane %v11275_v31, 4 }
 0xabb   :  { %v11278_v26 = vor.u32 %v11277_v9, %v11273_v0 }
 0xabd   :  { %v11279_v30 = vrot.slane %v11278_v26, 4 }
 0xabf   :  { %v11284_v22 = vsel %vm17138_vm2, %v11279_v30, %v11283_v21 }
 0xac0   :  { %15545 = vmatmul.mubr.bf16.gmra.mrb[44].mxu1 %v24508_v59 }
 0xac1   :  { %15548 = vmatprep.mubr.bf16.mxu1 %v24472_v8  ;;  %v24509_v8 = vld [vmem:[#allocation72_spill] sm:$0xff] }
 0xac8   :  { %15549 = vmatmul.mubr.bf16.gmra.mrb[48].mxu1 %v24473_v42  ;;  %v11268_v42 = vor.u32 %v11267_v10, %v11264_v18 }
 0xac9   :  { %15552 = vmatprep.mubr.bf16.mxu1 %v24474_v14 }
 0xaca   :  { %v11269_v53 = vrot.slane %v11268_v42, 4 }
 0xacc   :  { %v11274_v14 = vsel %vm17138_vm2, %v11269_v53, %v11273_v0 }
 0xacd   :  { %v13446_v25 = vcombine.low %v11274_v14, %v11284_v22 }
 0xad0   :  { %15553 = vmatmul.mubr.bf16.gmra.mrb[52].mxu1 %v24475_v47  ;;  %v24510_v47 = vld [vmem:[#allocation50_spill] sm:$0xff] }
 0xad1   :  { %15556 = vmatprep.mubr.bf16.mxu1 %v24509_v8 }
 0xad8   :  { %15557 = vmatmul.mubr.bf16.gmra.mrb[56].mxu1 %v24477_v38  ;;  %v24512_v38 = vld [vmem:[#allocation68_spill] sm:$0xff] }
 0xad9   :  { %15560 = vmatprep.mubr.bf16.mxu1 %v21557_v52  ;;  %v24513_v52 = vld [vmem:[#allocation5_spill] sm:$0xff] }
 0xae0   :  { %15561 = vmatmul.mubr.bf16.gmra.mrb[60].mxu1 %v13446_v25 }
 0xae1   :  { %15580 = vmatprep.mubr.bf16.mxu1 %v21663_v19  ;;  %v11715_v19 = vrot.slane %v22131_v36, 5 }
 0xae8   :  { %15581 = vmatmul.mubr.bf16.vlgmr.msra.gmra.mrb[0].mxu1 %v21681_v43  ;;  %v13455_v43 = vrot.slane %v22129_v13, 9 }
 0xae9   :  { %15584 = vmatprep.mubr.bf16.mxu1 %v21688_v29  ;;  %v11717_v29 = vrot.slane %v11715_v19, 4 }
 0xaea   :  { %v11716_v39 = vsel %vm18148_vm5, %v13455_v43, %v11715_v19 }
 0xaf0   :  { %15585 = vmatmul.mubr.bf16.gmra.mrb[4].mxu1 %v24510_v47 }
 0xaf1   :  { %15588 = vmatprep.mubr.bf16.mxu1 %v24511_v24 }
 0xaf8   :  { %15589 = vmatmul.mubr.bf16.gmra.mrb[8].mxu1 %v24512_v38 }
 0xaf9   :  { %15592 = vmatprep.mubr.bf16.mxu1 %v24513_v52 }
 0xb00   :  { %15593 = vmatmul.mubr.bf16.gmra.mrb[12].mxu1 %v24514_v32 }
 0xb01   :  { %15596 = vmatprep.mubr.bf16.mxu1 %v21758_v51 }
 0xb08   :  { %15597 = vmatmul.mubr.bf16.gmra.mrb[16].mxu1 %v24515_v54 }
 0xb09   :  { %15600 = vmatprep.mubr.bf16.mxu1 %v24479_v28  ;;  %v11719_v28 = vsel %vm18148_vm5, %v11717_v29, %v11718_v56 }
 0xb10   :  { %15601 = vmatmul.mubr.bf16.gmra.mrb[20].mxu1 %v21785_v44  ;;  %v13473_v44 = vcombine.low %v11716_v39, %v11719_v28 }
 0xb11   :  { %15604 = vmatprep.mubr.bf16.mxu1 %v24480_v7  ;;  %v24517_v7 = vld [vmem:[#allocation67_spill] sm:$0xff] }
 0xb18   :  { %15605 = vmatmul.mubr.bf16.gmra.mrb[24].mxu1 %v21799_v49  ;;  %v13456_v49 = vrot.slane %v22150_v40, 9 }
 0xb19   :  { %15608 = vmatprep.mubr.bf16.mxu1 %v24481_v62 }
 0xb20   :  { %15609 = vmatmul.mubr.bf16.gmra.mrb[28].mxu1 %v13473_v44 }
 0xb21   :  { %15612 = vmatprep.mubr.bf16.mxu1 %v24483_v33  ;;  %v24518_v33 = vld [vmem:[#allocation21_spill] sm:$0xff] }
 0xb28   :  { %15613 = vmatmul.mubr.bf16.gmra.mrb[32].mxu1 %v24484_v50 }
 0xb29   :  { %15616 = vmatprep.mubr.bf16.mxu1 %v24485_v35  ;;  %v11722_v35 = vrot.slane %v22152_v3, 5 }
 0xb30   :  { %15617 = vmatmul.mubr.bf16.gmra.mrb[36].mxu1 %v21836_v34  ;;  %v11724_v34 = vrot.slane %v11722_v35, 4 }
 0xb31   :  { %15620 = vmatprep.mubr.bf16.mxu1 %v24486_v17 }
 0xb38   :  { %15621 = vmatmul.mubr.bf16.gmra.mrb[40].mxu1 %v21851_v12  ;;  %v11725_v12 = vrot.slane %v6863_v63, 5 }
 0xb39   :  { %15624 = vmatprep.mubr.bf16.mxu1 %v21855_v23  ;;  %v11723_v23 = vsel %vm18148_vm5, %v13456_v49, %v11722_v35 }
 0xb40   :  { %15625 = vmatmul.mubr.bf16.gmra.mrb[44].mxu1 %v24517_v7 }
 0xb41   :  { %15628 = vmatprep.mubr.bf16.mxu1 %v21871_v61  ;;  %v11726_v61 = vsel %vm18148_vm5, %v11724_v34, %v11725_v12 }
 0xb48   :  { %15629 = vmatmul.mubr.bf16.gmra.mrb[48].mxu1 %v21886_v27  ;;  %v13474_v27 = vcombine.low %v11723_v23, %v11726_v61 }
 0xb49   :  { %15632 = vmatprep.mubr.bf16.mxu1 %v21890_v46 }
 0xb50   :  { %15633 = vmatmul.mubr.bf16.gmra.mrb[52].mxu1 %v21904_v55 }
 0xb51   :  { %15636 = vmatprep.mubr.bf16.mxu1 %v24518_v33 }
 0xb58   :  { %15637 = vmatmul.mubr.bf16.gmra.mrb[56].mxu1 %v24432_v16 }
 0xb59   :  { %15640 = vmatprep.mubr.bf16.mxu1 %v24487_v5 }
 0xb60   :  { %15641 = vmatmul.mubr.bf16.gmra.mrb[60].mxu1 %v13474_v27 }
 0xbbb   :  { %v22269_v46 = vpop.f32.mrb[0].mxu1 }
 0xbbc   :  { %v22271_v55 = vpop.f32.mrb[1].mxu1 }
 0xbbd   :  { %v22273_v17 = vpop.f32.mrb[2].mxu1 }
 0xbbe   :  { %v22275_v62 = vpop.f32.mrb[3].mxu1 }
 0xbbf   :  { %v12153_v16 = vadd.f32 %v22275_v62, %v22271_v55 }
 0xbc1   :  { %v12154_v50 = vadd.f32 %v22269_v46, %v12153_v16 }
 0xbc3   :  { %v22280_v5 = vpop.f32.mrb[4].mxu1  ;;  %v12155_v13 = vadd.f32 %v22273_v17, %v12154_v50 }
 0xbc4   :  { %v22283_v36 = vpop.f32.mrb[5].mxu1 }
 0xbc5   :  { %v12156_v40 = vadd.f32 %v12155_v13, %v22283_v36  ;;  %v22286_v3 = vpop.f32.mrb[6].mxu1 }
 0xbc6   :  { %v22288_v60 = vpop.f32.mrb[7].mxu1 }
 0xbc7   :  { %v12157_v57 = vadd.f32 %v12156_v40, %v22288_v60 }
 0xbc9   :  { %v12158_v15 = vadd.f32 %v22280_v5, %v12157_v57 }
 0xbcb   :  { %v22292_v58 = vpop.f32.mrb[8].mxu1  ;;  %v12159_v2 = vadd.f32 %v22286_v3, %v12158_v15 }
 0xbcc   :  { %v22295_v41 = vpop.f32.mrb[9].mxu1 }
 0xbcd   :  { %v12160_v11 = vadd.f32 %v12159_v2, %v22295_v41  ;;  %v22298_v37 = vpop.f32.mrb[10].mxu1 }
 0xbce   :  { %v22300_v1 = vpop.f32.mrb[11].mxu1 }
 0xbcf   :  { %v12161_v45 = vadd.f32 %v12160_v11, %v22300_v1 }
 0xbd1   :  { %v12162_v59 = vadd.f32 %v22292_v58, %v12161_v45 }
 0xbd3   :  { %v22304_v48 = vpop.f32.mrb[12].mxu1  ;;  %v12163_v4 = vadd.f32 %v22298_v37, %v12162_v59 }
 0xbd4   :  { %v22307_v31 = vpop.f32.mrb[13].mxu1 }
 0xbd5   :  { %v12164_v6 = vadd.f32 %v12163_v4, %v22307_v31  ;;  %v22310_v18 = vpop.f32.mrb[14].mxu1 }
 0xbd6   :  { %v22312_v10 = vpop.f32.mrb[15].mxu1 }
 0xbd7   :  { %v12165_v0 = vadd.f32 %v12164_v6, %v22312_v10 }
 0xbd9   :  { %v12166_v9 = vadd.f32 %v22304_v48, %v12165_v0 }
 0xbdb   :  { %v22316_v63 = vpop.f32.mrb[16].mxu1  ;;  %v12167_v8 = vadd.f32 %v22310_v18, %v12166_v9 }
 0xbdc   :  { %v22319_v42 = vpop.f32.mrb[17].mxu1 }
 0xbdd   :  { %v12168_v26 = vadd.f32 %v12167_v8, %v22319_v42  ;;  %v22322_v20 = vpop.f32.mrb[18].mxu1 }
 0xbde   :  { %v22324_v53 = vpop.f32.mrb[19].mxu1 }
 0xbdf   :  { %v12169_v30 = vadd.f32 %v12168_v26, %v22324_v53 }
 0xbe1   :  { %v12170_v21 = vadd.f32 %v22316_v63, %v12169_v30 }
 0xbe3   :  { %v22328_v14 = vpop.f32.mrb[20].mxu1  ;;  %v12171_v22 = vadd.f32 %v22322_v20, %v12170_v21 }
 0xbe4   :  { %v22331_v25 = vpop.f32.mrb[21].mxu1 }
 0xbe5   :  { %v12172_v47 = vadd.f32 %v12171_v22, %v22331_v25  ;;  %v22334_v24 = vpop.f32.mrb[22].mxu1 }
 0xbe6   :  { %v22336_v38 = vpop.f32.mrb[23].mxu1 }
 0xbe7   :  { %v12173_v52 = vadd.f32 %v12172_v47, %v22336_v38 }
 0xbe9   :  { %v12174_v32 = vadd.f32 %v22328_v14, %v12173_v52 }
 0xbeb   :  { %v22340_v54 = vpop.f32.mrb[24].mxu1  ;;  %v12175_v19 = vadd.f32 %v22334_v24, %v12174_v32 }
 0xbec   :  { %v22343_v43 = vpop.f32.mrb[25].mxu1 }
 0xbed   :  { %v12176_v29 = vadd.f32 %v12175_v19, %v22343_v43  ;;  %v22346_v56 = vpop.f32.mrb[26].mxu1 }
 0xbee   :  { %v22348_v51 = vpop.f32.mrb[27].mxu1 }
 0xbef   :  { %v12177_v39 = vadd.f32 %v12176_v29, %v22348_v51 }
 0xbf1   :  { %v12178_v28 = vadd.f32 %v22340_v54, %v12177_v39 }
 0xbf3   :  { %v22352_v44 = vpop.f32.mrb[28].mxu1  ;;  %v12179_v7 = vadd.f32 %v22346_v56, %v12178_v28 }
 0xbf4   :  { %v22355_v33 = vpop.f32.mrb[29].mxu1 }
 0xbf5   :  { %v12180_v35 = vadd.f32 %v12179_v7, %v22355_v33  ;;  %v22358_v49 = vpop.f32.mrb[30].mxu1 }
 0xbf6   :  { %v22360_v34 = vpop.f32.mrb[31].mxu1 }
 0xbf7   :  { %v12181_v12 = vadd.f32 %v12180_v35, %v22360_v34 }
 0xbf9   :  { %v12182_v23 = vadd.f32 %v22352_v44, %v12181_v12 }
 0xbfb   :  { %v22364_v61 = vpop.f32.mrb[32].mxu1  ;;  %v12183_v27 = vadd.f32 %v22358_v49, %v12182_v23 }
 0xbfc   :  { %v22367_v16 = vpop.f32.mrb[33].mxu1 }
 0xbfd   :  { %v12184_v50 = vadd.f32 %v12183_v27, %v22367_v16  ;;  %v22370_v13 = vpop.f32.mrb[34].mxu1 }
 0xbfe   :  { %v22372_v40 = vpop.f32.mrb[35].mxu1 }
 0xbff   :  { %v12185_v57 = vadd.f32 %v12184_v50, %v22372_v40 }
 0xc01   :  { %v12186_v15 = vadd.f32 %v22364_v61, %v12185_v57 }
 0xc03   :  { %v22376_v2 = vpop.f32.mrb[36].mxu1  ;;  %v12187_v11 = vadd.f32 %v22370_v13, %v12186_v15 }
 0xc04   :  { %v22379_v45 = vpop.f32.mrb[37].mxu1 }
 0xc05   :  { %v12188_v59 = vadd.f32 %v12187_v11, %v22379_v45  ;;  %v22382_v4 = vpop.f32.mrb[38].mxu1 }
 0xc06   :  { %v22384_v6 = vpop.f32.mrb[39].mxu1 }
 0xc07   :  { %v12189_v0 = vadd.f32 %v12188_v59, %v22384_v6 }
 0xc09   :  { %v12190_v9 = vadd.f32 %v22376_v2, %v12189_v0 }
 0xc0b   :  { %v22388_v8 = vpop.f32.mrb[40].mxu1  ;;  %v12191_v26 = vadd.f32 %v22382_v4, %v12190_v9 }
 0xc0c   :  { %v22391_v30 = vpop.f32.mrb[41].mxu1 }
 0xc0d   :  { %v12192_v21 = vadd.f32 %v12191_v26, %v22391_v30  ;;  %v22394_v22 = vpop.f32.mrb[42].mxu1 }
 0xc0e   :  { %v22396_v47 = vpop.f32.mrb[43].mxu1 }
 0xc0f   :  { %v12193_v52 = vadd.f32 %v12192_v21, %v22396_v47 }
 0xc11   :  { %v12194_v32 = vadd.f32 %v22388_v8, %v12193_v52 }
 0xc13   :  { %v22400_v19 = vpop.f32.mrb[44].mxu1  ;;  %v12195_v29 = vadd.f32 %v22394_v22, %v12194_v32 }
 0xc14   :  { %v22403_v39 = vpop.f32.mrb[45].mxu1 }
 0xc15   :  { %v12196_v28 = vadd.f32 %v12195_v29, %v22403_v39  ;;  %v22406_v7 = vpop.f32.mrb[46].mxu1 }
 0xc16   :  { %v22408_v35 = vpop.f32.mrb[47].mxu1 }
 0xc17   :  { %v12197_v12 = vadd.f32 %v12196_v28, %v22408_v35 }
 0xc19   :  { %v12198_v23 = vadd.f32 %v22400_v19, %v12197_v12 }
 0xc1b   :  { %v22412_v27 = vpop.f32.mrb[48].mxu1  ;;  %v12199_v50 = vadd.f32 %v22406_v7, %v12198_v23 }
 0xc1c   :  { %24519 = vst [vmem:[#allocation20_spill] sm:$0xff] %v22412_v27  ;;  %v22415_v57 = vpop.f32.mrb[49].mxu1 }
 0xc1d   :  { %24520 = vst [vmem:[#allocation23_spill] sm:$0xff] %v22415_v57  ;;  %v12200_v15 = vadd.f32 %v12199_v50, %v22415_v57  ;;  %v22418_v11 = vpop.f32.mrb[50].mxu1 }
 0xc1e   :  { %24521 = vst [vmem:[#allocation26_spill] sm:$0xff] %v22418_v11  ;;  %v22420_v59 = vpop.f32.mrb[51].mxu1 }
 0xc1f   :  { %24522 = vst [vmem:[#allocation32_spill] sm:$0xff] %v22420_v59  ;;  %v12201_v0 = vadd.f32 %v12200_v15, %v22420_v59 }
 0xc21   :  { %v12202_v9 = vadd.f32 %v22412_v27, %v12201_v0 }
 0xc23   :  { %v22424_v26 = vpop.f32.mrb[52].mxu1  ;;  %v12203_v21 = vadd.f32 %v22418_v11, %v12202_v9 }
 0xc24   :  { %24523 = vst [vmem:[#allocation34_spill] sm:$0xff] %v22424_v26  ;;  %v22427_v52 = vpop.f32.mrb[53].mxu1 }
 0xc25   :  { %24524 = vst [vmem:[#allocation28_spill] sm:$0xff] %v22427_v52  ;;  %v12204_v32 = vadd.f32 %v12203_v21, %v22427_v52  ;;  %v22430_v29 = vpop.f32.mrb[54].mxu1 }
 0xc26   :  { %24525 = vst [vmem:[#allocation55_spill] sm:$0xff] %v22430_v29  ;;  %v22432_v28 = vpop.f32.mrb[55].mxu1 }
 0xc27   :  { %24526 = vst [vmem:[#allocation51_spill] sm:$0xff] %v22432_v28  ;;  %v12205_v12 = vadd.f32 %v12204_v32, %v22432_v28 }
 0xc29   :  { %v12206_v23 = vadd.f32 %v22424_v26, %v12205_v12 }
 0xc2b   :  { %v22436_v50 = vpop.f32.mrb[56].mxu1  ;;  %v12207_v15 = vadd.f32 %v22430_v29, %v12206_v23 }
 0xc2c   :  { %24527 = vst [vmem:[#allocation57_spill] sm:$0xff] %v22436_v50  ;;  %v22439_v0 = vpop.f32.mrb[57].mxu1 }
 0xc2d   :  { %24528 = vst [vmem:[#allocation59_spill] sm:$0xff] %v22439_v0  ;;  %v12208_v9 = vadd.f32 %v12207_v15, %v22439_v0  ;;  %v22442_v11 = vpop.f32.mrb[58].mxu1 }
 0xc2e   :  { %24529 = vst [vmem:[#allocation62_spill] sm:$0xff] %v22442_v11  ;;  %v22444_v27 = vpop.f32.mrb[59].mxu1 }
 0xc2f   :  { %24530 = vst [vmem:[#allocation77_spill] sm:$0xff] %v22444_v27  ;;  %v12209_v21 = vadd.f32 %v12208_v9, %v22444_v27 }
 0xc31   :  { %v12210_v52 = vadd.f32 %v22436_v50, %v12209_v21 }
 0xc33   :  { %v22448_v59 = vpop.f32.mrb[60].mxu1  ;;  %v12211_v32 = vadd.f32 %v22442_v11, %v12210_v52 }
 0xc34   :  { %v22451_v12 = vpop.f32.mrb[61].mxu1 }
 0xc35   :  { %24531 = vst [vmem:[#allocation6_spill] sm:$0xff] %v22451_v12  ;;  %v12212_v23 = vadd.f32 %v12211_v32, %v22451_v12  ;;  %v22454_v29 = vpop.f32.mrb[62].mxu1 }
 0xc36   :  { %v22456_v26 = vpop.f32.mrb[63].mxu1 }
 0xc37   :  { %v12213_v15 = vadd.f32 %v12212_v23, %v22456_v26 }
 0xc39   :  { %v12214_v0 = vadd.f32 %v22448_v59, %v12213_v15  ;;  %v24545_v15 = vld [vmem:[#allocation26_spill] sm:$0xff] }
 0xc3b   :  { %v12215_v9 = vadd.f32 %v22454_v29, %v12214_v0  ;;  %v24543_v0 = vld [vmem:[#allocation20_spill] sm:$0xff] }
 0xc3d   :  { %v12216_v27 = vrot.slane %v12215_v9, 4 }
 0xc3f   :  { %v12217_v21 = vadd.f32 %v12216_v27, %v12215_v9  ;;  %v24547_v9 = vld [vmem:[#allocation28_spill] sm:$0xff] }
 0xc41   :  { %v12218_v50 = vrot.slane %v12217_v21, 2 }
 0xc43   :  { %v12219_v28 = vadd.f32 %v12218_v50, %v12217_v21  ;;  %v24541_v50 = vld [vmem:[#allocation32_spill] sm:$0xff]  ;;  %v24549_v21 = vld [vmem:[#allocation51_spill] sm:$0xff] }
 0xc45   :  { %v12220_v57 = vrot.slane %v12219_v28, 1 }
 0xc47   :  { %v12221_v52 = vadd.f32 %v12220_v57, %v12219_v28  ;;  %v24539_v28 = vld [vmem:[#allocation23_spill] sm:$0xff] }
 0xc49   :  { %v22461_v11 = vmul.f32 0.001953125, %v12221_v52 }
 0xc4b   :  { %v22465_v32 = vsub.f32 %v22271_v55, %v22461_v11  ;;  %v22469_v12 = vsub.f32 %v22275_v62, %v22461_v11  ;;  %v22473_v23 = vsub.f32 %v22269_v46, %v22461_v11  ;;  %v22477_v27 = vsub.f32 %v22273_v17, %v22461_v11 }
 0xc4c   :  { %v22481_v57 = vsub.f32 %v22283_v36, %v22461_v11  ;;  %v22485_v55 = vsub.f32 %v22288_v60, %v22461_v11  ;;  %v22489_v62 = vsub.f32 %v22280_v5, %v22461_v11  ;;  %v22493_v46 = vsub.f32 %v22286_v3, %v22461_v11 }
 0xc4d   :  { %24532 = vst [vmem:[#allocation8_spill] sm:$0xff] %v22465_v32  ;;  %24533 = vst [vmem:[#allocation11_spill] sm:$0xff] %v22469_v12  ;;  %v22497_v17 = vsub.f32 %v22295_v41, %v22461_v11  ;;  %v22501_v36 = vsub.f32 %v22300_v1, %v22461_v11  ;;  %v22505_v60 = vsub.f32 %v22292_v58, %v22461_v11 }
 0xc4e   :  { %24534 = vst [vmem:[#allocation14_spill] sm:$0xff] %v22473_v23  ;;  %v22509_v5 = vsub.f32 %v22298_v37, %v22461_v11  ;;  %v22513_v3 = vsub.f32 %v22307_v31, %v22461_v11  ;;  %v22517_v41 = vsub.f32 %v22312_v10, %v22461_v11  ;;  %v22521_v1 = vsub.f32 %v22304_v48, %v22461_v11 }
 0xc4f   :  { %v22525_v58 = vsub.f32 %v22310_v18, %v22461_v11  ;;  %v22529_v37 = vsub.f32 %v22319_v42, %v22461_v11  ;;  %v22533_v31 = vsub.f32 %v22324_v53, %v22461_v11  ;;  %v22537_v10 = vsub.f32 %v22316_v63, %v22461_v11 }
 0xc50   :  { %v22541_v48 = vsub.f32 %v22322_v20, %v22461_v11  ;;  %v22545_v18 = vsub.f32 %v22331_v25, %v22461_v11  ;;  %v22549_v42 = vsub.f32 %v22336_v38, %v22461_v11  ;;  %v22553_v53 = vsub.f32 %v22328_v14, %v22461_v11 }
 0xc51   :  { %v22557_v63 = vsub.f32 %v22334_v24, %v22461_v11  ;;  %v22561_v20 = vsub.f32 %v22343_v43, %v22461_v11  ;;  %v22565_v25 = vsub.f32 %v22348_v51, %v22461_v11  ;;  %v22569_v38 = vsub.f32 %v22340_v54, %v22461_v11 }
 0xc52   :  { %v22573_v14 = vsub.f32 %v22346_v56, %v22461_v11  ;;  %v22577_v24 = vsub.f32 %v22355_v33, %v22461_v11  ;;  %v22581_v43 = vsub.f32 %v22360_v34, %v22461_v11  ;;  %v22585_v51 = vsub.f32 %v22352_v44, %v22461_v11 }
 0xc53   :  { %v22589_v54 = vsub.f32 %v22358_v49, %v22461_v11  ;;  %v22593_v56 = vsub.f32 %v22367_v16, %v22461_v11  ;;  %v22597_v33 = vsub.f32 %v22372_v40, %v22461_v11  ;;  %v22601_v34 = vsub.f32 %v22364_v61, %v22461_v11 }
 0xc54   :  { %v22605_v44 = vsub.f32 %v22370_v13, %v22461_v11  ;;  %v22609_v49 = vsub.f32 %v22379_v45, %v22461_v11  ;;  %v22613_v16 = vsub.f32 %v22384_v6, %v22461_v11  ;;  %v22617_v40 = vsub.f32 %v22376_v2, %v22461_v11 }
 0xc55   :  { %v22621_v61 = vsub.f32 %v22382_v4, %v22461_v11  ;;  %v22625_v13 = vsub.f32 %v22391_v30, %v22461_v11  ;;  %v22629_v45 = vsub.f32 %v22396_v47, %v22461_v11  ;;  %v22633_v6 = vsub.f32 %v22388_v8, %v22461_v11 }
 0xc56   :  { %v22637_v2 = vsub.f32 %v22394_v22, %v22461_v11  ;;  %v22641_v4 = vsub.f32 %v22403_v39, %v22461_v11  ;;  %v22645_v30 = vsub.f32 %v22408_v35, %v22461_v11  ;;  %v22649_v47 = vsub.f32 %v22400_v19, %v22461_v11 }
 0xc57   :  { %v22653_v8 = vsub.f32 %v22406_v7, %v22461_v11  ;;  %v22657_v22 = vsub.f32 %v24539_v28, %v22461_v11  ;;  %v22661_v39 = vsub.f32 %v24541_v50, %v22461_v11  ;;  %v22665_v35 = vsub.f32 %v24543_v0, %v22461_v11  ;;  %v24551_v28 = vld [vmem:[#allocation34_spill] sm:$0xff] }
 0xc58   :  { %24535 = vst [vmem:[#allocation17_spill] sm:$0xff] %v22641_v4  ;;  %24536 = vst [vmem:[#allocation56_spill] sm:$0xff] %v22645_v30  ;;  %v22669_v19 = vsub.f32 %v24545_v15, %v22461_v11  ;;  %v22673_v7 = vsub.f32 %v24547_v9, %v22461_v11  ;;  %v22677_v52 = vsub.f32 %v24549_v21, %v22461_v11 }
 0xc59   :  { %24537 = vst [vmem:[#allocation22_spill] sm:$0xff] %v22649_v47  ;;  %24538 = vst [vmem:[#allocation31_spill] sm:$0xff] %v22653_v8  ;;  %v22681_v50 = vsub.f32 %v24551_v28, %v22461_v11 }
 0xc5a   :  { %24540 = vst [vmem:[#allocation27_spill] sm:$0xff] %v22657_v22  ;;  %24542 = vst [vmem:[#allocation29_spill] sm:$0xff] %v22661_v39  ;;  %v24553_v39 = vld [vmem:[#allocation55_spill] sm:$0xff] }
 0xc5b   :  { %24544 = vst [vmem:[#allocation73_spill] sm:$0xff] %v22665_v35  ;;  %24546 = vst [vmem:[#allocation74_spill] sm:$0xff] %v22669_v19  ;;  %v22685_v0 = vsub.f32 %v24553_v39, %v22461_v11  ;;  %v24555_v35 = vld [vmem:[#allocation59_spill] sm:$0xff]  ;;  %v24557_v19 = vld [vmem:[#allocation77_spill] sm:$0xff] }
 0xc5c   :  { %24548 = vst [vmem:[#allocation75_spill] sm:$0xff] %v22673_v7  ;;  %24550 = vst [vmem:[#allocation76_spill] sm:$0xff] %v22677_v52  ;;  %v22689_v15 = vsub.f32 %v24555_v35, %v22461_v11  ;;  %v22693_v9 = vsub.f32 %v24557_v19, %v22461_v11  ;;  %v24559_v7 = vld [vmem:[#allocation57_spill] sm:$0xff]  ;;  %v24561_v52 = vld [vmem:[#allocation62_spill] sm:$0xff]  ;;  %v22709_v35 = vsub.f32 %v22456_v26, %v22461_v11 }
 0xc5d   :  { %24552 = vst [vmem:[#allocation30_spill] sm:$0xff] %v22681_v50  ;;  %24554 = vst [vmem:[#allocation47_spill] sm:$0xff] %v22685_v0  ;;  %v22697_v21 = vsub.f32 %v24559_v7, %v22461_v11  ;;  %v22701_v28 = vsub.f32 %v24561_v52, %v22461_v11  ;;  %v24563_v50 = vld [vmem:[#allocation6_spill] sm:$0xff]  ;;  %v22713_v19 = vsub.f32 %v22448_v59, %v22461_v11 }
 0xc5e   :  { %24556 = vst [vmem:[#allocation35_spill] sm:$0xff] %v22689_v15  ;;  %24558 = vst [vmem:[#allocation36_spill] sm:$0xff] %v22693_v9  ;;  %v22705_v39 = vsub.f32 %v24563_v50, %v22461_v11  ;;  %v22717_v7 = vsub.f32 %v22454_v29, %v22461_v11  ;;  %v12287_v52 = vmul.f32 %v22465_v32, %v22465_v32 }
 0xc5f   :  { %24560 = vst [vmem:[#allocation37_spill] sm:$0xff] %v22697_v21  ;;  %24562 = vst [vmem:[#allocation53_spill] sm:$0xff] %v22701_v28  ;;  %v12288_v28 = vmul.f32 %v22469_v12, %v22469_v12  ;;  %v12289_v50 = vmul.f32 %v22473_v23, %v22473_v23  ;;  %v12290_v26 = vmul.f32 %v22477_v27, %v22477_v27 }
 0xc60   :  { %24564 = vst [vmem:[#allocation58_spill] sm:$0xff] %v22705_v39  ;;  %24565 = vst [vmem:[#allocation61_spill] sm:$0xff] %v22709_v35  ;;  %v12291_v59 = vmul.f32 %v22481_v57, %v22481_v57  ;;  %v12292_v11 = vmul.f32 %v22485_v55, %v22485_v55  ;;  %v12293_v32 = vmul.f32 %v22489_v62, %v22489_v62 }
 0xc61   :  { %24566 = vst [vmem:[#allocation69_spill] sm:$0xff] %v22713_v19  ;;  %24567 = vst [vmem:[#allocation70_spill] sm:$0xff] %v22717_v7  ;;  %v12351_v39 = vadd.f32 %v12288_v28, %v12287_v52  ;;  %v12294_v23 = vmul.f32 %v22493_v46, %v22493_v46  ;;  %v12295_v52 = vmul.f32 %v22497_v17, %v22497_v17 }
 0xc63   :  { %v12352_v35 = vadd.f32 %v12351_v39, %v12289_v50  ;;  %v12296_v50 = vmul.f32 %v22501_v36, %v22501_v36 }
 0xc65   :  { %v12353_v19 = vadd.f32 %v12352_v35, %v12290_v26  ;;  %v12297_v26 = vmul.f32 %v22505_v60, %v22505_v60 }
 0xc67   :  { %v12354_v29 = vadd.f32 %v12353_v19, %v12291_v59  ;;  %v12298_v59 = vmul.f32 %v22509_v5, %v22509_v5 }
 0xc69   :  { %v12355_v12 = vadd.f32 %v12354_v29, %v12292_v11  ;;  %v12299_v29 = vmul.f32 %v22513_v3, %v22513_v3 }
 0xc6b   :  { %v12356_v28 = vadd.f32 %v12355_v12, %v12293_v32  ;;  %v12300_v32 = vmul.f32 %v22517_v41, %v22517_v41 }
 0xc6d   :  { %v12357_v39 = vadd.f32 %v12356_v28, %v12294_v23  ;;  %v12301_v28 = vmul.f32 %v22521_v1, %v22521_v1 }
 0xc6f   :  { %v12358_v35 = vadd.f32 %v12357_v39, %v12295_v52  ;;  %v12302_v39 = vmul.f32 %v22525_v58, %v22525_v58 }
 0xc71   :  { %v12359_v19 = vadd.f32 %v12358_v35, %v12296_v50  ;;  %v12303_v35 = vmul.f32 %v22529_v37, %v22529_v37 }
 0xc73   :  { %v12360_v11 = vadd.f32 %v12359_v19, %v12297_v26  ;;  %v12304_v19 = vmul.f32 %v22533_v31, %v22533_v31 }
 0xc75   :  { %v12361_v12 = vadd.f32 %v12360_v11, %v12298_v59  ;;  %v12305_v11 = vmul.f32 %v22537_v10, %v22537_v10 }
 0xc77   :  { %v12362_v23 = vadd.f32 %v12361_v12, %v12299_v29  ;;  %v12306_v12 = vmul.f32 %v22541_v48, %v22541_v48 }
 0xc79   :  { %v12363_v52 = vadd.f32 %v12362_v23, %v12300_v32  ;;  %v12307_v23 = vmul.f32 %v22545_v18, %v22545_v18 }
 0xc7b   :  { %v12364_v50 = vadd.f32 %v12363_v52, %v12301_v28  ;;  %v12308_v52 = vmul.f32 %v22549_v42, %v22549_v42 }
 0xc7d   :  { %v12365_v26 = vadd.f32 %v12364_v50, %v12302_v39  ;;  %v12309_v50 = vmul.f32 %v22553_v53, %v22553_v53 }
 0xc7f   :  { %v12366_v59 = vadd.f32 %v12365_v26, %v12303_v35  ;;  %v12310_v26 = vmul.f32 %v22557_v63, %v22557_v63 }
 0xc81   :  { %v12367_v29 = vadd.f32 %v12366_v59, %v12304_v19  ;;  %v12311_v59 = vmul.f32 %v22561_v20, %v22561_v20 }
 0xc83   :  { %v12368_v32 = vadd.f32 %v12367_v29, %v12305_v11  ;;  %v12312_v29 = vmul.f32 %v22565_v25, %v22565_v25 }
 0xc85   :  { %v12369_v28 = vadd.f32 %v12368_v32, %v12306_v12  ;;  %v12313_v32 = vmul.f32 %v22569_v38, %v22569_v38 }
 0xc87   :  { %v12370_v39 = vadd.f32 %v12369_v28, %v12307_v23  ;;  %v12314_v28 = vmul.f32 %v22573_v14, %v22573_v14 }
 0xc89   :  { %v12371_v35 = vadd.f32 %v12370_v39, %v12308_v52  ;;  %v12315_v39 = vmul.f32 %v22577_v24, %v22577_v24 }
 0xc8b   :  { %v12372_v19 = vadd.f32 %v12371_v35, %v12309_v50  ;;  %v12316_v35 = vmul.f32 %v22581_v43, %v22581_v43 }
 0xc8d   :  { %v12373_v11 = vadd.f32 %v12372_v19, %v12310_v26  ;;  %v12317_v19 = vmul.f32 %v22585_v51, %v22585_v51 }
 0xc8f   :  { %v12374_v12 = vadd.f32 %v12373_v11, %v12311_v59  ;;  %v12318_v11 = vmul.f32 %v22589_v54, %v22589_v54 }
 0xc91   :  { %v12375_v23 = vadd.f32 %v12374_v12, %v12312_v29  ;;  %v12319_v12 = vmul.f32 %v22593_v56, %v22593_v56 }
 0xc93   :  { %v12376_v52 = vadd.f32 %v12375_v23, %v12313_v32  ;;  %v12320_v23 = vmul.f32 %v22597_v33, %v22597_v33 }
 0xc95   :  { %v12377_v50 = vadd.f32 %v12376_v52, %v12314_v28  ;;  %v12321_v52 = vmul.f32 %v22601_v34, %v22601_v34 }
 0xc97   :  { %v12378_v26 = vadd.f32 %v12377_v50, %v12315_v39  ;;  %v12322_v50 = vmul.f32 %v22605_v44, %v22605_v44 }
 0xc99   :  { %v12379_v59 = vadd.f32 %v12378_v26, %v12316_v35  ;;  %v12323_v26 = vmul.f32 %v22609_v49, %v22609_v49 }
 0xc9b   :  { %v12380_v29 = vadd.f32 %v12379_v59, %v12317_v19  ;;  %v12324_v59 = vmul.f32 %v22613_v16, %v22613_v16 }
 0xc9d   :  { %v12381_v32 = vadd.f32 %v12380_v29, %v12318_v11  ;;  %v12325_v29 = vmul.f32 %v22617_v40, %v22617_v40 }
 0xc9f   :  { %v12382_v28 = vadd.f32 %v12381_v32, %v12319_v12  ;;  %v12326_v32 = vmul.f32 %v22621_v61, %v22621_v61 }
 0xca1   :  { %v12383_v39 = vadd.f32 %v12382_v28, %v12320_v23  ;;  %v12327_v28 = vmul.f32 %v22625_v13, %v22625_v13 }
 0xca3   :  { %v12384_v35 = vadd.f32 %v12383_v39, %v12321_v52  ;;  %v12328_v39 = vmul.f32 %v22629_v45, %v22629_v45 }
 0xca5   :  { %v12385_v19 = vadd.f32 %v12384_v35, %v12322_v50  ;;  %v12329_v35 = vmul.f32 %v22633_v6, %v22633_v6 }
 0xca7   :  { %v12386_v11 = vadd.f32 %v12385_v19, %v12323_v26  ;;  %v12330_v19 = vmul.f32 %v22637_v2, %v22637_v2 }
 0xca9   :  { %v12387_v12 = vadd.f32 %v12386_v11, %v12324_v59  ;;  %v12331_v11 = vmul.f32 %v22641_v4, %v22641_v4 }
 0xcab   :  { %v12388_v23 = vadd.f32 %v12387_v12, %v12325_v29  ;;  %v12332_v12 = vmul.f32 %v22645_v30, %v22645_v30 }
 0xcad   :  { %v12389_v52 = vadd.f32 %v12388_v23, %v12326_v32  ;;  %v12333_v23 = vmul.f32 %v22649_v47, %v22649_v47 }
 0xcaf   :  { %v12390_v50 = vadd.f32 %v12389_v52, %v12327_v28  ;;  %v12334_v52 = vmul.f32 %v22653_v8, %v22653_v8 }
 0xcb1   :  { %v12391_v26 = vadd.f32 %v12390_v50, %v12328_v39  ;;  %v12335_v50 = vmul.f32 %v22657_v22, %v22657_v22 }
 0xcb3   :  { %v12392_v59 = vadd.f32 %v12391_v26, %v12329_v35  ;;  %v24568_v26 = vld [vmem:[#allocation29_spill] sm:$0xff] }
 0xcb4   :  { %v12336_v4 = vmul.f32 %v24568_v26, %v24568_v26 }
 0xcb5   :  { %v12393_v29 = vadd.f32 %v12392_v59, %v12330_v19  ;;  %v24569_v59 = vld [vmem:[#allocation73_spill] sm:$0xff] }
 0xcb6   :  { %v12337_v30 = vmul.f32 %v24569_v59, %v24569_v59 }
 0xcb7   :  { %v12394_v32 = vadd.f32 %v12393_v29, %v12331_v11  ;;  %v24570_v29 = vld [vmem:[#allocation74_spill] sm:$0xff] }
 0xcb8   :  { %v12338_v47 = vmul.f32 %v24570_v29, %v24570_v29 }
 0xcb9   :  { %v12395_v28 = vadd.f32 %v12394_v32, %v12332_v12  ;;  %v24571_v32 = vld [vmem:[#allocation75_spill] sm:$0xff] }
 0xcba   :  { %v12339_v8 = vmul.f32 %v24571_v32, %v24571_v32 }
 0xcbb   :  { %v12396_v39 = vadd.f32 %v12395_v28, %v12333_v23  ;;  %v24572_v28 = vld [vmem:[#allocation76_spill] sm:$0xff] }
 0xcbc   :  { %v12340_v22 = vmul.f32 %v24572_v28, %v24572_v28 }
 0xcbd   :  { %v12397_v35 = vadd.f32 %v12396_v39, %v12334_v52  ;;  %v24573_v39 = vld [vmem:[#allocation30_spill] sm:$0xff] }
 0xcbe   :  { %v12341_v26 = vmul.f32 %v24573_v39, %v24573_v39 }
 0xcbf   :  { %v12398_v19 = vadd.f32 %v12397_v35, %v12335_v50  ;;  %v12342_v35 = vmul.f32 %v22685_v0, %v22685_v0 }
 0xcc1   :  { %v12399_v11 = vadd.f32 %v12398_v19, %v12336_v4  ;;  %v12343_v19 = vmul.f32 %v22689_v15, %v22689_v15 }
 0xcc3   :  { %v12400_v12 = vadd.f32 %v12399_v11, %v12337_v30  ;;  %v12344_v11 = vmul.f32 %v22693_v9, %v22693_v9 }
 0xcc5   :  { %v12401_v23 = vadd.f32 %v12400_v12, %v12338_v47  ;;  %v12345_v12 = vmul.f32 %v22697_v21, %v22697_v21 }
 0xcc7   :  { %v12402_v52 = vadd.f32 %v12401_v23, %v12339_v8  ;;  %v24574_v23 = vld [vmem:[#allocation53_spill] sm:$0xff] }
 0xcc8   :  { %v12346_v39 = vmul.f32 %v24574_v23, %v24574_v23 }
 0xcc9   :  { %v12403_v50 = vadd.f32 %v12402_v52, %v12340_v22  ;;  %v24575_v52 = vld [vmem:[#allocation58_spill] sm:$0xff] }
 0xcca   :  { %v12347_v0 = vmul.f32 %v24575_v52, %v24575_v52 }
 0xccb   :  { %v12404_v4 = vadd.f32 %v12403_v50, %v12341_v26  ;;  %v24576_v50 = vld [vmem:[#allocation61_spill] sm:$0xff] }
 0xccc   :  { %v12348_v15 = vmul.f32 %v24576_v50, %v24576_v50 }
 0xccd   :  { %v12405_v30 = vadd.f32 %v12404_v4, %v12342_v35  ;;  %v24577_v4 = vld [vmem:[#allocation69_spill] sm:$0xff] }
 0xcce   :  { %v12349_v9 = vmul.f32 %v24577_v4, %v24577_v4 }
 0xccf   :  { %v12406_v47 = vadd.f32 %v12405_v30, %v12343_v19  ;;  %v12350_v30 = vmul.f32 %v22717_v7, %v22717_v7 }
 0xcd1   :  { %v12407_v8 = vadd.f32 %v12406_v47, %v12344_v11 }
 0xcd3   :  { %v12408_v22 = vadd.f32 %v12407_v8, %v12345_v12 }
 0xcd5   :  { %v12409_v26 = vadd.f32 %v12408_v22, %v12346_v39 }
 0xcd7   :  { %v12410_v35 = vadd.f32 %v12409_v26, %v12347_v0  ;;  %v12421_v0 = vld [vmem:[%s23632_s5] sm:$0x1] }
 0xcd9   :  { %v12411_v19 = vadd.f32 %v12410_v35, %v12348_v15  ;;  %v24578_v35 = vld [vmem:[#allocation66_spill] sm:$0xff] }
 0xcda   :  { %v24579_v4 = vsub.s32 0, %v24578_v35 }
 0xcdb   :  { %v12412_v11 = vadd.f32 %v12411_v19, %v12349_v9  ;;  %v24580_v9 = vld [vmem:[#allocation8_spill] sm:$0xff] }
 0xcdd   :  { %v12413_v47 = vadd.f32 %v12412_v11, %v12350_v30 }
 0xcdf   :  { %v12414_v21 = vrot.slane %v12413_v47, 4 }
 0xce1   :  { %v12415_v23 = vadd.f32 %v12414_v21, %v12413_v47 }
 0xce3   :  { %v12416_v12 = vrot.slane %v12415_v23, 2 }
 0xce5   :  { %v12417_v8 = vadd.f32 %v12416_v12, %v12415_v23  ;;  %v24581_v23 = vld [vmem:[#allocation11_spill] sm:$0xff] }
 0xce7   :  { %v12418_v28 = vrot.slane %v12417_v8, 1 }
 0xce9   :  { %v12419_v52 = vadd.f32 %v12418_v28, %v12417_v8  ;;  %v24583_v8 = vld [vmem:[#allocation17_spill] sm:$0xff] }
 0xceb   :  { %v12420_v39 = vmul.f32 0.001953125, %v12419_v52  ;;  %v24582_v52 = vld [vmem:[#allocation14_spill] sm:$0xff] }
 0xced   :  { %v12422_v22 = vadd.f32 1e-05, %v12420_v39  ;;  %v24584_v39 = vld [vmem:[#allocation56_spill] sm:$0xff] }
 0xcef   :  { %16887 = vrsqrt.f32 %v12422_v22  ;;  %v24585_v22 = vld [vmem:[#allocation22_spill] sm:$0xff] }
 0xcf9   :  { %v16888_v26 = vpop.eup %16887 }
 0xcfa   :  { %v12424_v15 = vmul.f32 %v16888_v26, %v12421_v0  ;;  %v24586_v0 = vld [vmem:[#allocation31_spill] sm:$0xff] }
 0xcfb   :  { %v24587_v26 = vld [vmem:[#allocation27_spill] sm:$0xff] }
 0xcfc   :  { %v22852_v7 = vrot.slane %v12424_v15, %v24579_v4  ;;  %v24588_v15 = vld [vmem:[#allocation29_spill] sm:$0xff] }
 0xcfe   :  { %v22856_v21 = vmul.f32 %v22852_v7, %v24580_v9  ;;  %v22860_v28 = vmul.f32 %v22852_v7, %v24581_v23  ;;  %v22864_v19 = vmul.f32 %v22852_v7, %v24582_v52  ;;  %v22868_v30 = vmul.f32 %v22852_v7, %v22477_v27 }
 0xcff   :  { %v22872_v4 = vmul.f32 %v22852_v7, %v22481_v57  ;;  %v22876_v11 = vmul.f32 %v22852_v7, %v22485_v55  ;;  %v22880_v47 = vmul.f32 %v22852_v7, %v22489_v62  ;;  %v22884_v12 = vmul.f32 %v22852_v7, %v22493_v46 }
 0xd00   :  { %v22888_v27 = vmul.f32 %v22852_v7, %v22497_v17  ;;  %v22892_v57 = vmul.f32 %v22852_v7, %v22501_v36  ;;  %v22896_v55 = vmul.f32 %v22852_v7, %v22505_v60  ;;  %v22900_v62 = vmul.f32 %v22852_v7, %v22509_v5 }
 0xd01   :  { %v22904_v46 = vmul.f32 %v22852_v7, %v22513_v3  ;;  %v22908_v17 = vmul.f32 %v22852_v7, %v22517_v41  ;;  %v22912_v36 = vmul.f32 %v22852_v7, %v22521_v1  ;;  %v22916_v60 = vmul.f32 %v22852_v7, %v22525_v58 }
 0xd02   :  { %v22920_v5 = vmul.f32 %v22852_v7, %v22529_v37  ;;  %v22924_v3 = vmul.f32 %v22852_v7, %v22533_v31  ;;  %v22928_v41 = vmul.f32 %v22852_v7, %v22537_v10  ;;  %v22932_v1 = vmul.f32 %v22852_v7, %v22541_v48 }
 0xd03   :  { %v22936_v58 = vmul.f32 %v22852_v7, %v22545_v18  ;;  %v22940_v37 = vmul.f32 %v22852_v7, %v22549_v42  ;;  %v22944_v31 = vmul.f32 %v22852_v7, %v22553_v53  ;;  %v22948_v10 = vmul.f32 %v22852_v7, %v22557_v63 }
 0xd04   :  { %v22952_v48 = vmul.f32 %v22852_v7, %v22561_v20  ;;  %v22956_v18 = vmul.f32 %v22852_v7, %v22565_v25  ;;  %v22960_v42 = vmul.f32 %v22852_v7, %v22569_v38  ;;  %v22964_v53 = vmul.f32 %v22852_v7, %v22573_v14 }
 0xd05   :  { %v22968_v63 = vmul.f32 %v22852_v7, %v22577_v24  ;;  %v22972_v20 = vmul.f32 %v22852_v7, %v22581_v43  ;;  %v22976_v25 = vmul.f32 %v22852_v7, %v22585_v51  ;;  %v22980_v38 = vmul.f32 %v22852_v7, %v22589_v54 }
 0xd06   :  { %v22984_v14 = vmul.f32 %v22852_v7, %v22593_v56  ;;  %v22988_v24 = vmul.f32 %v22852_v7, %v22597_v33  ;;  %v22992_v43 = vmul.f32 %v22852_v7, %v22601_v34  ;;  %v22996_v51 = vmul.f32 %v22852_v7, %v22605_v44 }
 0xd07   :  { %v23000_v54 = vmul.f32 %v22852_v7, %v22609_v49  ;;  %v23004_v56 = vmul.f32 %v22852_v7, %v22613_v16  ;;  %v23008_v33 = vmul.f32 %v22852_v7, %v22617_v40  ;;  %v23012_v34 = vmul.f32 %v22852_v7, %v22621_v61 }
 0xd08   :  { %v23016_v44 = vmul.f32 %v22852_v7, %v22625_v13  ;;  %v23020_v49 = vmul.f32 %v22852_v7, %v22629_v45  ;;  %v23024_v16 = vmul.f32 %v22852_v7, %v22633_v6  ;;  %v23028_v40 = vmul.f32 %v22852_v7, %v22637_v2 }
 0xd09   :  { %v23032_v61 = vmul.f32 %v22852_v7, %v24583_v8  ;;  %v23036_v13 = vmul.f32 %v22852_v7, %v24584_v39  ;;  %v23040_v45 = vmul.f32 %v22852_v7, %v24585_v22  ;;  %v23044_v6 = vmul.f32 %v22852_v7, %v24586_v0  ;;  %v24591_v8 = vld [vmem:[#allocation76_spill] sm:$0xff]  ;;  %v24593_v22 = vld [vmem:[#allocation30_spill] sm:$0xff] }
 0xd0a   :  { %v23048_v2 = vmul.f32 %v22852_v7, %v24587_v26  ;;  %v23052_v35 = vmul.f32 %v22852_v7, %v24588_v15  ;;  %v23056_v9 = vmul.f32 %v22852_v7, %v24569_v59  ;;  %v23060_v23 = vmul.f32 %v22852_v7, %v24570_v29  ;;  %v24595_v26 = vld [vmem:[#allocation47_spill] sm:$0xff]  ;;  %v23081_v29 = vld [vmem:[%s23633_s6] ss:$0 sm:$0xff] }
 0xd0b   :  { %v23064_v52 = vmul.f32 %v22852_v7, %v24571_v32  ;;  %v23068_v39 = vmul.f32 %v22852_v7, %v24591_v8  ;;  %v23072_v0 = vmul.f32 %v22852_v7, %v24593_v22  ;;  %v23076_v59 = vmul.f32 %v22852_v7, %v24595_v26  ;;  %v24597_v15 = vld [vmem:[#allocation35_spill] sm:$0xff] }
 0xd0c   :  { %24589 = vst [vmem:[#allocation52_spill] sm:$0xff] %v23060_v23  ;;  %v23085_v32 = vmul.f32 %v22852_v7, %v24597_v15  ;;  %v23105_v15 = vmul.f32 %v22852_v7, %v24576_v50  ;;  %v23125_v50 = vadd.f32 %v23081_v29, %v22864_v19  ;;  %v23145_v19 = vadd.f32 %v23081_v29, %v22884_v12 }
 0xd0d   :  { %24590 = vst [vmem:[#allocation13_spill] sm:$0xff] %v23064_v52  ;;  %24592 = vst [vmem:[#allocation25_spill] sm:$0xff] %v23068_v39  ;;  %v24599_v52 = vld [vmem:[#allocation36_spill] sm:$0xff]  ;;  %v24601_v39 = vld [vmem:[#allocation37_spill] sm:$0xff]  ;;  %v23165_v12 = vadd.f32 %v23081_v29, %v22904_v46  ;;  %v23185_v46 = vadd.f32 %v23081_v29, %v22924_v3  ;;  %v23205_v3 = vadd.f32 %v23081_v29, %v22944_v31 }
 0xd0e   :  { %24594 = vst [vmem:[#allocation79_spill] sm:$0xff] %v23072_v0  ;;  %24596 = vst [vmem:[#allocation9_spill] sm:$0xff] %v23076_v59  ;;  %v23089_v8 = vmul.f32 %v22852_v7, %v24599_v52  ;;  %v23093_v22 = vmul.f32 %v22852_v7, %v24601_v39  ;;  %v24602_v0 = vld [vmem:[#allocation53_spill] sm:$0xff]  ;;  %v24603_v59 = vld [vmem:[#allocation58_spill] sm:$0xff]  ;;  %v23225_v31 = vadd.f32 %v23081_v29, %v22964_v53 }
 0xd0f   :  { %24598 = vst [vmem:[#allocation12_spill] sm:$0xff] %v23085_v32  ;;  %v23097_v26 = vmul.f32 %v22852_v7, %v24602_v0  ;;  %v23101_v23 = vmul.f32 %v22852_v7, %v24603_v59  ;;  %v24604_v32 = vld [vmem:[#allocation69_spill] sm:$0xff]  ;;  %v23117_v0 = vadd.f32 %v23081_v29, %v22856_v21  ;;  %v23121_v59 = vadd.f32 %v23081_v29, %v22860_v28 }
 0xd10   :  { %24600 = vst [vmem:[#allocation16_spill] sm:$0xff] %v23089_v8  ;;  %v23109_v52 = vmul.f32 %v22852_v7, %v24604_v32  ;;  %v24605_v8 = vld [vmem:[#allocation70_spill] sm:$0xff]  ;;  %v23129_v32 = vadd.f32 %v23081_v29, %v22868_v30  ;;  %v23137_v21 = vadd.f32 %v23081_v29, %v22876_v11  ;;  %v23141_v28 = vadd.f32 %v23081_v29, %v22880_v47 }
 0xd11   :  { %v23113_v39 = vmul.f32 %v22852_v7, %v24605_v8  ;;  %v23133_v7 = vadd.f32 %v23081_v29, %v22872_v4  ;;  %v23149_v30 = vadd.f32 %v23081_v29, %v22888_v27  ;;  %v23153_v4 = vadd.f32 %v23081_v29, %v22892_v57 }
 0xd12   :  { %v23157_v11 = vadd.f32 %v23081_v29, %v22896_v55  ;;  %v23161_v47 = vadd.f32 %v23081_v29, %v22900_v62  ;;  %v23169_v27 = vadd.f32 %v23081_v29, %v22908_v17  ;;  %v23173_v57 = vadd.f32 %v23081_v29, %v22912_v36 }
 0xd13   :  { %v23177_v55 = vadd.f32 %v23081_v29, %v22916_v60  ;;  %v23181_v62 = vadd.f32 %v23081_v29, %v22920_v5  ;;  %v23189_v17 = vadd.f32 %v23081_v29, %v22928_v41  ;;  %v23193_v36 = vadd.f32 %v23081_v29, %v22932_v1  ;;  %v24611_v8 = vld [vmem:[#allocation52_spill] sm:$0xff] }
 0xd14   :  { %v23197_v60 = vadd.f32 %v23081_v29, %v22936_v58  ;;  %v23201_v5 = vadd.f32 %v23081_v29, %v22940_v37  ;;  %v23209_v41 = vadd.f32 %v23081_v29, %v22948_v10  ;;  %v23213_v1 = vadd.f32 %v23081_v29, %v22952_v48 }
 0xd15   :  { %v23217_v58 = vadd.f32 %v23081_v29, %v22956_v18  ;;  %v23221_v37 = vadd.f32 %v23081_v29, %v22960_v42  ;;  %v23229_v10 = vadd.f32 %v23081_v29, %v22968_v63  ;;  %v23233_v48 = vadd.f32 %v23081_v29, %v22972_v20 }
 0xd16   :  { %v23237_v18 = vadd.f32 %v23081_v29, %v22976_v25  ;;  %v23241_v42 = vadd.f32 %v23081_v29, %v22980_v38  ;;  %v23245_v53 = vadd.f32 %v23081_v29, %v22984_v14  ;;  %v23249_v63 = vadd.f32 %v23081_v29, %v22988_v24 }
 0xd17   :  { %v23253_v20 = vadd.f32 %v23081_v29, %v22992_v43  ;;  %v23257_v25 = vadd.f32 %v23081_v29, %v22996_v51  ;;  %v23261_v38 = vadd.f32 %v23081_v29, %v23000_v54  ;;  %v23265_v14 = vadd.f32 %v23081_v29, %v23004_v56 }
 0xd18   :  { %v23269_v24 = vadd.f32 %v23081_v29, %v23008_v33  ;;  %v23273_v43 = vadd.f32 %v23081_v29, %v23012_v34  ;;  %v23277_v51 = vadd.f32 %v23081_v29, %v23016_v44  ;;  %v23281_v54 = vadd.f32 %v23081_v29, %v23020_v49 }
 0xd19   :  { %v23285_v56 = vadd.f32 %v23081_v29, %v23024_v16  ;;  %v23289_v33 = vadd.f32 %v23081_v29, %v23028_v40  ;;  %v23293_v34 = vadd.f32 %v23081_v29, %v23032_v61  ;;  %v23297_v44 = vadd.f32 %v23081_v29, %v23036_v13 }
 0xd1a   :  { %v23301_v49 = vadd.f32 %v23081_v29, %v23040_v45  ;;  %v23305_v16 = vadd.f32 %v23081_v29, %v23044_v6  ;;  %v23309_v40 = vadd.f32 %v23081_v29, %v23048_v2  ;;  %v23313_v61 = vadd.f32 %v23081_v29, %v23052_v35 }
 0xd1b   :  { %v23317_v13 = vadd.f32 %v23081_v29, %v23056_v9  ;;  %v23321_v45 = vadd.f32 %v23081_v29, %v24611_v8 }
 0xd1c   :  { %24606 = vst [vmem:[#allocation18_spill] sm:$0xff] %v23301_v49  ;;  %24607 = vst [vmem:[#allocation15_spill] sm:$0xff] %v23305_v16  ;;  %v24613_v49 = vld [vmem:[#allocation13_spill] sm:$0xff] }
 0xd1d   :  { %24608 = vst [vmem:[#allocation80_spill] sm:$0xff] %v23309_v40  ;;  %24609 = vst [vmem:[#allocation24_spill] sm:$0xff] %v23313_v61  ;;  %v23325_v6 = vadd.f32 %v23081_v29, %v24613_v49  ;;  %v24614_v16 = vld [vmem:[#allocation25_spill] sm:$0xff]  ;;  %v24615_v40 = vld [vmem:[#allocation79_spill] sm:$0xff] }
 0xd1e   :  { %24610 = vst [vmem:[#allocation38_spill] sm:$0xff] %v23317_v13  ;;  %24612 = vst [vmem:[#allocation40_spill] sm:$0xff] %v23321_v45  ;;  %v23329_v2 = vadd.f32 %v23081_v29, %v24614_v16  ;;  %v23333_v35 = vadd.f32 %v23081_v29, %v24615_v40  ;;  %v24616_v61 = vld [vmem:[#allocation9_spill] sm:$0xff]  ;;  %v24617_v13 = vld [vmem:[#allocation12_spill] sm:$0xff]  ;;  %v23349_v16 = vadd.f32 %v23081_v29, %v23093_v22 }
 0xd1f   :  { %v23337_v9 = vadd.f32 %v23081_v29, %v24616_v61  ;;  %v23341_v8 = vadd.f32 %v23081_v29, %v24617_v13  ;;  %v24618_v45 = vld [vmem:[#allocation16_spill] sm:$0xff]  ;;  %v23353_v40 = vadd.f32 %v23081_v29, %v23097_v26  ;;  %v23357_v61 = vadd.f32 %v23081_v29, %v23101_v23 }
 0xd20   :  { %v23345_v49 = vadd.f32 %v23081_v29, %v24618_v45  ;;  %24619 = vst [vmem:[#allocation33_spill] sm:$0xff] %v23349_v16  ;;  %v23361_v13 = vadd.f32 %v23081_v29, %v23105_v15  ;;  %v23365_v45 = vadd.f32 %v23081_v29, %v23109_v52  ;;  %v23369_v22 = vadd.f32 %v23081_v29, %v23113_v39 }
 0xd21   :  { %24620 = vst [vmem:[#allocation39_spill] sm:$0xff] %v23353_v40  ;;  %24621 = vst [vmem:[#allocation42_spill] sm:$0xff] %v23357_v61  ;;  %v12566_v16 = vmax.f32 %v23117_v0, 0.0  ;;  %v12567_v26 = vmax.f32 %v23121_v59, 0.0  ;;  %v12568_v40 = vmax.f32 %v23125_v50, 0.0  ;;  %v12569_v23 = vmax.f32 %v23129_v32, 0.0 }
 0xd22   :  { %24622 = vst [vmem:[#allocation44_spill] sm:$0xff] %v23361_v13  ;;  %24623 = vst [vmem:[#allocation41_spill] sm:$0xff] %v23365_v45  ;;  %v12570_v61 = vmax.f32 %v23133_v7, 0.0  ;;  %v12571_v15 = vmax.f32 %v23137_v21, 0.0  ;;  %v12572_v13 = vmax.f32 %v23141_v28, 0.0  ;;  %v12573_v52 = vmax.f32 %v23145_v19, 0.0 }
 0xd23   :  { %v12574_v45 = vmax.f32 %v23149_v30, 0.0  ;;  %v12575_v29 = vmax.f32 %v23153_v4, 0.0  ;;  %v12576_v39 = vmax.f32 %v23157_v11, 0.0  ;;  %v12577_v0 = vmax.f32 %v23161_v47, 0.0  ;;  %12630 = vst [vmem:[%s23634_s7] sm:$0xff] %v12566_v16  ;;  %12631 = vst [vmem:[%s23634_s7 + $0x8] sm:$0xff] %v12567_v26 }
 0xd24   :  { %12632 = vst [vmem:[%s23634_s7 + $0x10] sm:$0xff] %v12568_v40  ;;  %12633 = vst [vmem:[%s23634_s7 + $0x18] sm:$0xff] %v12569_v23  ;;  %v12578_v59 = vmax.f32 %v23165_v12, 0.0  ;;  %v12579_v50 = vmax.f32 %v23169_v27, 0.0  ;;  %v12580_v32 = vmax.f32 %v23173_v57, 0.0  ;;  %v12581_v7 = vmax.f32 %v23177_v55, 0.0 }
 0xd25   :  { %12634 = vst [vmem:[%s23634_s7 + $0x20] sm:$0xff] %v12570_v61  ;;  %12635 = vst [vmem:[%s23634_s7 + $0x28] sm:$0xff] %v12571_v15  ;;  %v12582_v21 = vmax.f32 %v23181_v62, 0.0  ;;  %v12583_v28 = vmax.f32 %v23185_v46, 0.0  ;;  %v12584_v19 = vmax.f32 %v23189_v17, 0.0  ;;  %v12585_v30 = vmax.f32 %v23193_v36, 0.0 }
 0xd26   :  { %12636 = vst [vmem:[%s23634_s7 + $0x30] sm:$0xff] %v12572_v13  ;;  %12637 = vst [vmem:[%s23634_s7 + $0x38] sm:$0xff] %v12573_v52  ;;  %v12586_v4 = vmax.f32 %v23197_v60, 0.0  ;;  %v12587_v11 = vmax.f32 %v23201_v5, 0.0  ;;  %v12588_v47 = vmax.f32 %v23205_v3, 0.0  ;;  %v12589_v12 = vmax.f32 %v23209_v41, 0.0 }
 0xd27   :  { %12638 = vst [vmem:[%s23634_s7 + $0x40] sm:$0xff] %v12574_v45  ;;  %12639 = vst [vmem:[%s23634_s7 + $0x48] sm:$0xff] %v12575_v29  ;;  %v12590_v27 = vmax.f32 %v23213_v1, 0.0  ;;  %v12591_v57 = vmax.f32 %v23217_v58, 0.0  ;;  %v12592_v55 = vmax.f32 %v23221_v37, 0.0  ;;  %v12593_v62 = vmax.f32 %v23225_v31, 0.0 }
 0xd28   :  { %12640 = vst [vmem:[%s23634_s7 + $0x50] sm:$0xff] %v12576_v39  ;;  %12641 = vst [vmem:[%s23634_s7 + $0x58] sm:$0xff] %v12577_v0  ;;  %v12594_v46 = vmax.f32 %v23229_v10, 0.0  ;;  %v12595_v17 = vmax.f32 %v23233_v48, 0.0  ;;  %v12596_v36 = vmax.f32 %v23237_v18, 0.0  ;;  %v12597_v60 = vmax.f32 %v23241_v42, 0.0 }
 0xd29   :  { %12642 = vst [vmem:[%s23634_s7 + $0x60] sm:$0xff] %v12578_v59  ;;  %12643 = vst [vmem:[%s23634_s7 + $0x68] sm:$0xff] %v12579_v50  ;;  %v12598_v5 = vmax.f32 %v23245_v53, 0.0  ;;  %v12599_v3 = vmax.f32 %v23249_v63, 0.0  ;;  %v12600_v41 = vmax.f32 %v23253_v20, 0.0  ;;  %v12601_v1 = vmax.f32 %v23257_v25, 0.0 }
 0xd2a   :  { %12644 = vst [vmem:[%s23634_s7 + $0x70] sm:$0xff] %v12580_v32  ;;  %12645 = vst [vmem:[%s23634_s7 + $0x78] sm:$0xff] %v12581_v7  ;;  %v12602_v58 = vmax.f32 %v23261_v38, 0.0  ;;  %v12603_v37 = vmax.f32 %v23265_v14, 0.0  ;;  %v12604_v31 = vmax.f32 %v23269_v24, 0.0  ;;  %v12605_v10 = vmax.f32 %v23273_v43, 0.0 }
 0xd2b   :  { %12646 = vst [vmem:[%s23634_s7 + $0x80] sm:$0xff] %v12582_v21  ;;  %12647 = vst [vmem:[%s23634_s7 + $0x88] sm:$0xff] %v12583_v28  ;;  %v12606_v48 = vmax.f32 %v23277_v51, 0.0  ;;  %v12607_v18 = vmax.f32 %v23281_v54, 0.0  ;;  %v12608_v42 = vmax.f32 %v23285_v56, 0.0  ;;  %v12609_v53 = vmax.f32 %v23289_v33, 0.0 }
 0xd2c   :  { %12648 = vst [vmem:[%s23634_s7 + $0x90] sm:$0xff] %v12584_v19  ;;  %12649 = vst [vmem:[%s23634_s7 + $0x98] sm:$0xff] %v12585_v30  ;;  %v12610_v63 = vmax.f32 %v23293_v34, 0.0  ;;  %v12611_v20 = vmax.f32 %v23297_v44, 0.0  ;;  %v24624_v25 = vld [vmem:[#allocation18_spill] sm:$0xff]  ;;  %v24625_v14 = vld [vmem:[#allocation15_spill] sm:$0xff] }
 0xd2d   :  { %12650 = vst [vmem:[%s23634_s7 + $0xa0] sm:$0xff] %v12586_v4  ;;  %12651 = vst [vmem:[%s23634_s7 + $0xa8] sm:$0xff] %v12587_v11  ;;  %v12612_v38 = vmax.f32 %v24624_v25, 0.0  ;;  %v12613_v24 = vmax.f32 %v24625_v14, 0.0  ;;  %v24626_v43 = vld [vmem:[#allocation80_spill] sm:$0xff]  ;;  %v24628_v33 = vld [vmem:[#allocation38_spill] sm:$0xff] }
 0xd2e   :  { %12652 = vst [vmem:[%s23634_s7 + $0xb0] sm:$0xff] %v12588_v47  ;;  %12653 = vst [vmem:[%s23634_s7 + $0xb8] sm:$0xff] %v12589_v12  ;;  %v12614_v51 = vmax.f32 %v24626_v43, 0.0  ;;  %v24627_v54 = vld [vmem:[#allocation24_spill] sm:$0xff]  ;;  %v12616_v34 = vmax.f32 %v24628_v33, 0.0  ;;  %v12618_v40 = vmax.f32 %v23325_v6, 0.0 }
 0xd2f   :  { %12654 = vst [vmem:[%s23634_s7 + $0xc0] sm:$0xff] %v12590_v27  ;;  %12655 = vst [vmem:[%s23634_s7 + $0xc8] sm:$0xff] %v12591_v57  ;;  %v12615_v56 = vmax.f32 %v24627_v54, 0.0  ;;  %v24629_v44 = vld [vmem:[#allocation40_spill] sm:$0xff]  ;;  %v12619_v61 = vmax.f32 %v23329_v2, 0.0  ;;  %v12620_v13 = vmax.f32 %v23333_v35, 0.0 }
 0xd30   :  { %12656 = vst [vmem:[%s23634_s7 + $0xd0] sm:$0xff] %v12592_v55  ;;  %12657 = vst [vmem:[%s23634_s7 + $0xd8] sm:$0xff] %v12593_v62  ;;  %v12617_v16 = vmax.f32 %v24629_v44, 0.0  ;;  %v12621_v45 = vmax.f32 %v23337_v9, 0.0  ;;  %v12622_v6 = vmax.f32 %v23341_v8, 0.0  ;;  %v12623_v2 = vmax.f32 %v23345_v49, 0.0 }
 0xd31   :  { %12658 = vst [vmem:[%s23634_s7 + $0xe0] sm:$0xff] %v12594_v46  ;;  %12659 = vst [vmem:[%s23634_s7 + $0xe8] sm:$0xff] %v12595_v17  ;;  %v24630_v35 = vld [vmem:[#allocation33_spill] sm:$0xff]  ;;  %v24631_v26 = vld [vmem:[#allocation39_spill] sm:$0xff]  ;;  %v12629_v0 = vmax.f32 %v23369_v22, 0.0 }
 0xd32   :  { %12660 = vst [vmem:[%s23634_s7 + $0xf0] sm:$0xff] %v12596_v36  ;;  %12661 = vst [vmem:[%s23634_s7 + $0xf8] sm:$0xff] %v12597_v60  ;;  %v12624_v9 = vmax.f32 %v24630_v35, 0.0  ;;  %v12625_v23 = vmax.f32 %v24631_v26, 0.0  ;;  %v24632_v8 = vld [vmem:[#allocation42_spill] sm:$0xff]  ;;  %v24633_v15 = vld [vmem:[#allocation44_spill] sm:$0xff] }
 0xd33   :  { %12662 = vst [vmem:[%s23634_s7 + $0x100] sm:$0xff] %v12598_v5  ;;  %12663 = vst [vmem:[%s23634_s7 + $0x108] sm:$0xff] %v12599_v3  ;;  %v12626_v49 = vmax.f32 %v24632_v8, 0.0  ;;  %v12627_v52 = vmax.f32 %v24633_v15, 0.0  ;;  %v24634_v29 = vld [vmem:[#allocation41_spill] sm:$0xff] }
 0xd34   :  { %12664 = vst [vmem:[%s23634_s7 + $0x110] sm:$0xff] %v12600_v41  ;;  %12665 = vst [vmem:[%s23634_s7 + $0x118] sm:$0xff] %v12601_v1  ;;  %v12628_v39 = vmax.f32 %v24634_v29, 0.0 }
 0xd35   :  { %12666 = vst [vmem:[%s23634_s7 + $0x120] sm:$0xff] %v12602_v58  ;;  %12667 = vst [vmem:[%s23634_s7 + $0x128] sm:$0xff] %v12603_v37 }
 0xd36   :  { %12668 = vst [vmem:[%s23634_s7 + $0x130] sm:$0xff] %v12604_v31  ;;  %12669 = vst [vmem:[%s23634_s7 + $0x138] sm:$0xff] %v12605_v10 }
 0xd37   :  { %12670 = vst [vmem:[%s23634_s7 + $0x140] sm:$0xff] %v12606_v48  ;;  %12671 = vst [vmem:[%s23634_s7 + $0x148] sm:$0xff] %v12607_v18 }
 0xd38   :  { %12672 = vst [vmem:[%s23634_s7 + $0x150] sm:$0xff] %v12608_v42  ;;  %12673 = vst [vmem:[%s23634_s7 + $0x158] sm:$0xff] %v12609_v53 }
 0xd39   :  { %12674 = vst [vmem:[%s23634_s7 + $0x160] sm:$0xff] %v12610_v63  ;;  %12675 = vst [vmem:[%s23634_s7 + $0x168] sm:$0xff] %v12611_v20 }
 0xd3a   :  { %12676 = vst [vmem:[%s23634_s7 + $0x170] sm:$0xff] %v12612_v38  ;;  %12677 = vst [vmem:[%s23634_s7 + $0x178] sm:$0xff] %v12613_v24 }
 0xd3b   :  { %12678 = vst [vmem:[%s23634_s7 + $0x180] sm:$0xff] %v12614_v51  ;;  %12679 = vst [vmem:[%s23634_s7 + $0x188] sm:$0xff] %v12615_v56 }
 0xd3c   :  { %12680 = vst [vmem:[%s23634_s7 + $0x190] sm:$0xff] %v12616_v34  ;;  %12681 = vst [vmem:[%s23634_s7 + $0x198] sm:$0xff] %v12617_v16 }
 0xd3d   :  { %12682 = vst [vmem:[%s23634_s7 + $0x1a0] sm:$0xff] %v12618_v40  ;;  %12683 = vst [vmem:[%s23634_s7 + $0x1a8] sm:$0xff] %v12619_v61 }
 0xd3e   :  { %12684 = vst [vmem:[%s23634_s7 + $0x1b0] sm:$0xff] %v12620_v13  ;;  %12685 = vst [vmem:[%s23634_s7 + $0x1b8] sm:$0xff] %v12621_v45 }
 0xd3f   :  { %12686 = vst [vmem:[%s23634_s7 + $0x1c0] sm:$0xff] %v12622_v6  ;;  %12687 = vst [vmem:[%s23634_s7 + $0x1c8] sm:$0xff] %v12623_v2 }
 0xd40   :  { %12688 = vst [vmem:[%s23634_s7 + $0x1d0] sm:$0xff] %v12624_v9  ;;  %12689 = vst [vmem:[%s23634_s7 + $0x1d8] sm:$0xff] %v12625_v23 }
 0xd41   :  { %12690 = vst [vmem:[%s23634_s7 + $0x1e0] sm:$0xff] %v12626_v49  ;;  %12691 = vst [vmem:[%s23634_s7 + $0x1e8] sm:$0xff] %v12627_v52 }
 0xd42   :  { %12692 = vst [vmem:[%s23634_s7 + $0x1f0] sm:$0xff] %v12628_v39  ;;  %12693 = vst [vmem:[%s23634_s7 + $0x1f8] sm:$0xff] %v12629_v0 }

</bundles_post_ra>
